<compile_context>
chip_gen: v7x
topology: tpu7x:2x2x1
jax: 0.10.0
libtpu: 0.0.40
codegen_flags: <defaults>
</compile_context>

<pallas_src>
import functools

import jax
import jax.numpy as jnp
from jax.experimental import pallas as pl
from jax.experimental.pallas import tpu as pltpu

_BN_EPS = 1e-5
_VMEM_LIMIT = 32 * 1024 * 1024   # explicit; safe on v5e/v6e/v7x


def _pick_block(n, cap=8):
    """Largest divisor of n that is <= cap (images per grid step)."""
    for b in range(min(n, cap), 0, -1):
        if n % b == 0:
            return b
    return 1


# ----------------------------- Pallas kernels --------------------------------

def _bn_stats_kernel(x_ref, mean_ref, rstd_ref, sum_ref, sumsq_ref, *,
                     inv_m, eps):
    """Per-channel BatchNorm batch statistics over (N,H,W) of an NHWC tensor.

    Grid: (N//B_blk,), "arbitrary".  One (B_blk,H,W,C) block per step;
    per-channel sum / sum-of-squares accumulate in VMEM scratch; mean & rstd
    are written on the last step (resident (1,C) output blocks).
    """
    i = pl.program_id(0)

    @pl.when(i == 0)
    def _():
        sum_ref[...] = jnp.zeros_like(sum_ref)
        sumsq_ref[...] = jnp.zeros_like(sumsq_ref)

    c = x_ref.shape[-1]
    x2 = x_ref[...].reshape(-1, c)                        # (B_blk*H*W, C) f32
    sum_ref[...] += jnp.sum(x2, axis=0, keepdims=True)
    sumsq_ref[...] += jnp.sum(x2 * x2, axis=0, keepdims=True)

    @pl.when(i == pl.num_programs(0) - 1)
    def _():
        mean = sum_ref[...] * inv_m
        var = sumsq_ref[...] * inv_m - mean * mean        # biased variance
        mean_ref[...] = mean
        rstd_ref[...] = jax.lax.rsqrt(var + eps)


def _conv3x3_kernel(*refs, has_res, emit_stats, inv_m, eps):
    """Fused round(relu6(bn(x))) -> 3x3 conv (pad=1) [+ residual] [+ out stats].

    Grid: (N//B_blk,), "arbitrary".  Per step (B_blk images):
      1. normalize / clip / round the input block (f32 VPU), cast once to bf16,
      2. scatter the 9 shifted taps into a resident (B_blk,H,W,9*C) bf16
         im2col slab (1-pixel halo stays zero; slab zeroed once at step 0),
      3. ONE (B_blk*H*W, 9*C) @ (9*C, Cout) bf16 matmul, f32 accumulation,
      4. add residual (if any), store lane-dense (B_blk, H*W, Cout) f32,
      5. optionally accumulate per-channel sum/sumsq of the conv output and
         emit its BatchNorm mean/rstd on the last step.
    """
    it = iter(refs)
    x_ref = next(it)
    w_ref = next(it)
    mean_ref = next(it)
    rstd_ref = next(it)
    res_ref = next(it) if has_res else None
    o_ref = next(it)
    if emit_stats:
        mean_o_ref = next(it)
        rstd_o_ref = next(it)
    col_ref = next(it)
    if emit_stats:
        sum_ref = next(it)
        sumsq_ref = next(it)

    i = pl.program_id(0)
    nb, hh, ww, c = x_ref.shape
    cout = o_ref.shape[-1]

    @pl.when(i == 0)
    def _():
        # Zero the im2col slab once (valid only because this grid axis is
        # sequential/"arbitrary"): the halo regions are never written again,
        # the valid rectangles are fully rewritten every step.
        col_ref[...] = jnp.zeros_like(col_ref)
        if emit_stats:
            sum_ref[...] = jnp.zeros_like(sum_ref)
            sumsq_ref[...] = jnp.zeros_like(sumsq_ref)

    # Fused BatchNorm (batch stats) + relu6 + round-half-to-even (f32 VPU),
    # then a single cast to bf16 before the scatter.
    a = (x_ref[...] - mean_ref[...]) * rstd_ref[...]      # (B_blk, H, W, C)
    a = jnp.round(jnp.clip(a, 0.0, 6.0)).astype(jnp.bfloat16)

    # Scatter the 9 shifted taps into the im2col slab (lane-aligned column
    # blocks of width C; only the in-bounds rectangle of each tap is written).
    for ky in range(3):
        dy = ky - 1
        y0, y1 = max(0, -dy), hh - max(0, dy)
        for kx in range(3):
            dx = kx - 1
            x0, x1 = max(0, -dx), ww - max(0, dx)
            t = (ky * 3 + kx) * c
            col_ref[:, y0:y1, x0:x1, t:t + c] = a[:, y0 + dy:y1 + dy,
                                                  x0 + dx:x1 + dx, :]

    # One big MXU matmul: M = B_blk*H*W, K = 9*C, N = Cout.
    col2d = col_ref[...].reshape(nb * hh * ww, 9 * c)
    hb = jnp.dot(col2d, w_ref[...], preferred_element_type=jnp.float32)

    out = hb.reshape(nb, hh * ww, cout)
    if has_res:
        out = out + res_ref[...]
    o_ref[...] = out

    if emit_stats:
        # Fused BatchNorm statistics of the conv output (pre-residual; conv0
        # has no residual anyway) for the *next* layer's bn.
        sum_ref[...] += jnp.sum(hb, axis=0, keepdims=True)
        sumsq_ref[...] += jnp.sum(hb * hb, axis=0, keepdims=True)

        @pl.when(i == pl.num_programs(0) - 1)
        def _():
            m = sum_ref[...] * inv_m
            var = sumsq_ref[...] * inv_m - m * m          # biased variance
            mean_o_ref[...] = m
            rstd_o_ref[...] = jax.lax.rsqrt(var + eps)


# ----------------------------- kernel wrappers --------------------------------

def bn_stats(x_nhwc, eps=_BN_EPS):
    n, h, w, c = x_nhwc.shape
    b_blk = _pick_block(n)
    kernel = functools.partial(_bn_stats_kernel,
                               inv_m=1.0 / float(n * h * w), eps=eps)
    mean, rstd = pl.pallas_call(
        kernel,
        out_shape=(jax.ShapeDtypeStruct((1, c), jnp.float32),
                   jax.ShapeDtypeStruct((1, c), jnp.float32)),
        grid_spec=pltpu.PrefetchScalarGridSpec(
            num_scalar_prefetch=0,
            grid=(n // b_blk,),
            in_specs=[pl.BlockSpec((b_blk, h, w, c), lambda i: (i, 0, 0, 0))],
            out_specs=(pl.BlockSpec((1, c), lambda i: (0, 0)),
                       pl.BlockSpec((1, c), lambda i: (0, 0))),
            scratch_shapes=[pltpu.VMEM((1, c), jnp.float32),
                            pltpu.VMEM((1, c), jnp.float32)]),
        compiler_params=pltpu.CompilerParams(
            dimension_semantics=("arbitrary",),            # running reduction
            vmem_limit_bytes=_VMEM_LIMIT),
    )(x_nhwc)
    return mean, rstd


def conv3x3_bn_act(x_nhwc, w_flat, mean, rstd, residual=None,
                   emit_stats=False, eps=_BN_EPS):
    """[residual +] conv3x3(round(relu6(bn(x)))), padding=1, no bias.

    x_nhwc: (N,H,W,Cin) f32; w_flat: (9*Cin,Cout) bf16; mean/rstd: (1,Cin) f32;
    residual: optional (N,H*W,Cout) f32.
    Returns (N,H*W,Cout) f32  [and (mean, rstd) of the output if emit_stats].
    """
    n, h, w, c = x_nhwc.shape
    cout = w_flat.shape[-1]
    b_blk = _pick_block(n)
    has_res = residual is not None

    in_specs = [
        pl.BlockSpec((b_blk, h, w, c), lambda i: (i, 0, 0, 0)),
        pl.BlockSpec((9 * c, cout), lambda i: (0, 0)),     # resident weights
        pl.BlockSpec((1, c), lambda i: (0, 0)),
        pl.BlockSpec((1, c), lambda i: (0, 0)),
    ]
    args = [x_nhwc, w_flat, mean, rstd]
    if has_res:
        in_specs.append(pl.BlockSpec((b_blk, h * w, cout), lambda i: (i, 0, 0)))
        args.append(residual)

    conv_out = jax.ShapeDtypeStruct((n, h * w, cout), jnp.float32)
    conv_spec = pl.BlockSpec((b_blk, h * w, cout), lambda i: (i, 0, 0))
    if emit_stats:
        out_shape = (conv_out,
                     jax.ShapeDtypeStruct((1, cout), jnp.float32),
                     jax.ShapeDtypeStruct((1, cout), jnp.float32))
        out_specs = (conv_spec,
                     pl.BlockSpec((1, cout), lambda i: (0, 0)),
                     pl.BlockSpec((1, cout), lambda i: (0, 0)))
    else:
        out_shape = conv_out
        out_specs = conv_spec

    scratch = [pltpu.VMEM((b_blk, h, w, 9 * c), jnp.bfloat16)]   # bf16 im2col
    if emit_stats:
        scratch += [pltpu.VMEM((1, cout), jnp.float32),
                    pltpu.VMEM((1, cout), jnp.float32)]

    kernel = functools.partial(_conv3x3_kernel, has_res=has_res,
                               emit_stats=emit_stats,
                               inv_m=1.0 / float(n * h * w), eps=eps)

    flops = 2 * n * h * w * 9 * c * cout
    bytes_accessed = x_nhwc.size * 4 + w_flat.size * 2 + n * h * w * cout * 4
    if has_res:
        bytes_accessed += residual.size * 4

    out = pl.pallas_call(
        kernel,
        out_shape=out_shape,
        grid_spec=pltpu.PrefetchScalarGridSpec(
            num_scalar_prefetch=0,
            grid=(n // b_blk,),
            in_specs=in_specs,
            out_specs=out_specs,
            scratch_shapes=scratch),
        compiler_params=pltpu.CompilerParams(
            dimension_semantics=("arbitrary",),   # sequential: stats reduction
            vmem_limit_bytes=_VMEM_LIMIT),        # + zero-once im2col halo
        cost_estimate=pl.CostEstimate(flops=flops, transcendentals=0,
                                      bytes_accessed=bytes_accessed),
    )(*args)
    return out


# ----------------------------- Block forward ----------------------------------

def block_forward(x_nchw, w0, w1):
    """Pre-activated ResNet Block (dropit=None path); NCHW in / NCHW out."""
    x = jnp.transpose(x_nchw, (0, 2, 3, 1)).astype(jnp.float32)   # -> NHWC
    n, h, w, c = x.shape

    mean0, rstd0 = bn_stats(x)
    # conv0 with fused bn0+relu6+round; also emits bn1 batch stats of h.
    h_act, mean1, rstd1 = conv3x3_bn_act(x, w0, mean0, rstd0, emit_stats=True)
    # conv1 with fused bn1+relu6+round and fused residual add (x + conv1(...)).
    out = conv3x3_bn_act(h_act.reshape(n, h, w, -1), w1, mean1, rstd1,
                         residual=x.reshape(n, h * w, c))
    out = out.reshape(n, h, w, c)
    return jnp.transpose(out, (0, 3, 1, 2))                       # -> NCHW


def init_block_params(key, width):
    # kaiming_normal_(mode='fan_out', nonlinearity='relu'): std = sqrt(2/(Cout*3*3))
    std = (2.0 / (width * 9)) ** 0.5
    k0, k1 = jax.random.split(key)

    def make(k):
        w_hwio = std * jax.random.normal(k, (3, 3, width, width), jnp.float32)
        # (9*Cin, Cout): row (ky*3+kx)*Cin + ci matches the im2col column order.
        # bf16 at the MXU boundary (f32 accumulation in-kernel).
        return w_hwio.reshape(9 * width, width).astype(jnp.bfloat16)

    return make(k0), make(k1)


# ----------------------------- main -------------------------------------------

if __name__ == "__main__":
    batch, width, hw = 2, 128, 16     # width=128 -> lane-dense channel dim
    key = jax.random.PRNGKey(0)
    k_w, k_x = jax.random.split(key)
    w0, w1 = init_block_params(k_w, width)
    x = jax.random.normal(k_x, (batch, width, hw, hw), jnp.float32)   # NCHW

    fwd = jax.jit(lambda inp: block_forward(inp, w0, w1))
    out = fwd(x)
    jax.block_until_ready(out)
    assert out.shape == (batch, width, hw, hw), out.shape
    assert bool(jnp.all(jnp.isfinite(out))), "non-finite output"
    print("KERNEL_OK")
</pallas_src>

<mosaic_0001>
module attributes {stable_mosaic.version = 11 : i64} {
  func.func @_bn_stats_kernel(%arg0: i32, %arg1: memref<2x16x16x128xf32, #tpu.memory_space<vmem>>, %arg2: memref<1x128xf32, #tpu.memory_space<vmem>>, %arg3: memref<1x128xf32, #tpu.memory_space<vmem>>, %arg4: memref<1x128xf32, #tpu.memory_space<vmem>>, %arg5: memref<1x128xf32, #tpu.memory_space<vmem>>) attributes {dimension_semantics = [#tpu.dimension_semantics<arbitrary>], iteration_bounds = array<i64: 1>, scalar_prefetch = 0 : i64, scratch_operands = 2 : i64, tpu.core_type = #tpu.core_type<tc>, window_params = [{transform_indices = @transform_0, window_bounds = array<i64: 2, 16, 16, 128>}, {pipeline_mode = #tpu.pipeline_mode<synchronous>, transform_indices = @transform_1, window_bounds = array<i64: 1, 128>}, {pipeline_mode = #tpu.pipeline_mode<synchronous>, transform_indices = @transform_2, window_bounds = array<i64: 1, 128>}]} {
    %c0_i32 = arith.constant 0 : i32
    %0 = arith.cmpi eq, %arg0, %c0_i32 : i32
    %1 = arith.extui %0 : i1 to i32
    %c0_i32_0 = arith.constant 0 : i32
    %2 = arith.cmpi ne, %1, %c0_i32_0 : i32
    scf.if %2 {
      %cst_15 = arith.constant 0.000000e+00 : f32
      %19 = vector.broadcast %cst_15 : f32 to vector<1x128xf32>
      %c0_16 = arith.constant 0 : index
      %c0_17 = arith.constant 0 : index
      %20 = vector.load %arg4[%c0_16, %c0_17] : memref<1x128xf32, #tpu.memory_space<vmem>>, vector<1x128xf32>
      tpu.vector_store %arg4[%c0_16, %c0_17], %19 {strides = array<i32>} : memref<1x128xf32, #tpu.memory_space<vmem>>, vector<1x128xf32>,
      %cst_18 = arith.constant 0.000000e+00 : f32
      %21 = vector.broadcast %cst_18 : f32 to vector<1x128xf32>
      %c0_19 = arith.constant 0 : index
      %c0_20 = arith.constant 0 : index
      %22 = vector.load %arg5[%c0_19, %c0_20] : memref<1x128xf32, #tpu.memory_space<vmem>>, vector<1x128xf32>
      tpu.vector_store %arg5[%c0_19, %c0_20], %21 {strides = array<i32>} : memref<1x128xf32, #tpu.memory_space<vmem>>, vector<1x128xf32>,
    } else {
    }
    %c0 = arith.constant 0 : index
    %c0_1 = arith.constant 0 : index
    %c0_2 = arith.constant 0 : index
    %c0_3 = arith.constant 0 : index
    %3 = vector.load %arg1[%c0, %c0_1, %c0_2, %c0_3] : memref<2x16x16x128xf32, #tpu.memory_space<vmem>>, vector<2x16x16x128xf32>
    %4 = vector.shape_cast %3 : vector<2x16x16x128xf32> to vector<512x128xf32>
    %c0_4 = arith.constant 0 : index
    %c0_5 = arith.constant 0 : index
    %5 = vector.load %arg4[%c0_4, %c0_5] : memref<1x128xf32, #tpu.memory_space<vmem>>, vector<1x128xf32>
    %cst = arith.constant dense<0.000000e+00> : vector<128xf32>
    %6 = vector.multi_reduction <add>, %4, %cst [0] : vector<512x128xf32> to vector<128xf32>
    %7 = vector.shape_cast %6 : vector<128xf32> to vector<1x128xf32>
    %8 = arith.addf %5, %7 : vector<1x128xf32>
    %c0_6 = arith.constant 0 : index
    %c0_7 = arith.constant 0 : index
    %9 = vector.load %arg4[%c0_6, %c0_7] : memref<1x128xf32, #tpu.memory_space<vmem>>, vector<1x128xf32>
    tpu.vector_store %arg4[%c0_6, %c0_7], %8 {strides = array<i32>} : memref<1x128xf32, #tpu.memory_space<vmem>>, vector<1x128xf32>,
    %c0_8 = arith.constant 0 : index
    %c0_9 = arith.constant 0 : index
    %10 = vector.load %arg5[%c0_8, %c0_9] : memref<1x128xf32, #tpu.memory_space<vmem>>, vector<1x128xf32>
    %11 = arith.mulf %4, %4 : vector<512x128xf32>
    %cst_10 = arith.constant dense<0.000000e+00> : vector<128xf32>
    %12 = vector.multi_reduction <add>, %11, %cst_10 [0] : vector<512x128xf32> to vector<128xf32>
    %13 = vector.shape_cast %12 : vector<128xf32> to vector<1x128xf32>
    %14 = arith.addf %10, %13 : vector<1x128xf32>
    %c0_11 = arith.constant 0 : index
    %c0_12 = arith.constant 0 : index
    %15 = vector.load %arg5[%c0_11, %c0_12] : memref<1x128xf32, #tpu.memory_space<vmem>>, vector<1x128xf32>
    tpu.vector_store %arg5[%c0_11, %c0_12], %14 {strides = array<i32>} : memref<1x128xf32, #tpu.memory_space<vmem>>, vector<1x128xf32>,
    %c0_i32_13 = arith.constant 0 : i32
    %16 = arith.cmpi eq, %arg0, %c0_i32_13 : i32
    %17 = arith.extui %16 : i1 to i32
    %c0_i32_14 = arith.constant 0 : i32
    %18 = arith.cmpi ne, %17, %c0_i32_14 : i32
    scf.if %18 {
      %c0_15 = arith.constant 0 : index
      %c0_16 = arith.constant 0 : index
      %19 = vector.load %arg4[%c0_15, %c0_16] : memref<1x128xf32, #tpu.memory_space<vmem>>, vector<1x128xf32>
      %cst_17 = arith.constant 0.001953125 : f32
      %20 = vector.broadcast %cst_17 : f32 to vector<1x128xf32>
      %21 = arith.mulf %19, %20 : vector<1x128xf32>
      %c0_18 = arith.constant 0 : index
      %c0_19 = arith.constant 0 : index
      %22 = vector.load %arg5[%c0_18, %c0_19] : memref<1x128xf32, #tpu.memory_space<vmem>>, vector<1x128xf32>
      %cst_20 = arith.constant 0.001953125 : f32
      %23 = vector.broadcast %cst_20 : f32 to vector<1x128xf32>
      %24 = arith.mulf %22, %23 : vector<1x128xf32>
      %25 = arith.mulf %21, %21 : vector<1x128xf32>
      %26 = arith.subf %24, %25 : vector<1x128xf32>
      %c0_21 = arith.constant 0 : index
      %c0_22 = arith.constant 0 : index
      %27 = vector.load %arg2[%c0_21, %c0_22] : memref<1x128xf32, #tpu.memory_space<vmem>>, vector<1x128xf32>
      tpu.vector_store %arg2[%c0_21, %c0_22], %21 {strides = array<i32>} : memref<1x128xf32, #tpu.memory_space<vmem>>, vector<1x128xf32>,
      %cst_23 = arith.constant 9.99999974E-6 : f32
      %28 = vector.broadcast %cst_23 : f32 to vector<1x128xf32>
      %29 = arith.addf %26, %28 : vector<1x128xf32>
      %30 = math.rsqrt %29 : vector<1x128xf32>
      %c0_24 = arith.constant 0 : index
      %c0_25 = arith.constant 0 : index
      %31 = vector.load %arg3[%c0_24, %c0_25] : memref<1x128xf32, #tpu.memory_space<vmem>>, vector<1x128xf32>
      tpu.vector_store %arg3[%c0_24, %c0_25], %30 {strides = array<i32>} : memref<1x128xf32, #tpu.memory_space<vmem>>, vector<1x128xf32>,
    } else {
    }
    return
  }
  func.func @transform_0(%arg0: i32) -> (i32, i32, i32, i32) {
    %c0_i32 = arith.constant 0 : i32
    %c0_i32_0 = arith.constant 0 : i32
    %c0_i32_1 = arith.constant 0 : i32
    %c0_i32_2 = arith.constant 0 : i32
    return %arg0, %c0_i32, %c0_i32_0, %c0_i32_1 : i32, i32, i32, i32
  }
  func.func @transform_1(%arg0: i32) -> (i32, i32) {
    %c0_i32 = arith.constant 0 : i32
    %c0_i32_0 = arith.constant 0 : i32
    %c0_i32_1 = arith.constant 0 : i32
    return %c0_i32, %c0_i32_0 : i32, i32
  }
  func.func @transform_2(%arg0: i32) -> (i32, i32) {
    %c0_i32 = arith.constant 0 : i32
    %c0_i32_0 = arith.constant 0 : i32
    %c0_i32_1 = arith.constant 0 : i32
    return %c0_i32, %c0_i32_0 : i32, i32
  }
}

module attributes {stable_mosaic.version = 11 : i64} {
  func.func @_conv3x3_kernel(%arg0: i32, %arg1: memref<2x16x16x128xf32, #tpu.memory_space<vmem>>, %arg2: memref<1152x128xbf16, #tpu.memory_space<vmem>>, %arg3: memref<1x128xf32, #tpu.memory_space<vmem>>, %arg4: memref<1x128xf32, #tpu.memory_space<vmem>>, %arg5: memref<2x256x128xf32, #tpu.memory_space<vmem>>, %arg6: memref<2x256x128xf32, #tpu.memory_space<vmem>>, %arg7: memref<2x16x16x1152xbf16, #tpu.memory_space<vmem>>) attributes {dimension_semantics = [#tpu.dimension_semantics<arbitrary>], iteration_bounds = array<i64: 1>, scalar_prefetch = 0 : i64, scratch_operands = 1 : i64, tpu.core_type = #tpu.core_type<tc>, window_params = [{transform_indices = @transform_0, window_bounds = array<i64: 2, 16, 16, 128>}, {pipeline_mode = #tpu.pipeline_mode<synchronous>, transform_indices = @transform_1, window_bounds = array<i64: 1152, 128>}, {pipeline_mode = #tpu.pipeline_mode<synchronous>, transform_indices = @transform_2, window_bounds = array<i64: 1, 128>}, {pipeline_mode = #tpu.pipeline_mode<synchronous>, transform_indices = @transform_3, window_bounds = array<i64: 1, 128>}, {transform_indices = @transform_4, window_bounds = array<i64: 2, 256, 128>}, {transform_indices = @transform_5, window_bounds = array<i64: 2, 256, 128>}]} {
    %c0_i32 = arith.constant 0 : i32
    %0 = arith.cmpi eq, %arg0, %c0_i32 : i32
    %1 = arith.extui %0 : i1 to i32
    %c0_i32_0 = arith.constant 0 : i32
    %2 = arith.cmpi ne, %1, %c0_i32_0 : i32
    scf.if %2 {
      %cst_49 = arith.constant 0.000000e+00 : bf16
      %43 = vector.broadcast %cst_49 : bf16 to vector<2x16x16x1152xbf16>
      %c0_50 = arith.constant 0 : index
      %c0_51 = arith.constant 0 : index
      %c0_52 = arith.constant 0 : index
      %c0_53 = arith.constant 0 : index
      %44 = vector.load %arg7[%c0_50, %c0_51, %c0_52, %c0_53] : memref<2x16x16x1152xbf16, #tpu.memory_space<vmem>>, vector<2x16x16x1152xbf16>
      tpu.vector_store %arg7[%c0_50, %c0_51, %c0_52, %c0_53], %43 {strides = array<i32>} : memref<2x16x16x1152xbf16, #tpu.memory_space<vmem>>, vector<2x16x16x1152xbf16>,
    } else {
    }
    %c0 = arith.constant 0 : index
    %c0_1 = arith.constant 0 : index
    %c0_2 = arith.constant 0 : index
    %c0_3 = arith.constant 0 : index
    %3 = vector.load %arg1[%c0, %c0_1, %c0_2, %c0_3] : memref<2x16x16x128xf32, #tpu.memory_space<vmem>>, vector<2x16x16x128xf32>
    %c0_4 = arith.constant 0 : index
    %c0_5 = arith.constant 0 : index
    %4 = vector.load %arg3[%c0_4, %c0_5] : memref<1x128xf32, #tpu.memory_space<vmem>>, vector<1x128xf32>
    %5 = vector.shape_cast %4 : vector<1x128xf32> to vector<1x1x1x128xf32>
    %6 = vector.broadcast %5 : vector<1x1x1x128xf32> to vector<2x16x16x128xf32>
    %7 = arith.subf %3, %6 : vector<2x16x16x128xf32>
    %c0_6 = arith.constant 0 : index
    %c0_7 = arith.constant 0 : index
    %8 = vector.load %arg4[%c0_6, %c0_7] : memref<1x128xf32, #tpu.memory_space<vmem>>, vector<1x128xf32>
    %9 = vector.shape_cast %8 : vector<1x128xf32> to vector<1x1x1x128xf32>
    %10 = vector.broadcast %9 : vector<1x1x1x128xf32> to vector<2x16x16x128xf32>
    %11 = arith.mulf %7, %10 : vector<2x16x16x128xf32>
    %cst = arith.constant 0.000000e+00 : f32
    %cst_8 = arith.constant 6.000000e+00 : f32
    %12 = vector.broadcast %cst : f32 to vector<2x16x16x128xf32>
    %13 = arith.maximumf %12, %11 : vector<2x16x16x128xf32>
    %14 = vector.broadcast %cst_8 : f32 to vector<2x16x16x128xf32>
    %15 = arith.minimumf %14, %13 : vector<2x16x16x128xf32>
    %16 = math.roundeven %15 : vector<2x16x16x128xf32>
    %17 = arith.truncf %16 : vector<2x16x16x128xf32> to vector<2x16x16x128xbf16>
    %18 = vector.extract_strided_slice %17 {offsets = [0, 0, 0, 0], sizes = [2, 15, 15, 128], strides = [1, 1, 1, 1]} : vector<2x16x16x128xbf16> to vector<2x15x15x128xbf16>
    %c0_9 = arith.constant 0 : index
    %c1 = arith.constant 1 : index
    %c1_10 = arith.constant 1 : index
    %c0_11 = arith.constant 0 : index
    %19 = vector.load %arg7[%c0_9, %c1, %c1_10, %c0_11] : memref<2x16x16x1152xbf16, #tpu.memory_space<vmem>>, vector<2x15x15x128xbf16>
    tpu.vector_store %arg7[%c0_9, %c1, %c1_10, %c0_11], %18 {strides = array<i32>} : memref<2x16x16x1152xbf16, #tpu.memory_space<vmem>>, vector<2x15x15x128xbf16>,
    %20 = vector.extract_strided_slice %17 {offsets = [0, 0, 0, 0], sizes = [2, 15, 16, 128], strides = [1, 1, 1, 1]} : vector<2x16x16x128xbf16> to vector<2x15x16x128xbf16>
    %c0_12 = arith.constant 0 : index
    %c1_13 = arith.constant 1 : index
    %c0_14 = arith.constant 0 : index
    %c128 = arith.constant 128 : index
    %21 = vector.load %arg7[%c0_12, %c1_13, %c0_14, %c128] : memref<2x16x16x1152xbf16, #tpu.memory_space<vmem>>, vector<2x15x16x128xbf16>
    tpu.vector_store %arg7[%c0_12, %c1_13, %c0_14, %c128], %20 {strides = array<i32>} : memref<2x16x16x1152xbf16, #tpu.memory_space<vmem>>, vector<2x15x16x128xbf16>,
    %22 = vector.extract_strided_slice %17 {offsets = [0, 0, 1, 0], sizes = [2, 15, 15, 128], strides = [1, 1, 1, 1]} : vector<2x16x16x128xbf16> to vector<2x15x15x128xbf16>
    %c0_15 = arith.constant 0 : index
    %c1_16 = arith.constant 1 : index
    %c0_17 = arith.constant 0 : index
    %c256 = arith.constant 256 : index
    %23 = vector.load %arg7[%c0_15, %c1_16, %c0_17, %c256] : memref<2x16x16x1152xbf16, #tpu.memory_space<vmem>>, vector<2x15x15x128xbf16>
    tpu.vector_store %arg7[%c0_15, %c1_16, %c0_17, %c256], %22 {strides = array<i32>} : memref<2x16x16x1152xbf16, #tpu.memory_space<vmem>>, vector<2x15x15x128xbf16>,
    %24 = vector.extract_strided_slice %17 {offsets = [0, 0, 0, 0], sizes = [2, 16, 15, 128], strides = [1, 1, 1, 1]} : vector<2x16x16x128xbf16> to vector<2x16x15x128xbf16>
    %c0_18 = arith.constant 0 : index
    %c0_19 = arith.constant 0 : index
    %c1_20 = arith.constant 1 : index
    %c384 = arith.constant 384 : index
    %25 = vector.load %arg7[%c0_18, %c0_19, %c1_20, %c384] : memref<2x16x16x1152xbf16, #tpu.memory_space<vmem>>, vector<2x16x15x128xbf16>
    tpu.vector_store %arg7[%c0_18, %c0_19, %c1_20, %c384], %24 {strides = array<i32>} : memref<2x16x16x1152xbf16, #tpu.memory_space<vmem>>, vector<2x16x15x128xbf16>,
    %c0_21 = arith.constant 0 : index
    %c0_22 = arith.constant 0 : index
    %c0_23 = arith.constant 0 : index
    %c512 = arith.constant 512 : index
    %26 = vector.load %arg7[%c0_21, %c0_22, %c0_23, %c512] : memref<2x16x16x1152xbf16, #tpu.memory_space<vmem>>, vector<2x16x16x128xbf16>
    tpu.vector_store %arg7[%c0_21, %c0_22, %c0_23, %c512], %17 {strides = array<i32>} : memref<2x16x16x1152xbf16, #tpu.memory_space<vmem>>, vector<2x16x16x128xbf16>,
    %27 = vector.extract_strided_slice %17 {offsets = [0, 0, 1, 0], sizes = [2, 16, 15, 128], strides = [1, 1, 1, 1]} : vector<2x16x16x128xbf16> to vector<2x16x15x128xbf16>
    %c0_24 = arith.constant 0 : index
    %c0_25 = arith.constant 0 : index
    %c0_26 = arith.constant 0 : index
    %c640 = arith.constant 640 : index
    %28 = vector.load %arg7[%c0_24, %c0_25, %c0_26, %c640] : memref<2x16x16x1152xbf16, #tpu.memory_space<vmem>>, vector<2x16x15x128xbf16>
    tpu.vector_store %arg7[%c0_24, %c0_25, %c0_26, %c640], %27 {strides = array<i32>} : memref<2x16x16x1152xbf16, #tpu.memory_space<vmem>>, vector<2x16x15x128xbf16>,
    %29 = vector.extract_strided_slice %17 {offsets = [0, 1, 0, 0], sizes = [2, 15, 15, 128], strides = [1, 1, 1, 1]} : vector<2x16x16x128xbf16> to vector<2x15x15x128xbf16>
    %c0_27 = arith.constant 0 : index
    %c0_28 = arith.constant 0 : index
    %c1_29 = arith.constant 1 : index
    %c768 = arith.constant 768 : index
    %30 = vector.load %arg7[%c0_27, %c0_28, %c1_29, %c768] : memref<2x16x16x1152xbf16, #tpu.memory_space<vmem>>, vector<2x15x15x128xbf16>
    tpu.vector_store %arg7[%c0_27, %c0_28, %c1_29, %c768], %29 {strides = array<i32>} : memref<2x16x16x1152xbf16, #tpu.memory_space<vmem>>, vector<2x15x15x128xbf16>,
    %31 = vector.extract_strided_slice %17 {offsets = [0, 1, 0, 0], sizes = [2, 15, 16, 128], strides = [1, 1, 1, 1]} : vector<2x16x16x128xbf16> to vector<2x15x16x128xbf16>
    %c0_30 = arith.constant 0 : index
    %c0_31 = arith.constant 0 : index
    %c0_32 = arith.constant 0 : index
    %c896 = arith.constant 896 : index
    %32 = vector.load %arg7[%c0_30, %c0_31, %c0_32, %c896] : memref<2x16x16x1152xbf16, #tpu.memory_space<vmem>>, vector<2x15x16x128xbf16>
    tpu.vector_store %arg7[%c0_30, %c0_31, %c0_32, %c896], %31 {strides = array<i32>} : memref<2x16x16x1152xbf16, #tpu.memory_space<vmem>>, vector<2x15x16x128xbf16>,
    %33 = vector.extract_strided_slice %17 {offsets = [0, 1, 1, 0], sizes = [2, 15, 15, 128], strides = [1, 1, 1, 1]} : vector<2x16x16x128xbf16> to vector<2x15x15x128xbf16>
    %c0_33 = arith.constant 0 : index
    %c0_34 = arith.constant 0 : index
    %c0_35 = arith.constant 0 : index
    %c1024 = arith.constant 1024 : index
    %34 = vector.load %arg7[%c0_33, %c0_34, %c0_35, %c1024] : memref<2x16x16x1152xbf16, #tpu.memory_space<vmem>>, vector<2x15x15x128xbf16>
    tpu.vector_store %arg7[%c0_33, %c0_34, %c0_35, %c1024], %33 {strides = array<i32>} : memref<2x16x16x1152xbf16, #tpu.memory_space<vmem>>, vector<2x15x15x128xbf16>,
    %c0_36 = arith.constant 0 : index
    %c0_37 = arith.constant 0 : index
    %c0_38 = arith.constant 0 : index
    %c0_39 = arith.constant 0 : index
    %35 = vector.load %arg7[%c0_36, %c0_37, %c0_38, %c0_39] : memref<2x16x16x1152xbf16, #tpu.memory_space<vmem>>, vector<2x16x16x1152xbf16>
    %36 = vector.shape_cast %35 : vector<2x16x16x1152xbf16> to vector<512x1152xbf16>
    %c0_40 = arith.constant 0 : index
    %c0_41 = arith.constant 0 : index
    %37 = vector.load %arg2[%c0_40, %c0_41] : memref<1152x128xbf16, #tpu.memory_space<vmem>>, vector<1152x128xbf16>
    %cst_42 = arith.constant dense<0.000000e+00> : vector<512x128xf32>
    %38 = tpu.matmul %36, %37, %cst_42 {dimension_numbers = #tpu.dot_dimension_numbers<[1], [0], [0], [1], [0, 0, 1, 1], [], []>} : vector<512x1152xbf16>, vector<1152x128xbf16>, vector<512x128xf32> -> vector<512x128xf32>
    %39 = vector.shape_cast %38 : vector<512x128xf32> to vector<2x256x128xf32>
    %c0_43 = arith.constant 0 : index
    %c0_44 = arith.constant 0 : index
    %c0_45 = arith.constant 0 : index
    %40 = vector.load %arg5[%c0_43, %c0_44, %c0_45] : memref<2x256x128xf32, #tpu.memory_space<vmem>>, vector<2x256x128xf32>
    %41 = arith.addf %39, %40 : vector<2x256x128xf32>
    %c0_46 = arith.constant 0 : index
    %c0_47 = arith.constant 0 : index
    %c0_48 = arith.constant 0 : index
    %42 = vector.load %arg6[%c0_46, %c0_47, %c0_48] : memref<2x256x128xf32, #tpu.memory_space<vmem>>, vector<2x256x128xf32>
    tpu.vector_store %arg6[%c0_46, %c0_47, %c0_48], %41 {strides = array<i32>} : memref<2x256x128xf32, #tpu.memory_space<vmem>>, vector<2x256x128xf32>,
    return
  }
  func.func @transform_0(%arg0: i32) -> (i32, i32, i32, i32) {
    %c0_i32 = arith.constant 0 : i32
    %c0_i32_0 = arith.constant 0 : i32
    %c0_i32_1 = arith.constant 0 : i32
    %c0_i32_2 = arith.constant 0 : i32
    return %arg0, %c0_i32, %c0_i32_0, %c0_i32_1 : i32, i32, i32, i32
  }
  func.func @transform_1(%arg0: i32) -> (i32, i32) {
    %c0_i32 = arith.constant 0 : i32
    %c0_i32_0 = arith.constant 0 : i32
    %c0_i32_1 = arith.constant 0 : i32
    return %c0_i32, %c0_i32_0 : i32, i32
  }
  func.func @transform_2(%arg0: i32) -> (i32, i32) {
    %c0_i32 = arith.constant 0 : i32
    %c0_i32_0 = arith.constant 0 : i32
    %c0_i32_1 = arith.constant 0 : i32
    return %c0_i32, %c0_i32_0 : i32, i32
  }
  func.func @transform_3(%arg0: i32) -> (i32, i32) {
    %c0_i32 = arith.constant 0 : i32
    %c0_i32_0 = arith.constant 0 : i32
    %c0_i32_1 = arith.constant 0 : i32
    return %c0_i32, %c0_i32_0 : i32, i32
  }
  func.func @transform_4(%arg0: i32) -> (i32, i32, i32) {
    %c0_i32 = arith.constant 0 : i32
    %c0_i32_0 = arith.constant 0 : i32
    %c0_i32_1 = arith.constant 0 : i32
    return %arg0, %c0_i32, %c0_i32_0 : i32, i32, i32
  }
  func.func @transform_5(%arg0: i32) -> (i32, i32, i32) {
    %c0_i32 = arith.constant 0 : i32
    %c0_i32_0 = arith.constant 0 : i32
    %c0_i32_1 = arith.constant 0 : i32
    return %arg0, %c0_i32, %c0_i32_0 : i32, i32, i32
  }
}

module attributes {stable_mosaic.version = 11 : i64} {
  func.func @_conv3x3_kernel(%arg0: i32, %arg1: memref<2x16x16x128xf32, #tpu.memory_space<vmem>>, %arg2: memref<1152x128xbf16, #tpu.memory_space<vmem>>, %arg3: memref<1x128xf32, #tpu.memory_space<vmem>>, %arg4: memref<1x128xf32, #tpu.memory_space<vmem>>, %arg5: memref<2x256x128xf32, #tpu.memory_space<vmem>>, %arg6: memref<1x128xf32, #tpu.memory_space<vmem>>, %arg7: memref<1x128xf32, #tpu.memory_space<vmem>>, %arg8: memref<2x16x16x1152xbf16, #tpu.memory_space<vmem>>, %arg9: memref<1x128xf32, #tpu.memory_space<vmem>>, %arg10: memref<1x128xf32, #tpu.memory_space<vmem>>) attributes {dimension_semantics = [#tpu.dimension_semantics<arbitrary>], iteration_bounds = array<i64: 1>, scalar_prefetch = 0 : i64, scratch_operands = 3 : i64, tpu.core_type = #tpu.core_type<tc>, window_params = [{transform_indices = @transform_0, window_bounds = array<i64: 2, 16, 16, 128>}, {pipeline_mode = #tpu.pipeline_mode<synchronous>, transform_indices = @transform_1, window_bounds = array<i64: 1152, 128>}, {pipeline_mode = #tpu.pipeline_mode<synchronous>, transform_indices = @transform_2, window_bounds = array<i64: 1, 128>}, {pipeline_mode = #tpu.pipeline_mode<synchronous>, transform_indices = @transform_3, window_bounds = array<i64: 1, 128>}, {transform_indices = @transform_4, window_bounds = array<i64: 2, 256, 128>}, {pipeline_mode = #tpu.pipeline_mode<synchronous>, transform_indices = @transform_5, window_bounds = array<i64: 1, 128>}, {pipeline_mode = #tpu.pipeline_mode<synchronous>, transform_indices = @transform_6, window_bounds = array<i64: 1, 128>}]} {
    %c0_i32 = arith.constant 0 : i32
    %0 = arith.cmpi eq, %arg0, %c0_i32 : i32
    %1 = arith.extui %0 : i1 to i32
    %c0_i32_0 = arith.constant 0 : i32
    %2 = arith.cmpi ne, %1, %c0_i32_0 : i32
    scf.if %2 {
      %cst_58 = arith.constant 0.000000e+00 : bf16
      %55 = vector.broadcast %cst_58 : bf16 to vector<2x16x16x1152xbf16>
      %c0_59 = arith.constant 0 : index
      %c0_60 = arith.constant 0 : index
      %c0_61 = arith.constant 0 : index
      %c0_62 = arith.constant 0 : index
      %56 = vector.load %arg8[%c0_59, %c0_60, %c0_61, %c0_62] : memref<2x16x16x1152xbf16, #tpu.memory_space<vmem>>, vector<2x16x16x1152xbf16>
      tpu.vector_store %arg8[%c0_59, %c0_60, %c0_61, %c0_62], %55 {strides = array<i32>} : memref<2x16x16x1152xbf16, #tpu.memory_space<vmem>>, vector<2x16x16x1152xbf16>,
      %cst_63 = arith.constant 0.000000e+00 : f32
      %57 = vector.broadcast %cst_63 : f32 to vector<1x128xf32>
      %c0_64 = arith.constant 0 : index
      %c0_65 = arith.constant 0 : index
      %58 = vector.load %arg9[%c0_64, %c0_65] : memref<1x128xf32, #tpu.memory_space<vmem>>, vector<1x128xf32>
      tpu.vector_store %arg9[%c0_64, %c0_65], %57 {strides = array<i32>} : memref<1x128xf32, #tpu.memory_space<vmem>>, vector<1x128xf32>,
      %cst_66 = arith.constant 0.000000e+00 : f32
      %59 = vector.broadcast %cst_66 : f32 to vector<1x128xf32>
      %c0_67 = arith.constant 0 : index
      %c0_68 = arith.constant 0 : index
      %60 = vector.load %arg10[%c0_67, %c0_68] : memref<1x128xf32, #tpu.memory_space<vmem>>, vector<1x128xf32>
      tpu.vector_store %arg10[%c0_67, %c0_68], %59 {strides = array<i32>} : memref<1x128xf32, #tpu.memory_space<vmem>>, vector<1x128xf32>,
    } else {
    }
    %c0 = arith.constant 0 : index
    %c0_1 = arith.constant 0 : index
    %c0_2 = arith.constant 0 : index
    %c0_3 = arith.constant 0 : index
    %3 = vector.load %arg1[%c0, %c0_1, %c0_2, %c0_3] : memref<2x16x16x128xf32, #tpu.memory_space<vmem>>, vector<2x16x16x128xf32>
    %c0_4 = arith.constant 0 : index
    %c0_5 = arith.constant 0 : index
    %4 = vector.load %arg3[%c0_4, %c0_5] : memref<1x128xf32, #tpu.memory_space<vmem>>, vector<1x128xf32>
    %5 = vector.shape_cast %4 : vector<1x128xf32> to vector<1x1x1x128xf32>
    %6 = vector.broadcast %5 : vector<1x1x1x128xf32> to vector<2x16x16x128xf32>
    %7 = arith.subf %3, %6 : vector<2x16x16x128xf32>
    %c0_6 = arith.constant 0 : index
    %c0_7 = arith.constant 0 : index
    %8 = vector.load %arg4[%c0_6, %c0_7] : memref<1x128xf32, #tpu.memory_space<vmem>>, vector<1x128xf32>
    %9 = vector.shape_cast %8 : vector<1x128xf32> to vector<1x1x1x128xf32>
    %10 = vector.broadcast %9 : vector<1x1x1x128xf32> to vector<2x16x16x128xf32>
    %11 = arith.mulf %7, %10 : vector<2x16x16x128xf32>
    %cst = arith.constant 0.000000e+00 : f32
    %cst_8 = arith.constant 6.000000e+00 : f32
    %12 = vector.broadcast %cst : f32 to vector<2x16x16x128xf32>
    %13 = arith.maximumf %12, %11 : vector<2x16x16x128xf32>
    %14 = vector.broadcast %cst_8 : f32 to vector<2x16x16x128xf32>
    %15 = arith.minimumf %14, %13 : vector<2x16x16x128xf32>
    %16 = math.roundeven %15 : vector<2x16x16x128xf32>
    %17 = arith.truncf %16 : vector<2x16x16x128xf32> to vector<2x16x16x128xbf16>
    %18 = vector.extract_strided_slice %17 {offsets = [0, 0, 0, 0], sizes = [2, 15, 15, 128], strides = [1, 1, 1, 1]} : vector<2x16x16x128xbf16> to vector<2x15x15x128xbf16>
    %c0_9 = arith.constant 0 : index
    %c1 = arith.constant 1 : index
    %c1_10 = arith.constant 1 : index
    %c0_11 = arith.constant 0 : index
    %19 = vector.load %arg8[%c0_9, %c1, %c1_10, %c0_11] : memref<2x16x16x1152xbf16, #tpu.memory_space<vmem>>, vector<2x15x15x128xbf16>
    tpu.vector_store %arg8[%c0_9, %c1, %c1_10, %c0_11], %18 {strides = array<i32>} : memref<2x16x16x1152xbf16, #tpu.memory_space<vmem>>, vector<2x15x15x128xbf16>,
    %20 = vector.extract_strided_slice %17 {offsets = [0, 0, 0, 0], sizes = [2, 15, 16, 128], strides = [1, 1, 1, 1]} : vector<2x16x16x128xbf16> to vector<2x15x16x128xbf16>
    %c0_12 = arith.constant 0 : index
    %c1_13 = arith.constant 1 : index
    %c0_14 = arith.constant 0 : index
    %c128 = arith.constant 128 : index
    %21 = vector.load %arg8[%c0_12, %c1_13, %c0_14, %c128] : memref<2x16x16x1152xbf16, #tpu.memory_space<vmem>>, vector<2x15x16x128xbf16>
    tpu.vector_store %arg8[%c0_12, %c1_13, %c0_14, %c128], %20 {strides = array<i32>} : memref<2x16x16x1152xbf16, #tpu.memory_space<vmem>>, vector<2x15x16x128xbf16>,
    %22 = vector.extract_strided_slice %17 {offsets = [0, 0, 1, 0], sizes = [2, 15, 15, 128], strides = [1, 1, 1, 1]} : vector<2x16x16x128xbf16> to vector<2x15x15x128xbf16>
    %c0_15 = arith.constant 0 : index
    %c1_16 = arith.constant 1 : index
    %c0_17 = arith.constant 0 : index
    %c256 = arith.constant 256 : index
    %23 = vector.load %arg8[%c0_15, %c1_16, %c0_17, %c256] : memref<2x16x16x1152xbf16, #tpu.memory_space<vmem>>, vector<2x15x15x128xbf16>
    tpu.vector_store %arg8[%c0_15, %c1_16, %c0_17, %c256], %22 {strides = array<i32>} : memref<2x16x16x1152xbf16, #tpu.memory_space<vmem>>, vector<2x15x15x128xbf16>,
    %24 = vector.extract_strided_slice %17 {offsets = [0, 0, 0, 0], sizes = [2, 16, 15, 128], strides = [1, 1, 1, 1]} : vector<2x16x16x128xbf16> to vector<2x16x15x128xbf16>
    %c0_18 = arith.constant 0 : index
    %c0_19 = arith.constant 0 : index
    %c1_20 = arith.constant 1 : index
    %c384 = arith.constant 384 : index
    %25 = vector.load %arg8[%c0_18, %c0_19, %c1_20, %c384] : memref<2x16x16x1152xbf16, #tpu.memory_space<vmem>>, vector<2x16x15x128xbf16>
    tpu.vector_store %arg8[%c0_18, %c0_19, %c1_20, %c384], %24 {strides = array<i32>} : memref<2x16x16x1152xbf16, #tpu.memory_space<vmem>>, vector<2x16x15x128xbf16>,
    %c0_21 = arith.constant 0 : index
    %c0_22 = arith.constant 0 : index
    %c0_23 = arith.constant 0 : index
    %c512 = arith.constant 512 : index
    %26 = vector.load %arg8[%c0_21, %c0_22, %c0_23, %c512] : memref<2x16x16x1152xbf16, #tpu.memory_space<vmem>>, vector<2x16x16x128xbf16>
    tpu.vector_store %arg8[%c0_21, %c0_22, %c0_23, %c512], %17 {strides = array<i32>} : memref<2x16x16x1152xbf16, #tpu.memory_space<vmem>>, vector<2x16x16x128xbf16>,
    %27 = vector.extract_strided_slice %17 {offsets = [0, 0, 1, 0], sizes = [2, 16, 15, 128], strides = [1, 1, 1, 1]} : vector<2x16x16x128xbf16> to vector<2x16x15x128xbf16>
    %c0_24 = arith.constant 0 : index
    %c0_25 = arith.constant 0 : index
    %c0_26 = arith.constant 0 : index
    %c640 = arith.constant 640 : index
    %28 = vector.load %arg8[%c0_24, %c0_25, %c0_26, %c640] : memref<2x16x16x1152xbf16, #tpu.memory_space<vmem>>, vector<2x16x15x128xbf16>
    tpu.vector_store %arg8[%c0_24, %c0_25, %c0_26, %c640], %27 {strides = array<i32>} : memref<2x16x16x1152xbf16, #tpu.memory_space<vmem>>, vector<2x16x15x128xbf16>,
    %29 = vector.extract_strided_slice %17 {offsets = [0, 1, 0, 0], sizes = [2, 15, 15, 128], strides = [1, 1, 1, 1]} : vector<2x16x16x128xbf16> to vector<2x15x15x128xbf16>
    %c0_27 = arith.constant 0 : index
    %c0_28 = arith.constant 0 : index
    %c1_29 = arith.constant 1 : index
    %c768 = arith.constant 768 : index
    %30 = vector.load %arg8[%c0_27, %c0_28, %c1_29, %c768] : memref<2x16x16x1152xbf16, #tpu.memory_space<vmem>>, vector<2x15x15x128xbf16>
    tpu.vector_store %arg8[%c0_27, %c0_28, %c1_29, %c768], %29 {strides = array<i32>} : memref<2x16x16x1152xbf16, #tpu.memory_space<vmem>>, vector<2x15x15x128xbf16>,
    %31 = vector.extract_strided_slice %17 {offsets = [0, 1, 0, 0], sizes = [2, 15, 16, 128], strides = [1, 1, 1, 1]} : vector<2x16x16x128xbf16> to vector<2x15x16x128xbf16>
    %c0_30 = arith.constant 0 : index
    %c0_31 = arith.constant 0 : index
    %c0_32 = arith.constant 0 : index
    %c896 = arith.constant 896 : index
    %32 = vector.load %arg8[%c0_30, %c0_31, %c0_32, %c896] : memref<2x16x16x1152xbf16, #tpu.memory_space<vmem>>, vector<2x15x16x128xbf16>
    tpu.vector_store %arg8[%c0_30, %c0_31, %c0_32, %c896], %31 {strides = array<i32>} : memref<2x16x16x1152xbf16, #tpu.memory_space<vmem>>, vector<2x15x16x128xbf16>,
    %33 = vector.extract_strided_slice %17 {offsets = [0, 1, 1, 0], sizes = [2, 15, 15, 128], strides = [1, 1, 1, 1]} : vector<2x16x16x128xbf16> to vector<2x15x15x128xbf16>
    %c0_33 = arith.constant 0 : index
    %c0_34 = arith.constant 0 : index
    %c0_35 = arith.constant 0 : index
    %c1024 = arith.constant 1024 : index
    %34 = vector.load %arg8[%c0_33, %c0_34, %c0_35, %c1024] : memref<2x16x16x1152xbf16, #tpu.memory_space<vmem>>, vector<2x15x15x128xbf16>
    tpu.vector_store %arg8[%c0_33, %c0_34, %c0_35, %c1024], %33 {strides = array<i32>} : memref<2x16x16x1152xbf16, #tpu.memory_space<vmem>>, vector<2x15x15x128xbf16>,
    %c0_36 = arith.constant 0 : index
    %c0_37 = arith.constant 0 : index
    %c0_38 = arith.constant 0 : index
    %c0_39 = arith.constant 0 : index
    %35 = vector.load %arg8[%c0_36, %c0_37, %c0_38, %c0_39] : memref<2x16x16x1152xbf16, #tpu.memory_space<vmem>>, vector<2x16x16x1152xbf16>
    %36 = vector.shape_cast %35 : vector<2x16x16x1152xbf16> to vector<512x1152xbf16>
    %c0_40 = arith.constant 0 : index
    %c0_41 = arith.constant 0 : index
    %37 = vector.load %arg2[%c0_40, %c0_41] : memref<1152x128xbf16, #tpu.memory_space<vmem>>, vector<1152x128xbf16>
    %cst_42 = arith.constant dense<0.000000e+00> : vector<512x128xf32>
    %38 = tpu.matmul %36, %37, %cst_42 {dimension_numbers = #tpu.dot_dimension_numbers<[1], [0], [0], [1], [0, 0, 1, 1], [], []>} : vector<512x1152xbf16>, vector<1152x128xbf16>, vector<512x128xf32> -> vector<512x128xf32>
    %39 = vector.shape_cast %38 : vector<512x128xf32> to vector<2x256x128xf32>
    %c0_43 = arith.constant 0 : index
    %c0_44 = arith.constant 0 : index
    %c0_45 = arith.constant 0 : index
    %40 = vector.load %arg5[%c0_43, %c0_44, %c0_45] : memref<2x256x128xf32, #tpu.memory_space<vmem>>, vector<2x256x128xf32>
    tpu.vector_store %arg5[%c0_43, %c0_44, %c0_45], %39 {strides = array<i32>} : memref<2x256x128xf32, #tpu.memory_space<vmem>>, vector<2x256x128xf32>,
    %c0_46 = arith.constant 0 : index
    %c0_47 = arith.constant 0 : index
    %41 = vector.load %arg9[%c0_46, %c0_47] : memref<1x128xf32, #tpu.memory_space<vmem>>, vector<1x128xf32>
    %cst_48 = arith.constant dense<0.000000e+00> : vector<128xf32>
    %42 = vector.multi_reduction <add>, %38, %cst_48 [0] : vector<512x128xf32> to vector<128xf32>
    %43 = vector.shape_cast %42 : vector<128xf32> to vector<1x128xf32>
    %44 = arith.addf %41, %43 : vector<1x128xf32>
    %c0_49 = arith.constant 0 : index
    %c0_50 = arith.constant 0 : index
    %45 = vector.load %arg9[%c0_49, %c0_50] : memref<1x128xf32, #tpu.memory_space<vmem>>, vector<1x128xf32>
    tpu.vector_store %arg9[%c0_49, %c0_50], %44 {strides = array<i32>} : memref<1x128xf32, #tpu.memory_space<vmem>>, vector<1x128xf32>,
    %c0_51 = arith.constant 0 : index
    %c0_52 = arith.constant 0 : index
    %46 = vector.load %arg10[%c0_51, %c0_52] : memref<1x128xf32, #tpu.memory_space<vmem>>, vector<1x128xf32>
    %47 = arith.mulf %38, %38 : vector<512x128xf32>
    %cst_53 = arith.constant dense<0.000000e+00> : vector<128xf32>
    %48 = vector.multi_reduction <add>, %47, %cst_53 [0] : vector<512x128xf32> to vector<128xf32>
    %49 = vector.shape_cast %48 : vector<128xf32> to vector<1x128xf32>
    %50 = arith.addf %46, %49 : vector<1x128xf32>
    %c0_54 = arith.constant 0 : index
    %c0_55 = arith.constant 0 : index
    %51 = vector.load %arg10[%c0_54, %c0_55] : memref<1x128xf32, #tpu.memory_space<vmem>>, vector<1x128xf32>
    tpu.vector_store %arg10[%c0_54, %c0_55], %50 {strides = array<i32>} : memref<1x128xf32, #tpu.memory_space<vmem>>, vector<1x128xf32>,
    %c0_i32_56 = arith.constant 0 : i32
    %52 = arith.cmpi eq, %arg0, %c0_i32_56 : i32
    %53 = arith.extui %52 : i1 to i32
    %c0_i32_57 = arith.constant 0 : i32
    %54 = arith.cmpi ne, %53, %c0_i32_57 : i32
    scf.if %54 {
      %c0_58 = arith.constant 0 : index
      %c0_59 = arith.constant 0 : index
      %55 = vector.load %arg9[%c0_58, %c0_59] : memref<1x128xf32, #tpu.memory_space<vmem>>, vector<1x128xf32>
      %cst_60 = arith.constant 0.001953125 : f32
      %56 = vector.broadcast %cst_60 : f32 to vector<1x128xf32>
      %57 = arith.mulf %55, %56 : vector<1x128xf32>
      %c0_61 = arith.constant 0 : index
      %c0_62 = arith.constant 0 : index
      %58 = vector.load %arg10[%c0_61, %c0_62] : memref<1x128xf32, #tpu.memory_space<vmem>>, vector<1x128xf32>
      %cst_63 = arith.constant 0.001953125 : f32
      %59 = vector.broadcast %cst_63 : f32 to vector<1x128xf32>
      %60 = arith.mulf %58, %59 : vector<1x128xf32>
      %61 = arith.mulf %57, %57 : vector<1x128xf32>
      %62 = arith.subf %60, %61 : vector<1x128xf32>
      %c0_64 = arith.constant 0 : index
      %c0_65 = arith.constant 0 : index
      %63 = vector.load %arg6[%c0_64, %c0_65] : memref<1x128xf32, #tpu.memory_space<vmem>>, vector<1x128xf32>
      tpu.vector_store %arg6[%c0_64, %c0_65], %57 {strides = array<i32>} : memref<1x128xf32, #tpu.memory_space<vmem>>, vector<1x128xf32>,
      %cst_66 = arith.constant 9.99999974E-6 : f32
      %64 = vector.broadcast %cst_66 : f32 to vector<1x128xf32>
      %65 = arith.addf %62, %64 : vector<1x128xf32>
      %66 = math.rsqrt %65 : vector<1x128xf32>
      %c0_67 = arith.constant 0 : index
      %c0_68 = arith.constant 0 : index
      %67 = vector.load %arg7[%c0_67, %c0_68] : memref<1x128xf32, #tpu.memory_space<vmem>>, vector<1x128xf32>
      tpu.vector_store %arg7[%c0_67, %c0_68], %66 {strides = array<i32>} : memref<1x128xf32, #tpu.memory_space<vmem>>, vector<1x128xf32>,
    } else {
    }
    return
  }
  func.func @transform_0(%arg0: i32) -> (i32, i32, i32, i32) {
    %c0_i32 = arith.constant 0 : i32
    %c0_i32_0 = arith.constant 0 : i32
    %c0_i32_1 = arith.constant 0 : i32
    %c0_i32_2 = arith.constant 0 : i32
    return %arg0, %c0_i32, %c0_i32_0, %c0_i32_1 : i32, i32, i32, i32
  }
  func.func @transform_1(%arg0: i32) -> (i32, i32) {
    %c0_i32 = arith.constant 0 : i32
    %c0_i32_0 = arith.constant 0 : i32
    %c0_i32_1 = arith.constant 0 : i32
    return %c0_i32, %c0_i32_0 : i32, i32
  }
  func.func @transform_2(%arg0: i32) -> (i32, i32) {
    %c0_i32 = arith.constant 0 : i32
    %c0_i32_0 = arith.constant 0 : i32
    %c0_i32_1 = arith.constant 0 : i32
    return %c0_i32, %c0_i32_0 : i32, i32
  }
  func.func @transform_3(%arg0: i32) -> (i32, i32) {
    %c0_i32 = arith.constant 0 : i32
    %c0_i32_0 = arith.constant 0 : i32
    %c0_i32_1 = arith.constant 0 : i32
    return %c0_i32, %c0_i32_0 : i32, i32
  }
  func.func @transform_4(%arg0: i32) -> (i32, i32, i32) {
    %c0_i32 = arith.constant 0 : i32
    %c0_i32_0 = arith.constant 0 : i32
    %c0_i32_1 = arith.constant 0 : i32
    return %arg0, %c0_i32, %c0_i32_0 : i32, i32, i32
  }
  func.func @transform_5(%arg0: i32) -> (i32, i32) {
    %c0_i32 = arith.constant 0 : i32
    %c0_i32_0 = arith.constant 0 : i32
    %c0_i32_1 = arith.constant 0 : i32
    return %c0_i32, %c0_i32_0 : i32, i32
  }
  func.func @transform_6(%arg0: i32) -> (i32, i32) {
    %c0_i32 = arith.constant 0 : i32
    %c0_i32_0 = arith.constant 0 : i32
    %c0_i32_1 = arith.constant 0 : i32
    return %c0_i32, %c0_i32_0 : i32, i32
  }
}

</mosaic_0001>

<bundles_post_ra>
// kernel: _lambda_.3
= control target key start
LH: loop header
LB: loop body
LE: loop exit
PB: predicated region body
PF: predicated region fallthrough
CT: control target
= control target key end

     0   :  { %8 = vsyncpa [#allocation5], 0  ;;  %s354_s9 = smov [#allocation4]   ;;  %s391_s0 = inlined_call_operand.hbm [shape: f32[2,16,16,128], index: 0, kind: input, shape index: {}]   ;;  %s392_s1 = inlined_call_operand.vmem [shape: f32[1,128], index: 1, kind: output, shape index: {0}]   ;;  %s393_s2 = inlined_call_operand.vmem [shape: f32[1,128], index: 2, kind: output, shape index: {1}]  }
   0x1   :  { %s14_s10 = sshll.u32 %s354_s9, 4  ;;  %s330_s13 = scalar_lea.hbm %s391_s0, 8192  ;;  %s15_s10 = int_to_ptr.vmem [resolvable:$true] %s14_s10 }
   0x2   :  { %p331_p0 = scmp.ne.s32.totalorder %s391_s0, %s330_s13  ;;  %p334_p1 = scmp.lt.u32.totalorder %s330_s13, %s391_s0 }
   0x4   :  { %p336_p2 = pnand %p334_p1, %p331_p0 }
   0x6   :  { %339 = shalt.err (!%p336_p2)
}
   0x7   :  { %s340_s18 = scalar_lea.vmem %s15_s10, 8192  ;;  %p345_p4 = scmp.lt.s32.totalorder %s15_s10, %s15_s10 }
   0x8   :  { %p341_p3 = scmp.ne.s32.totalorder %s15_s10, %s340_s18  ;;  %p346_p5 = scmp.lt.s32.totalorder %s340_s18, %s340_s18 }
   0xa   :  { %p347_p6 = por %p346_p5, %p345_p4 }
   0xc   :  { %p348_p7 = pnand %p347_p6, %p341_p3 }
   0xe   :  { %351 = shalt.err (!%p348_p7)
}
   0xf   :  { %s355_s19 = smov 128   ;;  %s356_s20 = smov 8  }
  0x10   :  { %20 = dma.hbm_to_vmem [thread:$0]  %s391_s0, 8192, %s15_s10, [#allocation5], %s355_s19, %s355_s19, %s356_s20  }
  0x11   :  { %352 = dma.done.wait [#allocation5], 8192  }
  0x12   :  { %353 = vsyncadd [#allocation5], 4294959104  ;;  %v357_v0 = vmov 0.0   ;;  %v30_v1 = vld [vmem:[#allocation4] sm:$0xff]  ;;  %v31_v2 = vld [vmem:[#allocation4 + $0x8] sm:$0xff] }
  0x13   :  { %28 = vst [vmem:[#allocation2] sm:$0x1] %v357_v0  ;;  %29 = vst [vmem:[#allocation3] sm:$0x1] %v357_v0  ;;  %v32_v3 = vld [vmem:[#allocation4 + $0x10] sm:$0xff]  ;;  %v33_v4 = vld [vmem:[#allocation4 + $0x18] sm:$0xff]  ;;  %v95_v5 = vadd.f32 %v31_v2, %v30_v1  ;;  %v167_v6 = vmul.f32 %v30_v1, %v30_v1  ;;  %v168_v7 = vmul.f32 %v31_v2, %v31_v2 }
  0x14   :  { %v169_v8 = vmul.f32 %v32_v3, %v32_v3  ;;  %v34_v9 = vld [vmem:[#allocation4 + $0x20] sm:$0xff]  ;;  %v170_v11 = vmul.f32 %v33_v4, %v33_v4  ;;  %v35_v13 = vld [vmem:[#allocation4 + $0x28] sm:$0xff]  ;;  %v36_v17 = vld [vmem:[#allocation4 + $0x30] sm:$0xff] }
  0x15   :  { %v96_v10 = vadd.f32 %v95_v5, %v32_v3  ;;  %v231_v12 = vadd.f32 %v168_v7, %v167_v6  ;;  %v171_v15 = vmul.f32 %v34_v9, %v34_v9  ;;  %v172_v19 = vmul.f32 %v35_v13, %v35_v13  ;;  %v37_v21 = vld [vmem:[#allocation4 + $0x38] sm:$0xff]  ;;  %v38_v25 = vld [vmem:[#allocation4 + $0x40] sm:$0xff]  ;;  %v39_v29 = vld [vmem:[#allocation4 + $0x48] sm:$0xff] }
  0x16   :  { %v173_v23 = vmul.f32 %v36_v17, %v36_v17  ;;  %v174_v27 = vmul.f32 %v37_v21, %v37_v21  ;;  %v175_v31 = vmul.f32 %v38_v25, %v38_v25  ;;  %v40_v33 = vld [vmem:[#allocation4 + $0x50] sm:$0xff]  ;;  %v176_v35 = vmul.f32 %v39_v29, %v39_v29  ;;  %v41_v37 = vld [vmem:[#allocation4 + $0x58] sm:$0xff]  ;;  %v42_v41 = vld [vmem:[#allocation4 + $0x60] sm:$0xff] }
  0x17   :  { %v97_v14 = vadd.f32 %v96_v10, %v33_v4  ;;  %v232_v16 = vadd.f32 %v231_v12, %v169_v8  ;;  %v177_v39 = vmul.f32 %v40_v33, %v40_v33  ;;  %v178_v43 = vmul.f32 %v41_v37, %v41_v37  ;;  %v43_v45 = vld [vmem:[#allocation4 + $0x68] sm:$0xff]  ;;  %v44_v49 = vld [vmem:[#allocation4 + $0x70] sm:$0xff]  ;;  %v45_v53 = vld [vmem:[#allocation4 + $0x78] sm:$0xff] }
  0x18   :  { %v179_v47 = vmul.f32 %v42_v41, %v42_v41  ;;  %v180_v51 = vmul.f32 %v43_v45, %v43_v45  ;;  %v181_v55 = vmul.f32 %v44_v49, %v44_v49  ;;  %v46_v57 = vld [vmem:[#allocation4 + $0x80] sm:$0xff]  ;;  %v182_v59 = vmul.f32 %v45_v53, %v45_v53  ;;  %v47_v61 = vld [vmem:[#allocation4 + $0x88] sm:$0xff]  ;;  %v48_v1 = vld [vmem:[#allocation4 + $0x90] sm:$0xff] }
  0x19   :  { %v98_v18 = vadd.f32 %v97_v14, %v34_v9  ;;  %v233_v20 = vadd.f32 %v232_v16, %v170_v11  ;;  %v183_v63 = vmul.f32 %v46_v57, %v46_v57  ;;  %v184_v3 = vmul.f32 %v47_v61, %v47_v61  ;;  %v49_v5 = vld [vmem:[#allocation4 + $0x98] sm:$0xff]  ;;  %v50_v9 = vld [vmem:[#allocation4 + $0xa0] sm:$0xff] }
  0x1a   :  { %v185_v7 = vmul.f32 %v48_v1, %v48_v1  ;;  %v186_v11 = vmul.f32 %v49_v5, %v49_v5 }
  0x1b   :  { %v99_v22 = vadd.f32 %v98_v18, %v35_v13  ;;  %v234_v24 = vadd.f32 %v233_v20, %v171_v15  ;;  %v51_v13 = vld [vmem:[#allocation4 + $0xa8] sm:$0xff]  ;;  %v187_v15 = vmul.f32 %v50_v9, %v50_v9 }
  0x1d   :  { %v100_v26 = vadd.f32 %v99_v22, %v36_v17  ;;  %v235_v28 = vadd.f32 %v234_v24, %v172_v19  ;;  %v52_v17 = vld [vmem:[#allocation4 + $0xb0] sm:$0xff]  ;;  %v188_v19 = vmul.f32 %v51_v13, %v51_v13 }
  0x1f   :  { %v101_v30 = vadd.f32 %v100_v26, %v37_v21  ;;  %v236_v32 = vadd.f32 %v235_v28, %v173_v23  ;;  %v53_v21 = vld [vmem:[#allocation4 + $0xb8] sm:$0xff]  ;;  %v189_v23 = vmul.f32 %v52_v17, %v52_v17 }
  0x21   :  { %v102_v34 = vadd.f32 %v101_v30, %v38_v25  ;;  %v237_v36 = vadd.f32 %v236_v32, %v174_v27  ;;  %v54_v25 = vld [vmem:[#allocation4 + $0xc0] sm:$0xff]  ;;  %v190_v27 = vmul.f32 %v53_v21, %v53_v21 }
  0x23   :  { %v103_v38 = vadd.f32 %v102_v34, %v39_v29  ;;  %v238_v40 = vadd.f32 %v237_v36, %v175_v31  ;;  %v55_v29 = vld [vmem:[#allocation4 + $0xc8] sm:$0xff]  ;;  %v191_v31 = vmul.f32 %v54_v25, %v54_v25 }
  0x25   :  { %v104_v42 = vadd.f32 %v103_v38, %v40_v33  ;;  %v239_v44 = vadd.f32 %v238_v40, %v176_v35  ;;  %v56_v33 = vld [vmem:[#allocation4 + $0xd0] sm:$0xff]  ;;  %v192_v35 = vmul.f32 %v55_v29, %v55_v29 }
  0x27   :  { %v105_v46 = vadd.f32 %v104_v42, %v41_v37  ;;  %v240_v48 = vadd.f32 %v239_v44, %v177_v39  ;;  %v57_v37 = vld [vmem:[#allocation4 + $0xd8] sm:$0xff]  ;;  %v193_v39 = vmul.f32 %v56_v33, %v56_v33 }
  0x29   :  { %v106_v50 = vadd.f32 %v105_v46, %v42_v41  ;;  %v241_v52 = vadd.f32 %v240_v48, %v178_v43  ;;  %v58_v41 = vld [vmem:[#allocation4 + $0xe0] sm:$0xff]  ;;  %v194_v43 = vmul.f32 %v57_v37, %v57_v37 }
  0x2b   :  { %v107_v54 = vadd.f32 %v106_v50, %v43_v45  ;;  %v242_v56 = vadd.f32 %v241_v52, %v179_v47  ;;  %v59_v45 = vld [vmem:[#allocation4 + $0xe8] sm:$0xff]  ;;  %v195_v47 = vmul.f32 %v58_v41, %v58_v41 }
  0x2d   :  { %v108_v58 = vadd.f32 %v107_v54, %v44_v49  ;;  %v243_v60 = vadd.f32 %v242_v56, %v180_v51  ;;  %v60_v49 = vld [vmem:[#allocation4 + $0xf0] sm:$0xff]  ;;  %v196_v51 = vmul.f32 %v59_v45, %v59_v45 }
  0x2f   :  { %v109_v62 = vadd.f32 %v108_v58, %v45_v53  ;;  %v244_v0 = vadd.f32 %v243_v60, %v181_v55  ;;  %v61_v53 = vld [vmem:[#allocation4 + $0xf8] sm:$0xff]  ;;  %v197_v55 = vmul.f32 %v60_v49, %v60_v49 }
  0x31   :  { %v110_v2 = vadd.f32 %v109_v62, %v46_v57  ;;  %v245_v4 = vadd.f32 %v244_v0, %v182_v59  ;;  %v62_v57 = vld [vmem:[#allocation4 + $0x100] sm:$0xff]  ;;  %v198_v59 = vmul.f32 %v61_v53, %v61_v53 }
  0x33   :  { %v111_v6 = vadd.f32 %v110_v2, %v47_v61  ;;  %v246_v8 = vadd.f32 %v245_v4, %v183_v63  ;;  %v63_v61 = vld [vmem:[#allocation4 + $0x108] sm:$0xff]  ;;  %v199_v63 = vmul.f32 %v62_v57, %v62_v57 }
  0x35   :  { %v112_v10 = vadd.f32 %v111_v6, %v48_v1  ;;  %v247_v12 = vadd.f32 %v246_v8, %v184_v3  ;;  %v64_v1 = vld [vmem:[#allocation4 + $0x110] sm:$0xff]  ;;  %v200_v3 = vmul.f32 %v63_v61, %v63_v61 }
  0x37   :  { %v113_v14 = vadd.f32 %v112_v10, %v49_v5  ;;  %v248_v16 = vadd.f32 %v247_v12, %v185_v7  ;;  %v65_v5 = vld [vmem:[#allocation4 + $0x118] sm:$0xff]  ;;  %v201_v7 = vmul.f32 %v64_v1, %v64_v1 }
  0x39   :  { %v114_v18 = vadd.f32 %v113_v14, %v50_v9  ;;  %v249_v20 = vadd.f32 %v248_v16, %v186_v11  ;;  %v66_v9 = vld [vmem:[#allocation4 + $0x120] sm:$0xff]  ;;  %v202_v11 = vmul.f32 %v65_v5, %v65_v5 }
  0x3b   :  { %v115_v22 = vadd.f32 %v114_v18, %v51_v13  ;;  %v250_v24 = vadd.f32 %v249_v20, %v187_v15  ;;  %v67_v13 = vld [vmem:[#allocation4 + $0x128] sm:$0xff]  ;;  %v203_v15 = vmul.f32 %v66_v9, %v66_v9 }
  0x3d   :  { %v116_v26 = vadd.f32 %v115_v22, %v52_v17  ;;  %v251_v28 = vadd.f32 %v250_v24, %v188_v19  ;;  %v68_v17 = vld [vmem:[#allocation4 + $0x130] sm:$0xff]  ;;  %v204_v19 = vmul.f32 %v67_v13, %v67_v13 }
  0x3f   :  { %v117_v30 = vadd.f32 %v116_v26, %v53_v21  ;;  %v252_v32 = vadd.f32 %v251_v28, %v189_v23  ;;  %v69_v21 = vld [vmem:[#allocation4 + $0x138] sm:$0xff]  ;;  %v205_v23 = vmul.f32 %v68_v17, %v68_v17 }
  0x41   :  { %v118_v34 = vadd.f32 %v117_v30, %v54_v25  ;;  %v253_v36 = vadd.f32 %v252_v32, %v190_v27  ;;  %v70_v25 = vld [vmem:[#allocation4 + $0x140] sm:$0xff]  ;;  %v206_v27 = vmul.f32 %v69_v21, %v69_v21 }
  0x43   :  { %v119_v38 = vadd.f32 %v118_v34, %v55_v29  ;;  %v254_v40 = vadd.f32 %v253_v36, %v191_v31  ;;  %v71_v29 = vld [vmem:[#allocation4 + $0x148] sm:$0xff]  ;;  %v207_v31 = vmul.f32 %v70_v25, %v70_v25 }
  0x45   :  { %v120_v42 = vadd.f32 %v119_v38, %v56_v33  ;;  %v255_v44 = vadd.f32 %v254_v40, %v192_v35  ;;  %v72_v33 = vld [vmem:[#allocation4 + $0x150] sm:$0xff]  ;;  %v208_v35 = vmul.f32 %v71_v29, %v71_v29 }
  0x47   :  { %v121_v46 = vadd.f32 %v120_v42, %v57_v37  ;;  %v256_v48 = vadd.f32 %v255_v44, %v193_v39  ;;  %v73_v37 = vld [vmem:[#allocation4 + $0x158] sm:$0xff]  ;;  %v209_v39 = vmul.f32 %v72_v33, %v72_v33 }
  0x49   :  { %v122_v50 = vadd.f32 %v121_v46, %v58_v41  ;;  %v257_v52 = vadd.f32 %v256_v48, %v194_v43  ;;  %v74_v41 = vld [vmem:[#allocation4 + $0x160] sm:$0xff]  ;;  %v210_v43 = vmul.f32 %v73_v37, %v73_v37 }
  0x4b   :  { %v123_v54 = vadd.f32 %v122_v50, %v59_v45  ;;  %v258_v56 = vadd.f32 %v257_v52, %v195_v47  ;;  %v75_v45 = vld [vmem:[#allocation4 + $0x168] sm:$0xff]  ;;  %v211_v47 = vmul.f32 %v74_v41, %v74_v41 }
  0x4d   :  { %v124_v58 = vadd.f32 %v123_v54, %v60_v49  ;;  %v259_v60 = vadd.f32 %v258_v56, %v196_v51  ;;  %v76_v49 = vld [vmem:[#allocation4 + $0x170] sm:$0xff]  ;;  %v212_v51 = vmul.f32 %v75_v45, %v75_v45 }
  0x4f   :  { %v125_v62 = vadd.f32 %v124_v58, %v61_v53  ;;  %v260_v0 = vadd.f32 %v259_v60, %v197_v55  ;;  %v77_v53 = vld [vmem:[#allocation4 + $0x178] sm:$0xff]  ;;  %v213_v55 = vmul.f32 %v76_v49, %v76_v49 }
  0x51   :  { %v126_v2 = vadd.f32 %v125_v62, %v62_v57  ;;  %v261_v4 = vadd.f32 %v260_v0, %v198_v59  ;;  %v78_v57 = vld [vmem:[#allocation4 + $0x180] sm:$0xff]  ;;  %v214_v59 = vmul.f32 %v77_v53, %v77_v53 }
  0x53   :  { %v127_v6 = vadd.f32 %v126_v2, %v63_v61  ;;  %v262_v8 = vadd.f32 %v261_v4, %v199_v63  ;;  %v79_v61 = vld [vmem:[#allocation4 + $0x188] sm:$0xff]  ;;  %v215_v63 = vmul.f32 %v78_v57, %v78_v57 }
  0x55   :  { %v128_v10 = vadd.f32 %v127_v6, %v64_v1  ;;  %v263_v12 = vadd.f32 %v262_v8, %v200_v3  ;;  %v80_v1 = vld [vmem:[#allocation4 + $0x190] sm:$0xff]  ;;  %v216_v3 = vmul.f32 %v79_v61, %v79_v61 }
  0x57   :  { %v129_v14 = vadd.f32 %v128_v10, %v65_v5  ;;  %v264_v16 = vadd.f32 %v263_v12, %v201_v7  ;;  %v81_v5 = vld [vmem:[#allocation4 + $0x198] sm:$0xff]  ;;  %v217_v7 = vmul.f32 %v80_v1, %v80_v1 }
  0x59   :  { %v130_v18 = vadd.f32 %v129_v14, %v66_v9  ;;  %v265_v20 = vadd.f32 %v264_v16, %v202_v11  ;;  %v82_v9 = vld [vmem:[#allocation4 + $0x1a0] sm:$0xff]  ;;  %v218_v11 = vmul.f32 %v81_v5, %v81_v5 }
  0x5b   :  { %v131_v22 = vadd.f32 %v130_v18, %v67_v13  ;;  %v266_v24 = vadd.f32 %v265_v20, %v203_v15  ;;  %v83_v13 = vld [vmem:[#allocation4 + $0x1a8] sm:$0xff]  ;;  %v219_v15 = vmul.f32 %v82_v9, %v82_v9 }
  0x5d   :  { %v132_v26 = vadd.f32 %v131_v22, %v68_v17  ;;  %v267_v28 = vadd.f32 %v266_v24, %v204_v19  ;;  %v84_v17 = vld [vmem:[#allocation4 + $0x1b0] sm:$0xff]  ;;  %v220_v19 = vmul.f32 %v83_v13, %v83_v13 }
  0x5f   :  { %v133_v30 = vadd.f32 %v132_v26, %v69_v21  ;;  %v268_v32 = vadd.f32 %v267_v28, %v205_v23  ;;  %v85_v21 = vld [vmem:[#allocation4 + $0x1b8] sm:$0xff]  ;;  %v221_v23 = vmul.f32 %v84_v17, %v84_v17 }
  0x61   :  { %v134_v34 = vadd.f32 %v133_v30, %v70_v25  ;;  %v269_v36 = vadd.f32 %v268_v32, %v206_v27  ;;  %v86_v25 = vld [vmem:[#allocation4 + $0x1c0] sm:$0xff]  ;;  %v222_v27 = vmul.f32 %v85_v21, %v85_v21 }
  0x63   :  { %v135_v38 = vadd.f32 %v134_v34, %v71_v29  ;;  %v270_v40 = vadd.f32 %v269_v36, %v207_v31  ;;  %v87_v29 = vld [vmem:[#allocation4 + $0x1c8] sm:$0xff]  ;;  %v223_v31 = vmul.f32 %v86_v25, %v86_v25 }
  0x65   :  { %v136_v42 = vadd.f32 %v135_v38, %v72_v33  ;;  %v271_v44 = vadd.f32 %v270_v40, %v208_v35  ;;  %v88_v33 = vld [vmem:[#allocation4 + $0x1d0] sm:$0xff]  ;;  %v224_v35 = vmul.f32 %v87_v29, %v87_v29 }
  0x67   :  { %v137_v46 = vadd.f32 %v136_v42, %v73_v37  ;;  %v272_v48 = vadd.f32 %v271_v44, %v209_v39  ;;  %v89_v37 = vld [vmem:[#allocation4 + $0x1d8] sm:$0xff]  ;;  %v225_v39 = vmul.f32 %v88_v33, %v88_v33 }
  0x69   :  { %v138_v50 = vadd.f32 %v137_v46, %v74_v41  ;;  %v273_v52 = vadd.f32 %v272_v48, %v210_v43  ;;  %v90_v41 = vld [vmem:[#allocation4 + $0x1e0] sm:$0xff]  ;;  %v226_v43 = vmul.f32 %v89_v37, %v89_v37 }
  0x6b   :  { %v139_v54 = vadd.f32 %v138_v50, %v75_v45  ;;  %v274_v56 = vadd.f32 %v273_v52, %v211_v47  ;;  %v91_v45 = vld [vmem:[#allocation4 + $0x1e8] sm:$0xff]  ;;  %v227_v47 = vmul.f32 %v90_v41, %v90_v41 }
  0x6d   :  { %v140_v58 = vadd.f32 %v139_v54, %v76_v49  ;;  %v275_v60 = vadd.f32 %v274_v56, %v212_v51  ;;  %v92_v49 = vld [vmem:[#allocation4 + $0x1f0] sm:$0xff]  ;;  %v228_v51 = vmul.f32 %v91_v45, %v91_v45 }
  0x6f   :  { %v141_v62 = vadd.f32 %v140_v58, %v77_v53  ;;  %v276_v0 = vadd.f32 %v275_v60, %v213_v55  ;;  %v93_v53 = vld [vmem:[#allocation4 + $0x1f8] sm:$0xff]  ;;  %v229_v55 = vmul.f32 %v92_v49, %v92_v49 }
  0x70   :  { %v230_v58 = vmul.f32 %v93_v53, %v93_v53 }
  0x71   :  { %v142_v2 = vadd.f32 %v141_v62, %v78_v57  ;;  %v277_v4 = vadd.f32 %v276_v0, %v214_v59 }
  0x73   :  { %v143_v6 = vadd.f32 %v142_v2, %v79_v61  ;;  %v278_v8 = vadd.f32 %v277_v4, %v215_v63 }
  0x75   :  { %v144_v10 = vadd.f32 %v143_v6, %v80_v1  ;;  %v279_v12 = vadd.f32 %v278_v8, %v216_v3 }
  0x77   :  { %v145_v14 = vadd.f32 %v144_v10, %v81_v5  ;;  %v280_v16 = vadd.f32 %v279_v12, %v217_v7  ;;  %v94_v7 = vld [vmem:[#allocation2] sm:$0x1]  ;;  %v166_v12 = vld [vmem:[#allocation3] sm:$0x1] }
  0x79   :  { %v146_v18 = vadd.f32 %v145_v14, %v82_v9  ;;  %v281_v20 = vadd.f32 %v280_v16, %v218_v11 }
  0x7b   :  { %v147_v22 = vadd.f32 %v146_v18, %v83_v13  ;;  %v282_v24 = vadd.f32 %v281_v20, %v219_v15 }
  0x7d   :  { %v148_v26 = vadd.f32 %v147_v22, %v84_v17  ;;  %v283_v28 = vadd.f32 %v282_v24, %v220_v19 }
  0x7f   :  { %v149_v30 = vadd.f32 %v148_v26, %v85_v21  ;;  %v284_v32 = vadd.f32 %v283_v28, %v221_v23 }
  0x81   :  { %v150_v34 = vadd.f32 %v149_v30, %v86_v25  ;;  %v285_v36 = vadd.f32 %v284_v32, %v222_v27 }
  0x83   :  { %v151_v38 = vadd.f32 %v150_v34, %v87_v29  ;;  %v286_v40 = vadd.f32 %v285_v36, %v223_v31 }
  0x85   :  { %v152_v42 = vadd.f32 %v151_v38, %v88_v33  ;;  %v287_v44 = vadd.f32 %v286_v40, %v224_v35 }
  0x87   :  { %v153_v46 = vadd.f32 %v152_v42, %v89_v37  ;;  %v288_v48 = vadd.f32 %v287_v44, %v225_v39 }
  0x89   :  { %v154_v50 = vadd.f32 %v153_v46, %v90_v41  ;;  %v289_v52 = vadd.f32 %v288_v48, %v226_v43 }
  0x8b   :  { %v155_v54 = vadd.f32 %v154_v50, %v91_v45  ;;  %v290_v56 = vadd.f32 %v289_v52, %v227_v47 }
  0x8d   :  { %v156_v57 = vadd.f32 %v155_v54, %v92_v49  ;;  %v291_v59 = vadd.f32 %v290_v56, %v228_v51 }
  0x8f   :  { %v157_v60 = vadd.f32 %v156_v57, %v93_v53  ;;  %v292_v61 = vadd.f32 %v291_v59, %v229_v55 }
  0x91   :  { %v158_v62 = vrot.slane %v157_v60, 4  ;;  %v293_v63 = vadd.f32 %v292_v61, %v230_v58 }
  0x93   :  { %v159_v0 = vadd.f32 %v158_v62, %v157_v60  ;;  %v294_v1 = vrot.slane %v293_v63, 4 }
  0x95   :  { %v160_v2 = vrot.slane %v159_v0, 2  ;;  %v295_v3 = vadd.f32 %v294_v1, %v293_v63 }
  0x97   :  { %v161_v4 = vadd.f32 %v160_v2, %v159_v0  ;;  %v296_v5 = vrot.slane %v295_v3, 2 }
  0x99   :  { %v162_v6 = vrot.slane %v161_v4, 1  ;;  %v297_v8 = vadd.f32 %v296_v5, %v295_v3 }
  0x9b   :  { %v163_v9 = vadd.f32 %v162_v6, %v161_v4  ;;  %v298_v10 = vrot.slane %v297_v8, 1 }
  0x9d   :  { %v164_v11 = vadd.f32 %v163_v9, %v94_v7  ;;  %v299_v13 = vadd.f32 %v298_v10, %v297_v8 }
  0x9f   :  { %165 = vst [vmem:[#allocation2] sm:$0x1] %v164_v11  ;;  %v300_v14 = vadd.f32 %v299_v13, %v166_v12 }
  0xa1   :  { %301 = vst [vmem:[#allocation3] sm:$0x1] %v300_v14 }
  0xa6   :  { %v305_v15 = vld [vmem:[#allocation2] sm:$0x1] }
  0xa7   :  { %v306_v16 = vmul.f32 0.001953125, %v305_v15 }
  0xa8   :  { %v307_v17 = vld [vmem:[#allocation3] sm:$0x1] }
  0xa9   :  { %v309_v18 = vmul.f32 %v306_v16, %v306_v16  ;;  %311 = vst [vmem:[%s392_s1] sm:$0x1] %v306_v16  ;;  %v308_v19 = vmul.f32 0.001953125, %v307_v17 }
  0xab   :  { %v310_v20 = vsub.f32 %v308_v19, %v309_v18 }
  0xad   :  { %v312_v21 = vadd.f32 1e-05, %v310_v20 }
  0xaf   :  { %328 = vrsqrt.f32 %v312_v21 }
  0xb9   :  { %v329_v22 = vpop.eup %328 }
  0xba   :  { %314 = vst [vmem:[%s393_s2] sm:$0x1] %v329_v22 }
  0xbb   :  { %323 = vsyncpa [#allocation5], 1 }

// kernel: _lambda_.4
= control target key start
LH: loop header
LB: loop body
LE: loop exit
PB: predicated region body
PF: predicated region fallthrough
CT: control target
= control target key end

     0   :  { %12 = vsyncpa [#allocation6], 0  ;;  %s5085_s21 = smov [#allocation5]   ;;  %s7099_s0 = inlined_call_operand.vmem [shape: f32[2,16,16,128], index: 0, kind: input, shape index: {}]   ;;  %s7100_s1 = inlined_call_operand.hbm [shape: bf16[1152,128], index: 1, kind: input, shape index: {}]   ;;  %s7101_s2 = inlined_call_operand.vmem [shape: f32[1,128], index: 2, kind: input, shape index: {}]   ;;  %s7102_s3 = inlined_call_operand.vmem [shape: f32[1,128], index: 3, kind: input, shape index: {}]   ;;  %s7103_s4 = inlined_call_operand.vmem [shape: f32[2,256,128], index: 4, kind: output, shape index: {0}]   ;;  %s7104_s5 = inlined_call_operand.vmem [shape: f32[1,128], index: 5, kind: output, shape index: {1}]   ;;  %s7105_s6 = inlined_call_operand.vmem [shape: f32[1,128], index: 6, kind: output, shape index: {2}]  }
   0x1   :  { %s20_s22 = sshll.u32 %s5085_s21, 4  ;;  %s5061_s25 = scalar_lea.hbm %s7100_s1, 9216  ;;  %s21_s22 = int_to_ptr.vmem [resolvable:$true] %s20_s22 }
   0x2   :  { %p5062_p0 = scmp.ne.s32.totalorder %s7100_s1, %s5061_s25  ;;  %p5065_p1 = scmp.lt.u32.totalorder %s5061_s25, %s7100_s1 }
   0x4   :  { %p5067_p2 = pnand %p5065_p1, %p5062_p0 }
   0x6   :  { %5070 = shalt.err (!%p5067_p2)
}
   0x7   :  { %s5071_s30 = scalar_lea.vmem %s21_s22, 9216  ;;  %p5076_p4 = scmp.lt.s32.totalorder %s21_s22, %s21_s22 }
   0x8   :  { %p5072_p3 = scmp.ne.s32.totalorder %s21_s22, %s5071_s30  ;;  %p5077_p5 = scmp.lt.s32.totalorder %s5071_s30, %s5071_s30 }
   0xa   :  { %p5078_p6 = por %p5077_p5, %p5076_p4 }
   0xc   :  { %p5079_p7 = pnand %p5078_p6, %p5072_p3 }
   0xe   :  { %5082 = shalt.err (!%p5079_p7)
}
   0xf   :  { %s5086_s7 = smov 64   ;;  %s5087_s8 = smov 4  }
  0x10   :  { %26 = dma.hbm_to_vmem [thread:$0]  %s7100_s1, 9216, %s21_s22, [#allocation6], %s5086_s7, %s5086_s7, %s5087_s8  }
  0x11   :  { %5083 = dma.done.wait [#allocation6], 9216  }
  0x12   :  { %5084 = vsyncadd [#allocation6], 4294958080  ;;  %v7115_v0 = vmov 0   ;;  %v4983_v1 = vld [vmem:[#allocation5] sm:$0xff]   ;;  %v4985_v3 = vld [vmem:[#allocation5 + $0x8] sm:$0xff]   ;;  %vm1000_vm0 = vcmask 1047552  }
  0x13   :  { %2625 = vmatprep.subr.bf16.mxu1 %v7115_v0  ;;  %2914 = vmatprep.subr.bf16.mxu0 %v7115_v0  ;;  %v5140_v2 = vld [vmem:[#allocation5 + $0x80] sm:$0xff]   ;;  %v5144_v4 = vld [vmem:[#allocation5 + $0x88] sm:$0xff]   ;;  %v4987_v5 = vld [vmem:[#allocation5 + $0x10] sm:$0xff]   ;;  %vm1001_vm1 = vsmask.f32 7938 }
  0x14   :  { %2657 = vmatprep.mubr.bf16.mxu1 %v7115_v0  ;;  %2626 = vmatpush1.bf16.msra.mxu1 %v4983_v1  ;;  %v5149_v6 = vld [vmem:[#allocation5 + $0x90] sm:$0xff]   ;;  %v4989_v7 = vld [vmem:[#allocation5 + $0x18] sm:$0xff]   ;;  %v4991_v9 = vld [vmem:[#allocation5 + $0x20] sm:$0xff]   ;;  %vm1213_vm3 = vsmask.f32 7424 }
  0x15   :  { %2915 = vmatpush1.bf16.msra.mxu0 %v5140_v2  ;;  %2627 = vmatprep.subr.bf16.mxu1 %v7115_v0  ;;  %v5154_v8 = vld [vmem:[#allocation5 + $0x98] sm:$0xff]   ;;  %v5159_v10 = vld [vmem:[#allocation5 + $0xa0] sm:$0xff]   ;;  %v4993_v11 = vld [vmem:[#allocation5 + $0x28] sm:$0xff]  }
  0x16   :  { %2916 = vmatprep.subr.bf16.mxu0 %v7115_v0  ;;  %v5164_v12 = vld [vmem:[#allocation5 + $0xa8] sm:$0xff]   ;;  %v4995_v13 = vld [vmem:[#allocation5 + $0x30] sm:$0xff]   ;;  %v4997_v15 = vld [vmem:[#allocation5 + $0x38] sm:$0xff]  }
  0x17   :  { %v5169_v14 = vld [vmem:[#allocation5 + $0xb0] sm:$0xff]   ;;  %v5174_v16 = vld [vmem:[#allocation5 + $0xb8] sm:$0xff]   ;;  %v4999_v17 = vld [vmem:[#allocation5 + $0x40] sm:$0xff]  }
  0x18   :  { %2628 = vmatpush1.bf16.msra.mxu1 %v4985_v3  ;;  %v5179_v18 = vld [vmem:[#allocation5 + $0xc0] sm:$0xff]   ;;  %v5191_v21 = vld [vmem:[%s7101_s2] ss:$0 sm:$0xff]  ;;  %v5001_v25 = vld [vmem:[#allocation5 + $0x48] sm:$0xff]  }
  0x19   :  { %2917 = vmatpush1.bf16.msra.mxu0 %v5144_v4  ;;  %2629 = vmatprep.subr.bf16.mxu1 %v7115_v0  ;;  %v329_v19 = vld [vmem:[%s7099_s0] sm:$0xff]  ;;  %v330_v20 = vld [vmem:[%s7099_s0 + $0x8] sm:$0xff]  ;;  %v331_v29 = vld [vmem:[%s7099_s0 + $0x10] sm:$0xff] }
  0x1a   :  { %2918 = vmatprep.subr.bf16.mxu0 %v7115_v0  ;;  %v400_v22 = vsub.f32 %v329_v19, %v5191_v21  ;;  %v401_v23 = vsub.f32 %v330_v20, %v5191_v21  ;;  %v5198_v24 = vld [vmem:[%s7102_s3] ss:$0 sm:$0xff]  ;;  %v5202_v26 = vld [vmem:[#allocation5 + $0xc8] sm:$0xff]   ;;  %v332_v30 = vld [vmem:[%s7099_s0 + $0x18] sm:$0xff]  ;;  %v402_v32 = vsub.f32 %v331_v29, %v5191_v21 }
  0x1b   :  { %v5003_v31 = vld [vmem:[#allocation5 + $0x50] sm:$0xff]   ;;  %v403_v33 = vsub.f32 %v332_v30, %v5191_v21  ;;  %v333_v39 = vld [vmem:[%s7099_s0 + $0x20] sm:$0xff]  ;;  %v334_v40 = vld [vmem:[%s7099_s0 + $0x28] sm:$0xff] }
  0x1c   :  { %2630 = vmatpush1.bf16.msra.mxu1 %v4987_v5  ;;  %v471_v27 = vmul.f32 %v5198_v24, %v400_v22  ;;  %v472_v28 = vmul.f32 %v5198_v24, %v401_v23  ;;  %v5215_v36 = vld [vmem:[#allocation5 + $0xd0] sm:$0xff]   ;;  %v473_v37 = vmul.f32 %v5198_v24, %v402_v32  ;;  %v404_v43 = vsub.f32 %v333_v39, %v5191_v21  ;;  %v5005_v45 = vld [vmem:[#allocation5 + $0x58] sm:$0xff]   ;;  %v5007_v62 = vld [vmem:[#allocation5 + $0x60] sm:$0xff]  }
  0x1d   :  { %2919 = vmatpush1.bf16.msra.mxu0 %v5149_v6  ;;  %2631 = vmatprep.subr.bf16.mxu1 %v7115_v0  ;;  %v474_v38 = vmul.f32 %v5198_v24, %v403_v33  ;;  %v405_v44 = vsub.f32 %v334_v40, %v5191_v21  ;;  %v335_v52 = vld [vmem:[%s7099_s0 + $0x30] sm:$0xff]  ;;  %v336_v53 = vld [vmem:[%s7099_s0 + $0x38] sm:$0xff]  ;;  %vm5263_vm2 = vmand %vm1000_vm0, %vm1001_vm1 }
  0x1e   :  { %2920 = vmatprep.subr.bf16.mxu0 %v7115_v0  ;;  %v535_v34 = vmax.f32 %v471_v27, 0.0  ;;  %v536_v35 = vmax.f32 %v472_v28, 0.0  ;;  %v537_v46 = vmax.f32 %v473_v37, 0.0  ;;  %v475_v50 = vmul.f32 %v5198_v24, %v404_v43  ;;  %v5242_v58 = vld [vmem:[#allocation5 + $0xd8] sm:$0xff]   ;;  %v338_v22 = vld [vmem:[%s7099_s0 + $0x48] sm:$0xff]  ;;  %vm5344_vm4 = vmand %vm1000_vm0, %vm1213_vm3 }
  0x1f   :  { %v538_v47 = vmax.f32 %v474_v38, 0.0  ;;  %v476_v51 = vmul.f32 %v5198_v24, %v405_v44  ;;  %v406_v56 = vsub.f32 %v335_v52, %v5191_v21  ;;  %v407_v57 = vsub.f32 %v336_v53, %v5191_v21  ;;  %v5009_v23 = vld [vmem:[#allocation5 + $0x68] sm:$0xff]   ;;  %v5011_v38 = vld [vmem:[#allocation5 + $0x70] sm:$0xff]   ;;  %v5305_v52 = vld [vmem:[#allocation5 + $0xf8] sm:$0xff]  }
  0x20   :  { %2632 = vmatpush1.bf16.msra.mxu1 %v4989_v7  ;;  %v599_v41 = vmin.f32 %v535_v34, 6.0  ;;  %v600_v42 = vmin.f32 %v536_v35, 6.0  ;;  %v601_v54 = vmin.f32 %v537_v46, 6.0  ;;  %v539_v60 = vmax.f32 %v475_v50, 0.0  ;;  %v5249_v7 = vld [vmem:[#allocation5 + $0xe0] sm:$0xff]  }
  0x21   :  { %2921 = vmatpush1.bf16.msra.mxu0 %v5154_v8  ;;  %2633 = vmatprep.subr.bf16.mxu1 %v7115_v0  ;;  %v602_v55 = vmin.f32 %v538_v47, 6.0  ;;  %v540_v61 = vmax.f32 %v476_v51, 0.0  ;;  %v409_v35 = vsub.f32 %v338_v22, %v5191_v21  ;;  %v342_v22 = vld [vmem:[%s7099_s0 + $0x68] sm:$0xff] }
  0x22   :  { %2922 = vmatprep.subr.bf16.mxu0 %v7115_v0  ;;  %v4914_v48 = vround.rtne.f32 %v599_v41  ;;  %v4915_v49 = vround.rtne.f32 %v600_v42  ;;  %v4916_v3 = vround.rtne.f32 %v601_v54  ;;  %v5287_v41 = vld [vmem:[#allocation5 + $0xf0] sm:$0xff]  }
  0x23   :  { %v4917_v5 = vround.rtne.f32 %v602_v55  ;;  %v604_v19 = vmin.f32 %v540_v61, 6.0  ;;  %v480_v44 = vmul.f32 %v5198_v24, %v409_v35 }
  0x24   :  { %2634 = vmatpush1.bf16.msra.mxu1 %v4991_v9  ;;  %v5244_v59 = vpack.c.bf16 %v4915_v49, %v4914_v48  ;;  %v603_v9 = vmin.f32 %v539_v60, 6.0  ;;  %v339_v48 = vld [vmem:[%s7099_s0 + $0x50] sm:$0xff]  ;;  %v340_v49 = vld [vmem:[%s7099_s0 + $0x58] sm:$0xff] }
  0x25   :  { %2923 = vmatpush1.bf16.msra.mxu0 %v5159_v10  ;;  %2635 = vmatprep.subr.bf16.mxu1 %v7115_v0  ;;  %v5270_v27 = vpack.c.bf16 %v4917_v5, %v4916_v3  ;;  %v4919_v34 = vround.rtne.f32 %v604_v19  ;;  %v544_v55 = vmax.f32 %v480_v44, 0.0  ;;  %v5015_v3 = vld [vmem:[#allocation5 + $0x100] sm:$0xff]  }
  0x26   :  { %2924 = vmatprep.subr.bf16.mxu0 %v7115_v0  ;;  %v760_v63 = vshrl.u32 %v5244_v59, 16  ;;  %v763_v1 = vshll.u32 %v5244_v59, 16  ;;  %v4918_v33 = vround.rtne.f32 %v603_v9  ;;  %v341_v19 = vld [vmem:[%s7099_s0 + $0x60] sm:$0xff] }
  0x27   :  { %v767_v37 = vshrl.u32 %v5270_v27, 16  ;;  %v770_v47 = vshll.u32 %v5270_v27, 16 }
  0x28   :  { %2636 = vmatpush1.bf16.msra.mxu1 %v4993_v11  ;;  %v477_v11 = vmul.f32 %v5198_v24, %v406_v56  ;;  %v5289_v42 = vpack.c.bf16 %v4919_v34, %v4918_v33  ;;  %v410_v56 = vsub.f32 %v339_v48, %v5191_v21  ;;  %v1123_v61 = vrot.slane %v763_v1, 1 }
  0x29   :  { %2925 = vmatpush1.bf16.msra.mxu0 %v5164_v12  ;;  %2637 = vmatprep.subr.bf16.mxu1 %v7115_v0  ;;  %v769_v46 = vrot.slane %v767_v37, 7 }
  0x2a   :  { %2926 = vmatprep.subr.bf16.mxu0 %v7115_v0  ;;  %v541_v28 = vmax.f32 %v477_v11, 0.0  ;;  %v774_v53 = vshrl.u32 %v5289_v42, 16  ;;  %v777_v9 = vshll.u32 %v5289_v42, 16 }
  0x2b   :  { %v772_v60 = vor.u32 %v770_v47, %v769_v46 }
  0x2c   :  { %2638 = vmatpush1.bf16.msra.mxu1 %v4995_v13  ;;  %v478_v13 = vmul.f32 %v5198_v24, %v407_v57  ;;  %v605_v39 = vmin.f32 %v541_v28, 6.0  ;;  %v411_v57 = vsub.f32 %v340_v49, %v5191_v21  ;;  %v776_v5 = vrot.slane %v774_v53, 7 }
  0x2d   :  { %2927 = vmatpush1.bf16.msra.mxu0 %v5169_v14  ;;  %2639 = vmatprep.subr.bf16.mxu1 %v7115_v0  ;;  %v1124_v28 = vor.u32 %v1123_v61, %v760_v63 }
  0x2e   :  { %2928 = vmatprep.subr.bf16.mxu0 %v7115_v0  ;;  %v542_v29 = vmax.f32 %v478_v13, 0.0  ;;  %v4920_v50 = vround.rtne.f32 %v605_v39  ;;  %v608_v13 = vmin.f32 %v544_v55, 6.0  ;;  %v5017_v39 = vld [vmem:[#allocation5 + $0x110] sm:$0xff]  }
  0x30   :  { %2640 = vmatpush1.bf16.msra.mxu1 %v4997_v15  ;;  %v337_v15 = vld [vmem:[%s7099_s0 + $0x40] sm:$0xff]  ;;  %v606_v40 = vmin.f32 %v542_v29, 6.0  ;;  %v779_v29 = vor.u32 %v777_v9, %v776_v5  ;;  %v4923_v33 = vround.rtne.f32 %v608_v13 }
  0x31   :  { %2929 = vmatpush1.bf16.msra.mxu0 %v5174_v16  ;;  %2641 = vmatprep.subr.bf16.mxu1 %v7115_v0  ;;  %v408_v30 = vsub.f32 %v337_v15, %v5191_v21  ;;  %v481_v15 = vmul.f32 %v5198_v24, %v410_v56  ;;  %v5019_v13 = vld [vmem:[#allocation5 + $0x120] sm:$0xff]  }
  0x32   :  { %2930 = vmatprep.subr.bf16.mxu0 %v7115_v0  ;;  %v4921_v51 = vround.rtne.f32 %v606_v40  ;;  %v1125_v40 = vrot.slane %v770_v47, 1  ;;  %v5361_v46 = vsel %vm5263_vm2, %v779_v29, 0  ;;  %v344_v47 = vld [vmem:[%s7099_s0 + $0x78] sm:$0xff] }
  0x33   :  { %v479_v43 = vmul.f32 %v5198_v24, %v408_v30  ;;  %v545_v34 = vmax.f32 %v481_v15, 0.0 }
  0x34   :  { %2642 = vmatpush1.bf16.msra.mxu1 %v4999_v17  ;;  %v762_v17 = vrot.slane %v760_v63, 7  ;;  %v413_v63 = vsub.f32 %v342_v22, %v5191_v21  ;;  %v1126_v55 = vor.u32 %v1125_v40, %v767_v37 }
  0x35   :  { %2931 = vmatpush1.bf16.msra.mxu0 %v5179_v18  ;;  %2643 = vmatprep.subr.bf16.mxu1 %v7115_v0  ;;  %v543_v54 = vmax.f32 %v479_v43, 0.0  ;;  %v609_v49 = vmin.f32 %v545_v34, 6.0  ;;  %v5020_v34 = vld [vmem:[#allocation5 + $0x128] sm:$0xff]  }
  0x36   :  { %2932 = vmatprep.subr.bf16.mxu0 %v7115_v0  ;;  %v5391_v15 = vsel %vm5344_vm4, %v1126_v55, 0 }
  0x37   :  { %v607_v11 = vmin.f32 %v543_v54, 6.0  ;;  %v484_v54 = vmul.f32 %v5198_v24, %v413_v63  ;;  %7190 = vst [vmem:[#allocation9_spill] sm:$0xff] %v5391_v15 }
  0x38   :  { %2644 = vmatpush1.bf16.msra.mxu1 %v5001_v25  ;;  %v765_v25 = vor.u32 %v763_v1, %v762_v17  ;;  %v482_v1 = vmul.f32 %v5198_v24, %v411_v57  ;;  %v5324_v17 = vsel %vm5263_vm2, %v772_v60, 0  ;;  %v5018_v57 = vld [vmem:[#allocation5 + $0x118] sm:$0xff]  }
  0x39   :  { %2933 = vmatpush1.bf16.msra.mxu0 %v5202_v26  ;;  %2645 = vmatprep.subr.bf16.mxu1 %v7115_v0  ;;  %v4922_v30 = vround.rtne.f32 %v607_v11  ;;  %v548_v11 = vmax.f32 %v484_v54, 0.0 }
  0x3a   :  { %2934 = vmatprep.subr.bf16.mxu0 %v7115_v0  ;;  %v5279_v32 = vsel %vm5263_vm2, %v765_v25, 0  ;;  %v5016_v25 = vld [vmem:[#allocation5 + $0x108] sm:$0xff]   ;;  %v546_v35 = vmax.f32 %v482_v1, 0.0 }
  0x3b   :  { %2946 = vmatprep.mubr.bf16.mxu0 %v5279_v32  ;;  %v5363_v48 = vpack.c.bf16 %v4923_v33, %v4922_v30  ;;  %v612_v33 = vmin.f32 %v548_v11, 6.0 }
  0x3c   :  { %2646 = vmatpush1.bf16.msra.mxu1 %v5003_v31  ;;  %v5275_v31 = vld [vmem:[#allocation5 + $0xe8] sm:$0xff]  }
  0x3d   :  { %2935 = vmatpush1.bf16.msra.mxu0 %v5215_v36  ;;  %2647 = vmatprep.subr.bf16.mxu1 %v7115_v0  ;;  %7189 = vst [vmem:[#allocation8_spill] sm:$0xff] %v5363_v48  ;;  %v788_v60 = vshrl.u32 %v5363_v48, 16  ;;  %v4927_v40 = vround.rtne.f32 %v612_v33 }
  0x3e   :  { %2936 = vmatprep.subr.bf16.mxu0 %v7115_v0 }
  0x40   :  { %2648 = vmatpush1.bf16.msra.mxu1 %v5005_v45  ;;  %v5013_v45 = vld [vmem:[#allocation5 + $0x78] sm:$0xff]  }
  0x41   :  { %2937 = vmatpush1.bf16.msra.mxu0 %v5242_v58  ;;  %2649 = vmatprep.subr.bf16.mxu1 %v7115_v0 }
  0x42   :  { %2938 = vmatprep.subr.bf16.mxu0 %v7115_v0 }
  0x44   :  { %2650 = vmatpush1.bf16.msra.mxu1 %v5007_v62  ;;  %v5311_v62 = vpack.c.bf16 %v4921_v51, %v4920_v50  ;;  %v610_v50 = vmin.f32 %v546_v35, 6.0 }
  0x45   :  { %2939 = vmatpush1.bf16.msra.mxu0 %v5249_v7  ;;  %2651 = vmatprep.subr.bf16.mxu1 %v7115_v0 }
  0x46   :  { %2940 = vmatprep.subr.bf16.mxu0 %v7115_v0  ;;  %v784_v44 = vshll.u32 %v5311_v62, 16  ;;  %v4925_v5 = vround.rtne.f32 %v610_v50 }
  0x48   :  { %2652 = vmatpush1.bf16.msra.mxu1 %v5009_v23  ;;  %v781_v23 = vshrl.u32 %v5311_v62, 16 }
  0x49   :  { %2941 = vmatpush1.bf16.msra.mxu0 %v5275_v31  ;;  %2653 = vmatprep.subr.bf16.mxu1 %v7115_v0 }
  0x4a   :  { %2942 = vmatprep.subr.bf16.mxu0 %v7115_v0  ;;  %v783_v43 = vrot.slane %v781_v23, 7 }
  0x4c   :  { %2654 = vmatpush1.bf16.msra.mxu1 %v5011_v38  ;;  %v412_v38 = vsub.f32 %v341_v19, %v5191_v21  ;;  %v786_v56 = vor.u32 %v784_v44, %v783_v43  ;;  %v1127_v19 = vrot.slane %v777_v9, 1  ;;  %v5021_v43 = vld [vmem:[#allocation5 + $0x130] sm:$0xff]  }
  0x4d   :  { %2943 = vmatpush1.bf16.msra.mxu0 %v5287_v41  ;;  %2655 = vmatprep.subr.bf16.mxu1 %v7115_v0 }
  0x4e   :  { %2944 = vmatprep.subr.bf16.mxu0 %v7115_v0  ;;  %v483_v51 = vmul.f32 %v5198_v24, %v412_v38  ;;  %v5395_v1 = vsel %vm5263_vm2, %v786_v56, 0  ;;  %v1128_v9 = vor.u32 %v1127_v19, %v774_v53 }
  0x50   :  { %2656 = vmatpush1.bf16.msra.mxu1 %v5013_v45  ;;  %v5357_v45 = vsel %vm5344_vm4, %v1124_v28, 0  ;;  %v547_v37 = vmax.f32 %v483_v51, 0.0  ;;  %v790_v28 = vrot.slane %v788_v60, 7  ;;  %v5421_v53 = vsel %vm5344_vm4, %v1128_v9, 0 }
  0x51   :  { %2945 = vmatpush1.bf16.msra.mxu0 %v5305_v52  ;;  %4562 = vmatprep.subr.bf16.mxu1 %v7115_v0  ;;  %7192 = vst [vmem:[#allocation11_spill] sm:$0xff] %v5421_v53 }
  0x52   :  { %3203 = vmatprep.subr.bf16.mxu0 %v7115_v0  ;;  %v611_v30 = vmin.f32 %v547_v37, 6.0  ;;  %v346_v37 = vld [vmem:[%s7099_s0 + $0x88] sm:$0xff] }
  0x53   :  { %2658 = vmatmul.mubr.bf16.vlgmr.msra.gmra.mrb[0].mxu1 %v7115_v0 }
  0x54   :  { %2947 = vmatmul.mubr.bf16.vlgmr.msra.gmra.mrb[0].mxu0 %v7115_v0  ;;  %4578 = vmatpush1.bf16.msra.mxu1 %v5140_v2 }
  0x55   :  { %3204 = vmatpush1.bf16.msra.mxu0 %v5015_v3  ;;  %2665 = vmatprep.mubr.bf16.mxu1 %v5244_v59  ;;  %v4924_v3 = vround.rtne.f32 %v609_v49 }
  0x56   :  { %3205 = vmatprep.subr.bf16.mxu0 %v7115_v0  ;;  %2954 = vmatprep.mubr.bf16.mxu0 %v5324_v17 }
  0x57   :  { %4563 = vmatprep.subr.bf16.mxu1 %v7115_v0  ;;  %v5405_v29 = vpack.c.bf16 %v4925_v5, %v4924_v3 }
  0x58   :  { %4579 = vmatpush1.bf16.msra.mxu1 %v5144_v4  ;;  %v343_v4 = vld [vmem:[%s7099_s0 + $0x70] sm:$0xff] }
  0x59   :  { %3206 = vmatpush1.bf16.msra.mxu0 %v5016_v25  ;;  %4564 = vmatprep.subr.bf16.mxu1 %v7115_v0  ;;  %v414_v61 = vsub.f32 %v343_v4, %v5191_v21  ;;  %7191 = vst [vmem:[#allocation10_spill] sm:$0xff] %v5405_v29  ;;  %v795_v63 = vshrl.u32 %v5405_v29, 16  ;;  %v1129_v4 = vrot.slane %v784_v44, 1  ;;  %v5022_v44 = vld [vmem:[#allocation5 + $0x138] sm:$0xff]  }
  0x5a   :  { %3207 = vmatprep.subr.bf16.mxu0 %v7115_v0 }
  0x5b   :  { %2666 = vmatmul.mubr.bf16.gmra.mrb[4].mxu1 %v5279_v32  ;;  %v415_v32 = vsub.f32 %v344_v47, %v5191_v21  ;;  %v485_v22 = vmul.f32 %v5198_v24, %v414_v61  ;;  %v798_v47 = vshll.u32 %v5405_v29, 16  ;;  %v1130_v55 = vor.u32 %v1129_v4, %v781_v23  ;;  %v5023_v23 = vld [vmem:[#allocation5 + $0x140] sm:$0xff]  }
  0x5c   :  { %2955 = vmatmul.mubr.bf16.gmra.mrb[4].mxu0 %v5357_v45  ;;  %2673 = vmatprep.mubr.bf16.mxu1 %v5270_v27 }
  0x5d   :  { %3208 = vmatpush1.bf16.msra.mxu0 %v5017_v39  ;;  %2962 = vmatprep.mubr.bf16.mxu0 %v5361_v46  ;;  %v486_v25 = vmul.f32 %v5198_v24, %v415_v32  ;;  %v549_v35 = vmax.f32 %v485_v22, 0.0  ;;  %v4926_v39 = vround.rtne.f32 %v611_v30  ;;  %v345_v32 = vld [vmem:[%s7099_s0 + $0x80] sm:$0xff]  ;;  %v5452_v3 = vsel %vm5344_vm4, %v1130_v55, 0 }
  0x5e   :  { %3209 = vmatprep.subr.bf16.mxu0 %v7115_v0  ;;  %4580 = vmatpush1.bf16.msra.mxu1 %v5149_v6  ;;  %v791_v6 = vshll.u32 %v5363_v48, 16  ;;  %7195 = vst [vmem:[#allocation14_spill] sm:$0xff] %v5452_v3  ;;  %v417_v22 = vsub.f32 %v346_v37, %v5191_v21 }
  0x5f   :  { %4565 = vmatprep.subr.bf16.mxu1 %v7115_v0  ;;  %v550_v38 = vmax.f32 %v486_v25, 0.0  ;;  %v613_v49 = vmin.f32 %v549_v35, 6.0  ;;  %v5433_v51 = vpack.c.bf16 %v4927_v40, %v4926_v39  ;;  %v5024_v25 = vld [vmem:[#allocation5 + $0x148] sm:$0xff]   ;;  %v5025_v35 = vld [vmem:[#allocation5 + $0x150] sm:$0xff]  }
  0x60   :  { %v1131_v5 = vrot.slane %v791_v6, 1  ;;  %v488_v9 = vmul.f32 %v5198_v24, %v417_v22 }
  0x61   :  { %3210 = vmatpush1.bf16.msra.mxu0 %v5018_v57  ;;  %7194 = vst [vmem:[#allocation13_spill] sm:$0xff] %v5433_v51  ;;  %v614_v54 = vmin.f32 %v550_v38, 6.0  ;;  %v4928_v57 = vround.rtne.f32 %v613_v49  ;;  %v347_v38 = vld [vmem:[%s7099_s0 + $0x90] sm:$0xff] }
  0x62   :  { %3211 = vmatprep.subr.bf16.mxu0 %v7115_v0  ;;  %4581 = vmatpush1.bf16.msra.mxu1 %v5154_v8  ;;  %v793_v8 = vor.u32 %v791_v6, %v790_v28  ;;  %v416_v6 = vsub.f32 %v345_v32, %v5191_v21  ;;  %v1132_v28 = vor.u32 %v1131_v5, %v788_v60  ;;  %v1133_v60 = vrot.slane %v798_v47, 1  ;;  %v5027_v32 = vld [vmem:[#allocation5 + $0x160] sm:$0xff]  }
  0x63   :  { %2674 = vmatmul.mubr.bf16.gmra.mrb[8].mxu1 %v5324_v17  ;;  %4566 = vmatprep.subr.bf16.mxu1 %v7115_v0  ;;  %v4929_v61 = vround.rtne.f32 %v614_v54  ;;  %v552_v4 = vmax.f32 %v488_v9, 0.0 }
  0x64   :  { %2963 = vmatmul.mubr.bf16.gmra.mrb[8].mxu0 %v5391_v15  ;;  %2681 = vmatprep.mubr.bf16.mxu1 %v5289_v42  ;;  %v5429_v50 = vsel %vm5263_vm2, %v793_v8, 0  ;;  %v487_v33 = vmul.f32 %v5198_v24, %v416_v6 }
  0x65   :  { %3212 = vmatpush1.bf16.msra.mxu0 %v5019_v13  ;;  %2970 = vmatprep.mubr.bf16.mxu0 %v5395_v1  ;;  %7193 = vst [vmem:[#allocation12_spill] sm:$0xff] %v5429_v50  ;;  %v805_v13 = vshll.u32 %v5433_v51, 16  ;;  %v5465_v19 = vpack.c.bf16 %v4929_v61, %v4928_v57  ;;  %v616_v55 = vmin.f32 %v552_v4, 6.0  ;;  %v349_v61 = vld [vmem:[%s7099_s0 + $0xa0] sm:$0xff]  ;;  %v7315_v20 = vld [vmem:[#allocation14_spill] sm:$0xff] }
  0x66   :  { %3213 = vmatprep.subr.bf16.mxu0 %v7115_v0  ;;  %4582 = vmatpush1.bf16.msra.mxu1 %v5159_v10  ;;  %v797_v10 = vrot.slane %v795_v63, 7 }
  0x67   :  { %4567 = vmatprep.subr.bf16.mxu1 %v7115_v0  ;;  %7197 = vst [vmem:[#allocation16_spill] sm:$0xff] %v5465_v19  ;;  %v809_v30 = vshrl.u32 %v5465_v19, 16  ;;  %v812_v40 = vshll.u32 %v5465_v19, 16 }
  0x68   :  { %v800_v56 = vor.u32 %v798_v47, %v797_v10  ;;  %v418_v47 = vsub.f32 %v347_v38, %v5191_v21  ;;  %v5026_v10 = vld [vmem:[#allocation5 + $0x158] sm:$0xff]   ;;  %v351_v38 = vld [vmem:[%s7099_s0 + $0xb0] sm:$0xff] }
  0x69   :  { %3214 = vmatpush1.bf16.msra.mxu0 %v5020_v34  ;;  %v5485_v34 = vsel %vm5344_vm4, %v1132_v28, 0  ;;  %v811_v39 = vrot.slane %v809_v30, 7  ;;  %v5028_v28 = vld [vmem:[#allocation5 + $0x168] sm:$0xff]  }
  0x6a   :  { %3215 = vmatprep.subr.bf16.mxu0 %v7115_v0  ;;  %4583 = vmatpush1.bf16.msra.mxu1 %v5164_v12  ;;  %v802_v12 = vshrl.u32 %v5433_v51, 16  ;;  %7198 = vst [vmem:[#allocation17_spill] sm:$0xff] %v5485_v34 }
  0x6b   :  { %2682 = vmatmul.mubr.bf16.gmra.mrb[12].mxu1 %v5361_v46  ;;  %4568 = vmatprep.subr.bf16.mxu1 %v7115_v0  ;;  %v814_v54 = vor.u32 %v812_v40, %v811_v39 }
  0x6c   :  { %2971 = vmatmul.mubr.bf16.gmra.mrb[12].mxu0 %v5421_v53  ;;  %2689 = vmatprep.mubr.bf16.mxu1 %v5311_v62  ;;  %v804_v11 = vrot.slane %v802_v12, 7  ;;  %v7293_v2 = vld [vmem:[#allocation12_spill] sm:$0xff] }
  0x6d   :  { %3216 = vmatpush1.bf16.msra.mxu0 %v5021_v43  ;;  %2978 = vmatprep.mubr.bf16.mxu0 %v5429_v50  ;;  %v551_v43 = vmax.f32 %v487_v33, 0.0  ;;  %v5531_v5 = vsel %vm5263_vm2, %v814_v54, 0 }
  0x6e   :  { %3217 = vmatprep.subr.bf16.mxu0 %v7115_v0  ;;  %4584 = vmatpush1.bf16.msra.mxu1 %v5169_v14  ;;  %v5460_v14 = vsel %vm5263_vm2, %v800_v56, 0  ;;  %v489_v56 = vmul.f32 %v5198_v24, %v418_v47  ;;  %7201 = vst [vmem:[#allocation20_spill] sm:$0xff] %v5531_v5 }
  0x6f   :  { %4569 = vmatprep.subr.bf16.mxu1 %v7115_v0  ;;  %7196 = vst [vmem:[#allocation15_spill] sm:$0xff] %v5460_v14 }
  0x70   :  { %v553_v6 = vmax.f32 %v489_v56, 0.0 }
  0x71   :  { %3218 = vmatpush1.bf16.msra.mxu0 %v5022_v44  ;;  %v615_v44 = vmin.f32 %v551_v43, 6.0  ;;  %v422_v43 = vsub.f32 %v351_v38, %v5191_v21 }
  0x72   :  { %3219 = vmatprep.subr.bf16.mxu0 %v7115_v0  ;;  %4585 = vmatpush1.bf16.msra.mxu1 %v5174_v16  ;;  %v807_v16 = vor.u32 %v805_v13, %v804_v11  ;;  %v420_v11 = vsub.f32 %v349_v61, %v5191_v21  ;;  %v617_v9 = vmin.f32 %v553_v6, 6.0 }
  0x73   :  { %2690 = vmatmul.mubr.bf16.gmra.mrb[16].mxu1 %v5395_v1  ;;  %4570 = vmatprep.subr.bf16.mxu1 %v7115_v0  ;;  %v4930_v37 = vround.rtne.f32 %v615_v44  ;;  %v493_v44 = vmul.f32 %v5198_v24, %v422_v43  ;;  %v356_v43 = vld [vmem:[%s7099_s0 + $0xd8] sm:$0xff] }
  0x74   :  { %2979 = vmatmul.mubr.bf16.gmra.mrb[16].mxu0 %v5452_v3  ;;  %2697 = vmatprep.mubr.bf16.mxu1 %v5363_v48  ;;  %v5496_v8 = vsel %vm5263_vm2, %v807_v16, 0  ;;  %v491_v16 = vmul.f32 %v5198_v24, %v420_v11 }
  0x75   :  { %3220 = vmatpush1.bf16.msra.mxu0 %v5023_v23  ;;  %2986 = vmatprep.mubr.bf16.mxu0 %v5460_v14  ;;  %7199 = vst [vmem:[#allocation18_spill] sm:$0xff] %v5496_v8  ;;  %v1135_v23 = vrot.slane %v805_v13, 1  ;;  %v4931_v13 = vround.rtne.f32 %v616_v55 }
  0x76   :  { %3221 = vmatprep.subr.bf16.mxu0 %v7115_v0  ;;  %4586 = vmatpush1.bf16.msra.mxu1 %v5179_v18  ;;  %v348_v18 = vld [vmem:[%s7099_s0 + $0x98] sm:$0xff]  ;;  %v555_v39 = vmax.f32 %v491_v16, 0.0 }
  0x77   :  { %4571 = vmatprep.subr.bf16.mxu1 %v7115_v0  ;;  %v419_v49 = vsub.f32 %v348_v18, %v5191_v21  ;;  %v5547_v33 = vpack.c.bf16 %v4931_v13, %v4930_v37  ;;  %v5029_v18 = vld [vmem:[#allocation5 + $0x170] sm:$0xff]  }
  0x78   :  { %v619_v61 = vmin.f32 %v555_v39, 6.0  ;;  %v355_v39 = vld [vmem:[%s7099_s0 + $0xd0] sm:$0xff] }
  0x79   :  { %3222 = vmatpush1.bf16.msra.mxu0 %v5024_v25  ;;  %v490_v57 = vmul.f32 %v5198_v24, %v419_v49  ;;  %7202 = vst [vmem:[#allocation21_spill] sm:$0xff] %v5547_v33  ;;  %v816_v47 = vshrl.u32 %v5547_v33, 16  ;;  %v4932_v49 = vround.rtne.f32 %v617_v9  ;;  %v819_v54 = vshll.u32 %v5547_v33, 16 }
  0x7a   :  { %3223 = vmatprep.subr.bf16.mxu0 %v7115_v0  ;;  %4587 = vmatpush1.bf16.msra.mxu1 %v5202_v26  ;;  %v1134_v26 = vor.u32 %v1133_v60, %v795_v63 }
  0x7b   :  { %2698 = vmatmul.mubr.bf16.gmra.mrb[20].mxu1 %v5429_v50  ;;  %4572 = vmatprep.subr.bf16.mxu1 %v7115_v0  ;;  %v554_v22 = vmax.f32 %v490_v57, 0.0  ;;  %v818_v56 = vrot.slane %v816_v47, 7 }
  0x7c   :  { %2987 = vmatmul.mubr.bf16.gmra.mrb[20].mxu0 %v5485_v34  ;;  %2705 = vmatprep.mubr.bf16.mxu1 %v5405_v29  ;;  %v5523_v63 = vsel %vm5344_vm4, %v1134_v26, 0 }
  0x7d   :  { %3224 = vmatpush1.bf16.msra.mxu0 %v5025_v35  ;;  %2994 = vmatprep.mubr.bf16.mxu0 %v5496_v8  ;;  %7200 = vst [vmem:[#allocation19_spill] sm:$0xff] %v5523_v63  ;;  %v618_v35 = vmin.f32 %v554_v22, 6.0  ;;  %v821_v6 = vor.u32 %v819_v54, %v818_v56  ;;  %v427_v56 = vsub.f32 %v356_v43, %v5191_v21 }
  0x7e   :  { %3225 = vmatprep.subr.bf16.mxu0 %v7115_v0  ;;  %4588 = vmatpush1.bf16.msra.mxu1 %v5215_v36  ;;  %v350_v36 = vld [vmem:[%s7099_s0 + $0xa8] sm:$0xff] }
  0x7f   :  { %4573 = vmatprep.subr.bf16.mxu1 %v7115_v0  ;;  %v421_v25 = vsub.f32 %v350_v36, %v5191_v21  ;;  %v557_v36 = vmax.f32 %v493_v44, 0.0 }
  0x81   :  { %3226 = vmatpush1.bf16.msra.mxu0 %v5026_v10  ;;  %v492_v60 = vmul.f32 %v5198_v24, %v421_v25  ;;  %v4933_v10 = vround.rtne.f32 %v618_v35  ;;  %v4934_v25 = vround.rtne.f32 %v619_v61  ;;  %v5602_v35 = vsel %vm5263_vm2, %v821_v6, 0  ;;  %v5034_v61 = vld [vmem:[#allocation5 + $0x198] sm:$0xff]   ;;  %v358_v6 = vld [vmem:[%s7099_s0 + $0xe8] sm:$0xff] }
  0x82   :  { %3227 = vmatprep.subr.bf16.mxu0 %v7115_v0  ;;  %4589 = vmatpush1.bf16.msra.mxu1 %v5242_v58  ;;  %v1136_v58 = vor.u32 %v1135_v23, %v802_v12  ;;  %v352_v12 = vld [vmem:[%s7099_s0 + $0xb8] sm:$0xff]  ;;  %v5031_v23 = vld [vmem:[#allocation5 + $0x180] sm:$0xff]  }
  0x83   :  { %2706 = vmatmul.mubr.bf16.gmra.mrb[24].mxu1 %v5460_v14  ;;  %4574 = vmatprep.subr.bf16.mxu1 %v7115_v0  ;;  %v423_v4 = vsub.f32 %v352_v12, %v5191_v21  ;;  %v556_v26 = vmax.f32 %v492_v60, 0.0  ;;  %v5578_v57 = vpack.c.bf16 %v4933_v10, %v4932_v49 }
  0x84   :  { %2995 = vmatmul.mubr.bf16.gmra.mrb[24].mxu0 %v5523_v63  ;;  %2713 = vmatprep.mubr.bf16.mxu1 %v5433_v51 }
  0x85   :  { %3228 = vmatpush1.bf16.msra.mxu0 %v5027_v32  ;;  %3002 = vmatprep.mubr.bf16.mxu0 %v5531_v5  ;;  %v494_v55 = vmul.f32 %v5198_v24, %v423_v4  ;;  %7204 = vst [vmem:[#allocation23_spill] sm:$0xff] %v5578_v57  ;;  %v620_v32 = vmin.f32 %v556_v26, 6.0  ;;  %v823_v22 = vshrl.u32 %v5578_v57, 16  ;;  %v826_v38 = vshll.u32 %v5578_v57, 16 }
  0x86   :  { %3229 = vmatprep.subr.bf16.mxu0 %v7115_v0  ;;  %4590 = vmatpush1.bf16.msra.mxu1 %v5249_v7  ;;  %v5558_v7 = vsel %vm5344_vm4, %v1136_v58, 0  ;;  %v621_v58 = vmin.f32 %v557_v36, 6.0 }
  0x87   :  { %4575 = vmatprep.subr.bf16.mxu1 %v7115_v0  ;;  %7203 = vst [vmem:[#allocation22_spill] sm:$0xff] %v5558_v7  ;;  %v558_v37 = vmax.f32 %v494_v55, 0.0  ;;  %v825_v60 = vrot.slane %v823_v22, 7  ;;  %v426_v55 = vsub.f32 %v355_v39, %v5191_v21  ;;  %v5036_v39 = vld [vmem:[#allocation5 + $0x1a8] sm:$0xff]  }
  0x88   :  { %v4936_v4 = vround.rtne.f32 %v621_v58 }
  0x89   :  { %3230 = vmatpush1.bf16.msra.mxu0 %v5028_v28  ;;  %v4935_v28 = vround.rtne.f32 %v620_v32  ;;  %v622_v16 = vmin.f32 %v558_v37, 6.0 }
  0x8a   :  { %3231 = vmatprep.subr.bf16.mxu0 %v7115_v0  ;;  %4591 = vmatpush1.bf16.msra.mxu1 %v5275_v31  ;;  %v5030_v31 = vld [vmem:[#allocation5 + $0x178] sm:$0xff]  }
  0x8b   :  { %2714 = vmatmul.mubr.bf16.gmra.mrb[28].mxu1 %v5496_v8  ;;  %4576 = vmatprep.subr.bf16.mxu1 %v7115_v0  ;;  %v5607_v12 = vpack.c.bf16 %v4935_v28, %v4934_v25  ;;  %v4937_v49 = vround.rtne.f32 %v622_v16  ;;  %v5035_v25 = vld [vmem:[#allocation5 + $0x1a0] sm:$0xff]  }
  0x8c   :  { %3003 = vmatmul.mubr.bf16.gmra.mrb[28].mxu0 %v5558_v7  ;;  %2721 = vmatprep.mubr.bf16.mxu1 %v5465_v19 }
  0x8d   :  { %3232 = vmatpush1.bf16.msra.mxu0 %v5029_v18  ;;  %3235 = vmatprep.mubr.bf16.mxu0 %v5357_v45  ;;  %v353_v45 = vld [vmem:[%s7099_s0 + $0xc0] sm:$0xff]  ;;  %7205 = vst [vmem:[#allocation24_spill] sm:$0xff] %v5607_v12  ;;  %v5033_v18 = vld [vmem:[#allocation5 + $0x190] sm:$0xff]   ;;  %v830_v44 = vshrl.u32 %v5607_v12, 16  ;;  %v833_v32 = vshll.u32 %v5607_v12, 16 }
  0x8e   :  { %3233 = vmatprep.subr.bf16.mxu0 %v7115_v0  ;;  %4592 = vmatpush1.bf16.msra.mxu1 %v5287_v41  ;;  %v354_v41 = vld [vmem:[%s7099_s0 + $0xc8] sm:$0xff]  ;;  %v424_v11 = vsub.f32 %v353_v45, %v5191_v21  ;;  %v5627_v45 = vpack.c.bf16 %v4937_v49, %v4936_v4 }
  0x8f   :  { %4577 = vmatprep.subr.bf16.mxu1 %v7115_v0  ;;  %v425_v13 = vsub.f32 %v354_v41, %v5191_v21  ;;  %v832_v37 = vrot.slane %v830_v44, 7  ;;  %v497_v21 = vmul.f32 %v5198_v24, %v426_v55 }
  0x90   :  { %v495_v9 = vmul.f32 %v5198_v24, %v424_v11  ;;  %7206 = vst [vmem:[#allocation25_spill] sm:$0xff] %v5627_v45  ;;  %v498_v11 = vmul.f32 %v5198_v24, %v427_v56  ;;  %v7113_v28 = vshrl.u32 %v5627_v45, 16  ;;  %v840_v4 = vshll.u32 %v5627_v45, 16 }
  0x91   :  { %3234 = vmatpush1.bf16.msra.mxu0 %v5030_v31  ;;  %v828_v31 = vor.u32 %v826_v38, %v825_v60 }
  0x92   :  { %3492 = vmatprep.subr.bf16.mxu0 %v7115_v0  ;;  %4593 = vmatpush1.bf16.msra.mxu1 %v5305_v52  ;;  %v5032_v52 = vld [vmem:[#allocation5 + $0x188] sm:$0xff]   ;;  %v559_v10 = vmax.f32 %v495_v9, 0.0  ;;  %v835_v9 = vor.u32 %v833_v32, %v832_v37  ;;  %v562_v60 = vmax.f32 %v498_v11, 0.0  ;;  %v839_v43 = vrot.slane %v7113_v28, 7 }
  0x93   :  { %2722 = vmatmul.mubr.bf16.gmra.mrb[32].mxu1 %v5531_v5  ;;  %v5631_v36 = vsel %vm5263_vm2, %v828_v31, 0 }
  0x94   :  { %3236 = vmatmul.mubr.bf16.vlgmr.msra.gmra.mrb[0].mxu0 %v5244_v59  ;;  %2729 = vmatprep.mubr.bf16.mxu1 %v5547_v33  ;;  %v496_v59 = vmul.f32 %v5198_v24, %v425_v13  ;;  %v623_v41 = vmin.f32 %v559_v10, 6.0  ;;  %v357_v13 = vld [vmem:[%s7099_s0 + $0xe0] sm:$0xff]  ;;  %v5672_v31 = vsel %vm5263_vm2, %v835_v9, 0  ;;  %v626_v56 = vmin.f32 %v562_v60, 6.0 }
  0x95   :  { %3493 = vmatpush1.bf16.msra.mxu0 %v5031_v23  ;;  %3243 = vmatprep.mubr.bf16.mxu0 %v5391_v15  ;;  %v5649_v24 = vld [vmem:[%s7101_s2] ss:$0 sm:$0xff] }
  0x96   :  { %3494 = vmatprep.subr.bf16.mxu0 %v7115_v0  ;;  %v560_v26 = vmax.f32 %v496_v59, 0.0  ;;  %v428_v16 = vsub.f32 %v357_v13, %v5649_v24  ;;  %v561_v59 = vmax.f32 %v497_v21, 0.0  ;;  %v5667_v10 = vld [vmem:[%s7102_s3] ss:$0 sm:$0xff]  ;;  %v4941_v11 = vround.rtne.f32 %v626_v56 }
  0x98   :  { %v624_v23 = vmin.f32 %v560_v26, 6.0  ;;  %v499_v26 = vmul.f32 %v5667_v10, %v428_v16  ;;  %v625_v55 = vmin.f32 %v561_v59, 6.0  ;;  %v361_v16 = vld [vmem:[%s7099_s0 + $0x100] sm:$0xff] }
  0x99   :  { %3495 = vmatpush1.bf16.msra.mxu0 %v5032_v52  ;;  %v4938_v52 = vround.rtne.f32 %v623_v41  ;;  %v5037_v41 = vld [vmem:[#allocation5 + $0x1b0] sm:$0xff]  }
  0x9a   :  { %3496 = vmatprep.subr.bf16.mxu0 %v7115_v0  ;;  %v4939_v58 = vround.rtne.f32 %v624_v23  ;;  %v842_v23 = vor.u32 %v840_v4, %v839_v43  ;;  %v4940_v21 = vround.rtne.f32 %v625_v55  ;;  %v563_v13 = vmax.f32 %v499_v26, 0.0  ;;  %v5039_v43 = vld [vmem:[#allocation5 + $0x1c0] sm:$0xff]  }
  0x9b   :  { %2730 = vmatmul.mubr.bf16.gmra.mrb[36].mxu1 %v5602_v35  ;;  %v432_v26 = vsub.f32 %v361_v16, %v5649_v24 }
  0x9c   :  { %3244 = vmatmul.mubr.bf16.gmra.mrb[4].mxu0 %v5270_v27  ;;  %2737 = vmatprep.mubr.bf16.mxu1 %v5578_v57  ;;  %v5662_v49 = vpack.c.bf16 %v4939_v58, %v4938_v52  ;;  %v5686_v52 = vsel %vm5263_vm2, %v842_v23, 0  ;;  %v5694_v59 = vpack.c.bf16 %v4941_v11, %v4940_v21  ;;  %v627_v60 = vmin.f32 %v563_v13, 6.0  ;;  %v5040_v21 = vld [vmem:[#allocation5 + $0x1c8] sm:$0xff]  }
  0x9d   :  { %3251 = vmatprep.mubr.bf16.mxu0 %v5421_v53  ;;  %3497 = vmatpush1.bf16.msra.mxu0 %v5033_v18  ;;  %v429_v18 = vsub.f32 %v358_v6, %v5649_v24  ;;  %v503_v11 = vmul.f32 %v5667_v10, %v432_v26 }
  0x9e   :  { %3498 = vmatprep.subr.bf16.mxu0 %v7115_v0  ;;  %7207 = vst [vmem:[#allocation26_spill] sm:$0xff] %v5662_v49  ;;  %v7109_v37 = vshrl.u32 %v5662_v49, 16  ;;  %v7110_v58 = vshll.u32 %v5662_v49, 16  ;;  %7208 = vst [vmem:[#allocation27_spill] sm:$0xff] %v5694_v59  ;;  %v7108_v16 = vshll.u32 %v5694_v59, 16 }
  0x9f   :  { %v567_v26 = vmax.f32 %v503_v11, 0.0 }
  0xa0   :  { %v846_v9 = vrot.slane %v7109_v37, 7 }
  0xa1   :  { %3499 = vmatpush1.bf16.msra.mxu0 %v5034_v61  ;;  %v500_v61 = vmul.f32 %v5667_v10, %v429_v18  ;;  %v631_v11 = vmin.f32 %v567_v26, 6.0 }
  0xa2   :  { %3500 = vmatprep.subr.bf16.mxu0 %v7115_v0  ;;  %v849_v56 = vor.u32 %v7110_v58, %v846_v9  ;;  %v5042_v58 = vld [vmem:[#allocation5 + $0x1d8] sm:$0xff]  }
  0xa3   :  { %2738 = vmatmul.mubr.bf16.gmra.mrb[40].mxu1 %v5631_v36  ;;  %v564_v6 = vmax.f32 %v500_v61, 0.0  ;;  %v7106_v61 = vshrl.u32 %v5694_v59, 16 }
  0xa4   :  { %3252 = vmatmul.mubr.bf16.gmra.mrb[8].mxu0 %v5289_v42  ;;  %2745 = vmatprep.mubr.bf16.mxu1 %v5607_v12 }
  0xa5   :  { %3259 = vmatprep.mubr.bf16.mxu0 %v5452_v3  ;;  %3501 = vmatpush1.bf16.msra.mxu0 %v5035_v25  ;;  %v5038_v25 = vld [vmem:[#allocation5 + $0x1b8] sm:$0xff]   ;;  %v628_v18 = vmin.f32 %v564_v6, 6.0  ;;  %v5714_v6 = vsel %vm5263_vm2, %v849_v56, 0 }
  0xa6   :  { %3502 = vmatprep.subr.bf16.mxu0 %v7115_v0 }
  0xa7   :  { %v4943_v23 = vround.rtne.f32 %v628_v18  ;;  %v364_v18 = vld [vmem:[%s7099_s0 + $0x118] sm:$0xff] }
  0xa9   :  { %3503 = vmatpush1.bf16.msra.mxu0 %v5036_v39  ;;  %v362_v39 = vld [vmem:[%s7099_s0 + $0x108] sm:$0xff] }
  0xaa   :  { %3504 = vmatprep.subr.bf16.mxu0 %v7115_v0  ;;  %v433_v55 = vsub.f32 %v362_v39, %v5649_v24  ;;  %v5041_v39 = vld [vmem:[#allocation5 + $0x1d0] sm:$0xff]  }
  0xab   :  { %2746 = vmatmul.mubr.bf16.gmra.mrb[44].mxu1 %v5672_v31 }
  0xac   :  { %3260 = vmatmul.mubr.bf16.gmra.mrb[12].mxu0 %v5311_v62  ;;  %2753 = vmatprep.mubr.bf16.mxu1 %v5627_v45  ;;  %v504_v13 = vmul.f32 %v5667_v10, %v433_v55 }
  0xad   :  { %3267 = vmatprep.mubr.bf16.mxu0 %v5485_v34  ;;  %3505 = vmatpush1.bf16.msra.mxu0 %v5037_v41  ;;  %v4942_v41 = vround.rtne.f32 %v627_v60  ;;  %v363_v60 = vld [vmem:[%s7099_s0 + $0x110] sm:$0xff] }
  0xae   :  { %3506 = vmatprep.subr.bf16.mxu0 %v7115_v0  ;;  %v568_v55 = vmax.f32 %v504_v13, 0.0  ;;  %v434_v56 = vsub.f32 %v363_v60, %v5649_v24 }
  0xaf   :  { %v5719_v9 = vpack.c.bf16 %v4943_v23, %v4942_v41  ;;  %v435_v41 = vsub.f32 %v364_v18, %v5649_v24 }
  0xb0   :  { %v632_v13 = vmin.f32 %v568_v55, 6.0  ;;  %v505_v60 = vmul.f32 %v5667_v10, %v434_v56  ;;  %v1139_v55 = vrot.slane %v819_v54, 1  ;;  %v4946_v56 = vround.rtne.f32 %v631_v11 }
  0xb1   :  { %3507 = vmatpush1.bf16.msra.mxu0 %v5038_v25  ;;  %v853_v25 = vrot.slane %v7106_v61, 7  ;;  %7209 = vst [vmem:[#allocation28_spill] sm:$0xff] %v5719_v9  ;;  %v506_v18 = vmul.f32 %v5667_v10, %v435_v41 }
  0xb2   :  { %3508 = vmatprep.subr.bf16.mxu0 %v7115_v0  ;;  %v4947_v41 = vround.rtne.f32 %v632_v13  ;;  %v1140_v54 = vor.u32 %v1139_v55, %v816_v47  ;;  %v368_v47 = vld [vmem:[%s7099_s0 + $0x138] sm:$0xff] }
  0xb3   :  { %2754 = vmatmul.mubr.bf16.gmra.mrb[48].mxu1 %v5686_v52  ;;  %v856_v23 = vor.u32 %v7108_v16, %v853_v25 }
  0xb4   :  { %3268 = vmatmul.mubr.bf16.gmra.mrb[16].mxu0 %v5363_v48  ;;  %2761 = vmatprep.mubr.bf16.mxu1 %v5662_v49  ;;  %v5773_v11 = vpack.c.bf16 %v4947_v41, %v4946_v56 }
  0xb5   :  { %3275 = vmatprep.mubr.bf16.mxu0 %v5523_v63  ;;  %3509 = vmatpush1.bf16.msra.mxu0 %v5039_v43  ;;  %v1137_v43 = vrot.slane %v812_v40, 1  ;;  %v5746_v61 = vsel %vm5263_vm2, %v856_v23, 0  ;;  %v569_v23 = vmax.f32 %v505_v60, 0.0 }
  0xb6   :  { %3510 = vmatprep.subr.bf16.mxu0 %v7115_v0 }
  0xb7   :  { %v1138_v40 = vor.u32 %v1137_v43, %v809_v30  ;;  %v365_v30 = vld [vmem:[%s7099_s0 + $0x120] sm:$0xff]  ;;  %v366_v43 = vld [vmem:[%s7099_s0 + $0x128] sm:$0xff]  ;;  %v633_v13 = vmin.f32 %v569_v23, 6.0 }
  0xb8   :  { %v436_v16 = vsub.f32 %v365_v30, %v5649_v24  ;;  %v367_v30 = vld [vmem:[%s7099_s0 + $0x130] sm:$0xff] }
  0xb9   :  { %3511 = vmatpush1.bf16.msra.mxu0 %v5040_v21  ;;  %v7107_v21 = vshrl.u32 %v5719_v9, 16  ;;  %v5759_v26 = vsel %vm5344_vm4, %v1138_v40, 0  ;;  %v437_v40 = vsub.f32 %v366_v43, %v5649_v24  ;;  %v438_v55 = vsub.f32 %v367_v30, %v5649_v24 }
  0xba   :  { %3512 = vmatprep.subr.bf16.mxu0 %v7115_v0  ;;  %7210 = vst [vmem:[#allocation29_spill] sm:$0xff] %v5759_v26  ;;  %v4948_v56 = vround.rtne.f32 %v633_v13 }
  0xbb   :  { %2762 = vmatmul.mubr.bf16.gmra.mrb[52].mxu1 %v5714_v6  ;;  %v860_v25 = vrot.slane %v7107_v21, 7  ;;  %v570_v21 = vmax.f32 %v506_v18, 0.0  ;;  %v507_v18 = vmul.f32 %v5667_v10, %v436_v16  ;;  %v508_v43 = vmul.f32 %v5667_v10, %v437_v40 }
  0xbc   :  { %3276 = vmatmul.mubr.bf16.gmra.mrb[20].mxu0 %v5405_v29  ;;  %2769 = vmatprep.mubr.bf16.mxu1 %v5694_v59  ;;  %v1141_v16 = vrot.slane %v826_v38, 1  ;;  %v439_v40 = vsub.f32 %v368_v47, %v5649_v24  ;;  %v369_v47 = vld [vmem:[%s7099_s0 + $0x140] sm:$0xff] }
  0xbd   :  { %3283 = vmatprep.mubr.bf16.mxu0 %v5558_v7  ;;  %3513 = vmatpush1.bf16.msra.mxu0 %v5041_v39  ;;  %v7111_v39 = vshll.u32 %v5719_v9, 16  ;;  %v634_v60 = vmin.f32 %v570_v21, 6.0  ;;  %v5789_v21 = vsel %vm5344_vm4, %v1140_v54, 0  ;;  %v571_v23 = vmax.f32 %v507_v18, 0.0 }
  0xbe   :  { %3514 = vmatprep.subr.bf16.mxu0 %v7115_v0  ;;  %7211 = vst [vmem:[#allocation30_spill] sm:$0xff] %v5789_v21  ;;  %v1142_v38 = vor.u32 %v1141_v16, %v823_v22  ;;  %v7114_v54 = vshll.u32 %v5773_v11, 16  ;;  %v509_v18 = vmul.f32 %v5667_v10, %v438_v55  ;;  %v370_v22 = vld [vmem:[%s7099_s0 + $0x148] sm:$0xff] }
  0xbf   :  { %v863_v37 = vor.u32 %v7111_v39, %v860_v25  ;;  %v4949_v41 = vround.rtne.f32 %v634_v60  ;;  %v635_v60 = vmin.f32 %v571_v23, 6.0  ;;  %v441_v28 = vsub.f32 %v370_v22, %v5649_v24  ;;  %v5044_v22 = vld [vmem:[#allocation5 + $0x1e0] sm:$0xff]  }
  0xc0   :  { %v5818_v16 = vsel %vm5344_vm4, %v1142_v38, 0  ;;  %v440_v38 = vsub.f32 %v369_v47, %v5649_v24  ;;  %v371_v47 = vld [vmem:[%s7099_s0 + $0x150] sm:$0xff] }
  0xc1   :  { %v5781_v25 = vsel %vm5263_vm2, %v863_v37, 0  ;;  %3515 = vmatpush1.bf16.msra.mxu0 %v5042_v58  ;;  %v7112_v37 = vshrl.u32 %v5773_v11, 16  ;;  %v572_v58 = vmax.f32 %v508_v43, 0.0  ;;  %v5806_v13 = vpack.c.bf16 %v4949_v41, %v4948_v56 }
  0xc2   :  { %3516 = vmatprep.subr.bf16.mxu0 %v7115_v0  ;;  %v510_v43 = vmul.f32 %v5667_v10, %v439_v40  ;;  %v1143_v56 = vrot.slane %v833_v32, 1  ;;  %v4950_v23 = vround.rtne.f32 %v635_v60  ;;  %v5830_v32 = vld [vmem:[#allocation5 + $0x200] sm:$0xff]  }
  0xc3   :  { %2770 = vmatmul.mubr.bf16.gmra.mrb[56].mxu1 %v5746_v61  ;;  %v867_v30 = vrot.slane %v7112_v37, 7  ;;  %7212 = vst [vmem:[#allocation31_spill] sm:$0xff] %v5806_v13  ;;  %v636_v39 = vmin.f32 %v572_v58, 6.0  ;;  %v7117_v41 = vshrl.u32 %v5806_v13, 16  ;;  %v573_v58 = vmax.f32 %v509_v18, 0.0  ;;  %4482 = vmatprep.subr.bf16.mxu1 %v5830_v32 }
  0xc4   :  { %3284 = vmatmul.mubr.bf16.gmra.mrb[24].mxu0 %v5433_v51  ;;  %2777 = vmatprep.mubr.bf16.mxu1 %v5719_v9  ;;  %v574_v37 = vmax.f32 %v510_v43, 0.0  ;;  %v7119_v18 = vshll.u32 %v5806_v13, 16 }
  0xc5   :  { %3291 = vmatprep.mubr.bf16.mxu0 %v5759_v26  ;;  %v870_v55 = vor.u32 %v7114_v54, %v867_v30  ;;  %v4951_v40 = vround.rtne.f32 %v636_v39  ;;  %v1144_v30 = vor.u32 %v1143_v56, %v830_v44  ;;  %v874_v39 = vrot.slane %v7117_v41, 7  ;;  %3517 = vmatpush1.bf16.msra.mxu0 %v5044_v22 }
  0xc6   :  { %v637_v43 = vmin.f32 %v573_v58, 6.0  ;;  %v638_v44 = vmin.f32 %v574_v37, 6.0  ;;  %v511_v56 = vmul.f32 %v5667_v10, %v440_v38  ;;  %v1145_v41 = vrot.slane %v840_v4, 1  ;;  %v359_v4 = vld [vmem:[%s7099_s0 + $0xf0] sm:$0xff] }
  0xc7   :  { %v5838_v60 = vsel %vm5263_vm2, %v870_v55, 0  ;;  %v5846_v54 = vpack.c.bf16 %v4951_v40, %v4950_v23  ;;  %v372_v55 = vld [vmem:[%s7099_s0 + $0x158] sm:$0xff]  ;;  %v5857_v58 = vsel %vm5344_vm4, %v1144_v30, 0  ;;  %v442_v23 = vsub.f32 %v371_v47, %v5649_v24 }
  0xc8   :  { %v7214_v40 = vmov 0   ;;  %v4952_v37 = vround.rtne.f32 %v637_v43  ;;  %v443_v38 = vsub.f32 %v372_v55, %v5649_v24  ;;  %v360_v30 = vld [vmem:[%s7099_s0 + $0xf8] sm:$0xff]  ;;  %v4953_v22 = vround.rtne.f32 %v638_v44 }
  0xc9   :  { %7213 = vst [vmem:[#allocation32_spill] sm:$0xff] %v5846_v54  ;;  %3518 = vmatprep.subr.bf16.mxu0 %v7214_v40  ;;  %v575_v7 = vmax.f32 %v511_v56, 0.0  ;;  %v7215_v43 = vshrl.u32 %v5627_v45, 16  ;;  %v430_v63 = vsub.f32 %v359_v4, %v5649_v24  ;;  %v431_v34 = vsub.f32 %v360_v30, %v5649_v24 }
  0xca   :  { %v514_v44 = vmul.f32 %v5667_v10, %v443_v38  ;;  %v7217_v38 = vshll.u32 %v5662_v49, 16 }
  0xcb   :  { %2778 = vmatmul.mubr.bf16.gmra.mrb[60].mxu1 %v5781_v25  ;;  %v1146_v55 = vor.u32 %v1145_v41, %v7215_v43  ;;  %v7216_v41 = vshrl.u32 %v5846_v54, 16  ;;  %v639_v4 = vmin.f32 %v575_v7, 6.0 }
  0xcc   :  { %3292 = vmatmul.mubr.bf16.gmra.mrb[28].mxu0 %v5465_v19  ;;  %2785 = vmatprep.mubr.bf16.mxu1 %v7115_v0  ;;  %v1147_v47 = vrot.slane %v7217_v38, 1  ;;  %v578_v7 = vmax.f32 %v514_v44, 0.0 }
  0xcd   :  { %3299 = vmatprep.mubr.bf16.mxu0 %v5789_v21  ;;  %v881_v56 = vrot.slane %v7216_v41, 7  ;;  %v5898_v30 = vsel %vm5344_vm4, %v1146_v55, 0  ;;  %v501_v41 = vmul.f32 %v5667_v10, %v430_v63  ;;  %v4954_v38 = vround.rtne.f32 %v639_v4 }
  0xce   :  { %v642_v5 = vmin.f32 %v578_v7, 6.0 }
  0xd3   :  { %2786 = vmatmul.mubr.bf16.gmra.mrb[64].mxu1 %v7115_v0  ;;  %v512_v0 = vmul.f32 %v5667_v10, %v441_v28  ;;  %v877_v28 = vor.u32 %v7119_v18, %v874_v39  ;;  %v513_v18 = vmul.f32 %v5667_v10, %v442_v23  ;;  %v5891_v23 = vpack.c.bf16 %v4953_v22, %v4952_v37 }
  0xd4   :  { %3300 = vmatmul.mubr.bf16.gmra.mrb[32].mxu0 %v5547_v33  ;;  %2793 = vmatprep.mubr.bf16.mxu1 %v5773_v11  ;;  %v502_v37 = vmul.f32 %v5667_v10, %v431_v34  ;;  %v7219_v34 = vshrl.u32 %v5662_v49, 16  ;;  %v565_v33 = vmax.f32 %v501_v41, 0.0  ;;  %v7221_v41 = vshll.u32 %v5694_v59, 16 }
  0xd5   :  { %3307 = vmatprep.mubr.bf16.mxu0 %v5818_v16  ;;  %v576_v39 = vmax.f32 %v512_v0, 0.0  ;;  %v5882_v3 = vsel %vm5263_vm2, %v877_v28, 0  ;;  %v373_v0 = vld [vmem:[%s7099_s0 + $0x160] sm:$0xff]  ;;  %v374_v28 = vld [vmem:[%s7099_s0 + $0x168] sm:$0xff]  ;;  %v577_v53 = vmax.f32 %v513_v18, 0.0  ;;  %v7130_v18 = vshrl.u32 %v5891_v23, 16 }
  0xd6   :  { %v444_v15 = vsub.f32 %v373_v0, %v5649_v24  ;;  %v445_v22 = vsub.f32 %v374_v28, %v5649_v24  ;;  %v1148_v63 = vor.u32 %v1147_v47, %v7219_v34  ;;  %v7132_v47 = vshll.u32 %v5891_v23, 16 }
  0xd7   :  { %v640_v43 = vmin.f32 %v576_v39, 6.0  ;;  %v7218_v39 = vshll.u32 %v5846_v54, 16  ;;  %v641_v44 = vmin.f32 %v577_v53, 6.0  ;;  %v888_v4 = vrot.slane %v7130_v18, 7 }
  0xd8   :  { %v515_v28 = vmul.f32 %v5667_v10, %v444_v15  ;;  %v516_v19 = vmul.f32 %v5667_v10, %v445_v22  ;;  %v375_v15 = vld [vmem:[%s7099_s0 + $0x170] sm:$0xff] }
  0xd9   :  { %v884_v55 = vor.u32 %v7218_v39, %v881_v56  ;;  %v4955_v0 = vround.rtne.f32 %v640_v43  ;;  %v5935_v43 = vsel %vm5344_vm4, %v1148_v63, 0  ;;  %v4956_v7 = vround.rtne.f32 %v641_v44 }
  0xda   :  { %v579_v22 = vmax.f32 %v515_v28, 0.0  ;;  %v629_v39 = vmin.f32 %v565_v33, 6.0  ;;  %v446_v34 = vsub.f32 %v375_v15, %v5649_v24  ;;  %v891_v63 = vor.u32 %v7132_v47, %v888_v4 }
  0xdb   :  { %2794 = vmatmul.mubr.bf16.gmra.mrb[68].mxu1 %v5838_v60  ;;  %v5920_v56 = vsel %vm5263_vm2, %v884_v55, 0  ;;  %v5925_v53 = vpack.c.bf16 %v4955_v0, %v4954_v38  ;;  %v4957_v38 = vround.rtne.f32 %v642_v5  ;;  %v580_v0 = vmax.f32 %v516_v19, 0.0 }
  0xdc   :  { %3308 = vmatmul.mubr.bf16.gmra.mrb[36].mxu0 %v5578_v57  ;;  %2801 = vmatprep.mubr.bf16.mxu1 %v5806_v13  ;;  %v5045_v57 = vld [vmem:[#allocation5 + $0x1e8] sm:$0xff]   ;;  %v7222_v33 = vshrl.u32 %v5694_v59, 16  ;;  %v643_v5 = vmin.f32 %v579_v22, 6.0  ;;  %v4944_v19 = vround.rtne.f32 %v629_v39  ;;  %v5956_v4 = vsel %vm5263_vm2, %v891_v63, 0 }
  0xdd   :  { %3315 = vmatprep.mubr.bf16.mxu0 %v5857_v58  ;;  %3519 = vmatpush1.bf16.msra.mxu0 %v5045_v57  ;;  %7220 = vst [vmem:[#allocation33_spill] sm:$0xff] %v5925_v53  ;;  %v376_v57 = vld [vmem:[%s7099_s0 + $0x178] sm:$0xff]  ;;  %v7134_v44 = vshrl.u32 %v5925_v53, 16  ;;  %v5950_v15 = vpack.c.bf16 %v4957_v38, %v4956_v7  ;;  %v7137_v8 = vshll.u32 %v5925_v53, 16  ;;  %v378_v7 = vld [vmem:[%s7099_s0 + $0x188] sm:$0xff]  ;;  %v7224_v22 = vshll.u32 %v5719_v9, 16 }
  0xde   :  { %3520 = vmatprep.subr.bf16.mxu0 %v7214_v40  ;;  %v447_v18 = vsub.f32 %v376_v57, %v5649_v24  ;;  %v644_v57 = vmin.f32 %v580_v0, 6.0 }
  0xdf   :  { %7223 = vst [vmem:[#allocation34_spill] sm:$0xff] %v5950_v15  ;;  %v895_v47 = vrot.slane %v7134_v44, 7  ;;  %v1151_v39 = vrot.slane %v7224_v22, 1  ;;  %v7136_v0 = vshrl.u32 %v5950_v15, 16 }
  0xe3   :  { %2802 = vmatmul.mubr.bf16.gmra.mrb[72].mxu1 %v5882_v3 }
  0xe4   :  { %3316 = vmatmul.mubr.bf16.gmra.mrb[40].mxu0 %v5607_v12  ;;  %2809 = vmatprep.mubr.bf16.mxu1 %v5846_v54  ;;  %v566_v12 = vmax.f32 %v502_v37, 0.0  ;;  %v1149_v37 = vrot.slane %v7221_v41, 1  ;;  %v517_v41 = vmul.f32 %v5667_v10, %v446_v34  ;;  %v4959_v34 = vround.rtne.f32 %v644_v57 }
  0xe5   :  { %3323 = vmatprep.mubr.bf16.mxu0 %v5898_v30  ;;  %v7142_v57 = vshll.u32 %v5950_v15, 16 }
  0xe6   :  { %v630_v55 = vmin.f32 %v566_v12, 6.0  ;;  %v1150_v12 = vor.u32 %v1149_v37, %v7222_v33  ;;  %v377_v37 = vld [vmem:[%s7099_s0 + $0x180] sm:$0xff]  ;;  %v581_v63 = vmax.f32 %v517_v41, 0.0  ;;  %v902_v41 = vrot.slane %v7136_v0, 7 }
  0xe7   :  { %v448_v44 = vsub.f32 %v377_v37, %v5649_v24 }
  0xe8   :  { %v4945_v28 = vround.rtne.f32 %v630_v55  ;;  %v4958_v55 = vround.rtne.f32 %v643_v5  ;;  %v449_v5 = vsub.f32 %v378_v7, %v5649_v24 }
  0xea   :  { %v5973_v38 = vpack.c.bf16 %v4945_v28, %v4944_v19  ;;  %v5047_v19 = vld [vmem:[#allocation5 + $0x1f0] sm:$0xff]   ;;  %v7225_v28 = vshrl.u32 %v5719_v9, 16 }
  0xeb   :  { %2810 = vmatmul.mubr.bf16.gmra.mrb[76].mxu1 %v5920_v56  ;;  %3521 = vmatpush1.bf16.msra.mxu0 %v5047_v19  ;;  %v379_v19 = vld [vmem:[%s7099_s0 + $0x190] sm:$0xff] }
  0xec   :  { %3324 = vmatmul.mubr.bf16.gmra.mrb[44].mxu0 %v5627_v45  ;;  %2817 = vmatprep.mubr.bf16.mxu1 %v5891_v23  ;;  %v518_v45 = vmul.f32 %v5667_v10, %v447_v18  ;;  %v5969_v18 = vsel %vm5344_vm4, %v1150_v12, 0  ;;  %v898_v12 = vor.u32 %v7137_v8, %v895_v47  ;;  %v1152_v22 = vor.u32 %v1151_v39, %v7225_v28 }
  0xed   :  { %3331 = vmatprep.mubr.bf16.mxu0 %v5935_v43  ;;  %v645_v47 = vmin.f32 %v581_v63, 6.0  ;;  %3522 = vmatprep.subr.bf16.mxu0 %v7214_v40  ;;  %v519_v39 = vmul.f32 %v5667_v10, %v448_v44  ;;  %v520_v28 = vmul.f32 %v5667_v10, %v449_v5  ;;  %v905_v44 = vor.u32 %v7142_v57, %v902_v41 }
  0xee   :  { %v582_v33 = vmax.f32 %v518_v45, 0.0  ;;  %v7139_v45 = vshll.u32 %v5973_v38, 16  ;;  %v5995_v7 = vsel %vm5263_vm2, %v898_v12, 0  ;;  %v450_v63 = vsub.f32 %v379_v19, %v5649_v24  ;;  %v382_v19 = vld [vmem:[%s7099_s0 + $0x1a8] sm:$0xff] }
  0xef   :  { %7227 = vst [vmem:[#allocation36_spill] sm:$0xff] %v5995_v7  ;;  %v4960_v5 = vround.rtne.f32 %v645_v47  ;;  %v584_v8 = vmax.f32 %v520_v28, 0.0  ;;  %v6025_v41 = vsel %vm5263_vm2, %v905_v44, 0  ;;  %v381_v28 = vld [vmem:[%s7099_s0 + $0x1a0] sm:$0xff] }
  0xf0   :  { %v646_v37 = vmin.f32 %v582_v33, 6.0  ;;  %v1449_v33 = vrot.slane %v7139_v45, 1  ;;  %v7228_v45 = vshrl.u32 %v5973_v38, 16  ;;  %7229 = vst [vmem:[#allocation37_spill] sm:$0xff] %v6025_v41  ;;  %v452_v57 = vsub.f32 %v381_v28, %v5649_v24 }
  0xf1   :  { %v7234_v28 = vshrl.u32 %v5773_v11, 16 }
  0xf2   :  { %v4961_v0 = vround.rtne.f32 %v646_v37  ;;  %v1450_v14 = vor.u32 %v1449_v33, %v7228_v45  ;;  %v521_v33 = vmul.f32 %v5667_v10, %v450_v63  ;;  %v453_v37 = vsub.f32 %v382_v19, %v5649_v24 }
  0xf3   :  { %2818 = vmatmul.mubr.bf16.gmra.mrb[80].mxu1 %v5956_v4 }
  0xf4   :  { %3332 = vmatmul.mubr.bf16.gmra.mrb[48].mxu0 %v5662_v49  ;;  %2825 = vmatprep.mubr.bf16.mxu1 %v5925_v53  ;;  %v5990_v49 = vpack.c.bf16 %v4959_v34, %v4958_v55  ;;  %v380_v55 = vld [vmem:[%s7099_s0 + $0x198] sm:$0xff]  ;;  %v6007_v34 = vsel %vm5344_vm4, %v1152_v22, 0  ;;  %v583_v22 = vmax.f32 %v519_v39, 0.0  ;;  %v6030_v39 = vpack.c.bf16 %v4961_v0, %v4960_v5 }
  0xf5   :  { %3339 = vmatprep.mubr.bf16.mxu0 %v5969_v18  ;;  %v451_v51 = vsub.f32 %v380_v55, %v5649_v24  ;;  %v648_v55 = vmin.f32 %v584_v8, 6.0  ;;  %v7232_v0 = vshll.u32 %v5773_v11, 16 }
  0xf6   :  { %7226 = vst [vmem:[#allocation35_spill] sm:$0xff] %v5990_v49  ;;  %v7141_v12 = vshrl.u32 %v5990_v49, 16  ;;  %7230 = vst [vmem:[#allocation38_spill] sm:$0xff] %v6030_v39  ;;  %v647_v45 = vmin.f32 %v583_v22, 6.0  ;;  %v7233_v22 = vshll.u32 %v5990_v49, 16  ;;  %v7148_v63 = vshrl.u32 %v6030_v39, 16 }
  0xf7   :  { %v522_v44 = vmul.f32 %v5667_v10, %v451_v51  ;;  %v1153_v5 = vrot.slane %v7232_v0, 1  ;;  %v5049_v0 = vld [vmem:[#allocation5 + $0x1f8] sm:$0xff]  }
  0xf8   :  { %v909_v47 = vrot.slane %v7141_v12, 7  ;;  %v6042_v12 = vsel %vm5344_vm4, %v1450_v14, 0  ;;  %v4962_v51 = vround.rtne.f32 %v647_v45  ;;  %v4963_v14 = vround.rtne.f32 %v648_v55  ;;  %3523 = vmatpush1.bf16.msra.mxu0 %v5049_v0 }
  0xf9   :  { %7231 = vst [vmem:[#allocation39_spill] sm:$0xff] %v6042_v12  ;;  %v586_v29 = vmax.f32 %v522_v44, 0.0  ;;  %v1154_v19 = vor.u32 %v1153_v5, %v7234_v28  ;;  %v7155_v45 = vshll.u32 %v6030_v39, 16  ;;  %v916_v55 = vrot.slane %v7148_v63, 7 }
  0xfa   :  { %v912_v8 = vor.u32 %v7233_v22, %v909_v47  ;;  %v524_v47 = vmul.f32 %v5667_v10, %v453_v37  ;;  %v384_v37 = vld [vmem:[%s7099_s0 + $0x1b8] sm:$0xff] }
  0xfb   :  { %2826 = vmatmul.mubr.bf16.gmra.mrb[84].mxu1 %v5995_v7  ;;  %v6076_v5 = vsel %vm5344_vm4, %v1154_v19, 0 }
  0xfc   :  { %3340 = vmatmul.mubr.bf16.gmra.mrb[52].mxu0 %v5694_v59  ;;  %2833 = vmatprep.mubr.bf16.mxu1 %v5950_v15  ;;  %v585_v59 = vmax.f32 %v521_v33, 0.0  ;;  %v6061_v22 = vsel %vm5263_vm2, %v912_v8, 0  ;;  %v6066_v33 = vpack.c.bf16 %v4963_v14, %v4962_v51  ;;  %v7237_v8 = vshll.u32 %v5806_v13, 16 }
  0xfd   :  { %3347 = vmatprep.mubr.bf16.mxu0 %v6007_v34  ;;  %7235 = vst [vmem:[#allocation40_spill] sm:$0xff] %v6061_v22  ;;  %v588_v51 = vmax.f32 %v524_v47, 0.0  ;;  %v919_v14 = vor.u32 %v7155_v45, %v916_v55 }
  0xfe   :  { %7236 = vst [vmem:[#allocation41_spill] sm:$0xff] %v6066_v33  ;;  %v649_v44 = vmin.f32 %v585_v59, 6.0  ;;  %v1155_v0 = vrot.slane %v7237_v8, 1  ;;  %v455_v59 = vsub.f32 %v384_v37, %v5649_v24  ;;  %v7154_v19 = vshrl.u32 %v6066_v33, 16 }
  0xff   :  { %v6095_v7 = vsel %vm5263_vm2, %v919_v14, 0 }
 0x100   :  { %v4964_v63 = vround.rtne.f32 %v649_v44  ;;  %7239 = vst [vmem:[#allocation42_spill] sm:$0xff] %v6095_v7  ;;  %v923_v55 = vrot.slane %v7154_v19, 7 }
 0x103   :  { %2834 = vmatmul.mubr.bf16.gmra.mrb[88].mxu1 %v6025_v41  ;;  %v523_v41 = vmul.f32 %v5667_v10, %v452_v57  ;;  %v383_v57 = vld [vmem:[%s7099_s0 + $0x1b0] sm:$0xff] }
 0x104   :  { %3348 = vmatmul.mubr.bf16.gmra.mrb[56].mxu0 %v5719_v9  ;;  %2841 = vmatprep.mubr.bf16.mxu1 %v5990_v49 }
 0x105   :  { %3355 = vmatprep.mubr.bf16.mxu0 %v6042_v12  ;;  %v650_v12 = vmin.f32 %v586_v29, 6.0  ;;  %v587_v28 = vmax.f32 %v523_v41, 0.0  ;;  %v454_v29 = vsub.f32 %v383_v57, %v5649_v24  ;;  %v7238_v41 = vshrl.u32 %v5806_v13, 16 }
 0x106   :  { %v652_v57 = vmin.f32 %v588_v51, 6.0 }
 0x107   :  { %v4965_v9 = vround.rtne.f32 %v650_v12  ;;  %v1156_v47 = vor.u32 %v1155_v0, %v7238_v41  ;;  %v651_v8 = vmin.f32 %v587_v28, 6.0  ;;  %v525_v37 = vmul.f32 %v5667_v10, %v454_v29  ;;  %v385_v0 = vld [vmem:[%s7099_s0 + $0x1c0] sm:$0xff]  ;;  %v386_v28 = vld [vmem:[%s7099_s0 + $0x1c8] sm:$0xff] }
 0x108   :  { %v7157_v12 = vshll.u32 %v6066_v33, 16  ;;  %v7241_v29 = vshll.u32 %v5846_v54, 16  ;;  %v4967_v41 = vround.rtne.f32 %v652_v57  ;;  %v456_v19 = vsub.f32 %v385_v0, %v5649_v24 }
 0x109   :  { %v6100_v44 = vpack.c.bf16 %v4965_v9, %v4964_v63  ;;  %v6110_v51 = vsel %vm5344_vm4, %v1156_v47, 0  ;;  %v4966_v14 = vround.rtne.f32 %v651_v8  ;;  %v589_v9 = vmax.f32 %v525_v37, 0.0 }
 0x10a   :  { %v457_v45 = vsub.f32 %v386_v28, %v5649_v24  ;;  %v926_v47 = vor.u32 %v7157_v12, %v923_v55  ;;  %v7242_v8 = vshrl.u32 %v5846_v54, 16  ;;  %v527_v28 = vmul.f32 %v5667_v10, %v456_v19 }
 0x10b   :  { %2842 = vmatmul.mubr.bf16.gmra.mrb[92].mxu1 %v6061_v22  ;;  %v526_v22 = vmul.f32 %v5667_v10, %v455_v59  ;;  %7240 = vst [vmem:[#allocation43_spill] sm:$0xff] %v6100_v44  ;;  %v1157_v59 = vrot.slane %v7241_v29, 1  ;;  %v7158_v50 = vshrl.u32 %v6100_v44, 16  ;;  %v6125_v37 = vpack.c.bf16 %v4967_v41, %v4966_v14  ;;  %v388_v14 = vld [vmem:[%s7099_s0 + $0x1d8] sm:$0xff] }
 0x10c   :  { %3356 = vmatmul.mubr.bf16.gmra.mrb[60].mxu0 %v5973_v38  ;;  %2849 = vmatprep.mubr.bf16.mxu1 %v6030_v39  ;;  %v6131_v29 = vsel %vm5263_vm2, %v926_v47, 0  ;;  %v7165_v12 = vshll.u32 %v6100_v44, 16  ;;  %v7246_v19 = vshll.u32 %v5891_v23, 16  ;;  %v459_v48 = vsub.f32 %v388_v14, %v5649_v24 }
 0x10d   :  { %3363 = vmatprep.mubr.bf16.mxu0 %v6076_v5  ;;  %v590_v63 = vmax.f32 %v526_v22, 0.0  ;;  %v1158_v57 = vor.u32 %v1157_v59, %v7242_v8  ;;  %7243 = vst [vmem:[#allocation44_spill] sm:$0xff] %v6125_v37  ;;  %v653_v22 = vmin.f32 %v589_v9, 6.0  ;;  %7244 = vst [vmem:[#allocation45_spill] sm:$0xff] %v6131_v29  ;;  %v930_v55 = vrot.slane %v7158_v50, 7  ;;  %v387_v59 = vld [vmem:[%s7099_s0 + $0x1d0] sm:$0xff] }
 0x10e   :  { %v1159_v41 = vrot.slane %v7246_v19, 1  ;;  %v591_v8 = vmax.f32 %v527_v28, 0.0  ;;  %v7247_v19 = vshrl.u32 %v5891_v23, 16  ;;  %v530_v14 = vmul.f32 %v5667_v10, %v459_v48 }
 0x10f   :  { %v654_v0 = vmin.f32 %v590_v63, 6.0  ;;  %v4968_v63 = vround.rtne.f32 %v653_v22  ;;  %v7168_v22 = vshll.u32 %v6125_v37, 16 }
 0x110   :  { %v1160_v9 = vor.u32 %v1159_v41, %v7247_v19  ;;  %v389_v41 = vld [vmem:[%s7099_s0 + $0x1e0] sm:$0xff]  ;;  %v390_v19 = vld [vmem:[%s7099_s0 + $0x1e8] sm:$0xff] }
 0x111   :  { %v4969_v47 = vround.rtne.f32 %v654_v0  ;;  %v7248_v0 = vshrl.u32 %v6125_v37, 16 }
 0x113   :  { %2850 = vmatmul.mubr.bf16.gmra.mrb[96].mxu1 %v6095_v7  ;;  %v933_v7 = vor.u32 %v7165_v12, %v930_v55  ;;  %v937_v28 = vrot.slane %v7248_v0, 7  ;;  %v594_v12 = vmax.f32 %v530_v14, 0.0 }
 0x114   :  { %3364 = vmatmul.mubr.bf16.gmra.mrb[64].mxu0 %v5773_v11  ;;  %2857 = vmatprep.mubr.bf16.mxu1 %v6066_v33  ;;  %v528_v11 = vmul.f32 %v5667_v10, %v457_v45  ;;  %v6144_v45 = vsel %vm5344_vm4, %v1158_v57, 0  ;;  %v458_v57 = vsub.f32 %v387_v59, %v5649_v24 }
 0x115   :  { %3371 = vmatprep.mubr.bf16.mxu0 %v6110_v51  ;;  %7245 = vst [vmem:[#allocation46_spill] sm:$0xff] %v6144_v45  ;;  %v6166_v55 = vsel %vm5263_vm2, %v933_v7, 0  ;;  %v940_v48 = vor.u32 %v7168_v22, %v937_v28  ;;  %v7251_v28 = vshrl.u32 %v5925_v53, 16 }
 0x116   :  { %v592_v50 = vmax.f32 %v528_v11, 0.0  ;;  %v6162_v11 = vpack.c.bf16 %v4969_v47, %v4968_v63  ;;  %v529_v59 = vmul.f32 %v5667_v10, %v458_v57  ;;  %v6178_v63 = vsel %vm5344_vm4, %v1160_v9, 0 }
 0x117   :  { %v460_v9 = vsub.f32 %v389_v41, %v5649_v24 }
 0x118   :  { %v593_v0 = vmax.f32 %v529_v59, 0.0  ;;  %v7170_v14 = vshll.u32 %v6162_v11, 16 }
 0x11b   :  { %2858 = vmatmul.mubr.bf16.gmra.mrb[100].mxu1 %v6131_v29  ;;  %v656_v29 = vmin.f32 %v592_v50, 6.0  ;;  %v7249_v50 = vshll.u32 %v5925_v53, 16 }
 0x11c   :  { %3372 = vmatmul.mubr.bf16.gmra.mrb[68].mxu0 %v5806_v13  ;;  %2865 = vmatprep.mubr.bf16.mxu1 %v6100_v44  ;;  %v655_v13 = vmin.f32 %v591_v8, 6.0 }
 0x11d   :  { %3379 = vmatprep.mubr.bf16.mxu0 %v6144_v45  ;;  %v1161_v7 = vrot.slane %v7249_v50, 1  ;;  %v4971_v57 = vround.rtne.f32 %v656_v29  ;;  %v461_v45 = vsub.f32 %v390_v19, %v5649_v24  ;;  %v7252_v29 = vshrl.u32 %v6162_v11, 16 }
 0x11e   :  { %v4970_v8 = vround.rtne.f32 %v655_v13  ;;  %v6197_v13 = vsel %vm5263_vm2, %v940_v48, 0  ;;  %v657_v19 = vmin.f32 %v593_v0, 6.0 }
 0x11f   :  { %v1162_v22 = vor.u32 %v1161_v7, %v7251_v28  ;;  %v944_v59 = vrot.slane %v7252_v29, 7  ;;  %v532_v7 = vmul.f32 %v5667_v10, %v461_v45  ;;  %v7254_v28 = vshll.u32 %v5950_v15, 16 }
 0x120   :  { %v6202_v41 = vpack.c.bf16 %v4971_v57, %v4970_v8 }
 0x121   :  { %v6210_v48 = vsel %vm5344_vm4, %v1162_v22, 0  ;;  %v1163_v29 = vrot.slane %v7254_v28, 1  ;;  %v947_v8 = vor.u32 %v7170_v14, %v944_v59  ;;  %v596_v0 = vmax.f32 %v532_v7, 0.0 }
 0x122   :  { %v7171_v14 = vshll.u32 %v6202_v41, 16 }
 0x123   :  { %2866 = vmatmul.mubr.bf16.gmra.mrb[104].mxu1 %v6166_v55  ;;  %v6227_v59 = vsel %vm5263_vm2, %v947_v8, 0 }
 0x124   :  { %3380 = vmatmul.mubr.bf16.gmra.mrb[72].mxu0 %v5846_v54  ;;  %2873 = vmatprep.mubr.bf16.mxu1 %v6125_v37  ;;  %v658_v54 = vmin.f32 %v594_v12, 6.0 }
 0x125   :  { %3387 = vmatprep.mubr.bf16.mxu0 %v6178_v63 }
 0x126   :  { %v6191_v50 = vpop.f32.mrb[0].mxu1  ;;  %v4973_v12 = vround.rtne.f32 %v658_v54  ;;  %v7258_v54 = vshrl.u32 %v6202_v41, 16 }
 0x127   :  { %7250 = vst [vmem:[#allocation47_spill] sm:$0xff] %v6191_v50  ;;  %v2661_v47 = vpop.f32.mrb[1].mxu1  ;;  %v531_v50 = vmul.f32 %v5667_v10, %v460_v9  ;;  %v4972_v10 = vround.rtne.f32 %v657_v19  ;;  %v7256_v9 = vshrl.u32 %v5950_v15, 16 }
 0x128   :  { %v6204_v24 = vpop.f32.mrb[2].mxu1 }
 0x129   :  { %7253 = vst [vmem:[#allocation48_spill] sm:$0xff] %v6204_v24  ;;  %v2664_v47 = vpop.f32.mrb[3].mxu1  ;;  %v595_v45 = vmax.f32 %v531_v50, 0.0  ;;  %v951_v50 = vrot.slane %v7258_v54, 7  ;;  %v6234_v19 = vpack.c.bf16 %v4973_v12, %v4972_v10  ;;  %v660_v24 = vmin.f32 %v596_v0, 6.0 }
 0x12a   :  { %v1164_v47 = vor.u32 %v1163_v29, %v7256_v9  ;;  %v7259_v9 = vshll.u32 %v5990_v49, 16 }
 0x12b   :  { %2874 = vmatmul.mubr.bf16.gmra.mrb[108].mxu1 %v6197_v13  ;;  %v659_v7 = vmin.f32 %v595_v45, 6.0  ;;  %v954_v10 = vor.u32 %v7171_v14, %v951_v50  ;;  %v7172_v12 = vshrl.u32 %v6234_v19, 16  ;;  %v4975_v0 = vround.rtne.f32 %v660_v24 }
 0x12c   :  { %3388 = vmatmul.mubr.bf16.gmra.mrb[76].mxu0 %v5891_v23  ;;  %2881 = vmatprep.mubr.bf16.mxu1 %v6162_v11  ;;  %v6238_v29 = vsel %vm5344_vm4, %v1164_v47, 0  ;;  %v1165_v8 = vrot.slane %v7259_v9, 1  ;;  %v7261_v47 = vshrl.u32 %v5990_v49, 16 }
 0x12d   :  { %3395 = vmatprep.mubr.bf16.mxu0 %v6210_v48  ;;  %v4974_v45 = vround.rtne.f32 %v659_v7  ;;  %v958_v50 = vrot.slane %v7172_v12, 7  ;;  %v7173_v7 = vshll.u32 %v6234_v19, 16 }
 0x12e   :  { %v6221_v22 = vpop.f32.mrb[4].mxu1 }
 0x12f   :  { %7255 = vst [vmem:[#allocation49_spill] sm:$0xff] %v6221_v22  ;;  %v2669_v28 = vpop.f32.mrb[5].mxu1  ;;  %v6262_v24 = vpack.c.bf16 %v4975_v0, %v4974_v45  ;;  %v7265_v0 = vshrl.u32 %v6030_v39, 16 }
 0x130   :  { %v6230_v57 = vpop.f32.mrb[6].mxu1  ;;  %v1166_v28 = vor.u32 %v1165_v8, %v7261_v47  ;;  %v7263_v8 = vshll.u32 %v6030_v39, 16 }
 0x131   :  { %7257 = vst [vmem:[#allocation50_spill] sm:$0xff] %v6230_v57  ;;  %v2672_v22 = vpop.f32.mrb[7].mxu1  ;;  %v6257_v57 = vsel %vm5263_vm2, %v954_v10, 0  ;;  %v961_v10 = vor.u32 %v7173_v7, %v958_v50  ;;  %v7175_v45 = vshrl.u32 %v6262_v24, 16  ;;  %v7177_v50 = vshll.u32 %v6262_v24, 16 }
 0x132   :  { %v1167_v47 = vrot.slane %v7263_v8, 1 }
 0x133   :  { %2882 = vmatmul.mubr.bf16.gmra.mrb[112].mxu1 %v6227_v59  ;;  %v6285_v12 = vsel %vm5263_vm2, %v961_v10, 0 }
 0x134   :  { %3396 = vmatmul.mubr.bf16.gmra.mrb[80].mxu0 %v5925_v53  ;;  %2889 = vmatprep.mubr.bf16.mxu1 %v6202_v41  ;;  %v5050_v53 = vld [vmem:[#allocation5 + $0x218] sm:$0xff]  }
 0x135   :  { %3403 = vmatprep.mubr.bf16.mxu0 %v6238_v29 }
 0x136   :  { %v6249_v22 = vpop.f32.mrb[8].mxu1 }
 0x137   :  { %7260 = vst [vmem:[#allocation51_spill] sm:$0xff] %v6249_v22  ;;  %v2677_v54 = vpop.f32.mrb[9].mxu1  ;;  %v6266_v22 = vsel %vm5344_vm4, %v1166_v28, 0  ;;  %v1168_v28 = vor.u32 %v1167_v47, %v7265_v0 }
 0x138   :  { %v6253_v9 = vpop.f32.mrb[10].mxu1 }
 0x139   :  { %7262 = vst [vmem:[#allocation52_spill] sm:$0xff] %v6253_v9  ;;  %v2680_v14 = vpop.f32.mrb[11].mxu1  ;;  %v965_v9 = vrot.slane %v7175_v45, 7 }
 0x13b   :  { %2890 = vmatmul.mubr.bf16.gmra.mrb[116].mxu1 %v6257_v57  ;;  %v968_v10 = vor.u32 %v7177_v50, %v965_v9  ;;  %v7271_v9 = vshll.u32 %v6100_v44, 16 }
 0x13c   :  { %3404 = vmatmul.mubr.bf16.gmra.mrb[84].mxu0 %v5950_v15  ;;  %2897 = vmatprep.mubr.bf16.mxu1 %v6234_v19  ;;  %v6292_v15 = vsel %vm5344_vm4, %v1168_v28, 0 }
 0x13d   :  { %3411 = vmatprep.mubr.bf16.mxu0 %v6266_v22  ;;  %v1171_v50 = vrot.slane %v7271_v9, 1 }
 0x13e   :  { %v6277_v14 = vpop.f32.mrb[12].mxu1 }
 0x13f   :  { %7264 = vst [vmem:[#allocation53_spill] sm:$0xff] %v6277_v14  ;;  %v2685_v54 = vpop.f32.mrb[13].mxu1  ;;  %v7267_v14 = vshll.u32 %v6066_v33, 16 }
 0x140   :  { %v6281_v8 = vpop.f32.mrb[14].mxu1 }
 0x141   :  { %7266 = vst [vmem:[#allocation54_spill] sm:$0xff] %v6281_v8  ;;  %v2688_v7 = vpop.f32.mrb[15].mxu1  ;;  %v1169_v47 = vrot.slane %v7267_v14, 1  ;;  %v6310_v14 = vsel %vm5263_vm2, %v968_v10, 0  ;;  %v7273_v10 = vshrl.u32 %v6100_v44, 16 }
 0x142   :  { %v7269_v7 = vshrl.u32 %v6066_v33, 16 }
 0x143   :  { %2898 = vmatmul.mubr.bf16.gmra.mrb[120].mxu1 %v6285_v12 }
 0x144   :  { %3412 = vmatmul.mubr.bf16.gmra.mrb[88].mxu0 %v5990_v49  ;;  %2905 = vmatprep.mubr.bf16.mxu1 %v6262_v24  ;;  %v1170_v28 = vor.u32 %v1169_v47, %v7269_v7 }
 0x145   :  { %3419 = vmatprep.mubr.bf16.mxu0 %v6292_v15 }
 0x146   :  { %v6302_v0 = vpop.f32.mrb[16].mxu1  ;;  %v6314_v49 = vsel %vm5344_vm4, %v1170_v28, 0 }
 0x147   :  { %7268 = vst [vmem:[#allocation55_spill] sm:$0xff] %v6302_v0  ;;  %v2693_v54 = vpop.f32.mrb[17].mxu1 }
 0x148   :  { %v6306_v45 = vpop.f32.mrb[18].mxu1 }
 0x149   :  { %7270 = vst [vmem:[#allocation56_spill] sm:$0xff] %v6306_v45  ;;  %v2696_v8 = vpop.f32.mrb[19].mxu1  ;;  %v7275_v45 = vshll.u32 %v6125_v37, 16 }
 0x14a   :  { %v1172_v8 = vor.u32 %v1171_v50, %v7273_v10  ;;  %v5048_v50 = vld [vmem:[#allocation5 + $0x210] sm:$0xff]  }
 0x14b   :  { %2906 = vmatmul.mubr.bf16.gmra.mrb[124].mxu1 %v6310_v14  ;;  %v1173_v0 = vrot.slane %v7275_v45, 1 }
 0x14c   :  { %3420 = vmatmul.mubr.bf16.gmra.mrb[92].mxu0 %v6030_v39  ;;  %3010 = vmatprep.mubr.bf16.mxu1 %v5602_v35  ;;  %v6330_v9 = vsel %vm5344_vm4, %v1172_v8, 0  ;;  %v5046_v39 = vld [vmem:[#allocation5 + $0x208] sm:$0xff]   ;;  %v7277_v8 = vshrl.u32 %v6125_v37, 16 }
 0x14d   :  { %3427 = vmatprep.mubr.bf16.mxu0 %v6314_v49 }
 0x14e   :  { %v6322_v47 = vpop.f32.mrb[20].mxu1 }
 0x14f   :  { %7272 = vst [vmem:[#allocation57_spill] sm:$0xff] %v6322_v47  ;;  %v2701_v7 = vpop.f32.mrb[21].mxu1  ;;  %v7279_v47 = vshll.u32 %v6162_v11, 16 }
 0x150   :  { %v6326_v54 = vpop.f32.mrb[22].mxu1  ;;  %v1174_v7 = vor.u32 %v1173_v0, %v7277_v8  ;;  %v391_v0 = vld [vmem:[%s7099_s0 + $0x1f0] sm:$0xff] }
 0x151   :  { %7274 = vst [vmem:[#allocation58_spill] sm:$0xff] %v6326_v54  ;;  %v2704_v28 = vpop.f32.mrb[23].mxu1 }
 0x153   :  { %3011 = vmatmul.mubr.bf16.vlgmr.msra.gmra.mrb[32].mxu1 %v5759_v26 }
 0x154   :  { %3428 = vmatmul.mubr.bf16.gmra.mrb[96].mxu0 %v6066_v33  ;;  %4483 = vmatpush3.bf16.msra.mxu1 %v5830_v32  ;;  %v6347_v32 = vsel %vm5344_vm4, %v1174_v7, 0  ;;  %v1175_v33 = vrot.slane %v7279_v47, 1  ;;  %v7281_v47 = vshrl.u32 %v6162_v11, 16  ;;  %v5059_v7 = vld [vmem:[%s7101_s2] ss:$0 sm:$0xff] }
 0x155   :  { %3018 = vmatprep.mubr.bf16.mxu1 %v5631_v36  ;;  %3435 = vmatprep.mubr.bf16.mxu0 %v6330_v9 }
 0x156   :  { %v6339_v10 = vpop.f32.mrb[24].mxu1  ;;  %4484 = vmatprep.subr.bf16.mxu1 %v5046_v39  ;;  %v1176_v8 = vor.u32 %v1175_v33, %v7281_v47  ;;  %v5060_v47 = vld [vmem:[%s7102_s3] ss:$0 sm:$0xff] }
 0x157   :  { %7276 = vst [vmem:[#allocation59_spill] sm:$0xff] %v6339_v10  ;;  %v2709_v28 = vpop.f32.mrb[25].mxu1  ;;  %v5051_v10 = vld [vmem:[#allocation5 + $0x220] sm:$0xff]  }
 0x158   :  { %v6343_v45 = vpop.f32.mrb[26].mxu1  ;;  %4485 = vmatpush3.bf16.msra.mxu1 %v5046_v39  ;;  %v392_v39 = vld [vmem:[%s7099_s0 + $0x1f8] sm:$0xff]  ;;  %v462_v28 = vsub.f32 %v391_v0, %v5059_v7 }
 0x159   :  { %7278 = vst [vmem:[#allocation60_spill] sm:$0xff] %v6343_v45  ;;  %v2712_v54 = vpop.f32.mrb[27].mxu1  ;;  %4486 = vmatprep.subr.bf16.mxu1 %v5048_v50  ;;  %v463_v45 = vsub.f32 %v392_v39, %v5059_v7  ;;  %v5052_v7 = vld [vmem:[#allocation5 + $0x228] sm:$0xff]  }
 0x15a   :  { %v533_v0 = vmul.f32 %v5060_v47, %v462_v28  ;;  %v7285_v28 = vshll.u32 %v6234_v19, 16 }
 0x15b   :  { %3019 = vmatmul.mubr.bf16.gmra.mrb[36].mxu1 %v5789_v21  ;;  %v534_v39 = vmul.f32 %v5060_v47, %v463_v45 }
 0x15c   :  { %3436 = vmatmul.mubr.bf16.gmra.mrb[100].mxu0 %v6100_v44  ;;  %3026 = vmatprep.mubr.bf16.mxu1 %v5672_v31  ;;  %v1179_v47 = vrot.slane %v7285_v28, 1 }
 0x15d   :  { %3443 = vmatprep.mubr.bf16.mxu0 %v6347_v32  ;;  %4487 = vmatpush3.bf16.msra.mxu1 %v5048_v50  ;;  %v6372_v50 = vsel %vm5344_vm4, %v1176_v8, 0  ;;  %v5053_v8 = vld [vmem:[#allocation5 + $0x230] sm:$0xff]  }
 0x15e   :  { %v6361_v54 = vpop.f32.mrb[28].mxu1  ;;  %4488 = vmatprep.subr.bf16.mxu1 %v5050_v53 }
 0x15f   :  { %7280 = vst [vmem:[#allocation61_spill] sm:$0xff] %v6361_v54  ;;  %v2717_v21 = vpop.f32.mrb[29].mxu1  ;;  %v7283_v54 = vshll.u32 %v6202_v41, 16 }
 0x160   :  { %v6368_v44 = vpop.f32.mrb[30].mxu1 }
 0x161   :  { %7282 = vst [vmem:[#allocation62_spill] sm:$0xff] %v6368_v44  ;;  %v2720_v26 = vpop.f32.mrb[31].mxu1  ;;  %4489 = vmatpush3.bf16.msra.mxu1 %v5050_v53  ;;  %v1177_v33 = vrot.slane %v7283_v54, 1  ;;  %v597_v53 = vmax.f32 %v533_v0, 0.0  ;;  %v598_v54 = vmax.f32 %v534_v39, 0.0 }
 0x162   :  { %4490 = vmatprep.subr.bf16.mxu1 %v5051_v10  ;;  %v7284_v26 = vshrl.u32 %v6202_v41, 16 }
 0x163   :  { %3027 = vmatmul.mubr.bf16.gmra.mrb[40].mxu1 %v5818_v16  ;;  %v661_v44 = vmin.f32 %v597_v53, 6.0 }
 0x164   :  { %3444 = vmatmul.mubr.bf16.gmra.mrb[104].mxu0 %v6125_v37  ;;  %3034 = vmatprep.mubr.bf16.mxu1 %v5686_v52  ;;  %v1178_v21 = vor.u32 %v1177_v33, %v7284_v26  ;;  %v662_v37 = vmin.f32 %v598_v54, 6.0  ;;  %v7287_v26 = vshll.u32 %v6262_v24, 16 }
 0x165   :  { %3451 = vmatprep.mubr.bf16.mxu0 %v6372_v50  ;;  %4491 = vmatpush3.bf16.msra.mxu1 %v5051_v10  ;;  %v7286_v10 = vshrl.u32 %v6234_v19, 16  ;;  %v4976_v0 = vround.rtne.f32 %v661_v44  ;;  %v7288_v44 = vshrl.u32 %v6262_v24, 16 }
 0x166   :  { %4492 = vmatprep.subr.bf16.mxu1 %v5052_v7  ;;  %v6387_v45 = vsel %vm5344_vm4, %v1178_v21, 0  ;;  %v4977_v39 = vround.rtne.f32 %v662_v37  ;;  %v1181_v21 = vrot.slane %v7287_v26, 1 }
 0x167   :  { %v1180_v33 = vor.u32 %v1179_v47, %v7286_v10 }
 0x168   :  { %v6403_v53 = vpack.c.bf16 %v4977_v39, %v4976_v0  ;;  %v1182_v37 = vor.u32 %v1181_v21, %v7288_v44  ;;  %v5054_v0 = vld [vmem:[#allocation5 + $0x238] sm:$0xff]   ;;  %v7290_v39 = vshll.u32 %v5973_v38, 16 }
 0x169   :  { %4493 = vmatpush3.bf16.msra.mxu1 %v5052_v7  ;;  %v6399_v7 = vsel %vm5344_vm4, %v1180_v33, 0 }
 0x16a   :  { %4494 = vmatprep.subr.bf16.mxu1 %v5053_v8  ;;  %v1316_v54 = vshll.u32 %v6403_v53, 16  ;;  %v6416_v47 = vsel %vm5344_vm4, %v1182_v37, 0  ;;  %v1313_v10 = vshrl.u32 %v6403_v53, 16 }
 0x16b   :  { %3035 = vmatmul.mubr.bf16.gmra.mrb[44].mxu1 %v5857_v58 }
 0x16c   :  { %3452 = vmatmul.mubr.bf16.gmra.mrb[108].mxu0 %v6162_v11  ;;  %3042 = vmatprep.mubr.bf16.mxu1 %v5714_v6  ;;  %v1451_v33 = vrot.slane %v1316_v54, 1 }
 0x16d   :  { %3459 = vmatprep.mubr.bf16.mxu0 %v6387_v45  ;;  %4495 = vmatpush3.bf16.msra.mxu1 %v5053_v8  ;;  %v7289_v8 = vshrl.u32 %v5973_v38, 16 }
 0x16e   :  { %v1452_v21 = vor.u32 %v1451_v33, %v1313_v10  ;;  %4496 = vmatprep.subr.bf16.mxu1 %v5054_v0  ;;  %v7302_v33 = vld [vmem:[#allocation20_spill] sm:$0xff] }
 0x16f   :  { %v1308_v28 = vrot.slane %v7289_v8, 7  ;;  %v7300_v8 = vld [vmem:[#allocation40_spill] sm:$0xff] }
 0x170   :  { %v6435_v37 = vsel %vm5344_vm4, %v1452_v21, 0  ;;  %v7306_v21 = vld [vmem:[#allocation23_spill] sm:$0xff] }
 0x171   :  { %v1311_v26 = vor.u32 %v7290_v39, %v1308_v28  ;;  %4497 = vmatpush3.bf16.msra.mxu1 %v5054_v0  ;;  %v7301_v28 = vld [vmem:[#allocation16_spill] sm:$0xff]  ;;  %v7303_v0 = vld [vmem:[#allocation42_spill] sm:$0xff]  ;;  %v7304_v39 = vld [vmem:[#allocation21_spill] sm:$0xff] }
 0x173   :  { %3043 = vmatmul.mubr.bf16.gmra.mrb[48].mxu1 %v5898_v30  ;;  %v6431_v44 = vsel %vm5263_vm2, %v1311_v26, 0  ;;  %v7305_v26 = vld [vmem:[#allocation45_spill] sm:$0xff] }
 0x174   :  { %3460 = vmatmul.mubr.bf16.gmra.mrb[112].mxu0 %v6202_v41  ;;  %3050 = vmatprep.mubr.bf16.mxu1 %v5746_v61 }
 0x175   :  { %3467 = vmatprep.mubr.bf16.mxu0 %v6399_v7 }
 0x17b   :  { %3051 = vmatmul.mubr.bf16.gmra.mrb[52].mxu1 %v5935_v43 }
 0x17c   :  { %3468 = vmatmul.mubr.bf16.gmra.mrb[116].mxu0 %v6234_v19  ;;  %3058 = vmatprep.mubr.bf16.mxu1 %v5781_v25 }
 0x17d   :  { %3475 = vmatprep.mubr.bf16.mxu0 %v6416_v47 }
 0x183   :  { %3059 = vmatmul.mubr.bf16.gmra.mrb[56].mxu1 %v5969_v18 }
 0x184   :  { %3476 = vmatmul.mubr.bf16.gmra.mrb[120].mxu0 %v6262_v24  ;;  %3066 = vmatprep.mubr.bf16.mxu1 %v6431_v44 }
 0x185   :  { %3483 = vmatprep.mubr.bf16.mxu0 %v6435_v37 }
 0x18b   :  { %3067 = vmatmul.mubr.bf16.gmra.mrb[60].mxu1 %v6007_v34 }
 0x18c   :  { %3484 = vmatmul.mubr.bf16.gmra.mrb[124].mxu0 %v6403_v53  ;;  %3074 = vmatprep.mubr.bf16.mxu1 %v5838_v60  ;;  %v7295_v60 = vld [vmem:[#allocation10_spill] sm:$0xff] }
 0x18d   :  { %3524 = vmatprep.mubr.bf16.mxu0 %v5270_v27  ;;  %v7291_v27 = vld [vmem:[#allocation8_spill] sm:$0xff] }
 0x193   :  { %3075 = vmatmul.mubr.bf16.gmra.mrb[64].mxu1 %v7214_v40 }
 0x194   :  { %3525 = vmatmul.mubr.bf16.vlgmr.msra.gmra.mrb[0].mxu0 %v5324_v17  ;;  %3082 = vmatprep.mubr.bf16.mxu1 %v5882_v3  ;;  %v7292_v17 = vld [vmem:[#allocation46_spill] sm:$0xff] }
 0x195   :  { %3532 = vmatprep.mubr.bf16.mxu0 %v5289_v42  ;;  %v7294_v42 = vld [vmem:[#allocation36_spill] sm:$0xff] }
 0x19b   :  { %3083 = vmatmul.mubr.bf16.gmra.mrb[68].mxu1 %v6076_v5  ;;  %v7298_v5 = vld [vmem:[#allocation13_spill] sm:$0xff] }
 0x19c   :  { %3533 = vmatmul.mubr.bf16.gmra.mrb[4].mxu0 %v5361_v46  ;;  %3090 = vmatprep.mubr.bf16.mxu1 %v5920_v56  ;;  %v7296_v46 = vld [vmem:[#allocation15_spill] sm:$0xff] }
 0x19d   :  { %3540 = vmatprep.mubr.bf16.mxu0 %v5311_v62  ;;  %v7297_v62 = vld [vmem:[#allocation37_spill] sm:$0xff] }
 0x1a3   :  { %3091 = vmatmul.mubr.bf16.gmra.mrb[72].mxu1 %v6110_v51 }
 0x1a4   :  { %3541 = vmatmul.mubr.bf16.gmra.mrb[8].mxu0 %v5395_v1  ;;  %3098 = vmatprep.mubr.bf16.mxu1 %v5956_v4  ;;  %v7299_v1 = vld [vmem:[#allocation18_spill] sm:$0xff] }
 0x1a5   :  { %3548 = vmatprep.mubr.bf16.mxu0 %v7291_v27  ;;  %v7307_v27 = vld [vmem:[#allocation24_spill] sm:$0xff] }
 0x1ab   :  { %3099 = vmatmul.mubr.bf16.gmra.mrb[76].mxu1 %v7292_v17 }
 0x1ac   :  { %3549 = vmatmul.mubr.bf16.gmra.mrb[12].mxu0 %v7293_v2  ;;  %3106 = vmatprep.mubr.bf16.mxu1 %v7294_v42  ;;  %v7308_v2 = vld [vmem:[#allocation25_spill] sm:$0xff] }
 0x1ad   :  { %3556 = vmatprep.mubr.bf16.mxu0 %v7295_v60  ;;  %v7318_v60 = vld [vmem:[#allocation19_spill] sm:$0xff] }
 0x1b3   :  { %3107 = vmatmul.mubr.bf16.gmra.mrb[80].mxu1 %v6178_v63 }
 0x1b4   :  { %3557 = vmatmul.mubr.bf16.gmra.mrb[16].mxu0 %v7296_v46  ;;  %3114 = vmatprep.mubr.bf16.mxu1 %v7297_v62  ;;  %v7319_v46 = vld [vmem:[#allocation22_spill] sm:$0xff] }
 0x1b5   :  { %3564 = vmatprep.mubr.bf16.mxu0 %v7298_v5  ;;  %v7320_v5 = vld [vmem:[#allocation29_spill] sm:$0xff] }
 0x1bb   :  { %3115 = vmatmul.mubr.bf16.gmra.mrb[84].mxu1 %v6210_v48 }
 0x1bc   :  { %3565 = vmatmul.mubr.bf16.gmra.mrb[20].mxu0 %v7299_v1  ;;  %3122 = vmatprep.mubr.bf16.mxu1 %v7300_v8  ;;  %v7321_v1 = vld [vmem:[#allocation33_spill] sm:$0xff] }
 0x1bd   :  { %3572 = vmatprep.mubr.bf16.mxu0 %v7301_v28 }
 0x1c3   :  { %3123 = vmatmul.mubr.bf16.gmra.mrb[88].mxu1 %v6238_v29 }
 0x1c4   :  { %3573 = vmatmul.mubr.bf16.gmra.mrb[24].mxu0 %v7302_v33  ;;  %3130 = vmatprep.mubr.bf16.mxu1 %v7303_v0 }
 0x1c5   :  { %3580 = vmatprep.mubr.bf16.mxu0 %v7304_v39 }
 0x1cb   :  { %3131 = vmatmul.mubr.bf16.gmra.mrb[92].mxu1 %v6266_v22 }
 0x1cc   :  { %3581 = vmatmul.mubr.bf16.gmra.mrb[28].mxu0 %v5602_v35  ;;  %3138 = vmatprep.mubr.bf16.mxu1 %v7305_v26  ;;  %v7309_v35 = vld [vmem:[#allocation26_spill] sm:$0xff] }
 0x1cd   :  { %3588 = vmatprep.mubr.bf16.mxu0 %v7306_v21  ;;  %v7322_v21 = vld [vmem:[#allocation30_spill] sm:$0xff] }
 0x1d3   :  { %3139 = vmatmul.mubr.bf16.gmra.mrb[96].mxu1 %v6292_v15 }
 0x1d4   :  { %3589 = vmatmul.mubr.bf16.gmra.mrb[32].mxu0 %v5631_v36  ;;  %3146 = vmatprep.mubr.bf16.mxu1 %v6166_v55  ;;  %v7310_v36 = vld [vmem:[#allocation27_spill] sm:$0xff] }
 0x1d5   :  { %3596 = vmatprep.mubr.bf16.mxu0 %v7307_v27 }
 0x1db   :  { %3147 = vmatmul.mubr.bf16.gmra.mrb[100].mxu1 %v6314_v49 }
 0x1dc   :  { %3597 = vmatmul.mubr.bf16.gmra.mrb[36].mxu0 %v5672_v31  ;;  %3154 = vmatprep.mubr.bf16.mxu1 %v6197_v13  ;;  %v7311_v31 = vld [vmem:[#allocation28_spill] sm:$0xff] }
 0x1dd   :  { %3604 = vmatprep.mubr.bf16.mxu0 %v7308_v2 }
 0x1e3   :  { %3155 = vmatmul.mubr.bf16.gmra.mrb[104].mxu1 %v6330_v9 }
 0x1e4   :  { %3605 = vmatmul.mubr.bf16.gmra.mrb[40].mxu0 %v5686_v52  ;;  %3162 = vmatprep.mubr.bf16.mxu1 %v6227_v59  ;;  %v1315_v52 = vrot.slane %v1313_v10, 7  ;;  %v7316_v10 = vld [vmem:[#allocation32_spill] sm:$0xff] }
 0x1e5   :  { %3612 = vmatprep.mubr.bf16.mxu0 %v7309_v35  ;;  %v7324_v35 = vld [vmem:[#allocation35_spill] sm:$0xff] }
 0x1eb   :  { %3163 = vmatmul.mubr.bf16.gmra.mrb[108].mxu1 %v6347_v32 }
 0x1ec   :  { %3613 = vmatmul.mubr.bf16.gmra.mrb[44].mxu0 %v5714_v6  ;;  %3170 = vmatprep.mubr.bf16.mxu1 %v6257_v57  ;;  %v1318_v6 = vor.u32 %v1316_v54, %v1315_v52  ;;  %v7314_v54 = vld [vmem:[#allocation11_spill] sm:$0xff]  ;;  %v7325_v52 = vld [vmem:[#allocation38_spill] sm:$0xff] }
 0x1ed   :  { %3620 = vmatprep.mubr.bf16.mxu0 %v7310_v36 }
 0x1f3   :  { %3171 = vmatmul.mubr.bf16.gmra.mrb[112].mxu1 %v6372_v50 }
 0x1f4   :  { %3621 = vmatmul.mubr.bf16.gmra.mrb[48].mxu0 %v5746_v61  ;;  %3178 = vmatprep.mubr.bf16.mxu1 %v6285_v12  ;;  %v6507_v61 = vsel %vm5263_vm2, %v1318_v6, 0 }
 0x1f5   :  { %3628 = vmatprep.mubr.bf16.mxu0 %v7311_v31 }
 0x1fb   :  { %3179 = vmatmul.mubr.bf16.gmra.mrb[116].mxu1 %v6387_v45 }
 0x1fc   :  { %3629 = vmatmul.mubr.bf16.gmra.mrb[52].mxu0 %v5781_v25  ;;  %3186 = vmatprep.mubr.bf16.mxu1 %v6310_v14  ;;  %v7312_v25 = vld [vmem:[#allocation9_spill] sm:$0xff] }
 0x1fd   :  { %3636 = vmatprep.mubr.bf16.mxu0 %v5973_v38  ;;  %v7313_v38 = vld [vmem:[#allocation31_spill] sm:$0xff] }
 0x203   :  { %3187 = vmatmul.mubr.bf16.gmra.mrb[120].mxu1 %v6399_v7 }
 0x204   :  { %3637 = vmatmul.mubr.bf16.gmra.mrb[56].mxu0 %v6431_v44  ;;  %3194 = vmatprep.mubr.bf16.mxu1 %v6507_v61  ;;  %v7317_v44 = vld [vmem:[#allocation17_spill] sm:$0xff] }
 0x205   :  { %3644 = vmatprep.mubr.bf16.mxu0 %v7214_v40 }
 0x20b   :  { %3195 = vmatmul.mubr.bf16.gmra.mrb[124].mxu1 %v6416_v47 }
 0x20c   :  { %3645 = vmatmul.mubr.bf16.gmra.mrb[60].mxu0 %v7214_v40  ;;  %4498 = vmatprep.mubr.bf16.mxu1 %v7312_v25  ;;  %v7326_v25 = vld [vmem:[#allocation39_spill] sm:$0xff] }
 0x20d   :  { %3652 = vmatprep.mubr.bf16.mxu0 %v7313_v38  ;;  %v7327_v38 = vld [vmem:[#allocation41_spill] sm:$0xff] }
 0x213   :  { %4499 = vmatmul.mubr.bf16.vlgmr.msra.gmra.mrb[128].mxu1 %v7314_v54 }
 0x214   :  { %3653 = vmatmul.mubr.bf16.gmra.mrb[64].mxu0 %v5882_v3  ;;  %4502 = vmatprep.mubr.bf16.mxu1 %v7315_v20  ;;  %v7328_v20 = vld [vmem:[#allocation43_spill] sm:$0xff] }
 0x215   :  { %3660 = vmatprep.mubr.bf16.mxu0 %v7316_v10 }
 0x21b   :  { %4503 = vmatmul.mubr.bf16.gmra.mrb[132].mxu1 %v7317_v44 }
 0x21c   :  { %3661 = vmatmul.mubr.bf16.gmra.mrb[68].mxu0 %v5920_v56  ;;  %4506 = vmatprep.mubr.bf16.mxu1 %v7318_v60  ;;  %v7329_v60 = vld [vmem:[#allocation44_spill] sm:$0xff] }
 0x21d   :  { %3668 = vmatprep.mubr.bf16.mxu0 %v5891_v23  ;;  %v7323_v23 = vld [vmem:[#allocation34_spill] sm:$0xff] }
 0x223   :  { %4507 = vmatmul.mubr.bf16.gmra.mrb[136].mxu1 %v7319_v46 }
 0x224   :  { %3669 = vmatmul.mubr.bf16.gmra.mrb[72].mxu0 %v5956_v4  ;;  %4510 = vmatprep.mubr.bf16.mxu1 %v7320_v5 }
 0x225   :  { %3676 = vmatprep.mubr.bf16.mxu0 %v7321_v1 }
 0x226   :  { %v6529_v3 = vpop.f32.mrb[32].mxu1 }
 0x227   :  { %v3014_v28 = vpop.f32.mrb[33].mxu1 }
 0x228   :  { %v6531_v33 = vpop.f32.mrb[34].mxu1  ;;  %v7330_v28 = vld [vmem:[#allocation47_spill] sm:$0xff] }
 0x229   :  { %v3017_v39 = vpop.f32.mrb[35].mxu1 }
 0x22b   :  { %4511 = vmatmul.mubr.bf16.gmra.mrb[140].mxu1 %v7322_v21 }
 0x22c   :  { %3677 = vmatmul.mubr.bf16.gmra.mrb[76].mxu0 %v7294_v42  ;;  %4514 = vmatprep.mubr.bf16.mxu1 %v5818_v16 }
 0x22d   :  { %3684 = vmatprep.mubr.bf16.mxu0 %v7323_v23 }
 0x22e   :  { %v6537_v56 = vpop.f32.mrb[36].mxu1 }
 0x22f   :  { %v3022_v4 = vpop.f32.mrb[37].mxu1 }
 0x230   :  { %v6539_v27 = vpop.f32.mrb[38].mxu1 }
 0x231   :  { %v3025_v2 = vpop.f32.mrb[39].mxu1 }
 0x232   :  { %v7331_v2 = vld [vmem:[#allocation48_spill] sm:$0xff] }
 0x233   :  { %4515 = vmatmul.mubr.bf16.gmra.mrb[144].mxu1 %v5857_v58 }
 0x234   :  { %3685 = vmatmul.mubr.bf16.gmra.mrb[80].mxu0 %v7297_v62  ;;  %4518 = vmatprep.mubr.bf16.mxu1 %v5898_v30 }
 0x235   :  { %3692 = vmatprep.mubr.bf16.mxu0 %v7324_v35 }
 0x236   :  { %v6545_v36 = vpop.f32.mrb[40].mxu1 }
 0x237   :  { %v3030_v42 = vpop.f32.mrb[41].mxu1 }
 0x238   :  { %v6547_v16 = vpop.f32.mrb[42].mxu1  ;;  %v7332_v42 = vld [vmem:[#allocation49_spill] sm:$0xff] }
 0x239   :  { %v3033_v31 = vpop.f32.mrb[43].mxu1 }
 0x23b   :  { %4519 = vmatmul.mubr.bf16.gmra.mrb[148].mxu1 %v5935_v43 }
 0x23c   :  { %3693 = vmatmul.mubr.bf16.gmra.mrb[84].mxu0 %v7300_v8  ;;  %4522 = vmatprep.mubr.bf16.mxu1 %v5969_v18 }
 0x23d   :  { %3700 = vmatprep.mubr.bf16.mxu0 %v7325_v52 }
 0x23e   :  { %v6553_v58 = vpop.f32.mrb[44].mxu1 }
 0x23f   :  { %v3038_v62 = vpop.f32.mrb[45].mxu1 }
 0x240   :  { %v6555_v30 = vpop.f32.mrb[46].mxu1 }
 0x241   :  { %v3041_v6 = vpop.f32.mrb[47].mxu1 }
 0x243   :  { %4523 = vmatmul.mubr.bf16.gmra.mrb[152].mxu1 %v6007_v34 }
 0x244   :  { %3701 = vmatmul.mubr.bf16.gmra.mrb[88].mxu0 %v7303_v0  ;;  %4526 = vmatprep.mubr.bf16.mxu1 %v7326_v25 }
 0x245   :  { %3708 = vmatprep.mubr.bf16.mxu0 %v7327_v38  ;;  %v7333_v38 = vld [vmem:[#allocation50_spill] sm:$0xff] }
 0x246   :  { %v6561_v43 = vpop.f32.mrb[48].mxu1 }
 0x247   :  { %v3046_v8 = vpop.f32.mrb[49].mxu1 }
 0x248   :  { %v6563_v18 = vpop.f32.mrb[50].mxu1 }
 0x249   :  { %v3049_v54 = vpop.f32.mrb[51].mxu1 }
 0x24a   :  { %v7334_v54 = vld [vmem:[#allocation51_spill] sm:$0xff] }
 0x24b   :  { %4527 = vmatmul.mubr.bf16.gmra.mrb[156].mxu1 %v7214_v40 }
 0x24c   :  { %3709 = vmatmul.mubr.bf16.gmra.mrb[92].mxu0 %v7305_v26  ;;  %4530 = vmatprep.mubr.bf16.mxu1 %v6110_v51 }
 0x24d   :  { %3716 = vmatprep.mubr.bf16.mxu0 %v7328_v20 }
 0x24e   :  { %v6569_v34 = vpop.f32.mrb[52].mxu1 }
 0x24f   :  { %v3054_v0 = vpop.f32.mrb[53].mxu1 }
 0x250   :  { %v6571_v10 = vpop.f32.mrb[54].mxu1 }
 0x251   :  { %v3057_v44 = vpop.f32.mrb[55].mxu1 }
 0x253   :  { %4531 = vmatmul.mubr.bf16.gmra.mrb[160].mxu1 %v7292_v17 }
 0x254   :  { %3717 = vmatmul.mubr.bf16.gmra.mrb[96].mxu0 %v6166_v55  ;;  %4534 = vmatprep.mubr.bf16.mxu1 %v6178_v63 }
 0x255   :  { %3724 = vmatprep.mubr.bf16.mxu0 %v7329_v60 }
 0x256   :  { %v6577_v46 = vpop.f32.mrb[56].mxu1 }
 0x257   :  { %v3062_v26 = vpop.f32.mrb[57].mxu1 }
 0x258   :  { %v6579_v51 = vpop.f32.mrb[58].mxu1 }
 0x259   :  { %v3065_v5 = vpop.f32.mrb[59].mxu1 }
 0x25a   :  { %v7335_v5 = vld [vmem:[#allocation52_spill] sm:$0xff] }
 0x25b   :  { %4535 = vmatmul.mubr.bf16.gmra.mrb[164].mxu1 %v6210_v48 }
 0x25c   :  { %3725 = vmatmul.mubr.bf16.gmra.mrb[100].mxu0 %v6197_v13  ;;  %4538 = vmatprep.mubr.bf16.mxu1 %v6238_v29 }
 0x25d   :  { %3732 = vmatprep.mubr.bf16.mxu0 %v6162_v11 }
 0x25e   :  { %v6585_v17 = vpop.f32.mrb[60].mxu1 }
 0x25f   :  { %v3070_v55 = vpop.f32.mrb[61].mxu1 }
 0x260   :  { %v6587_v63 = vpop.f32.mrb[62].mxu1 }
 0x261   :  { %v3073_v1 = vpop.f32.mrb[63].mxu1 }
 0x262   :  { %v7336_v1 = vld [vmem:[#allocation53_spill] sm:$0xff] }
 0x263   :  { %4539 = vmatmul.mubr.bf16.gmra.mrb[168].mxu1 %v6266_v22 }
 0x264   :  { %3733 = vmatmul.mubr.bf16.gmra.mrb[104].mxu0 %v6227_v59  ;;  %4542 = vmatprep.mubr.bf16.mxu1 %v6292_v15 }
 0x265   :  { %3740 = vmatprep.mubr.bf16.mxu0 %v6202_v41 }
 0x266   :  { %v6593_v48 = vpop.f32.mrb[64].mxu1 }
 0x267   :  { %v3526_v13 = vpop.f32.mrb[0].mxu0  ;;  %v3078_v29 = vpop.f32.mrb[65].mxu1 }
 0x268   :  { %v6596_v11 = vadd.f32 %v3526_v13, %v7330_v28  ;;  %v3528_v39 = vpop.f32.mrb[1].mxu0  ;;  %v6598_v21 = vpop.f32.mrb[66].mxu1 }
 0x269   :  { %v3529_v23 = vpop.f32.mrb[2].mxu0  ;;  %v3081_v4 = vpop.f32.mrb[67].mxu1 }
 0x26a   :  { %v6601_v22 = vadd.f32 %v3529_v23, %v7331_v2  ;;  %v3531_v59 = vpop.f32.mrb[3].mxu0  ;;  %v7337_v4 = vld [vmem:[#allocation54_spill] sm:$0xff] }
 0x26b   :  { %4543 = vmatmul.mubr.bf16.gmra.mrb[172].mxu1 %v6314_v49  ;;  %v7338_v59 = vld [vmem:[#allocation55_spill] sm:$0xff] }
 0x26c   :  { %3741 = vmatmul.mubr.bf16.gmra.mrb[108].mxu0 %v6257_v57  ;;  %4546 = vmatprep.mubr.bf16.mxu1 %v6330_v9 }
 0x26d   :  { %3748 = vmatprep.mubr.bf16.mxu0 %v6234_v19 }
 0x26e   :  { %v6607_v15 = vpop.f32.mrb[68].mxu1 }
 0x26f   :  { %v3534_v41 = vpop.f32.mrb[4].mxu0  ;;  %v3086_v35 = vpop.f32.mrb[69].mxu1 }
 0x270   :  { %v6610_v31 = vadd.f32 %v3534_v41, %v7332_v42  ;;  %v3536_v52 = vpop.f32.mrb[5].mxu0  ;;  %v6612_v62 = vpop.f32.mrb[70].mxu1 }
 0x271   :  { %v3537_v6 = vpop.f32.mrb[6].mxu0  ;;  %v3089_v25 = vpop.f32.mrb[71].mxu1 }
 0x272   :  { %v6615_v49 = vadd.f32 %v3537_v6, %v7333_v38  ;;  %v3539_v57 = vpop.f32.mrb[7].mxu0  ;;  %v7339_v25 = vld [vmem:[#allocation56_spill] sm:$0xff] }
 0x273   :  { %4547 = vmatmul.mubr.bf16.gmra.mrb[176].mxu1 %v6347_v32 }
 0x274   :  { %3749 = vmatmul.mubr.bf16.gmra.mrb[112].mxu0 %v6285_v12  ;;  %4550 = vmatprep.mubr.bf16.mxu1 %v6372_v50 }
 0x275   :  { %3756 = vmatprep.mubr.bf16.mxu0 %v6262_v24 }
 0x276   :  { %v6621_v19 = vpop.f32.mrb[72].mxu1 }
 0x277   :  { %v3542_v9 = vpop.f32.mrb[8].mxu0  ;;  %v3094_v8 = vpop.f32.mrb[73].mxu1 }
 0x278   :  { %v6624_v20 = vadd.f32 %v3542_v9, %v7334_v54  ;;  %v3544_v0 = vpop.f32.mrb[9].mxu0  ;;  %v6626_v44 = vpop.f32.mrb[74].mxu1  ;;  %v7340_v9 = vld [vmem:[#allocation57_spill] sm:$0xff] }
 0x279   :  { %v3545_v60 = vpop.f32.mrb[10].mxu0  ;;  %v3097_v26 = vpop.f32.mrb[75].mxu1 }
 0x27a   :  { %v6629_v32 = vadd.f32 %v3545_v60, %v7335_v5  ;;  %v3547_v12 = vpop.f32.mrb[11].mxu0  ;;  %v7341_v5 = vld [vmem:[#allocation58_spill] sm:$0xff] }
 0x27b   :  { %4551 = vmatmul.mubr.bf16.gmra.mrb[180].mxu1 %v6387_v45 }
 0x27c   :  { %3757 = vmatmul.mubr.bf16.gmra.mrb[116].mxu0 %v6310_v14  ;;  %4554 = vmatprep.mubr.bf16.mxu1 %v6399_v7 }
 0x27d   :  { %3764 = vmatprep.mubr.bf16.mxu0 %v6403_v53 }
 0x27e   :  { %v6635_v24 = vpop.f32.mrb[76].mxu1 }
 0x27f   :  { %v3550_v50 = vpop.f32.mrb[12].mxu0  ;;  %v3102_v55 = vpop.f32.mrb[77].mxu1 }
 0x280   :  { %v6638_v13 = vadd.f32 %v3550_v50, %v7336_v1  ;;  %v3552_v29 = vpop.f32.mrb[13].mxu0  ;;  %v6640_v28 = vpop.f32.mrb[78].mxu1 }
 0x281   :  { %v3553_v39 = vpop.f32.mrb[14].mxu0  ;;  %v3105_v23 = vpop.f32.mrb[79].mxu1  ;;  %v7342_v29 = vld [vmem:[#allocation59_spill] sm:$0xff] }
 0x282   :  { %v6643_v45 = vadd.f32 %v3553_v39, %v7337_v4  ;;  %v3555_v14 = vpop.f32.mrb[15].mxu0 }
 0x283   :  { %4555 = vmatmul.mubr.bf16.gmra.mrb[184].mxu1 %v6416_v47 }
 0x284   :  { %3765 = vmatmul.mubr.bf16.gmra.mrb[120].mxu0 %v6507_v61  ;;  %4558 = vmatprep.mubr.bf16.mxu1 %v6435_v37 }
 0x285   :  { %3772 = vmatprep.mubr.bf16.mxu0 %v7214_v40 }
 0x286   :  { %v6649_v7 = vpop.f32.mrb[80].mxu1 }
 0x287   :  { %v3558_v53 = vpop.f32.mrb[16].mxu0  ;;  %v3110_v2 = vpop.f32.mrb[81].mxu1 }
 0x288   :  { %v6652_v41 = vadd.f32 %v3558_v53, %v7338_v59  ;;  %v3560_v35 = vpop.f32.mrb[17].mxu0  ;;  %v6654_v42 = vpop.f32.mrb[82].mxu1  ;;  %v7343_v2 = vld [vmem:[#allocation60_spill] sm:$0xff] }
 0x289   :  { %v3561_v52 = vpop.f32.mrb[18].mxu0  ;;  %v3113_v6 = vpop.f32.mrb[83].mxu1 }
 0x28a   :  { %v6657_v47 = vadd.f32 %v3561_v52, %v7339_v25  ;;  %v3563_v61 = vpop.f32.mrb[19].mxu0 }
 0x28b   :  { %4559 = vmatmul.mubr.bf16.gmra.mrb[188].mxu1 %v7214_v40  ;;  %v7344_v61 = vld [vmem:[#allocation61_spill] sm:$0xff] }
 0x28c   :  { %3773 = vmatmul.mubr.bf16.gmra.mrb[124].mxu0 %v7214_v40 }
 0x28e   :  { %v6661_v37 = vpop.f32.mrb[84].mxu1 }
 0x28f   :  { %v3566_v38 = vpop.f32.mrb[20].mxu0  ;;  %v3118_v57 = vpop.f32.mrb[85].mxu1 }
 0x290   :  { %v6664_v8 = vadd.f32 %v3566_v38, %v7340_v9  ;;  %v3568_v54 = vpop.f32.mrb[21].mxu0  ;;  %v6666_v0 = vpop.f32.mrb[86].mxu1 }
 0x291   :  { %v3569_v60 = vpop.f32.mrb[22].mxu0  ;;  %v3121_v26 = vpop.f32.mrb[87].mxu1 }
 0x292   :  { %v6669_v12 = vadd.f32 %v3569_v60, %v7341_v5  ;;  %v3571_v50 = vpop.f32.mrb[23].mxu0  ;;  %v7345_v26 = vld [vmem:[#allocation62_spill] sm:$0xff] }
 0x296   :  { %v6671_v55 = vpop.f32.mrb[88].mxu1 }
 0x297   :  { %v3574_v1 = vpop.f32.mrb[24].mxu0  ;;  %v3126_v40 = vpop.f32.mrb[89].mxu1 }
 0x298   :  { %v6674_v39 = vadd.f32 %v3574_v1, %v7342_v29  ;;  %v3576_v23 = vpop.f32.mrb[25].mxu0  ;;  %v6676_v4 = vpop.f32.mrb[90].mxu1 }
 0x299   :  { %v3577_v14 = vpop.f32.mrb[26].mxu0  ;;  %v3129_v53 = vpop.f32.mrb[91].mxu1 }
 0x29a   :  { %v6679_v59 = vadd.f32 %v3577_v14, %v7343_v2  ;;  %v3579_v35 = vpop.f32.mrb[27].mxu0 }
 0x29e   :  { %v6681_v52 = vpop.f32.mrb[92].mxu1 }
 0x29f   :  { %v3582_v6 = vpop.f32.mrb[28].mxu0  ;;  %v3134_v25 = vpop.f32.mrb[93].mxu1 }
 0x2a0   :  { %v6684_v38 = vadd.f32 %v3582_v6, %v7344_v61  ;;  %v3584_v57 = vpop.f32.mrb[29].mxu0  ;;  %v6686_v9 = vpop.f32.mrb[94].mxu1 }
 0x2a1   :  { %v3585_v54 = vpop.f32.mrb[30].mxu0  ;;  %v3137_v60 = vpop.f32.mrb[95].mxu1 }
 0x2a2   :  { %v6689_v5 = vadd.f32 %v3585_v54, %v7345_v26  ;;  %v3587_v50 = vpop.f32.mrb[31].mxu0 }
 0x2a6   :  { %v6691_v1 = vpop.f32.mrb[96].mxu1 }
 0x2a7   :  { %v3590_v40 = vpop.f32.mrb[32].mxu0  ;;  %v3142_v29 = vpop.f32.mrb[97].mxu1 }
 0x2a8   :  { %v6694_v23 = vadd.f32 %v3590_v40, %v6529_v3  ;;  %v3592_v14 = vpop.f32.mrb[33].mxu0  ;;  %v6696_v53 = vpop.f32.mrb[98].mxu1 }
 0x2a9   :  { %7346 = vst [vmem:[#allocation8_spill] sm:$0xff] %v6696_v53  ;;  %v3593_v2 = vpop.f32.mrb[34].mxu0  ;;  %v3145_v35 = vpop.f32.mrb[99].mxu1 }
 0x2aa   :  { %v6699_v6 = vadd.f32 %v3593_v2, %v6531_v33  ;;  %v3595_v25 = vpop.f32.mrb[35].mxu0 }
 0x2ae   :  { %v6701_v61 = vpop.f32.mrb[100].mxu1 }
 0x2af   :  { %7347 = vst [vmem:[#allocation46_spill] sm:$0xff] %v6701_v61  ;;  %v3598_v57 = vpop.f32.mrb[36].mxu0  ;;  %v3150_v54 = vpop.f32.mrb[101].mxu1 }
 0x2b0   :  { %v6704_v60 = vadd.f32 %v3598_v57, %v6537_v56  ;;  %v3600_v26 = vpop.f32.mrb[37].mxu0  ;;  %v6706_v50 = vpop.f32.mrb[102].mxu1 }
 0x2b1   :  { %7348 = vst [vmem:[#allocation12_spill] sm:$0xff] %v6706_v50  ;;  %v3601_v3 = vpop.f32.mrb[38].mxu0  ;;  %v3153_v40 = vpop.f32.mrb[103].mxu1 }
 0x2b2   :  { %v6709_v29 = vadd.f32 %v3601_v3, %v6539_v27  ;;  %v3603_v14 = vpop.f32.mrb[39].mxu0 }
 0x2b6   :  { %v6711_v35 = vpop.f32.mrb[104].mxu1 }
 0x2b7   :  { %7349 = vst [vmem:[#allocation36_spill] sm:$0xff] %v6711_v35  ;;  %v3606_v33 = vpop.f32.mrb[40].mxu0  ;;  %v3158_v2 = vpop.f32.mrb[105].mxu1 }
 0x2b8   :  { %v6714_v25 = vadd.f32 %v3606_v33, %v6545_v36  ;;  %v3608_v54 = vpop.f32.mrb[41].mxu0  ;;  %v6716_v61 = vpop.f32.mrb[106].mxu1 }
 0x2b9   :  { %7350 = vst [vmem:[#allocation10_spill] sm:$0xff] %v6716_v61  ;;  %v3609_v56 = vpop.f32.mrb[42].mxu0  ;;  %v3161_v57 = vpop.f32.mrb[107].mxu1 }
 0x2ba   :  { %v6719_v26 = vadd.f32 %v3609_v56, %v6547_v16  ;;  %v3611_v40 = vpop.f32.mrb[43].mxu0 }
 0x2be   :  { %v6721_v50 = vpop.f32.mrb[108].mxu1 }
 0x2bf   :  { %7351 = vst [vmem:[#allocation15_spill] sm:$0xff] %v6721_v50  ;;  %v3614_v27 = vpop.f32.mrb[44].mxu0  ;;  %v3166_v3 = vpop.f32.mrb[109].mxu1 }
 0x2c0   :  { %v6724_v14 = vadd.f32 %v3614_v27, %v6553_v58  ;;  %v3616_v2 = vpop.f32.mrb[45].mxu0  ;;  %v6726_v35 = vpop.f32.mrb[110].mxu1 }
 0x2c1   :  { %7352 = vst [vmem:[#allocation37_spill] sm:$0xff] %v6726_v35  ;;  %v3617_v36 = vpop.f32.mrb[46].mxu0  ;;  %v3169_v33 = vpop.f32.mrb[111].mxu1 }
 0x2c2   :  { %v6729_v54 = vadd.f32 %v3617_v36, %v6555_v30  ;;  %v3619_v57 = vpop.f32.mrb[47].mxu0 }
 0x2c6   :  { %v6731_v61 = vpop.f32.mrb[112].mxu1 }
 0x2c7   :  { %7353 = vst [vmem:[#allocation13_spill] sm:$0xff] %v6731_v61  ;;  %v3622_v16 = vpop.f32.mrb[48].mxu0  ;;  %v3174_v56 = vpop.f32.mrb[113].mxu1 }
 0x2c8   :  { %v6734_v40 = vadd.f32 %v3622_v16, %v6561_v43  ;;  %v3624_v3 = vpop.f32.mrb[49].mxu0  ;;  %v6736_v50 = vpop.f32.mrb[114].mxu1 }
 0x2c9   :  { %7354 = vst [vmem:[#allocation18_spill] sm:$0xff] %v6736_v50  ;;  %v3625_v58 = vpop.f32.mrb[50].mxu0  ;;  %v3177_v27 = vpop.f32.mrb[115].mxu1 }
 0x2ca   :  { %v6739_v2 = vadd.f32 %v3625_v58, %v6563_v18  ;;  %v3627_v33 = vpop.f32.mrb[51].mxu0 }
 0x2ce   :  { %v6741_v35 = vpop.f32.mrb[116].mxu1 }
 0x2cf   :  { %7355 = vst [vmem:[#allocation40_spill] sm:$0xff] %v6741_v35  ;;  %v3630_v30 = vpop.f32.mrb[52].mxu0  ;;  %v3182_v36 = vpop.f32.mrb[117].mxu1 }
 0x2d0   :  { %v6744_v57 = vadd.f32 %v3630_v30, %v6569_v34  ;;  %v3632_v56 = vpop.f32.mrb[53].mxu0  ;;  %v6746_v61 = vpop.f32.mrb[118].mxu1 }
 0x2d1   :  { %7356 = vst [vmem:[#allocation16_spill] sm:$0xff] %v6746_v61  ;;  %v3633_v43 = vpop.f32.mrb[54].mxu0  ;;  %v3185_v16 = vpop.f32.mrb[119].mxu1 }
 0x2d2   :  { %v6749_v3 = vadd.f32 %v3633_v43, %v6571_v10  ;;  %v3635_v27 = vpop.f32.mrb[55].mxu0 }
 0x2d6   :  { %v6751_v50 = vpop.f32.mrb[120].mxu1 }
 0x2d7   :  { %7357 = vst [vmem:[#allocation20_spill] sm:$0xff] %v6751_v50  ;;  %v3638_v18 = vpop.f32.mrb[56].mxu0  ;;  %v3190_v58 = vpop.f32.mrb[121].mxu1 }
 0x2d8   :  { %v6754_v33 = vadd.f32 %v3638_v18, %v6577_v46  ;;  %v3640_v36 = vpop.f32.mrb[57].mxu0  ;;  %v6756_v35 = vpop.f32.mrb[122].mxu1 }
 0x2d9   :  { %7358 = vst [vmem:[#allocation42_spill] sm:$0xff] %v6756_v35  ;;  %v3641_v34 = vpop.f32.mrb[58].mxu0  ;;  %v3193_v30 = vpop.f32.mrb[123].mxu1 }
 0x2da   :  { %v6759_v56 = vadd.f32 %v3641_v34, %v6579_v51  ;;  %v3643_v16 = vpop.f32.mrb[59].mxu0 }
 0x2de   :  { %v6761_v61 = vpop.f32.mrb[124].mxu1 }
 0x2df   :  { %7359 = vst [vmem:[#allocation21_spill] sm:$0xff] %v6761_v61  ;;  %v3646_v10 = vpop.f32.mrb[60].mxu0  ;;  %v3198_v43 = vpop.f32.mrb[125].mxu1  ;;  %v5089_v61 = vmov 0.0  }
 0x2e0   :  { %v6764_v27 = vadd.f32 %v3646_v10, %v6585_v17  ;;  %v3648_v58 = vpop.f32.mrb[61].mxu0  ;;  %v6766_v50 = vpop.f32.mrb[126].mxu1  ;;  %327 = vst [vmem:[#allocation3] sm:$0x1] %v5089_v61  ;;  %328 = vst [vmem:[#allocation4] sm:$0x1] %v5089_v61 }
 0x2e1   :  { %7360 = vst [vmem:[#allocation45_spill] sm:$0xff] %v6766_v50  ;;  %v3649_v46 = vpop.f32.mrb[62].mxu0  ;;  %v3201_v18 = vpop.f32.mrb[127].mxu1 }
 0x2e2   :  { %v6769_v36 = vadd.f32 %v3649_v46, %v6587_v63  ;;  %v3651_v30 = vpop.f32.mrb[63].mxu0 }
 0x2e6   :  { %v4500_v35 = vpop.f32.mrb[128].mxu1 }
 0x2e7   :  { %v3654_v51 = vpop.f32.mrb[64].mxu0  ;;  %v3824_v34 = vadd.f32 %v6610_v31, %v4500_v35  ;;  %v3815_v16 = vpop.f32.mrb[129].mxu1 }
 0x2e8   :  { %v6773_v17 = vadd.f32 %v3654_v51, %v6593_v48  ;;  %v3656_v10 = vpop.f32.mrb[65].mxu0  ;;  %v3816_v43 = vadd.f32 %v6596_v11, %v3815_v16  ;;  %v4501_v58 = vpop.f32.mrb[130].mxu1 }
 0x2e9   :  { %4072 = vst [vmem:[%s7103_s4 + $0x10] sm:$0xff] %v3824_v34  ;;  %v3657_v63 = vpop.f32.mrb[66].mxu0  ;;  %v3827_v46 = vadd.f32 %v6615_v49, %v4501_v58  ;;  %v3818_v18 = vpop.f32.mrb[131].mxu1  ;;  %v4209_v30 = vmul.f32 %v3824_v34, %v3824_v34 }
 0x2ea   :  { %7361 = vst [vmem:[#allocation23_spill] sm:$0xff] %v6773_v17  ;;  %4070 = vst [vmem:[%s7103_s4] sm:$0xff] %v3816_v43  ;;  %v6784_v31 = vadd.f32 %v3657_v63, %v6598_v21  ;;  %v3659_v48 = vpop.f32.mrb[67].mxu0  ;;  %v3819_v61 = vadd.f32 %v6601_v22, %v3818_v18  ;;  %v4207_v11 = vmul.f32 %v3816_v43, %v3816_v43 }
 0x2eb   :  { %4073 = vst [vmem:[%s7103_s4 + $0x18] sm:$0xff] %v3827_v46  ;;  %v4210_v21 = vmul.f32 %v3827_v46, %v3827_v46 }
 0x2ec   :  { %7362 = vst [vmem:[#allocation24_spill] sm:$0xff] %v6784_v31  ;;  %4071 = vst [vmem:[%s7103_s4 + $0x8] sm:$0xff] %v3819_v61  ;;  %v4135_v49 = vadd.f32 %v3819_v61, %v3816_v43  ;;  %v4208_v35 = vmul.f32 %v3819_v61, %v3819_v61 }
 0x2ee   :  { %v4136_v51 = vadd.f32 %v4135_v49, %v3824_v34  ;;  %v4271_v16 = vadd.f32 %v4208_v35, %v4207_v11  ;;  %v4504_v10 = vpop.f32.mrb[132].mxu1 }
 0x2ef   :  { %v3662_v58 = vpop.f32.mrb[68].mxu0  ;;  %v3840_v63 = vadd.f32 %v6638_v13, %v4504_v10  ;;  %v3831_v22 = vpop.f32.mrb[133].mxu1 }
 0x2f0   :  { %v4272_v18 = vadd.f32 %v4271_v16, %v4209_v30  ;;  %v6795_v48 = vadd.f32 %v3662_v58, %v6607_v15  ;;  %v3664_v50 = vpop.f32.mrb[69].mxu0  ;;  %v3832_v31 = vadd.f32 %v6624_v20, %v3831_v22  ;;  %v4137_v53 = vadd.f32 %v4136_v51, %v3827_v46  ;;  %v4505_v17 = vpop.f32.mrb[134].mxu1 }
 0x2f1   :  { %4076 = vst [vmem:[%s7103_s4 + $0x30] sm:$0xff] %v3840_v63  ;;  %v3665_v34 = vpop.f32.mrb[70].mxu0  ;;  %v3843_v43 = vadd.f32 %v6643_v45, %v4505_v17  ;;  %v3834_v61 = vpop.f32.mrb[135].mxu1 }
 0x2f2   :  { %4074 = vst [vmem:[%s7103_s4 + $0x20] sm:$0xff] %v3832_v31  ;;  %v4138_v13 = vadd.f32 %v4137_v53, %v3832_v31  ;;  %v4211_v15 = vmul.f32 %v3832_v31, %v3832_v31  ;;  %v4273_v11 = vadd.f32 %v4272_v18, %v4210_v21  ;;  %v6806_v50 = vadd.f32 %v3665_v34, %v6612_v62  ;;  %v3667_v20 = vpop.f32.mrb[71].mxu0 }
 0x2f3   :  { %4077 = vst [vmem:[%s7103_s4 + $0x38] sm:$0xff] %v3843_v43  ;;  %v3835_v46 = vadd.f32 %v6629_v32, %v3834_v61  ;;  %v4213_v31 = vmul.f32 %v3840_v63, %v3840_v63  ;;  %v4214_v22 = vmul.f32 %v3843_v43, %v3843_v43 }
 0x2f4   :  { %v4274_v49 = vadd.f32 %v4273_v11, %v4211_v15 }
 0x2f5   :  { %4075 = vst [vmem:[%s7103_s4 + $0x28] sm:$0xff] %v3835_v46  ;;  %v4139_v45 = vadd.f32 %v4138_v13, %v3835_v46  ;;  %v4212_v17 = vmul.f32 %v3835_v46, %v3835_v46 }
 0x2f6   :  { %v4508_v53 = vpop.f32.mrb[136].mxu1 }
 0x2f7   :  { %v4140_v35 = vadd.f32 %v4139_v45, %v3840_v63  ;;  %v4275_v30 = vadd.f32 %v4274_v49, %v4212_v17  ;;  %v3670_v62 = vpop.f32.mrb[72].mxu0  ;;  %v3856_v51 = vadd.f32 %v6664_v8, %v4508_v53  ;;  %v3847_v16 = vpop.f32.mrb[137].mxu1 }
 0x2f8   :  { %v6817_v10 = vadd.f32 %v3670_v62, %v6621_v19  ;;  %v3672_v21 = vpop.f32.mrb[73].mxu0  ;;  %v3848_v32 = vadd.f32 %v6652_v41, %v3847_v16  ;;  %v4509_v58 = vpop.f32.mrb[138].mxu1 }
 0x2f9   :  { %v4276_v18 = vadd.f32 %v4275_v30, %v4213_v31  ;;  %4080 = vst [vmem:[%s7103_s4 + $0x50] sm:$0xff] %v3856_v51  ;;  %v4141_v34 = vadd.f32 %v4140_v35, %v3843_v43  ;;  %v3673_v63 = vpop.f32.mrb[74].mxu0  ;;  %v3859_v61 = vadd.f32 %v6669_v12, %v4509_v58  ;;  %v3850_v13 = vpop.f32.mrb[139].mxu1  ;;  %v4217_v45 = vmul.f32 %v3856_v51, %v3856_v51 }
 0x2fa   :  { %4078 = vst [vmem:[%s7103_s4 + $0x40] sm:$0xff] %v3848_v32  ;;  %v4215_v19 = vmul.f32 %v3848_v32, %v3848_v32  ;;  %v6828_v8 = vadd.f32 %v3673_v63, %v6626_v44  ;;  %v3675_v41 = vpop.f32.mrb[75].mxu0  ;;  %v3851_v15 = vadd.f32 %v6657_v47, %v3850_v13 }
 0x2fb   :  { %v4142_v11 = vadd.f32 %v4141_v34, %v3848_v32  ;;  %v4277_v20 = vadd.f32 %v4276_v18, %v4214_v22  ;;  %4081 = vst [vmem:[%s7103_s4 + $0x58] sm:$0xff] %v3859_v61  ;;  %v4218_v21 = vmul.f32 %v3859_v61, %v3859_v61 }
 0x2fc   :  { %4079 = vst [vmem:[%s7103_s4 + $0x48] sm:$0xff] %v3851_v15  ;;  %v4216_v12 = vmul.f32 %v3851_v15, %v3851_v15 }
 0x2fd   :  { %v4278_v43 = vadd.f32 %v4277_v20, %v4215_v19  ;;  %v4143_v46 = vadd.f32 %v4142_v11, %v3851_v15 }
 0x2fe   :  { %v4512_v49 = vpop.f32.mrb[140].mxu1 }
 0x2ff   :  { %v4144_v44 = vadd.f32 %v4143_v46, %v3856_v51  ;;  %v4279_v17 = vadd.f32 %v4278_v43, %v4216_v12  ;;  %v3678_v53 = vpop.f32.mrb[76].mxu0  ;;  %v3872_v47 = vadd.f32 %v6684_v38, %v4512_v49  ;;  %v3863_v31 = vpop.f32.mrb[141].mxu1 }
 0x300   :  { %v6839_v35 = vadd.f32 %v3678_v53, %v6635_v24  ;;  %v3680_v30 = vpop.f32.mrb[77].mxu0  ;;  %v3864_v62 = vadd.f32 %v6674_v39, %v3863_v31  ;;  %v4513_v16 = vpop.f32.mrb[142].mxu1 }
 0x301   :  { %v4280_v32 = vadd.f32 %v4279_v17, %v4217_v45  ;;  %4084 = vst [vmem:[%s7103_s4 + $0x70] sm:$0xff] %v3872_v47  ;;  %v4145_v58 = vadd.f32 %v4144_v44, %v3859_v61  ;;  %v3681_v51 = vpop.f32.mrb[78].mxu0  ;;  %v3875_v22 = vadd.f32 %v6689_v5, %v4513_v16  ;;  %v3866_v18 = vpop.f32.mrb[143].mxu1  ;;  %v4221_v15 = vmul.f32 %v3872_v47, %v3872_v47 }
 0x302   :  { %4082 = vst [vmem:[%s7103_s4 + $0x60] sm:$0xff] %v3864_v62  ;;  %v4219_v24 = vmul.f32 %v3864_v62, %v3864_v62  ;;  %v6850_v38 = vadd.f32 %v3681_v51, %v6640_v28  ;;  %v3683_v39 = vpop.f32.mrb[79].mxu0  ;;  %v3867_v34 = vadd.f32 %v6679_v59, %v3866_v18 }
 0x303   :  { %v4146_v63 = vadd.f32 %v4145_v58, %v3864_v62  ;;  %v4281_v13 = vadd.f32 %v4280_v32, %v4218_v21  ;;  %4085 = vst [vmem:[%s7103_s4 + $0x78] sm:$0xff] %v3875_v22  ;;  %v4222_v44 = vmul.f32 %v3875_v22, %v3875_v22 }
 0x304   :  { %4083 = vst [vmem:[%s7103_s4 + $0x68] sm:$0xff] %v3867_v34  ;;  %v4220_v5 = vmul.f32 %v3867_v34, %v3867_v34 }
 0x305   :  { %v4282_v61 = vadd.f32 %v4281_v13, %v4219_v24  ;;  %v4147_v19 = vadd.f32 %v4146_v63, %v3867_v34 }
 0x306   :  { %v4516_v41 = vpop.f32.mrb[144].mxu1 }
 0x307   :  { %v4148_v28 = vadd.f32 %v4147_v19, %v3872_v47  ;;  %v4283_v11 = vadd.f32 %v4282_v61, %v4220_v5  ;;  %v3686_v20 = vpop.f32.mrb[80].mxu0  ;;  %v3888_v59 = vadd.f32 %v6704_v60, %v4516_v41  ;;  %v3879_v12 = vpop.f32.mrb[145].mxu1 }
 0x308   :  { %v6861_v43 = vadd.f32 %v3686_v20, %v6649_v7  ;;  %v3688_v46 = vpop.f32.mrb[81].mxu0  ;;  %v3880_v49 = vadd.f32 %v6694_v23, %v3879_v12  ;;  %v4517_v45 = vpop.f32.mrb[146].mxu1 }
 0x309   :  { %v4284_v17 = vadd.f32 %v4283_v11, %v4221_v15  ;;  %4088 = vst [vmem:[%s7103_s4 + $0x90] sm:$0xff] %v3888_v59  ;;  %v4149_v53 = vadd.f32 %v4148_v28, %v3875_v22  ;;  %v3689_v47 = vpop.f32.mrb[82].mxu0  ;;  %v3891_v31 = vadd.f32 %v6709_v29, %v4517_v45  ;;  %v3882_v30 = vpop.f32.mrb[147].mxu1  ;;  %v4225_v22 = vmul.f32 %v3888_v59, %v3888_v59 }
 0x30a   :  { %4086 = vst [vmem:[%s7103_s4 + $0x80] sm:$0xff] %v3880_v49  ;;  %v4223_v7 = vmul.f32 %v3880_v49, %v3880_v49  ;;  %v6872_v60 = vadd.f32 %v3689_v47, %v6654_v42  ;;  %v3691_v23 = vpop.f32.mrb[83].mxu0  ;;  %v3883_v62 = vadd.f32 %v6699_v6, %v3882_v30 }
 0x30b   :  { %v4150_v16 = vadd.f32 %v4149_v53, %v3880_v49  ;;  %v4285_v21 = vadd.f32 %v4284_v17, %v4222_v44  ;;  %4089 = vst [vmem:[%s7103_s4 + $0x98] sm:$0xff] %v3891_v31  ;;  %v4226_v61 = vmul.f32 %v3891_v31, %v3891_v31 }
 0x30c   :  { %4087 = vst [vmem:[%s7103_s4 + $0x88] sm:$0xff] %v3883_v62  ;;  %v4224_v29 = vmul.f32 %v3883_v62, %v3883_v62 }
 0x30d   :  { %v4286_v32 = vadd.f32 %v4285_v21, %v4223_v7  ;;  %v4151_v58 = vadd.f32 %v4150_v16, %v3883_v62 }
 0x30e   :  { %v4520_v51 = vpop.f32.mrb[148].mxu1 }
 0x30f   :  { %v4152_v42 = vadd.f32 %v4151_v58, %v3888_v59  ;;  %v4287_v18 = vadd.f32 %v4286_v32, %v4224_v29  ;;  %v3694_v24 = vpop.f32.mrb[84].mxu0  ;;  %v3904_v6 = vadd.f32 %v6724_v14, %v4520_v51  ;;  %v3895_v39 = vpop.f32.mrb[149].mxu1 }
 0x310   :  { %v6883_v34 = vadd.f32 %v3694_v24, %v6661_v37  ;;  %v3696_v63 = vpop.f32.mrb[85].mxu0  ;;  %v3896_v13 = vadd.f32 %v6714_v25, %v3895_v39  ;;  %v4521_v5 = vpop.f32.mrb[150].mxu1 }
 0x311   :  { %v4288_v19 = vadd.f32 %v4287_v18, %v4225_v22  ;;  %4092 = vst [vmem:[%s7103_s4 + $0xb0] sm:$0xff] %v3904_v6  ;;  %v4153_v41 = vadd.f32 %v4152_v42, %v3891_v31  ;;  %v3697_v15 = vpop.f32.mrb[86].mxu0  ;;  %v3907_v28 = vadd.f32 %v6729_v54, %v4521_v5  ;;  %v3898_v11 = vpop.f32.mrb[151].mxu1  ;;  %v4229_v44 = vmul.f32 %v3904_v6, %v3904_v6 }
 0x312   :  { %4090 = vst [vmem:[%s7103_s4 + $0xa0] sm:$0xff] %v3896_v13  ;;  %v4227_v37 = vmul.f32 %v3896_v13, %v3896_v13  ;;  %v6894_v14 = vadd.f32 %v3697_v15, %v6666_v0  ;;  %v3699_v25 = vpop.f32.mrb[87].mxu0  ;;  %v3899_v20 = vadd.f32 %v6719_v26, %v3898_v11 }
 0x313   :  { %v4154_v59 = vadd.f32 %v4153_v41, %v3896_v13  ;;  %v4289_v12 = vadd.f32 %v4288_v19, %v4226_v61  ;;  %4093 = vst [vmem:[%s7103_s4 + $0xb8] sm:$0xff] %v3907_v28  ;;  %v4230_v62 = vmul.f32 %v3907_v28, %v3907_v28 }
 0x314   :  { %4091 = vst [vmem:[%s7103_s4 + $0xa8] sm:$0xff] %v3899_v20  ;;  %v4228_v54 = vmul.f32 %v3899_v20, %v3899_v20 }
 0x315   :  { %v4290_v46 = vadd.f32 %v4289_v12, %v4227_v37  ;;  %v4155_v49 = vadd.f32 %v4154_v59, %v3899_v20 }
 0x316   :  { %v4524_v45 = vpop.f32.mrb[152].mxu1 }
 0x317   :  { %v4156_v0 = vadd.f32 %v4155_v49, %v3904_v6  ;;  %v4291_v17 = vadd.f32 %v4290_v46, %v4228_v54  ;;  %v3702_v53 = vpop.f32.mrb[88].mxu0  ;;  %v3920_v26 = vadd.f32 %v6744_v57, %v4524_v45  ;;  %v3911_v47 = vpop.f32.mrb[153].mxu1 }
 0x318   :  { %v6905_v31 = vadd.f32 %v3702_v53, %v6671_v55  ;;  %v3704_v30 = vpop.f32.mrb[89].mxu0  ;;  %v3912_v7 = vadd.f32 %v6734_v40, %v3911_v47  ;;  %v4525_v23 = vpop.f32.mrb[154].mxu1 }
 0x319   :  { %v4292_v16 = vadd.f32 %v4291_v17, %v4229_v44  ;;  %4096 = vst [vmem:[%s7103_s4 + $0xd0] sm:$0xff] %v3920_v26  ;;  %v4157_v21 = vadd.f32 %v4156_v0, %v3907_v28  ;;  %v3705_v29 = vpop.f32.mrb[90].mxu0  ;;  %v3923_v32 = vadd.f32 %v6749_v3, %v4525_v23  ;;  %v3914_v58 = vpop.f32.mrb[155].mxu1  ;;  %v4233_v39 = vmul.f32 %v3920_v26, %v3920_v26 }
 0x31a   :  { %4094 = vst [vmem:[%s7103_s4 + $0xc0] sm:$0xff] %v3912_v7  ;;  %v4231_v55 = vmul.f32 %v3912_v7, %v3912_v7  ;;  %v6916_v57 = vadd.f32 %v3705_v29, %v6676_v4  ;;  %v3707_v40 = vpop.f32.mrb[91].mxu0  ;;  %v3915_v51 = vadd.f32 %v6739_v2, %v3914_v58 }
 0x31b   :  { %v4158_v22 = vadd.f32 %v4157_v21, %v3912_v7  ;;  %v4293_v42 = vadd.f32 %v4292_v16, %v4230_v62  ;;  %4097 = vst [vmem:[%s7103_s4 + $0xd8] sm:$0xff] %v3923_v32  ;;  %v4234_v28 = vmul.f32 %v3923_v32, %v3923_v32  ;;  %v7363_v7 = vld [vmem:[#allocation23_spill] sm:$0xff] }
 0x31c   :  { %4095 = vst [vmem:[%s7103_s4 + $0xc8] sm:$0xff] %v3915_v51  ;;  %v4232_v3 = vmul.f32 %v3915_v51, %v3915_v51 }
 0x31d   :  { %v4294_v18 = vadd.f32 %v4293_v42, %v4231_v55  ;;  %v4159_v24 = vadd.f32 %v4158_v22, %v3915_v51  ;;  %v7365_v22 = vld [vmem:[#allocation24_spill] sm:$0xff] }
 0x31e   :  { %v4528_v6 = vpop.f32.mrb[156].mxu1 }
 0x31f   :  { %v4160_v4 = vadd.f32 %v4159_v24, %v3920_v26  ;;  %v4295_v63 = vadd.f32 %v4294_v18, %v4232_v3  ;;  %v3710_v13 = vpop.f32.mrb[92].mxu0  ;;  %v3936_v2 = vadd.f32 %v6764_v27, %v4528_v6  ;;  %v3927_v5 = vpop.f32.mrb[157].mxu1 }
 0x320   :  { %v6927_v61 = vadd.f32 %v3710_v13, %v6681_v52  ;;  %v3712_v19 = vpop.f32.mrb[93].mxu0  ;;  %v3928_v41 = vadd.f32 %v6754_v33, %v3927_v5  ;;  %v4529_v15 = vpop.f32.mrb[158].mxu1 }
 0x321   :  { %v4296_v11 = vadd.f32 %v4295_v63, %v4233_v39  ;;  %4100 = vst [vmem:[%s7103_s4 + $0xf0] sm:$0xff] %v3936_v2  ;;  %v4161_v37 = vadd.f32 %v4160_v4, %v3923_v32  ;;  %v3713_v25 = vpop.f32.mrb[94].mxu0  ;;  %v3939_v20 = vadd.f32 %v6769_v36, %v4529_v15  ;;  %v3930_v59 = vpop.f32.mrb[159].mxu1  ;;  %v4237_v0 = vmul.f32 %v3936_v2, %v3936_v2 }
 0x322   :  { %4098 = vst [vmem:[%s7103_s4 + $0xe0] sm:$0xff] %v3928_v41  ;;  %v4235_v52 = vmul.f32 %v3928_v41, %v3928_v41  ;;  %v6938_v27 = vadd.f32 %v3713_v25, %v6686_v9  ;;  %v3715_v33 = vpop.f32.mrb[95].mxu0  ;;  %v3931_v12 = vadd.f32 %v6759_v56, %v3930_v59 }
 0x323   :  { %v4162_v54 = vadd.f32 %v4161_v37, %v3928_v41  ;;  %v4297_v46 = vadd.f32 %v4296_v11, %v4234_v28  ;;  %4101 = vst [vmem:[%s7103_s4 + $0xf8] sm:$0xff] %v3939_v20  ;;  %v4238_v16 = vmul.f32 %v3939_v20, %v3939_v20  ;;  %v7366_v41 = vld [vmem:[#allocation46_spill] sm:$0xff] }
 0x324   :  { %4099 = vst [vmem:[%s7103_s4 + $0xe8] sm:$0xff] %v3931_v12  ;;  %v4236_v36 = vmul.f32 %v3931_v12, %v3931_v12 }
 0x325   :  { %v4298_v49 = vadd.f32 %v4297_v46, %v4235_v52  ;;  %v4163_v45 = vadd.f32 %v4162_v54, %v3931_v12  ;;  %v7367_v54 = vld [vmem:[#allocation12_spill] sm:$0xff] }
 0x326   :  { %v4532_v44 = vpop.f32.mrb[160].mxu1 }
 0x327   :  { %v4164_v9 = vadd.f32 %v4163_v45, %v3936_v2  ;;  %v4299_v17 = vadd.f32 %v4298_v49, %v4236_v36  ;;  %v3718_v53 = vpop.f32.mrb[96].mxu0  ;;  %v3952_v56 = vadd.f32 %v6795_v48, %v4532_v44  ;;  %v3943_v26 = vpop.f32.mrb[161].mxu1  ;;  %v7364_v48 = vld [vmem:[#allocation8_spill] sm:$0xff] }
 0x328   :  { %v6949_v47 = vadd.f32 %v3718_v53, %v6691_v1  ;;  %v3720_v30 = vpop.f32.mrb[97].mxu0  ;;  %v3944_v23 = vadd.f32 %v7363_v7, %v3943_v26  ;;  %v4533_v62 = vpop.f32.mrb[162].mxu1  ;;  %v7368_v7 = vld [vmem:[#allocation36_spill] sm:$0xff] }
 0x329   :  { %v4300_v21 = vadd.f32 %v4299_v17, %v4237_v0  ;;  %4104 = vst [vmem:[%s7103_s4 + $0x110] sm:$0xff] %v3952_v56  ;;  %v4165_v29 = vadd.f32 %v4164_v9, %v3939_v20  ;;  %v3721_v32 = vpop.f32.mrb[98].mxu0  ;;  %v3955_v58 = vadd.f32 %v6806_v50, %v4533_v62  ;;  %v3946_v55 = vpop.f32.mrb[163].mxu1  ;;  %v4241_v4 = vmul.f32 %v3952_v56, %v3952_v56 }
 0x32a   :  { %4102 = vst [vmem:[%s7103_s4 + $0x100] sm:$0xff] %v3944_v23  ;;  %v4239_v1 = vmul.f32 %v3944_v23, %v3944_v23  ;;  %v6960_v40 = vadd.f32 %v3721_v32, %v7364_v48  ;;  %v3723_v51 = vpop.f32.mrb[99].mxu0  ;;  %v3947_v42 = vadd.f32 %v7365_v22, %v3946_v55 }
 0x32b   :  { %v4166_v3 = vadd.f32 %v4165_v29, %v3944_v23  ;;  %v4301_v18 = vadd.f32 %v4300_v21, %v4238_v16  ;;  %4105 = vst [vmem:[%s7103_s4 + $0x118] sm:$0xff] %v3955_v58  ;;  %v4242_v25 = vmul.f32 %v3955_v58, %v3955_v58  ;;  %v7369_v51 = vld [vmem:[#allocation10_spill] sm:$0xff] }
 0x32c   :  { %4103 = vst [vmem:[%s7103_s4 + $0x108] sm:$0xff] %v3947_v42  ;;  %v4240_v50 = vmul.f32 %v3947_v42, %v3947_v42 }
 0x32d   :  { %v4302_v24 = vadd.f32 %v4301_v18, %v4239_v1  ;;  %v4167_v6 = vadd.f32 %v4166_v3, %v3947_v42 }
 0x32e   :  { %v4536_v39 = vpop.f32.mrb[164].mxu1 }
 0x32f   :  { %v4168_v63 = vadd.f32 %v4167_v6, %v3952_v56  ;;  %v4303_v13 = vadd.f32 %v4302_v24, %v4240_v50  ;;  %v3726_v2 = vpop.f32.mrb[100].mxu0  ;;  %v3968_v5 = vadd.f32 %v6839_v35, %v4536_v39  ;;  %v3959_v19 = vpop.f32.mrb[165].mxu1 }
 0x330   :  { %v6971_v15 = vadd.f32 %v3726_v2, %v7366_v41  ;;  %v3728_v28 = vpop.f32.mrb[101].mxu0  ;;  %v3960_v11 = vadd.f32 %v6817_v10, %v3959_v19  ;;  %v4537_v37 = vpop.f32.mrb[166].mxu1 }
 0x331   :  { %v4304_v20 = vadd.f32 %v4303_v13, %v4241_v4  ;;  %4108 = vst [vmem:[%s7103_s4 + $0x130] sm:$0xff] %v3968_v5  ;;  %v4169_v59 = vadd.f32 %v4168_v63, %v3955_v58  ;;  %v3729_v52 = vpop.f32.mrb[102].mxu0  ;;  %v3971_v33 = vadd.f32 %v6850_v38, %v4537_v37  ;;  %v3962_v12 = vpop.f32.mrb[167].mxu1  ;;  %v4245_v17 = vmul.f32 %v3968_v5, %v3968_v5 }
 0x332   :  { %4106 = vst [vmem:[%s7103_s4 + $0x120] sm:$0xff] %v3960_v11  ;;  %v4243_v35 = vmul.f32 %v3960_v11, %v3960_v11  ;;  %v6982_v46 = vadd.f32 %v3729_v52, %v7367_v54  ;;  %v3731_v10 = vpop.f32.mrb[103].mxu0  ;;  %v3963_v36 = vadd.f32 %v6828_v8, %v3962_v12  ;;  %v7371_v12 = vld [vmem:[#allocation37_spill] sm:$0xff] }
 0x333   :  { %v4170_v49 = vadd.f32 %v4169_v59, %v3960_v11  ;;  %v4305_v45 = vadd.f32 %v4304_v20, %v4242_v25  ;;  %4109 = vst [vmem:[%s7103_s4 + $0x138] sm:$0xff] %v3971_v33  ;;  %v4246_v29 = vmul.f32 %v3971_v33, %v3971_v33 }
 0x334   :  { %4107 = vst [vmem:[%s7103_s4 + $0x128] sm:$0xff] %v3963_v36  ;;  %v4244_v38 = vmul.f32 %v3963_v36, %v3963_v36 }
 0x335   :  { %v4306_v44 = vadd.f32 %v4305_v45, %v4243_v35  ;;  %v4171_v0 = vadd.f32 %v4170_v49, %v3963_v36 }
 0x336   :  { %v4540_v9 = vpop.f32.mrb[168].mxu1 }
 0x337   :  { %v4172_v53 = vadd.f32 %v4171_v0, %v3968_v5  ;;  %v4307_v56 = vadd.f32 %v4306_v44, %v4244_v38  ;;  %v3734_v26 = vpop.f32.mrb[104].mxu0  ;;  %v3984_v8 = vadd.f32 %v6883_v34, %v4540_v9  ;;  %v3975_v30 = vpop.f32.mrb[169].mxu1  ;;  %v7370_v5 = vld [vmem:[#allocation15_spill] sm:$0xff] }
 0x338   :  { %v6993_v23 = vadd.f32 %v3734_v26, %v7368_v7  ;;  %v3736_v62 = vpop.f32.mrb[105].mxu0  ;;  %v3976_v16 = vadd.f32 %v6861_v43, %v3975_v30  ;;  %v4541_v21 = vpop.f32.mrb[170].mxu1 }
 0x339   :  { %v4308_v32 = vadd.f32 %v4307_v56, %v4245_v17  ;;  %4112 = vst [vmem:[%s7103_s4 + $0x150] sm:$0xff] %v3984_v8  ;;  %v4173_v58 = vadd.f32 %v4172_v53, %v3971_v33  ;;  %v3737_v55 = vpop.f32.mrb[106].mxu0  ;;  %v3987_v1 = vadd.f32 %v6894_v14, %v4541_v21  ;;  %v3978_v48 = vpop.f32.mrb[171].mxu1  ;;  %v4249_v39 = vmul.f32 %v3984_v8, %v3984_v8  ;;  %v7372_v56 = vld [vmem:[#allocation13_spill] sm:$0xff] }
 0x33a   :  { %4110 = vst [vmem:[%s7103_s4 + $0x140] sm:$0xff] %v3976_v16  ;;  %v4247_v34 = vmul.f32 %v3976_v16, %v3976_v16  ;;  %v7004_v22 = vadd.f32 %v3737_v55, %v7369_v51  ;;  %v3739_v43 = vpop.f32.mrb[107].mxu0  ;;  %v3979_v42 = vadd.f32 %v6872_v60, %v3978_v48  ;;  %v7373_v55 = vld [vmem:[#allocation18_spill] sm:$0xff] }
 0x33b   :  { %v4174_v3 = vadd.f32 %v4173_v58, %v3976_v16  ;;  %v4309_v18 = vadd.f32 %v4308_v32, %v4246_v29  ;;  %4113 = vst [vmem:[%s7103_s4 + $0x158] sm:$0xff] %v3987_v1  ;;  %v4250_v37 = vmul.f32 %v3987_v1, %v3987_v1 }
 0x33c   :  { %4111 = vst [vmem:[%s7103_s4 + $0x148] sm:$0xff] %v3979_v42  ;;  %v4248_v14 = vmul.f32 %v3979_v42, %v3979_v42 }
 0x33d   :  { %v4310_v50 = vadd.f32 %v4309_v18, %v4247_v34  ;;  %v4175_v24 = vadd.f32 %v4174_v3, %v3979_v42 }
 0x33e   :  { %v4544_v6 = vpop.f32.mrb[172].mxu1 }
 0x33f   :  { %v4176_v4 = vadd.f32 %v4175_v24, %v3984_v8  ;;  %v4311_v63 = vadd.f32 %v4310_v50, %v4248_v14  ;;  %v3742_v13 = vpop.f32.mrb[108].mxu0  ;;  %v4000_v60 = vadd.f32 %v6927_v61, %v4544_v6  ;;  %v3991_v2 = vpop.f32.mrb[173].mxu1 }
 0x340   :  { %v4648_v19 = vadd.f32 %v3742_v13, %v7370_v5  ;;  %v3744_v41 = vpop.f32.mrb[109].mxu0  ;;  %v3992_v28 = vadd.f32 %v6905_v31, %v3991_v2  ;;  %v4545_v11 = vpop.f32.mrb[174].mxu1 }
 0x341   :  { %v4312_v25 = vadd.f32 %v4311_v63, %v4249_v39  ;;  %4116 = vst [vmem:[%s7103_s4 + $0x170] sm:$0xff] %v4000_v60  ;;  %v4177_v20 = vadd.f32 %v4176_v4, %v3987_v1  ;;  %v3745_v59 = vpop.f32.mrb[110].mxu0  ;;  %v4003_v52 = vadd.f32 %v6938_v27, %v4545_v11  ;;  %v3994_v33 = vpop.f32.mrb[175].mxu1  ;;  %v4253_v44 = vmul.f32 %v4000_v60, %v4000_v60  ;;  %v7374_v39 = vld [vmem:[#allocation40_spill] sm:$0xff] }
 0x342   :  { %4114 = vst [vmem:[%s7103_s4 + $0x160] sm:$0xff] %v3992_v28  ;;  %v4251_v61 = vmul.f32 %v3992_v28, %v3992_v28  ;;  %v4649_v35 = vadd.f32 %v3745_v59, %v7371_v12  ;;  %v3747_v31 = vpop.f32.mrb[111].mxu0  ;;  %v3995_v54 = vadd.f32 %v6916_v57, %v3994_v33 }
 0x343   :  { %v4178_v10 = vadd.f32 %v4177_v20, %v3992_v28  ;;  %v4313_v36 = vadd.f32 %v4312_v25, %v4250_v37  ;;  %4117 = vst [vmem:[%s7103_s4 + $0x178] sm:$0xff] %v4003_v52  ;;  %v4254_v62 = vmul.f32 %v4003_v52, %v4003_v52  ;;  %v7375_v25 = vld [vmem:[#allocation16_spill] sm:$0xff] }
 0x344   :  { %4115 = vst [vmem:[%s7103_s4 + $0x168] sm:$0xff] %v3995_v54  ;;  %v4252_v27 = vmul.f32 %v3995_v54, %v3995_v54 }
 0x345   :  { %v4314_v49 = vadd.f32 %v4313_v36, %v4251_v61  ;;  %v4179_v45 = vadd.f32 %v4178_v10, %v3995_v54 }
 0x346   :  { %v4548_v38 = vpop.f32.mrb[176].mxu1 }
 0x347   :  { %v4180_v0 = vadd.f32 %v4179_v45, %v4000_v60  ;;  %v4315_v9 = vadd.f32 %v4314_v49, %v4252_v27  ;;  %v3750_v17 = vpop.f32.mrb[112].mxu0  ;;  %v4016_v57 = vadd.f32 %v6971_v15, %v4548_v38  ;;  %v4007_v53 = vpop.f32.mrb[177].mxu1  ;;  %v7376_v45 = vld [vmem:[#allocation20_spill] sm:$0xff] }
 0x348   :  { %v4650_v26 = vadd.f32 %v3750_v17, %v7372_v56  ;;  %v3752_v8 = vpop.f32.mrb[113].mxu0  ;;  %v4008_v30 = vadd.f32 %v6949_v47, %v4007_v53  ;;  %v4549_v7 = vpop.f32.mrb[178].mxu1 }
 0x349   :  { %v4316_v16 = vadd.f32 %v4315_v9, %v4253_v44  ;;  %4120 = vst [vmem:[%s7103_s4 + $0x190] sm:$0xff] %v4016_v57  ;;  %v4181_v21 = vadd.f32 %v4180_v0, %v4003_v52  ;;  %v3753_v29 = vpop.f32.mrb[114].mxu0  ;;  %v4019_v32 = vadd.f32 %v6982_v46, %v4549_v7  ;;  %v4010_v58 = vpop.f32.mrb[179].mxu1  ;;  %v4257_v18 = vmul.f32 %v4016_v57, %v4016_v57 }
 0x34a   :  { %4118 = vst [vmem:[%s7103_s4 + $0x180] sm:$0xff] %v4008_v30  ;;  %v4255_v15 = vmul.f32 %v4008_v30, %v4008_v30  ;;  %v4651_v1 = vadd.f32 %v3753_v29, %v7373_v55  ;;  %v3755_v47 = vpop.f32.mrb[115].mxu0  ;;  %v4011_v48 = vadd.f32 %v6960_v40, %v4010_v58 }
 0x34b   :  { %v4182_v34 = vadd.f32 %v4181_v21, %v4008_v30  ;;  %v4317_v51 = vadd.f32 %v4316_v16, %v4254_v62  ;;  %4121 = vst [vmem:[%s7103_s4 + $0x198] sm:$0xff] %v4019_v32  ;;  %v4258_v2 = vmul.f32 %v4019_v32, %v4019_v32  ;;  %v7377_v62 = vld [vmem:[#allocation42_spill] sm:$0xff] }
 0x34c   :  { %4119 = vst [vmem:[%s7103_s4 + $0x188] sm:$0xff] %v4011_v48  ;;  %v4256_v46 = vmul.f32 %v4011_v48, %v4011_v48 }
 0x34d   :  { %v4318_v43 = vadd.f32 %v4317_v51, %v4255_v15  ;;  %v4183_v42 = vadd.f32 %v4182_v34, %v4011_v48 }
 0x34e   :  { %v4552_v3 = vpop.f32.mrb[180].mxu1 }
 0x34f   :  { %v4184_v14 = vadd.f32 %v4183_v42, %v4016_v57  ;;  %v4319_v50 = vadd.f32 %v4318_v43, %v4256_v46  ;;  %v3758_v24 = vpop.f32.mrb[116].mxu0  ;;  %v4032_v6 = vadd.f32 %v4648_v19, %v4552_v3  ;;  %v4023_v40 = vpop.f32.mrb[181].mxu1 }
 0x350   :  { %v4652_v4 = vadd.f32 %v3758_v24, %v7374_v39  ;;  %v3760_v63 = vpop.f32.mrb[117].mxu0  ;;  %v4024_v13 = vadd.f32 %v6993_v23, %v4023_v40  ;;  %v4553_v60 = vpop.f32.mrb[182].mxu1 }
 0x351   :  { %v4320_v5 = vadd.f32 %v4319_v50, %v4257_v18  ;;  %4124 = vst [vmem:[%s7103_s4 + $0x1b0] sm:$0xff] %v4032_v6  ;;  %v4185_v41 = vadd.f32 %v4184_v14, %v4019_v32  ;;  %v3761_v28 = vpop.f32.mrb[118].mxu0  ;;  %v4035_v11 = vadd.f32 %v4649_v35, %v4553_v60  ;;  %v4026_v37 = vpop.f32.mrb[183].mxu1  ;;  %v4261_v54 = vmul.f32 %v4032_v6, %v4032_v6 }
 0x352   :  { %4122 = vst [vmem:[%s7103_s4 + $0x1a0] sm:$0xff] %v4024_v13  ;;  %v4259_v19 = vmul.f32 %v4024_v13, %v4024_v13  ;;  %v4653_v20 = vadd.f32 %v3761_v28, %v7375_v25  ;;  %v3763_v59 = vpop.f32.mrb[119].mxu0  ;;  %v4027_v23 = vadd.f32 %v7004_v22, %v4026_v37 }
 0x353   :  { %v4186_v52 = vadd.f32 %v4185_v41, %v4024_v13  ;;  %v4321_v33 = vadd.f32 %v4320_v5, %v4258_v2  ;;  %4125 = vst [vmem:[%s7103_s4 + $0x1b8] sm:$0xff] %v4035_v11  ;;  %v4262_v17 = vmul.f32 %v4035_v11, %v4035_v11  ;;  %v7379_v13 = vld [vmem:[#allocation45_spill] sm:$0xff] }
 0x354   :  { %4123 = vst [vmem:[%s7103_s4 + $0x1a8] sm:$0xff] %v4027_v23  ;;  %v4260_v61 = vmul.f32 %v4027_v23, %v4027_v23 }
 0x355   :  { %v4322_v12 = vadd.f32 %v4321_v33, %v4259_v19  ;;  %v4187_v35 = vadd.f32 %v4186_v52, %v4027_v23 }
 0x356   :  { %v4556_v31 = vpop.f32.mrb[184].mxu1 }
 0x357   :  { %v4188_v10 = vadd.f32 %v4187_v35, %v4032_v6  ;;  %v4323_v36 = vadd.f32 %v4322_v12, %v4260_v61  ;;  %v3766_v27 = vpop.f32.mrb[120].mxu0  ;;  %v4048_v49 = vadd.f32 %v4652_v4, %v4556_v31  ;;  %v4039_v22 = vpop.f32.mrb[185].mxu1 }
 0x358   :  { %v4654_v38 = vadd.f32 %v3766_v27, %v7376_v45  ;;  %v3768_v44 = vpop.f32.mrb[121].mxu0  ;;  %v4040_v0 = vadd.f32 %v4650_v26, %v4039_v22  ;;  %v4557_v9 = vpop.f32.mrb[186].mxu1 }
 0x359   :  { %v4324_v57 = vadd.f32 %v4323_v36, %v4261_v54  ;;  %4128 = vst [vmem:[%s7103_s4 + $0x1d0] sm:$0xff] %v4048_v49  ;;  %v4189_v53 = vadd.f32 %v4188_v10, %v4035_v11  ;;  %v3769_v56 = vpop.f32.mrb[122].mxu0  ;;  %v4051_v8 = vadd.f32 %v4653_v20, %v4557_v9  ;;  %v4042_v30 = vpop.f32.mrb[187].mxu1  ;;  %v4265_v48 = vmul.f32 %v4048_v49, %v4048_v49  ;;  %v4206_v9 = vld [vmem:[#allocation4] sm:$0x1] }
 0x35a   :  { %4126 = vst [vmem:[%s7103_s4 + $0x1c0] sm:$0xff] %v4040_v0  ;;  %v4263_v7 = vmul.f32 %v4040_v0, %v4040_v0  ;;  %v4655_v16 = vadd.f32 %v3769_v56, %v7377_v62  ;;  %v3771_v21 = vpop.f32.mrb[123].mxu0  ;;  %v4043_v26 = vadd.f32 %v4651_v1, %v4042_v30  ;;  %v7378_v1 = vld [vmem:[#allocation21_spill] sm:$0xff] }
 0x35b   :  { %v4190_v29 = vadd.f32 %v4189_v53, %v4040_v0  ;;  %v4325_v32 = vadd.f32 %v4324_v57, %v4262_v17  ;;  %4129 = vst [vmem:[%s7103_s4 + $0x1d8] sm:$0xff] %v4051_v8  ;;  %v4266_v50 = vmul.f32 %v4051_v8, %v4051_v8 }
 0x35c   :  { %4127 = vst [vmem:[%s7103_s4 + $0x1c8] sm:$0xff] %v4043_v26  ;;  %v4264_v58 = vmul.f32 %v4043_v26, %v4043_v26 }
 0x35d   :  { %v4326_v15 = vadd.f32 %v4325_v32, %v4263_v7  ;;  %v4191_v55 = vadd.f32 %v4190_v29, %v4043_v26 }
 0x35e   :  { %v4560_v47 = vpop.f32.mrb[188].mxu1 }
 0x35f   :  { %v4192_v34 = vadd.f32 %v4191_v55, %v4048_v49  ;;  %v4327_v51 = vadd.f32 %v4326_v15, %v4264_v58  ;;  %v3774_v46 = vpop.f32.mrb[124].mxu0  ;;  %v4055_v43 = vpop.f32.mrb[189].mxu1 }
 0x360   :  { %v4656_v42 = vadd.f32 %v3774_v46, %v7378_v1  ;;  %v3776_v3 = vpop.f32.mrb[125].mxu0  ;;  %v4056_v18 = vadd.f32 %v4654_v38, %v4055_v43  ;;  %v4561_v14 = vpop.f32.mrb[190].mxu1  ;;  %v4134_v38 = vld [vmem:[#allocation3] sm:$0x1] }
 0x361   :  { %v4328_v24 = vadd.f32 %v4327_v51, %v4265_v48  ;;  %v4193_v6 = vadd.f32 %v4192_v34, %v4051_v8  ;;  %v3777_v40 = vpop.f32.mrb[126].mxu0  ;;  %v4058_v39 = vpop.f32.mrb[191].mxu1 }
 0x362   :  { %v4064_v4 = vadd.f32 %v4656_v42, %v4560_v47  ;;  %4130 = vst [vmem:[%s7103_s4 + $0x1e0] sm:$0xff] %v4056_v18  ;;  %v4267_v63 = vmul.f32 %v4056_v18, %v4056_v18  ;;  %v4657_v60 = vadd.f32 %v3777_v40, %v7379_v13  ;;  %v3779_v2 = vpop.f32.mrb[127].mxu0  ;;  %v4059_v5 = vadd.f32 %v4655_v16, %v4058_v39 }
 0x363   :  { %v4194_v41 = vadd.f32 %v4193_v6, %v4056_v18  ;;  %v4329_v28 = vadd.f32 %v4328_v24, %v4266_v50 }
 0x364   :  { %4132 = vst [vmem:[%s7103_s4 + $0x1f0] sm:$0xff] %v4064_v4  ;;  %v4067_v11 = vadd.f32 %v4657_v60, %v4561_v14  ;;  %4131 = vst [vmem:[%s7103_s4 + $0x1e8] sm:$0xff] %v4059_v5  ;;  %v4268_v37 = vmul.f32 %v4059_v5, %v4059_v5  ;;  %v4269_v20 = vmul.f32 %v4064_v4, %v4064_v4 }
 0x365   :  { %v4330_v19 = vadd.f32 %v4329_v28, %v4267_v63  ;;  %v4195_v25 = vadd.f32 %v4194_v41, %v4059_v5 }
 0x366   :  { %4133 = vst [vmem:[%s7103_s4 + $0x1f8] sm:$0xff] %v4067_v11  ;;  %v4270_v52 = vmul.f32 %v4067_v11, %v4067_v11 }
 0x367   :  { %v4196_v59 = vadd.f32 %v4195_v25, %v4064_v4  ;;  %v4331_v23 = vadd.f32 %v4330_v19, %v4268_v37 }
 0x369   :  { %v4197_v33 = vadd.f32 %v4196_v59, %v4067_v11  ;;  %v4332_v61 = vadd.f32 %v4331_v23, %v4269_v20 }
 0x36b   :  { %v4198_v12 = vrot.slane %v4197_v33, 4  ;;  %v4333_v35 = vadd.f32 %v4332_v61, %v4270_v52 }
 0x36d   :  { %v4199_v31 = vadd.f32 %v4198_v12, %v4197_v33  ;;  %v4334_v54 = vrot.slane %v4333_v35, 4 }
 0x36f   :  { %v4200_v10 = vrot.slane %v4199_v31, 2  ;;  %v4335_v36 = vadd.f32 %v4334_v54, %v4333_v35 }
 0x371   :  { %v4201_v27 = vadd.f32 %v4200_v10, %v4199_v31  ;;  %v4336_v49 = vrot.slane %v4335_v36, 2 }
 0x373   :  { %v4202_v22 = vrot.slane %v4201_v27, 1  ;;  %v4337_v45 = vadd.f32 %v4336_v49, %v4335_v36 }
 0x375   :  { %v4203_v44 = vadd.f32 %v4202_v22, %v4201_v27  ;;  %v4338_v0 = vrot.slane %v4337_v45, 1 }
 0x377   :  { %v4204_v17 = vadd.f32 %v4203_v44, %v4134_v38  ;;  %v4339_v57 = vadd.f32 %v4338_v0, %v4337_v45 }
 0x379   :  { %4205 = vst [vmem:[#allocation3] sm:$0x1] %v4204_v17  ;;  %v4340_v53 = vadd.f32 %v4339_v57, %v4206_v9 }
 0x37b   :  { %4341 = vst [vmem:[#allocation4] sm:$0x1] %v4340_v53 }
 0x380   :  { %v4345_v56 = vld [vmem:[#allocation3] sm:$0x1] }
 0x381   :  { %v4346_v8 = vmul.f32 0.001953125, %v4345_v56 }
 0x382   :  { %v4347_v30 = vld [vmem:[#allocation4] sm:$0x1] }
 0x383   :  { %v4348_v7 = vmul.f32 0.001953125, %v4347_v30  ;;  %v4349_v62 = vmul.f32 %v4346_v8, %v4346_v8  ;;  %4351 = vst [vmem:[%s7104_s5] sm:$0x1] %v4346_v8 }
 0x385   :  { %v4350_v16 = vsub.f32 %v4348_v7, %v4349_v62 }
 0x387   :  { %v4352_v21 = vadd.f32 1e-05, %v4350_v16 }
 0x389   :  { %5055 = vrsqrt.f32 %v4352_v21 }
 0x393   :  { %v5056_v26 = vpop.eup %5055 }
 0x394   :  { %4354 = vst [vmem:[%s7105_s6] sm:$0x1] %v5056_v26 }
 0x395   :  { %4367 = vsyncpa [#allocation6], 1 }

// kernel: _lambda_.5
= control target key start
LH: loop header
LB: loop body
LE: loop exit
PB: predicated region body
PF: predicated region fallthrough
CT: control target
= control target key end

     0   :  { %v7216_v1 = vmov 0   ;;  %vm985_vm0 = vcmask 1047552   ;;  %vm986_vm1 = vsmask.f32 7938  ;;  %vm1198_vm3 = vsmask.f32 7424  ;;  %s7199_s0 = inlined_call_operand.vmem [shape: f32[2,16,16,128], index: 0, kind: input, shape index: {}]   ;;  %s7200_s1 = inlined_call_operand.vmem [shape: bf16[1152,128], index: 1, kind: input, shape index: {}]   ;;  %s7201_s2 = inlined_call_operand.vmem [shape: f32[1,128], index: 2, kind: input, shape index: {}]   ;;  %s7202_s3 = inlined_call_operand.vmem [shape: f32[1,128], index: 3, kind: input, shape index: {}]   ;;  %s7203_s4 = inlined_call_operand.vmem [shape: f32[2,256,128], index: 4, kind: input, shape index: {}]   ;;  %s7204_s5 = inlined_call_operand.hbm [shape: f32[2,256,128], index: 5, kind: output, shape index: {}]  }
   0x1   :  { %v4877_v0 = vld [vmem:[%s7200_s1] sm:$0xff]   ;;  %2610 = vmatprep.subr.bf16.mxu1 %v7216_v1  ;;  %2899 = vmatprep.subr.bf16.mxu0 %v7216_v1  ;;  %v4879_v3 = vld [vmem:[%s7200_s1 + $0x8] sm:$0xff]   ;;  %v4881_v5 = vld [vmem:[%s7200_s1 + $0x10] sm:$0xff]  }
   0x2   :  { %v5019_v2 = vld [vmem:[%s7200_s1 + $0x80] sm:$0xff]   ;;  %2611 = vmatpush1.bf16.msra.mxu1 %v4877_v0  ;;  %2642 = vmatprep.mubr.bf16.mxu1 %v7216_v1  ;;  %v5030_v4 = vld [vmem:[%s7200_s1 + $0x88] sm:$0xff]   ;;  %v5041_v6 = vld [vmem:[%s7200_s1 + $0x90] sm:$0xff]  }
   0x3   :  { %2900 = vmatpush1.bf16.msra.mxu0 %v5019_v2  ;;  %2612 = vmatprep.subr.bf16.mxu1 %v7216_v1  ;;  %v4883_v7 = vld [vmem:[%s7200_s1 + $0x18] sm:$0xff]   ;;  %v4885_v9 = vld [vmem:[%s7200_s1 + $0x20] sm:$0xff]   ;;  %v4887_v11 = vld [vmem:[%s7200_s1 + $0x28] sm:$0xff]  }
   0x4   :  { %2901 = vmatprep.subr.bf16.mxu0 %v7216_v1  ;;  %v5052_v8 = vld [vmem:[%s7200_s1 + $0x98] sm:$0xff]   ;;  %v5063_v10 = vld [vmem:[%s7200_s1 + $0xa0] sm:$0xff]   ;;  %v5074_v12 = vld [vmem:[%s7200_s1 + $0xa8] sm:$0xff]  }
   0x5   :  { %v4889_v13 = vld [vmem:[%s7200_s1 + $0x30] sm:$0xff]   ;;  %v4891_v15 = vld [vmem:[%s7200_s1 + $0x38] sm:$0xff]   ;;  %v4893_v17 = vld [vmem:[%s7200_s1 + $0x40] sm:$0xff]  }
   0x6   :  { %2613 = vmatpush1.bf16.msra.mxu1 %v4879_v3  ;;  %v5085_v14 = vld [vmem:[%s7200_s1 + $0xb0] sm:$0xff]   ;;  %v5096_v16 = vld [vmem:[%s7200_s1 + $0xb8] sm:$0xff]   ;;  %v5107_v18 = vld [vmem:[%s7200_s1 + $0xc0] sm:$0xff]  }
   0x7   :  { %2902 = vmatpush1.bf16.msra.mxu0 %v5030_v4  ;;  %2614 = vmatprep.subr.bf16.mxu1 %v7216_v1  ;;  %v314_v19 = vld [vmem:[%s7199_s0] sm:$0xff]  ;;  %v315_v20 = vld [vmem:[%s7199_s0 + $0x8] sm:$0xff]  ;;  %v316_v29 = vld [vmem:[%s7199_s0 + $0x10] sm:$0xff] }
   0x8   :  { %2903 = vmatprep.subr.bf16.mxu0 %v7216_v1  ;;  %v5119_v21 = vld [vmem:[%s7201_s2] ss:$0 sm:$0xff]  ;;  %v4895_v25 = vld [vmem:[%s7200_s1 + $0x48] sm:$0xff]   ;;  %v317_v30 = vld [vmem:[%s7199_s0 + $0x18] sm:$0xff] }
   0x9   :  { %v385_v22 = vsub.f32 %v314_v19, %v5119_v21  ;;  %v386_v23 = vsub.f32 %v315_v20, %v5119_v21  ;;  %v5126_v24 = vld [vmem:[%s7202_s3] ss:$0 sm:$0xff]  ;;  %v5136_v26 = vld [vmem:[%s7200_s1 + $0xc8] sm:$0xff]   ;;  %v387_v31 = vsub.f32 %v316_v29, %v5119_v21  ;;  %v4897_v32 = vld [vmem:[%s7200_s1 + $0x50] sm:$0xff]   ;;  %v388_v35 = vsub.f32 %v317_v30, %v5119_v21 }
   0xa   :  { %2615 = vmatpush1.bf16.msra.mxu1 %v4881_v5  ;;  %v318_v37 = vld [vmem:[%s7199_s0 + $0x20] sm:$0xff]  ;;  %v5161_v38 = vld [vmem:[%s7200_s1 + $0xd0] sm:$0xff]   ;;  %v319_v42 = vld [vmem:[%s7199_s0 + $0x28] sm:$0xff] }
   0xb   :  { %2904 = vmatpush1.bf16.msra.mxu0 %v5041_v6  ;;  %2616 = vmatprep.subr.bf16.mxu1 %v7216_v1  ;;  %v456_v27 = vmul.f32 %v5126_v24, %v385_v22  ;;  %v457_v28 = vmul.f32 %v5126_v24, %v386_v23  ;;  %v458_v36 = vmul.f32 %v5126_v24, %v387_v31  ;;  %v4899_v44 = vld [vmem:[%s7200_s1 + $0x58] sm:$0xff]   ;;  %v320_v51 = vld [vmem:[%s7199_s0 + $0x30] sm:$0xff]  ;;  %v4901_v62 = vld [vmem:[%s7200_s1 + $0x60] sm:$0xff]  }
   0xc   :  { %2905 = vmatprep.subr.bf16.mxu0 %v7216_v1  ;;  %v459_v41 = vmul.f32 %v5126_v24, %v388_v35  ;;  %v389_v43 = vsub.f32 %v318_v37, %v5119_v21  ;;  %v390_v46 = vsub.f32 %v319_v42, %v5119_v21  ;;  %v321_v52 = vld [vmem:[%s7199_s0 + $0x38] sm:$0xff]  ;;  %v391_v56 = vsub.f32 %v320_v51, %v5119_v21  ;;  %vm5215_vm2 = vmand %vm985_vm0, %vm986_vm1  ;;  %v323_v22 = vld [vmem:[%s7199_s0 + $0x48] sm:$0xff] }
   0xd   :  { %v520_v33 = vmax.f32 %v456_v27, 0.0  ;;  %v521_v34 = vmax.f32 %v457_v28, 0.0  ;;  %v522_v45 = vmax.f32 %v458_v36, 0.0  ;;  %v5183_v53 = vld [vmem:[%s7200_s1 + $0xd8] sm:$0xff]   ;;  %v392_v57 = vsub.f32 %v321_v52, %v5119_v21  ;;  %v4903_v23 = vld [vmem:[%s7200_s1 + $0x68] sm:$0xff]   ;;  %v4905_v37 = vld [vmem:[%s7200_s1 + $0x70] sm:$0xff]  }
   0xe   :  { %2617 = vmatpush1.bf16.msra.mxu1 %v4883_v7  ;;  %v523_v49 = vmax.f32 %v459_v41, 0.0  ;;  %v460_v50 = vmul.f32 %v5126_v24, %v389_v43  ;;  %v461_v55 = vmul.f32 %v5126_v24, %v390_v46  ;;  %v5201_v7 = vld [vmem:[%s7200_s1 + $0xe0] sm:$0xff]   ;;  %v5235_v31 = vld [vmem:[%s7200_s1 + $0xe8] sm:$0xff]   ;;  %v394_v35 = vsub.f32 %v323_v22, %v5119_v21  ;;  %v5253_v41 = vld [vmem:[%s7200_s1 + $0xf0] sm:$0xff]  }
   0xf   :  { %2906 = vmatpush1.bf16.msra.mxu0 %v5052_v8  ;;  %2618 = vmatprep.subr.bf16.mxu1 %v7216_v1  ;;  %v584_v39 = vmin.f32 %v520_v33, 6.0  ;;  %v585_v40 = vmin.f32 %v521_v34, 6.0  ;;  %v586_v54 = vmin.f32 %v522_v45, 6.0  ;;  %v324_v45 = vld [vmem:[%s7199_s0 + $0x50] sm:$0xff]  ;;  %v325_v46 = vld [vmem:[%s7199_s0 + $0x58] sm:$0xff]  ;;  %v327_v22 = vld [vmem:[%s7199_s0 + $0x68] sm:$0xff] }
  0x10   :  { %2907 = vmatprep.subr.bf16.mxu0 %v7216_v1  ;;  %v587_v59 = vmin.f32 %v523_v49, 6.0  ;;  %v524_v60 = vmax.f32 %v460_v50, 0.0  ;;  %v525_v61 = vmax.f32 %v461_v55, 0.0  ;;  %v4907_v49 = vld [vmem:[%s7200_s1 + $0x78] sm:$0xff]   ;;  %vm5324_vm4 = vmand %vm985_vm0, %vm1198_vm3 }
  0x11   :  { %v4809_v47 = vround.rtne.f32 %v584_v39  ;;  %v4810_v48 = vround.rtne.f32 %v585_v40  ;;  %v4811_v3 = vround.rtne.f32 %v586_v54  ;;  %v5277_v52 = vld [vmem:[%s7200_s1 + $0xf8] sm:$0xff]  }
  0x12   :  { %2619 = vmatpush1.bf16.msra.mxu1 %v4885_v9  ;;  %v4812_v5 = vround.rtne.f32 %v587_v59  ;;  %v588_v9 = vmin.f32 %v524_v60, 6.0  ;;  %v589_v19 = vmin.f32 %v525_v61, 6.0  ;;  %v396_v59 = vsub.f32 %v325_v46, %v5119_v21  ;;  %v4909_v61 = vld [vmem:[%s7200_s1 + $0x100] sm:$0xff]  }
  0x13   :  { %2908 = vmatpush1.bf16.msra.mxu0 %v5063_v10  ;;  %2620 = vmatprep.subr.bf16.mxu1 %v7216_v1  ;;  %v5190_v58 = vpack.c.bf16 %v4810_v48, %v4809_v47 }
  0x14   :  { %2909 = vmatprep.subr.bf16.mxu0 %v7216_v1  ;;  %v5227_v27 = vpack.c.bf16 %v4812_v5, %v4811_v3  ;;  %v4813_v33 = vround.rtne.f32 %v588_v9  ;;  %v4814_v34 = vround.rtne.f32 %v589_v19  ;;  %v326_v19 = vld [vmem:[%s7199_s0 + $0x60] sm:$0xff] }
  0x15   :  { %v745_v63 = vshrl.u32 %v5190_v58, 16  ;;  %v748_v0 = vshll.u32 %v5190_v58, 16 }
  0x16   :  { %2621 = vmatpush1.bf16.msra.mxu1 %v4887_v11  ;;  %v462_v11 = vmul.f32 %v5126_v24, %v391_v56  ;;  %v752_v36 = vshrl.u32 %v5227_v27, 16  ;;  %v5255_v42 = vpack.c.bf16 %v4814_v34, %v4813_v33  ;;  %v755_v48 = vshll.u32 %v5227_v27, 16 }
  0x17   :  { %2910 = vmatpush1.bf16.msra.mxu0 %v5074_v12  ;;  %2622 = vmatprep.subr.bf16.mxu1 %v7216_v1 }
  0x18   :  { %2911 = vmatprep.subr.bf16.mxu0 %v7216_v1  ;;  %v526_v28 = vmax.f32 %v462_v11, 0.0  ;;  %v754_v47 = vrot.slane %v752_v36, 7  ;;  %v759_v54 = vshrl.u32 %v5255_v42, 16  ;;  %v762_v9 = vshll.u32 %v5255_v42, 16 }
  0x1a   :  { %2623 = vmatpush1.bf16.msra.mxu1 %v4889_v13  ;;  %v463_v13 = vmul.f32 %v5126_v24, %v392_v57  ;;  %v590_v39 = vmin.f32 %v526_v28, 6.0  ;;  %v395_v57 = vsub.f32 %v324_v45, %v5119_v21  ;;  %v757_v60 = vor.u32 %v755_v48, %v754_v47  ;;  %v4911_v45 = vld [vmem:[%s7200_s1 + $0x110] sm:$0xff]  }
  0x1b   :  { %2912 = vmatpush1.bf16.msra.mxu0 %v5085_v14  ;;  %2624 = vmatprep.subr.bf16.mxu1 %v7216_v1  ;;  %v761_v5 = vrot.slane %v759_v54, 7 }
  0x1c   :  { %2913 = vmatprep.subr.bf16.mxu0 %v7216_v1  ;;  %v527_v29 = vmax.f32 %v463_v13, 0.0  ;;  %v4815_v50 = vround.rtne.f32 %v590_v39  ;;  %v1110_v39 = vrot.slane %v755_v48, 1 }
  0x1e   :  { %2625 = vmatpush1.bf16.msra.mxu1 %v4891_v15  ;;  %v322_v15 = vld [vmem:[%s7199_s0 + $0x40] sm:$0xff]  ;;  %v591_v40 = vmin.f32 %v527_v29, 6.0  ;;  %v764_v29 = vor.u32 %v762_v9, %v761_v5 }
  0x1f   :  { %2914 = vmatpush1.bf16.msra.mxu0 %v5096_v16  ;;  %2626 = vmatprep.subr.bf16.mxu1 %v7216_v1  ;;  %v393_v30 = vsub.f32 %v322_v15, %v5119_v21  ;;  %v466_v15 = vmul.f32 %v5126_v24, %v395_v57 }
  0x20   :  { %2915 = vmatprep.subr.bf16.mxu0 %v7216_v1  ;;  %v4816_v51 = vround.rtne.f32 %v591_v40  ;;  %v5344_v46 = vsel %vm5215_vm2, %v764_v29, 0 }
  0x21   :  { %v464_v43 = vmul.f32 %v5126_v24, %v393_v30  ;;  %v530_v34 = vmax.f32 %v466_v15, 0.0  ;;  %v4913_v15 = vld [vmem:[%s7200_s1 + $0x120] sm:$0xff]  }
  0x22   :  { %2627 = vmatpush1.bf16.msra.mxu1 %v4893_v17  ;;  %v747_v17 = vrot.slane %v745_v63, 7  ;;  %v5288_v3 = vpack.c.bf16 %v4816_v51, %v4815_v50  ;;  %v328_v51 = vld [vmem:[%s7199_s0 + $0x70] sm:$0xff] }
  0x23   :  { %2916 = vmatpush1.bf16.msra.mxu0 %v5107_v18  ;;  %2628 = vmatprep.subr.bf16.mxu1 %v7216_v1  ;;  %v528_v55 = vmax.f32 %v464_v43, 0.0 }
  0x24   :  { %2917 = vmatprep.subr.bf16.mxu0 %v7216_v1  ;;  %v769_v43 = vshll.u32 %v5288_v3, 16 }
  0x25   :  { %v592_v11 = vmin.f32 %v528_v55, 6.0  ;;  %v329_v55 = vld [vmem:[%s7199_s0 + $0x78] sm:$0xff] }
  0x26   :  { %2629 = vmatpush1.bf16.msra.mxu1 %v4895_v25  ;;  %v750_v25 = vor.u32 %v748_v0, %v747_v17  ;;  %v5301_v17 = vsel %vm5215_vm2, %v757_v60, 0 }
  0x27   :  { %2918 = vmatpush1.bf16.msra.mxu0 %v5136_v26  ;;  %2630 = vmatprep.subr.bf16.mxu1 %v7216_v1  ;;  %v4817_v30 = vround.rtne.f32 %v592_v11 }
  0x28   :  { %2919 = vmatprep.subr.bf16.mxu0 %v7216_v1 }
  0x2a   :  { %2631 = vmatpush1.bf16.msra.mxu1 %v4897_v32  ;;  %v5239_v32 = vsel %vm5215_vm2, %v750_v25, 0  ;;  %v4910_v25 = vld [vmem:[%s7200_s1 + $0x108] sm:$0xff]  }
  0x2b   :  { %2920 = vmatpush1.bf16.msra.mxu0 %v5161_v38  ;;  %2632 = vmatprep.subr.bf16.mxu1 %v7216_v1 }
  0x2c   :  { %2921 = vmatprep.subr.bf16.mxu0 %v7216_v1  ;;  %2931 = vmatprep.mubr.bf16.mxu0 %v5239_v32 }
  0x2e   :  { %2633 = vmatpush1.bf16.msra.mxu1 %v4899_v44  ;;  %v465_v44 = vmul.f32 %v5126_v24, %v394_v35 }
  0x2f   :  { %2922 = vmatpush1.bf16.msra.mxu0 %v5183_v53  ;;  %2634 = vmatprep.subr.bf16.mxu1 %v7216_v1 }
  0x30   :  { %2923 = vmatprep.subr.bf16.mxu0 %v7216_v1  ;;  %v529_v56 = vmax.f32 %v465_v44, 0.0 }
  0x32   :  { %2635 = vmatpush1.bf16.msra.mxu1 %v4901_v62  ;;  %v1108_v62 = vrot.slane %v748_v0, 1  ;;  %v593_v13 = vmin.f32 %v529_v56, 6.0  ;;  %v467_v0 = vmul.f32 %v5126_v24, %v396_v59  ;;  %v1111_v56 = vor.u32 %v1110_v39, %v752_v36  ;;  %v4912_v59 = vld [vmem:[%s7200_s1 + $0x118] sm:$0xff]  }
  0x33   :  { %2924 = vmatpush1.bf16.msra.mxu0 %v5201_v7  ;;  %2636 = vmatprep.subr.bf16.mxu1 %v7216_v1 }
  0x34   :  { %2925 = vmatprep.subr.bf16.mxu0 %v7216_v1  ;;  %v1109_v28 = vor.u32 %v1108_v62, %v745_v63  ;;  %v4818_v33 = vround.rtne.f32 %v593_v13  ;;  %v531_v35 = vmax.f32 %v467_v0, 0.0  ;;  %v398_v63 = vsub.f32 %v327_v22, %v5119_v21 }
  0x35   :  { %v5377_v13 = vsel %vm5324_vm4, %v1111_v56, 0 }
  0x36   :  { %2637 = vmatpush1.bf16.msra.mxu1 %v4903_v23  ;;  %v766_v23 = vshrl.u32 %v5288_v3, 16  ;;  %v5337_v44 = vsel %vm5324_vm4, %v1109_v28, 0  ;;  %v5346_v47 = vpack.c.bf16 %v4818_v33, %v4817_v30  ;;  %v595_v48 = vmin.f32 %v531_v35, 6.0  ;;  %7289 = vst [vmem:[#allocation7_spill] sm:$0xff] %v5377_v13 }
  0x37   :  { %2926 = vmatpush1.bf16.msra.mxu0 %v5235_v31  ;;  %2638 = vmatprep.subr.bf16.mxu1 %v7216_v1  ;;  %v469_v50 = vmul.f32 %v5126_v24, %v398_v63 }
  0x38   :  { %2927 = vmatprep.subr.bf16.mxu0 %v7216_v1  ;;  %v768_v40 = vrot.slane %v766_v23, 7  ;;  %7288 = vst [vmem:[#allocation6_spill] sm:$0xff] %v5346_v47  ;;  %v773_v60 = vshrl.u32 %v5346_v47, 16  ;;  %v4820_v62 = vround.rtne.f32 %v595_v48  ;;  %v776_v22 = vshll.u32 %v5346_v47, 16 }
  0x39   :  { %v533_v11 = vmax.f32 %v469_v50, 0.0 }
  0x3a   :  { %2639 = vmatpush1.bf16.msra.mxu1 %v4905_v37  ;;  %v397_v37 = vsub.f32 %v326_v19, %v5119_v21  ;;  %v771_v57 = vor.u32 %v769_v43, %v768_v40  ;;  %v775_v19 = vrot.slane %v773_v60, 7 }
  0x3b   :  { %2928 = vmatpush1.bf16.msra.mxu0 %v5253_v41  ;;  %2640 = vmatprep.subr.bf16.mxu1 %v7216_v1  ;;  %v597_v33 = vmin.f32 %v533_v11, 6.0 }
  0x3c   :  { %2929 = vmatprep.subr.bf16.mxu0 %v7216_v1  ;;  %v5384_v0 = vsel %vm5215_vm2, %v771_v57, 0  ;;  %v778_v35 = vor.u32 %v776_v22, %v775_v19 }
  0x3d   :  { %v4822_v40 = vround.rtne.f32 %v597_v33 }
  0x3e   :  { %2641 = vmatpush1.bf16.msra.mxu1 %v4907_v49  ;;  %v468_v49 = vmul.f32 %v5126_v24, %v397_v37  ;;  %v5422_v48 = vsel %vm5215_vm2, %v778_v35, 0 }
  0x3f   :  { %2930 = vmatpush1.bf16.msra.mxu0 %v5277_v52  ;;  %4457 = vmatprep.subr.bf16.mxu1 %v7216_v1  ;;  %7292 = vst [vmem:[#allocation10_spill] sm:$0xff] %v5422_v48 }
  0x40   :  { %3188 = vmatprep.subr.bf16.mxu0 %v7216_v1  ;;  %v532_v5 = vmax.f32 %v468_v49, 0.0 }
  0x41   :  { %2643 = vmatmul.mubr.bf16.vlgmr.msra.gmra.mrb[0].mxu1 %v7216_v1 }
  0x42   :  { %2932 = vmatmul.mubr.bf16.vlgmr.msra.gmra.mrb[0].mxu0 %v7216_v1  ;;  %4473 = vmatpush1.bf16.msra.mxu1 %v5019_v2  ;;  %v596_v30 = vmin.f32 %v532_v5, 6.0 }
  0x43   :  { %3189 = vmatpush1.bf16.msra.mxu0 %v4909_v61  ;;  %2650 = vmatprep.mubr.bf16.mxu1 %v5190_v58  ;;  %v400_v61 = vsub.f32 %v329_v55, %v5119_v21 }
  0x44   :  { %3190 = vmatprep.subr.bf16.mxu0 %v7216_v1  ;;  %2939 = vmatprep.mubr.bf16.mxu0 %v5301_v17  ;;  %v4821_v39 = vround.rtne.f32 %v596_v30 }
  0x45   :  { %4458 = vmatprep.subr.bf16.mxu1 %v7216_v1  ;;  %v471_v28 = vmul.f32 %v5126_v24, %v400_v61  ;;  %v330_v61 = vld [vmem:[%s7199_s0 + $0x80] sm:$0xff] }
  0x46   :  { %4474 = vmatpush1.bf16.msra.mxu1 %v5030_v4  ;;  %v594_v4 = vmin.f32 %v530_v34, 6.0  ;;  %v5428_v55 = vpack.c.bf16 %v4822_v40, %v4821_v39 }
  0x47   :  { %3191 = vmatpush1.bf16.msra.mxu0 %v4910_v25  ;;  %4459 = vmatprep.subr.bf16.mxu1 %v7216_v1  ;;  %v535_v37 = vmax.f32 %v471_v28, 0.0 }
  0x48   :  { %3192 = vmatprep.subr.bf16.mxu0 %v7216_v1  ;;  %v4819_v36 = vround.rtne.f32 %v594_v4  ;;  %7293 = vst [vmem:[#allocation11_spill] sm:$0xff] %v5428_v55  ;;  %v787_v57 = vshrl.u32 %v5428_v55, 16 }
  0x49   :  { %2651 = vmatmul.mubr.bf16.gmra.mrb[4].mxu1 %v5239_v32  ;;  %v399_v32 = vsub.f32 %v328_v51, %v5119_v21 }
  0x4a   :  { %2940 = vmatmul.mubr.bf16.gmra.mrb[4].mxu0 %v5337_v44  ;;  %2658 = vmatprep.mubr.bf16.mxu1 %v5227_v27  ;;  %v5394_v29 = vpack.c.bf16 %v4820_v62, %v4819_v36  ;;  %v331_v36 = vld [vmem:[%s7199_s0 + $0x88] sm:$0xff]  ;;  %v4917_v62 = vld [vmem:[%s7200_s1 + $0x140] sm:$0xff]  }
  0x4b   :  { %3193 = vmatpush1.bf16.msra.mxu0 %v4911_v45  ;;  %2947 = vmatprep.mubr.bf16.mxu0 %v5344_v46  ;;  %v470_v25 = vmul.f32 %v5126_v24, %v399_v32  ;;  %v4915_v45 = vld [vmem:[%s7200_s1 + $0x130] sm:$0xff]  }
  0x4c   :  { %3194 = vmatprep.subr.bf16.mxu0 %v7216_v1  ;;  %4475 = vmatpush1.bf16.msra.mxu1 %v5041_v6  ;;  %v1112_v6 = vrot.slane %v762_v9, 1  ;;  %7290 = vst [vmem:[#allocation8_spill] sm:$0xff] %v5394_v29  ;;  %v4914_v9 = vld [vmem:[%s7200_s1 + $0x128] sm:$0xff]   ;;  %v780_v63 = vshrl.u32 %v5394_v29, 16  ;;  %v783_v51 = vshll.u32 %v5394_v29, 16 }
  0x4d   :  { %4460 = vmatprep.subr.bf16.mxu1 %v7216_v1 }
  0x4e   :  { %v1113_v34 = vor.u32 %v1112_v6, %v759_v54  ;;  %v1114_v54 = vrot.slane %v769_v43, 1  ;;  %v782_v50 = vrot.slane %v780_v63, 7  ;;  %v4916_v43 = vld [vmem:[%s7200_s1 + $0x138] sm:$0xff]  }
  0x4f   :  { %3195 = vmatpush1.bf16.msra.mxu0 %v4912_v59 }
  0x50   :  { %3196 = vmatprep.subr.bf16.mxu0 %v7216_v1  ;;  %4476 = vmatpush1.bf16.msra.mxu1 %v5052_v8  ;;  %v534_v8 = vmax.f32 %v470_v25, 0.0  ;;  %v5418_v4 = vsel %vm5324_vm4, %v1113_v34, 0  ;;  %v1115_v56 = vor.u32 %v1114_v54, %v766_v23 }
  0x51   :  { %2659 = vmatmul.mubr.bf16.gmra.mrb[8].mxu1 %v5301_v17  ;;  %4461 = vmatprep.subr.bf16.mxu1 %v7216_v1  ;;  %7291 = vst [vmem:[#allocation9_spill] sm:$0xff] %v5418_v4 }
  0x52   :  { %2948 = vmatmul.mubr.bf16.gmra.mrb[8].mxu0 %v5377_v13  ;;  %2666 = vmatprep.mubr.bf16.mxu1 %v5255_v42  ;;  %v598_v49 = vmin.f32 %v534_v8, 6.0  ;;  %v5453_v23 = vsel %vm5324_vm4, %v1115_v56, 0 }
  0x53   :  { %3197 = vmatpush1.bf16.msra.mxu0 %v4913_v15  ;;  %2955 = vmatprep.mubr.bf16.mxu0 %v5384_v0  ;;  %7294 = vst [vmem:[#allocation12_spill] sm:$0xff] %v5453_v23 }
  0x54   :  { %3198 = vmatprep.subr.bf16.mxu0 %v7216_v1  ;;  %4477 = vmatpush1.bf16.msra.mxu1 %v5063_v10  ;;  %v599_v10 = vmin.f32 %v535_v37, 6.0  ;;  %v4823_v59 = vround.rtne.f32 %v598_v49 }
  0x55   :  { %4462 = vmatprep.subr.bf16.mxu1 %v7216_v1 }
  0x56   :  { %v4824_v32 = vround.rtne.f32 %v599_v10 }
  0x57   :  { %3199 = vmatpush1.bf16.msra.mxu0 %v4914_v9 }
  0x58   :  { %3200 = vmatprep.subr.bf16.mxu0 %v7216_v1  ;;  %4478 = vmatpush1.bf16.msra.mxu1 %v5074_v12  ;;  %v785_v12 = vor.u32 %v783_v51, %v782_v50 }
  0x59   :  { %2667 = vmatmul.mubr.bf16.gmra.mrb[12].mxu1 %v5344_v46  ;;  %4463 = vmatprep.subr.bf16.mxu1 %v7216_v1 }
  0x5a   :  { %2956 = vmatmul.mubr.bf16.gmra.mrb[12].mxu0 %v5418_v4  ;;  %2674 = vmatprep.mubr.bf16.mxu1 %v5288_v3 }
  0x5b   :  { %3201 = vmatpush1.bf16.msra.mxu0 %v4915_v45  ;;  %2963 = vmatprep.mubr.bf16.mxu0 %v5422_v48 }
  0x5c   :  { %3202 = vmatprep.subr.bf16.mxu0 %v7216_v1  ;;  %4479 = vmatpush1.bf16.msra.mxu1 %v5085_v14  ;;  %v1116_v14 = vrot.slane %v776_v22, 1 }
  0x5d   :  { %4464 = vmatprep.subr.bf16.mxu1 %v7216_v1 }
  0x5f   :  { %3203 = vmatpush1.bf16.msra.mxu0 %v4916_v43 }
  0x60   :  { %10 = vsyncpa [#allocation4], 0  ;;  %3204 = vmatprep.subr.bf16.mxu0 %v7216_v1  ;;  %v5461_v5 = vsel %vm5215_vm2, %v785_v12, 0  ;;  %v789_v11 = vrot.slane %v787_v57, 7  ;;  %v790_v15 = vshll.u32 %v5428_v55, 16  ;;  %v5466_v6 = vpack.c.bf16 %v4824_v32, %v4823_v59  ;;  %4480 = vmatpush1.bf16.msra.mxu1 %v5096_v16  ;;  %v4918_v25 = vld [vmem:[%s7200_s1 + $0x148] sm:$0xff]  }
  0x61   :  { %7295 = vst [vmem:[#allocation13_spill] sm:$0xff] %v5461_v5  ;;  %2675 = vmatmul.mubr.bf16.gmra.mrb[16].mxu1 %v5384_v0  ;;  %v401_v19 = vsub.f32 %v330_v61, %v5119_v21  ;;  %v402_v22 = vsub.f32 %v331_v36, %v5119_v21  ;;  %4465 = vmatprep.subr.bf16.mxu1 %v7216_v1  ;;  %v1118_v35 = vrot.slane %v783_v51, 1  ;;  %v333_v8 = vld [vmem:[%s7199_s0 + $0x98] sm:$0xff]  ;;  %v335_v36 = vld [vmem:[%s7199_s0 + $0xa8] sm:$0xff]  ;;  %v7390_v2 = vld [vmem:[#allocation10_spill] sm:$0xff]  ;;  %s4978_s8 = smov [#allocation3]  }
  0x62   :  { %7296 = vst [vmem:[#allocation14_spill] sm:$0xff] %v5466_v6  ;;  %2964 = vmatmul.mubr.bf16.gmra.mrb[16].mxu0 %v5453_v23  ;;  %2682 = vmatprep.mubr.bf16.mxu1 %v5346_v47  ;;  %v1117_v16 = vor.u32 %v1116_v14, %v773_v60  ;;  %v792_v28 = vor.u32 %v790_v15, %v789_v11  ;;  %v794_v30 = vshrl.u32 %v5466_v6, 16  ;;  %v4919_v60 = vld [vmem:[%s7200_s1 + $0x150] sm:$0xff]   ;;  %v797_v40 = vshll.u32 %v5466_v6, 16  ;;  %v4920_v50 = vld [vmem:[%s7200_s1 + $0x158] sm:$0xff]   ;;  %s4252_s9 = sshll.u32 %s4978_s8, 4  ;;  %s4253_s9 = int_to_ptr.vmem [resolvable:$true] %s4252_s9 }
  0x63   :  { %3205 = vmatpush1.bf16.msra.mxu0 %v4917_v62  ;;  %2971 = vmatprep.mubr.bf16.mxu0 %v5461_v5  ;;  %v472_v33 = vmul.f32 %v5126_v24, %v401_v19  ;;  %v473_v9 = vmul.f32 %v5126_v24, %v402_v22  ;;  %v404_v10 = vsub.f32 %v333_v8, %v5119_v21  ;;  %v1120_v61 = vrot.slane %v790_v15, 1  ;;  %v4923_v8 = vld [vmem:[%s7200_s1 + $0x170] sm:$0xff]   ;;  %s4953_s12 = scalar_lea.vmem %s4253_s9, 8192  ;;  %p4958_p1 = scmp.lt.s32.totalorder %s4253_s9, %s4253_s9 }
  0x64   :  { %3206 = vmatprep.subr.bf16.mxu0 %v7216_v1  ;;  %4481 = vmatpush1.bf16.msra.mxu1 %v5107_v18  ;;  %v5489_v34 = vsel %vm5324_vm4, %v1117_v16, 0  ;;  %v332_v18 = vld [vmem:[%s7199_s0 + $0x90] sm:$0xff]  ;;  %v5503_v37 = vsel %vm5215_vm2, %v792_v28, 0  ;;  %v796_v39 = vrot.slane %v794_v30, 7  ;;  %p4954_p0 = scmp.ne.s32.totalorder %s4253_s9, %s4953_s12  ;;  %p4959_p2 = scmp.lt.s32.totalorder %s4953_s12, %s4953_s12 }
  0x65   :  { %4466 = vmatprep.subr.bf16.mxu1 %v7216_v1  ;;  %7297 = vst [vmem:[#allocation15_spill] sm:$0xff] %v5489_v34  ;;  %7298 = vst [vmem:[#allocation16_spill] sm:$0xff] %v5503_v37  ;;  %v536_v45 = vmax.f32 %v472_v33, 0.0  ;;  %v537_v54 = vmax.f32 %v473_v9, 0.0  ;;  %v403_v49 = vsub.f32 %v332_v18, %v5119_v21  ;;  %v475_v59 = vmul.f32 %v5126_v24, %v404_v10  ;;  %v336_v18 = vld [vmem:[%s7199_s0 + $0xb0] sm:$0xff] }
  0x66   :  { %v799_v51 = vor.u32 %v797_v40, %v796_v39  ;;  %v1121_v16 = vor.u32 %v1120_v61, %v787_v57  ;;  %v337_v57 = vld [vmem:[%s7199_s0 + $0xb8] sm:$0xff]  ;;  %v7412_v20 = vld [vmem:[#allocation12_spill] sm:$0xff]  ;;  %p4960_p3 = por %p4959_p2, %p4958_p1 }
  0x67   :  { %3207 = vmatpush1.bf16.msra.mxu0 %v4918_v25  ;;  %v600_v43 = vmin.f32 %v536_v45, 6.0  ;;  %v601_v56 = vmin.f32 %v537_v54, 6.0  ;;  %v474_v12 = vmul.f32 %v5126_v24, %v403_v49  ;;  %v539_v19 = vmax.f32 %v475_v59, 0.0 }
  0x68   :  { %3208 = vmatprep.subr.bf16.mxu0 %v7216_v1  ;;  %4482 = vmatpush1.bf16.msra.mxu1 %v5136_v26  ;;  %v1119_v26 = vor.u32 %v1118_v35, %v780_v63  ;;  %v4921_v63 = vld [vmem:[%s7200_s1 + $0x160] sm:$0xff]   ;;  %v5544_v62 = vsel %vm5215_vm2, %v799_v51, 0  ;;  %v406_v25 = vsub.f32 %v335_v36, %v5119_v21  ;;  %v407_v45 = vsub.f32 %v336_v18, %v5119_v21  ;;  %p4961_p4 = pnand %p4960_p3, %p4954_p0 }
  0x69   :  { %2683 = vmatmul.mubr.bf16.gmra.mrb[20].mxu1 %v5422_v48  ;;  %4467 = vmatprep.subr.bf16.mxu1 %v7216_v1  ;;  %7300 = vst [vmem:[#allocation18_spill] sm:$0xff] %v5544_v62  ;;  %v4825_v14 = vround.rtne.f32 %v600_v43  ;;  %v4826_v11 = vround.rtne.f32 %v601_v56  ;;  %v538_v15 = vmax.f32 %v474_v12, 0.0  ;;  %v603_v9 = vmin.f32 %v539_v19, 6.0 }
  0x6a   :  { %2972 = vmatmul.mubr.bf16.gmra.mrb[20].mxu0 %v5489_v34  ;;  %2690 = vmatprep.mubr.bf16.mxu1 %v5394_v29  ;;  %v5530_v32 = vsel %vm5324_vm4, %v1119_v26, 0  ;;  %v477_v35 = vmul.f32 %v5126_v24, %v406_v25  ;;  %v408_v54 = vsub.f32 %v337_v57, %v5119_v21  ;;  %v478_v43 = vmul.f32 %v5126_v24, %v407_v45  ;;  %v4927_v45 = vld [vmem:[%s7200_s1 + $0x190] sm:$0xff]  }
  0x6b   :  { %3209 = vmatpush1.bf16.msra.mxu0 %v4919_v60  ;;  %2979 = vmatprep.mubr.bf16.mxu0 %v5503_v37  ;;  %7299 = vst [vmem:[#allocation17_spill] sm:$0xff] %v5530_v32  ;;  %v5561_v28 = vpack.c.bf16 %v4826_v11, %v4825_v14  ;;  %v602_v33 = vmin.f32 %v538_v15, 6.0  ;;  %v4828_v10 = vround.rtne.f32 %v603_v9 }
  0x6c   :  { %3210 = vmatprep.subr.bf16.mxu0 %v7216_v1  ;;  %4483 = vmatpush1.bf16.msra.mxu1 %v5161_v38  ;;  %v334_v38 = vld [vmem:[%s7199_s0 + $0xa0] sm:$0xff]  ;;  %v541_v26 = vmax.f32 %v477_v35, 0.0  ;;  %v479_v56 = vmul.f32 %v5126_v24, %v408_v54  ;;  %v542_v36 = vmax.f32 %v478_v43, 0.0  ;;  %v341_v54 = vld [vmem:[%s7199_s0 + $0xd8] sm:$0xff] }
  0x6d   :  { %4468 = vmatprep.subr.bf16.mxu1 %v7216_v1  ;;  %v405_v22 = vsub.f32 %v334_v38, %v5119_v21  ;;  %7301 = vst [vmem:[#allocation19_spill] sm:$0xff] %v5561_v28  ;;  %v801_v39 = vshrl.u32 %v5561_v28, 16  ;;  %v4827_v49 = vround.rtne.f32 %v602_v33  ;;  %v804_v51 = vshll.u32 %v5561_v28, 16  ;;  %v4925_v38 = vld [vmem:[%s7200_s1 + $0x180] sm:$0xff]  }
  0x6e   :  { %v605_v61 = vmin.f32 %v541_v26, 6.0  ;;  %v543_v14 = vmax.f32 %v479_v56, 0.0 }
  0x6f   :  { %3211 = vmatpush1.bf16.msra.mxu0 %v4920_v50  ;;  %v476_v60 = vmul.f32 %v5126_v24, %v405_v22  ;;  %v803_v12 = vrot.slane %v801_v39, 7  ;;  %v5600_v59 = vpack.c.bf16 %v4828_v10, %v4827_v49 }
  0x70   :  { %3212 = vmatprep.subr.bf16.mxu0 %v7216_v1  ;;  %4484 = vmatpush1.bf16.msra.mxu1 %v5183_v53  ;;  %v4922_v53 = vld [vmem:[%s7200_s1 + $0x168] sm:$0xff]   ;;  %v607_v57 = vmin.f32 %v543_v14, 6.0 }
  0x71   :  { %2691 = vmatmul.mubr.bf16.gmra.mrb[24].mxu1 %v5461_v5  ;;  %4469 = vmatprep.subr.bf16.mxu1 %v7216_v1  ;;  %v540_v50 = vmax.f32 %v476_v60, 0.0  ;;  %7303 = vst [vmem:[#allocation21_spill] sm:$0xff] %v5600_v59  ;;  %v806_v19 = vor.u32 %v804_v51, %v803_v12  ;;  %v808_v22 = vshrl.u32 %v5600_v59, 16  ;;  %v412_v12 = vsub.f32 %v341_v54, %v5119_v21 }
  0x72   :  { %2980 = vmatmul.mubr.bf16.gmra.mrb[24].mxu0 %v5530_v32  ;;  %2698 = vmatprep.mubr.bf16.mxu1 %v5428_v55  ;;  %v4832_v56 = vround.rtne.f32 %v607_v57 }
  0x73   :  { %3213 = vmatpush1.bf16.msra.mxu0 %v4921_v63  ;;  %2987 = vmatprep.mubr.bf16.mxu0 %v5544_v62  ;;  %v604_v63 = vmin.f32 %v540_v50, 6.0  ;;  %v5631_v60 = vsel %vm5215_vm2, %v806_v19, 0  ;;  %v810_v35 = vrot.slane %v808_v22, 7  ;;  %v343_v19 = vld [vmem:[%s7199_s0 + $0xe8] sm:$0xff] }
  0x74   :  { %3214 = vmatprep.subr.bf16.mxu0 %v7216_v1  ;;  %4485 = vmatpush1.bf16.msra.mxu1 %v5201_v7  ;;  %v5574_v7 = vsel %vm5324_vm4, %v1121_v16, 0  ;;  %v606_v16 = vmin.f32 %v542_v36, 6.0 }
  0x75   :  { %4470 = vmatprep.subr.bf16.mxu1 %v7216_v1  ;;  %7302 = vst [vmem:[#allocation20_spill] sm:$0xff] %v5574_v7  ;;  %v4829_v25 = vround.rtne.f32 %v604_v63  ;;  %v4928_v63 = vld [vmem:[%s7200_s1 + $0x198] sm:$0xff]  }
  0x76   :  { %v4831_v49 = vround.rtne.f32 %v606_v16  ;;  %v5685_v16 = vld [vmem:[%s7201_s2] ss:$0 sm:$0xff] }
  0x77   :  { %3215 = vmatpush1.bf16.msra.mxu0 %v4922_v53  ;;  %v4830_v53 = vround.rtne.f32 %v605_v61 }
  0x78   :  { %3216 = vmatprep.subr.bf16.mxu0 %v7216_v1  ;;  %4486 = vmatpush1.bf16.msra.mxu1 %v5235_v31  ;;  %v4924_v31 = vld [vmem:[%s7200_s1 + $0x178] sm:$0xff]   ;;  %v5668_v14 = vpack.c.bf16 %v4832_v56, %v4831_v49 }
  0x79   :  { %2699 = vmatmul.mubr.bf16.gmra.mrb[28].mxu1 %v5503_v37  ;;  %4471 = vmatprep.subr.bf16.mxu1 %v7216_v1  ;;  %v5635_v18 = vpack.c.bf16 %v4830_v53, %v4829_v25  ;;  %v4929_v25 = vld [vmem:[%s7200_s1 + $0x1a0] sm:$0xff]  }
  0x7a   :  { %2988 = vmatmul.mubr.bf16.gmra.mrb[28].mxu0 %v5574_v7  ;;  %2706 = vmatprep.mubr.bf16.mxu1 %v5466_v6  ;;  %7305 = vst [vmem:[#allocation23_spill] sm:$0xff] %v5668_v14  ;;  %v825_v54 = vshll.u32 %v5668_v14, 16 }
  0x7b   :  { %3217 = vmatpush1.bf16.msra.mxu0 %v4923_v8  ;;  %3220 = vmatprep.mubr.bf16.mxu0 %v5337_v44  ;;  %v338_v44 = vld [vmem:[%s7199_s0 + $0xc0] sm:$0xff]  ;;  %7304 = vst [vmem:[#allocation22_spill] sm:$0xff] %v5635_v18  ;;  %v340_v8 = vld [vmem:[%s7199_s0 + $0xd0] sm:$0xff]  ;;  %v815_v43 = vshrl.u32 %v5635_v18, 16  ;;  %v818_v61 = vshll.u32 %v5635_v18, 16 }
  0x7c   :  { %3218 = vmatprep.subr.bf16.mxu0 %v7216_v1  ;;  %4487 = vmatpush1.bf16.msra.mxu1 %v5253_v41  ;;  %v339_v41 = vld [vmem:[%s7199_s0 + $0xc8] sm:$0xff]  ;;  %v409_v11 = vsub.f32 %v338_v44, %v5119_v21  ;;  %v411_v26 = vsub.f32 %v340_v8, %v5119_v21  ;;  %v414_v8 = vsub.f32 %v343_v19, %v5685_v16 }
  0x7d   :  { %4472 = vmatprep.subr.bf16.mxu1 %v7216_v1  ;;  %v410_v15 = vsub.f32 %v339_v41, %v5119_v21  ;;  %v817_v21 = vrot.slane %v815_v43, 7 }
  0x7e   :  { %v480_v33 = vmul.f32 %v5126_v24, %v409_v11  ;;  %v483_v11 = vmul.f32 %v5126_v24, %v412_v12 }
  0x7f   :  { %3219 = vmatpush1.bf16.msra.mxu0 %v4924_v31  ;;  %v481_v9 = vmul.f32 %v5126_v24, %v410_v15  ;;  %v342_v15 = vld [vmem:[%s7199_s0 + $0xe0] sm:$0xff] }
  0x80   :  { %3477 = vmatprep.subr.bf16.mxu0 %v7216_v1  ;;  %4488 = vmatpush1.bf16.msra.mxu1 %v5277_v52  ;;  %v4926_v52 = vld [vmem:[%s7200_s1 + $0x188] sm:$0xff]   ;;  %v544_v10 = vmax.f32 %v480_v33, 0.0  ;;  %v413_v33 = vsub.f32 %v342_v15, %v5685_v16  ;;  %v547_v57 = vmax.f32 %v483_v11, 0.0 }
  0x81   :  { %2707 = vmatmul.mubr.bf16.gmra.mrb[32].mxu1 %v5544_v62  ;;  %v545_v50 = vmax.f32 %v481_v9, 0.0  ;;  %v820_v9 = vor.u32 %v818_v61, %v817_v21 }
  0x82   :  { %3221 = vmatmul.mubr.bf16.vlgmr.msra.gmra.mrb[0].mxu0 %v5190_v58  ;;  %2714 = vmatprep.mubr.bf16.mxu1 %v5561_v28  ;;  %v811_v58 = vshll.u32 %v5600_v59, 16  ;;  %v608_v44 = vmin.f32 %v544_v10, 6.0  ;;  %v611_v12 = vmin.f32 %v547_v57, 6.0 }
  0x83   :  { %3478 = vmatpush1.bf16.msra.mxu0 %v4925_v38  ;;  %3228 = vmatprep.mubr.bf16.mxu0 %v5377_v13  ;;  %v609_v41 = vmin.f32 %v545_v50, 6.0  ;;  %v482_v38 = vmul.f32 %v5126_v24, %v411_v26  ;;  %v5705_v50 = vld [vmem:[%s7202_s3] ss:$0 sm:$0xff] }
  0x84   :  { %3479 = vmatprep.subr.bf16.mxu0 %v7216_v1  ;;  %v813_v31 = vor.u32 %v811_v58, %v810_v35  ;;  %v4833_v53 = vround.rtne.f32 %v608_v44  ;;  %v7211_v35 = vshrl.u32 %v5668_v14, 16  ;;  %v484_v26 = vmul.f32 %v5705_v50, %v413_v33  ;;  %v4931_v44 = vld [vmem:[%s7200_s1 + $0x1b0] sm:$0xff]  }
  0x85   :  { %v546_v24 = vmax.f32 %v482_v38, 0.0  ;;  %v4836_v11 = vround.rtne.f32 %v611_v12 }
  0x86   :  { %v5664_v36 = vsel %vm5215_vm2, %v813_v31, 0  ;;  %v5710_v31 = vsel %vm5215_vm2, %v820_v9, 0  ;;  %v824_v56 = vrot.slane %v7211_v35, 7  ;;  %v548_v15 = vmax.f32 %v484_v26, 0.0 }
  0x87   :  { %3480 = vmatpush1.bf16.msra.mxu0 %v4926_v52  ;;  %v4834_v52 = vround.rtne.f32 %v609_v41  ;;  %v610_v10 = vmin.f32 %v546_v24, 6.0 }
  0x88   :  { %3481 = vmatprep.subr.bf16.mxu0 %v7216_v1  ;;  %v827_v21 = vor.u32 %v825_v54, %v824_v56  ;;  %v612_v9 = vmin.f32 %v548_v15, 6.0 }
  0x89   :  { %2715 = vmatmul.mubr.bf16.gmra.mrb[36].mxu1 %v5631_v60  ;;  %v5700_v49 = vpack.c.bf16 %v4834_v52, %v4833_v53  ;;  %v4835_v38 = vround.rtne.f32 %v610_v10  ;;  %v4933_v10 = vld [vmem:[%s7200_s1 + $0x1c0] sm:$0xff]  }
  0x8a   :  { %3229 = vmatmul.mubr.bf16.gmra.mrb[4].mxu0 %v5227_v27  ;;  %2722 = vmatprep.mubr.bf16.mxu1 %v5600_v59  ;;  %v5735_v24 = vsel %vm5215_vm2, %v827_v21, 0  ;;  %v4934_v21 = vld [vmem:[%s7200_s1 + $0x1c8] sm:$0xff]  }
  0x8b   :  { %3236 = vmatprep.mubr.bf16.mxu0 %v5418_v4  ;;  %3482 = vmatpush1.bf16.msra.mxu0 %v4927_v45  ;;  %v4930_v45 = vld [vmem:[%s7200_s1 + $0x1a8] sm:$0xff]   ;;  %7306 = vst [vmem:[#allocation24_spill] sm:$0xff] %v5700_v49  ;;  %v7208_v41 = vshrl.u32 %v5700_v49, 16  ;;  %v7210_v52 = vshll.u32 %v5700_v49, 16  ;;  %v5737_v33 = vpack.c.bf16 %v4836_v11, %v4835_v38 }
  0x8c   :  { %3483 = vmatprep.subr.bf16.mxu0 %v7216_v1 }
  0x8d   :  { %v831_v53 = vrot.slane %v7208_v41, 7  ;;  %7307 = vst [vmem:[#allocation25_spill] sm:$0xff] %v5737_v33 }
  0x8f   :  { %3484 = vmatpush1.bf16.msra.mxu0 %v4928_v63  ;;  %v485_v63 = vmul.f32 %v5705_v50, %v414_v8  ;;  %v346_v8 = vld [vmem:[%s7199_s0 + $0x100] sm:$0xff]  ;;  %v834_v12 = vor.u32 %v7210_v52, %v831_v53  ;;  %v7207_v53 = vshll.u32 %v5737_v33, 16 }
  0x90   :  { %3485 = vmatprep.subr.bf16.mxu0 %v7216_v1  ;;  %v417_v26 = vsub.f32 %v346_v8, %v5685_v16  ;;  %v349_v8 = vld [vmem:[%s7199_s0 + $0x118] sm:$0xff] }
  0x91   :  { %2723 = vmatmul.mubr.bf16.gmra.mrb[40].mxu1 %v5664_v36  ;;  %v549_v19 = vmax.f32 %v485_v63, 0.0  ;;  %v7205_v63 = vshrl.u32 %v5737_v33, 16 }
  0x92   :  { %3237 = vmatmul.mubr.bf16.gmra.mrb[8].mxu0 %v5255_v42  ;;  %2730 = vmatprep.mubr.bf16.mxu1 %v5635_v18  ;;  %v488_v11 = vmul.f32 %v5705_v50, %v417_v26 }
  0x93   :  { %3244 = vmatprep.mubr.bf16.mxu0 %v5453_v23  ;;  %3486 = vmatpush1.bf16.msra.mxu0 %v4929_v25  ;;  %v4932_v25 = vld [vmem:[%s7200_s1 + $0x1b8] sm:$0xff]   ;;  %v613_v57 = vmin.f32 %v549_v19, 6.0  ;;  %v5766_v19 = vsel %vm5215_vm2, %v834_v12, 0 }
  0x94   :  { %3487 = vmatprep.subr.bf16.mxu0 %v7216_v1  ;;  %v552_v26 = vmax.f32 %v488_v11, 0.0 }
  0x95   :  { %v4838_v38 = vround.rtne.f32 %v613_v57  ;;  %v348_v57 = vld [vmem:[%s7199_s0 + $0x110] sm:$0xff] }
  0x96   :  { %v419_v12 = vsub.f32 %v348_v57, %v5685_v16  ;;  %v616_v11 = vmin.f32 %v552_v26, 6.0 }
  0x97   :  { %3488 = vmatpush1.bf16.msra.mxu0 %v4930_v45  ;;  %v347_v45 = vld [vmem:[%s7199_s0 + $0x108] sm:$0xff] }
  0x98   :  { %3489 = vmatprep.subr.bf16.mxu0 %v7216_v1  ;;  %v418_v56 = vsub.f32 %v347_v45, %v5685_v16  ;;  %v4935_v45 = vld [vmem:[%s7200_s1 + $0x1d0] sm:$0xff]   ;;  %v490_v57 = vmul.f32 %v5705_v50, %v419_v12  ;;  %v4841_v12 = vround.rtne.f32 %v616_v11 }
  0x99   :  { %2731 = vmatmul.mubr.bf16.gmra.mrb[44].mxu1 %v5710_v31 }
  0x9a   :  { %3245 = vmatmul.mubr.bf16.gmra.mrb[12].mxu0 %v5288_v3  ;;  %2738 = vmatprep.mubr.bf16.mxu1 %v5668_v14  ;;  %v489_v15 = vmul.f32 %v5705_v50, %v418_v56 }
  0x9b   :  { %3252 = vmatprep.mubr.bf16.mxu0 %v5489_v34  ;;  %3490 = vmatpush1.bf16.msra.mxu0 %v4931_v44  ;;  %v4837_v44 = vround.rtne.f32 %v612_v9 }
  0x9c   :  { %3491 = vmatprep.subr.bf16.mxu0 %v7216_v1  ;;  %v553_v56 = vmax.f32 %v489_v15, 0.0 }
  0x9d   :  { %v5771_v9 = vpack.c.bf16 %v4838_v38, %v4837_v44  ;;  %v420_v44 = vsub.f32 %v349_v8, %v5685_v16 }
  0x9e   :  { %v617_v15 = vmin.f32 %v553_v56, 6.0  ;;  %v1124_v56 = vrot.slane %v804_v51, 1  ;;  %v4936_v51 = vld [vmem:[%s7200_s1 + $0x1d8] sm:$0xff]  }
  0x9f   :  { %3492 = vmatpush1.bf16.msra.mxu0 %v4932_v25  ;;  %v838_v25 = vrot.slane %v7205_v63, 7  ;;  %7308 = vst [vmem:[#allocation26_spill] sm:$0xff] %v5771_v9  ;;  %v491_v8 = vmul.f32 %v5705_v50, %v420_v44 }
  0xa0   :  { %3493 = vmatprep.subr.bf16.mxu0 %v7216_v1  ;;  %v4842_v44 = vround.rtne.f32 %v617_v15  ;;  %v1125_v11 = vor.u32 %v1124_v56, %v801_v39  ;;  %v353_v39 = vld [vmem:[%s7199_s0 + $0x138] sm:$0xff] }
  0xa1   :  { %2739 = vmatmul.mubr.bf16.gmra.mrb[48].mxu1 %v5735_v24  ;;  %v841_v38 = vor.u32 %v7207_v53, %v838_v25 }
  0xa2   :  { %3253 = vmatmul.mubr.bf16.gmra.mrb[16].mxu0 %v5346_v47  ;;  %2746 = vmatprep.mubr.bf16.mxu1 %v5700_v49  ;;  %v5831_v15 = vpack.c.bf16 %v4842_v44, %v4841_v12 }
  0xa3   :  { %3260 = vmatprep.mubr.bf16.mxu0 %v5530_v32  ;;  %3494 = vmatpush1.bf16.msra.mxu0 %v4933_v10  ;;  %v1122_v10 = vrot.slane %v797_v40, 1  ;;  %v5801_v63 = vsel %vm5215_vm2, %v841_v38, 0  ;;  %v554_v38 = vmax.f32 %v490_v57, 0.0 }
  0xa4   :  { %3495 = vmatprep.subr.bf16.mxu0 %v7216_v1 }
  0xa5   :  { %v1123_v40 = vor.u32 %v1122_v10, %v794_v30  ;;  %v350_v30 = vld [vmem:[%s7199_s0 + $0x120] sm:$0xff]  ;;  %v351_v10 = vld [vmem:[%s7199_s0 + $0x128] sm:$0xff]  ;;  %v618_v57 = vmin.f32 %v554_v38, 6.0 }
  0xa6   :  { %v421_v41 = vsub.f32 %v350_v30, %v5685_v16 }
  0xa7   :  { %3496 = vmatpush1.bf16.msra.mxu0 %v4934_v21  ;;  %v7206_v21 = vshrl.u32 %v5771_v9, 16  ;;  %v5814_v26 = vsel %vm5324_vm4, %v1123_v40, 0  ;;  %v422_v40 = vsub.f32 %v351_v10, %v5685_v16  ;;  %v4843_v56 = vround.rtne.f32 %v618_v57 }
  0xa8   :  { %3497 = vmatprep.subr.bf16.mxu0 %v7216_v1  ;;  %v492_v30 = vmul.f32 %v5705_v50, %v421_v41  ;;  %v7212_v41 = vshrl.u32 %v5831_v15, 16  ;;  %v7214_v57 = vshll.u32 %v5831_v15, 16 }
  0xa9   :  { %2747 = vmatmul.mubr.bf16.gmra.mrb[52].mxu1 %v5766_v19  ;;  %v845_v25 = vrot.slane %v7206_v21, 7  ;;  %v555_v21 = vmax.f32 %v491_v8, 0.0  ;;  %v493_v10 = vmul.f32 %v5705_v50, %v422_v40 }
  0xaa   :  { %3261 = vmatmul.mubr.bf16.gmra.mrb[20].mxu0 %v5394_v29  ;;  %2754 = vmatprep.mubr.bf16.mxu1 %v5737_v33  ;;  %v556_v38 = vmax.f32 %v492_v30, 0.0 }
  0xab   :  { %3268 = vmatprep.mubr.bf16.mxu0 %v5574_v7  ;;  %3498 = vmatpush1.bf16.msra.mxu0 %v4935_v45  ;;  %v7209_v45 = vshll.u32 %v5771_v9, 16  ;;  %v619_v8 = vmin.f32 %v555_v21, 6.0  ;;  %v5848_v21 = vsel %vm5324_vm4, %v1125_v11, 0  ;;  %v557_v40 = vmax.f32 %v493_v10, 0.0  ;;  %v354_v10 = vld [vmem:[%s7199_s0 + $0x140] sm:$0xff] }
  0xac   :  { %3499 = vmatprep.subr.bf16.mxu0 %v7216_v1  ;;  %7309 = vst [vmem:[#allocation27_spill] sm:$0xff] %v5848_v21  ;;  %v852_v11 = vrot.slane %v7212_v41, 7  ;;  %v620_v52 = vmin.f32 %v556_v38, 6.0  ;;  %v425_v38 = vsub.f32 %v354_v10, %v5685_v16 }
  0xad   :  { %v848_v53 = vor.u32 %v7209_v45, %v845_v25  ;;  %v352_v45 = vld [vmem:[%s7199_s0 + $0x130] sm:$0xff]  ;;  %v4844_v12 = vround.rtne.f32 %v619_v8  ;;  %v621_v35 = vmin.f32 %v557_v40, 6.0 }
  0xae   :  { %v423_v44 = vsub.f32 %v352_v45, %v5685_v16  ;;  %v4845_v40 = vround.rtne.f32 %v620_v52 }
  0xaf   :  { %3500 = vmatpush1.bf16.msra.mxu0 %v4936_v51  ;;  %v5836_v25 = vsel %vm5215_vm2, %v848_v53, 0  ;;  %v1126_v53 = vrot.slane %v811_v58, 1  ;;  %v424_v51 = vsub.f32 %v353_v39, %v5685_v16  ;;  %v5864_v8 = vpack.c.bf16 %v4844_v12, %v4843_v56 }
  0xb0   :  { %3501 = vmatprep.subr.bf16.mxu0 %v7216_v1  ;;  %v494_v45 = vmul.f32 %v5705_v50, %v423_v44  ;;  %v855_v56 = vor.u32 %v7214_v57, %v852_v11  ;;  %v5894_v11 = vld [vmem:[%s7200_s1 + $0x200] sm:$0xff]  }
  0xb1   :  { %2755 = vmatmul.mubr.bf16.gmra.mrb[56].mxu1 %v5801_v63  ;;  %v1127_v58 = vor.u32 %v1126_v53, %v808_v22  ;;  %7310 = vst [vmem:[#allocation28_spill] sm:$0xff] %v5864_v8  ;;  %v495_v30 = vmul.f32 %v5705_v50, %v424_v51  ;;  %v355_v22 = vld [vmem:[%s7199_s0 + $0x148] sm:$0xff]  ;;  %v1128_v53 = vrot.slane %v818_v61, 1  ;;  %v7213_v12 = vshrl.u32 %v5864_v8, 16  ;;  %v4937_v61 = vld [vmem:[%s7200_s1 + $0x1e0] sm:$0xff]   ;;  %4377 = vmatprep.subr.bf16.mxu1 %v5894_v11 }
  0xb2   :  { %3269 = vmatmul.mubr.bf16.gmra.mrb[24].mxu0 %v5428_v55  ;;  %2762 = vmatprep.mubr.bf16.mxu1 %v5771_v9  ;;  %v558_v44 = vmax.f32 %v494_v45, 0.0  ;;  %v4846_v51 = vround.rtne.f32 %v621_v35  ;;  %v426_v41 = vsub.f32 %v355_v22, %v5685_v16  ;;  %v5902_v35 = vsel %vm5215_vm2, %v855_v56, 0  ;;  %v356_v22 = vld [vmem:[%s7199_s0 + $0x150] sm:$0xff] }
  0xb3   :  { %3276 = vmatprep.mubr.bf16.mxu0 %v5814_v26  ;;  %v5876_v39 = vsel %vm5324_vm4, %v1127_v58, 0  ;;  %v559_v58 = vmax.f32 %v495_v30, 0.0  ;;  %v1129_v45 = vor.u32 %v1128_v53, %v815_v43  ;;  %3502 = vmatpush1.bf16.msra.mxu0 %v4937_v61  ;;  %v859_v52 = vrot.slane %v7213_v12, 7  ;;  %v357_v43 = vld [vmem:[%s7199_s0 + $0x158] sm:$0xff] }
  0xb4   :  { %v622_v10 = vmin.f32 %v558_v44, 6.0  ;;  %3503 = vmatprep.subr.bf16.mxu0 %v7216_v1  ;;  %v5914_v53 = vpack.c.bf16 %v4846_v51, %v4845_v40  ;;  %v496_v61 = vmul.f32 %v5705_v50, %v425_v38  ;;  %v497_v12 = vmul.f32 %v5705_v50, %v426_v41  ;;  %v344_v41 = vld [vmem:[%s7199_s0 + $0xf0] sm:$0xff] }
  0xb5   :  { %v623_v56 = vmin.f32 %v559_v58, 6.0  ;;  %v1130_v44 = vrot.slane %v825_v54, 1  ;;  %v5922_v57 = vsel %vm5324_vm4, %v1129_v45, 0  ;;  %v427_v30 = vsub.f32 %v356_v22, %v5685_v16  ;;  %v345_v54 = vld [vmem:[%s7199_s0 + $0xf8] sm:$0xff] }
  0xb6   :  { %7311 = vst [vmem:[#allocation29_spill] sm:$0xff] %v5914_v53  ;;  %v428_v7 = vsub.f32 %v357_v43, %v5685_v16  ;;  %v7312_v40 = vshll.u32 %v5864_v8, 16  ;;  %v4847_v58 = vround.rtne.f32 %v622_v10  ;;  %v7221_v38 = vshrl.u32 %v5914_v53, 16 }
  0xb7   :  { %v4848_v45 = vround.rtne.f32 %v623_v56  ;;  %v560_v22 = vmax.f32 %v496_v61, 0.0  ;;  %v561_v43 = vmax.f32 %v497_v12, 0.0  ;;  %v415_v32 = vsub.f32 %v344_v41, %v5685_v16 }
  0xb8   :  { %v862_v51 = vor.u32 %v7312_v40, %v859_v52  ;;  %v7313_v52 = vshrl.u32 %v5668_v14, 16  ;;  %v498_v40 = vmul.f32 %v5705_v50, %v427_v30  ;;  %v416_v34 = vsub.f32 %v345_v54, %v5685_v16  ;;  %v359_v30 = vld [vmem:[%s7199_s0 + $0x168] sm:$0xff] }
  0xb9   :  { %2763 = vmatmul.mubr.bf16.gmra.mrb[60].mxu1 %v5836_v25  ;;  %v866_v12 = vrot.slane %v7221_v38, 7  ;;  %v5952_v61 = vpack.c.bf16 %v4848_v45, %v4847_v58  ;;  %v7314_v41 = vshll.u32 %v5700_v49, 16  ;;  %v486_v45 = vmul.f32 %v5705_v50, %v415_v32 }
  0xba   :  { %3277 = vmatmul.mubr.bf16.gmra.mrb[28].mxu0 %v5466_v6  ;;  %2770 = vmatprep.mubr.bf16.mxu1 %v7216_v1  ;;  %v1131_v10 = vor.u32 %v1130_v44, %v7313_v52  ;;  %v5947_v23 = vsel %vm5215_vm2, %v862_v51, 0  ;;  %v624_v44 = vmin.f32 %v560_v22, 6.0  ;;  %v625_v52 = vmin.f32 %v561_v43, 6.0 }
  0xbb   :  { %3284 = vmatprep.mubr.bf16.mxu0 %v5848_v21  ;;  %v1132_v54 = vrot.slane %v7314_v41, 1  ;;  %v562_v38 = vmax.f32 %v498_v40, 0.0  ;;  %v487_v22 = vmul.f32 %v5705_v50, %v416_v34  ;;  %v430_v56 = vsub.f32 %v359_v30, %v5685_v16  ;;  %v4939_v34 = vld [vmem:[%s7200_s1 + $0x1e8] sm:$0xff]  }
  0xbc   :  { %v5962_v51 = vsel %vm5324_vm4, %v1131_v10, 0  ;;  %v7315_v10 = vshll.u32 %v5914_v53, 16  ;;  %v7227_v40 = vshrl.u32 %v5952_v61, 16  ;;  %v4850_v41 = vround.rtne.f32 %v625_v52  ;;  %3504 = vmatpush1.bf16.msra.mxu0 %v4939_v34 }
  0xbd   :  { %v7316_v32 = vshrl.u32 %v5700_v49, 16  ;;  %v626_v30 = vmin.f32 %v562_v38, 6.0 }
  0xbe   :  { %v869_v4 = vor.u32 %v7315_v10, %v866_v12  ;;  %v501_v10 = vmul.f32 %v5705_v50, %v430_v56  ;;  %v361_v56 = vld [vmem:[%s7199_s0 + $0x178] sm:$0xff] }
  0xbf   :  { %v432_v62 = vsub.f32 %v361_v56, %v5685_v16 }
  0xc0   :  { %v5987_v52 = vsel %vm5215_vm2, %v869_v4, 0  ;;  %v7319_v4 = vshll.u32 %v5737_v33, 16 }
  0xc1   :  { %2771 = vmatmul.mubr.bf16.gmra.mrb[64].mxu1 %v7216_v1  ;;  %v499_v1 = vmul.f32 %v5705_v50, %v428_v7  ;;  %v358_v7 = vld [vmem:[%s7199_s0 + $0x160] sm:$0xff] }
  0xc2   :  { %3285 = vmatmul.mubr.bf16.gmra.mrb[32].mxu0 %v5561_v28  ;;  %2778 = vmatprep.mubr.bf16.mxu1 %v5831_v15  ;;  %v429_v43 = vsub.f32 %v358_v7, %v5685_v16  ;;  %v1133_v7 = vor.u32 %v1132_v54, %v7316_v32  ;;  %v873_v28 = vrot.slane %v7227_v40, 7  ;;  %v565_v40 = vmax.f32 %v501_v10, 0.0 }
  0xc3   :  { %3292 = vmatprep.mubr.bf16.mxu0 %v5876_v39  ;;  %v563_v58 = vmax.f32 %v499_v1, 0.0  ;;  %v4849_v1 = vround.rtne.f32 %v624_v44  ;;  %v7317_v44 = vmov 0  }
  0xc4   :  { %v500_v12 = vmul.f32 %v5705_v50, %v429_v43  ;;  %3505 = vmatprep.subr.bf16.mxu0 %v7317_v44  ;;  %v4851_v43 = vround.rtne.f32 %v626_v30  ;;  %v629_v56 = vmin.f32 %v565_v40, 6.0  ;;  %v363_v40 = vld [vmem:[%s7199_s0 + $0x188] sm:$0xff] }
  0xc5   :  { %v627_v13 = vmin.f32 %v563_v58, 6.0  ;;  %v5992_v38 = vpack.c.bf16 %v4850_v41, %v4849_v1  ;;  %v360_v58 = vld [vmem:[%s7199_s0 + $0x170] sm:$0xff] }
  0xc6   :  { %v564_v41 = vmax.f32 %v500_v12, 0.0  ;;  %v431_v54 = vsub.f32 %v360_v58, %v5685_v16 }
  0xc7   :  { %7318 = vst [vmem:[#allocation30_spill] sm:$0xff] %v5992_v38  ;;  %v4852_v34 = vround.rtne.f32 %v627_v13  ;;  %v7232_v30 = vshrl.u32 %v5992_v38, 16  ;;  %v7321_v13 = vshrl.u32 %v5737_v33, 16  ;;  %v7233_v37 = vshll.u32 %v5992_v38, 16 }
  0xc8   :  { %v628_v58 = vmin.f32 %v564_v41, 6.0 }
  0xc9   :  { %2779 = vmatmul.mubr.bf16.gmra.mrb[68].mxu1 %v5902_v35 }
  0xca   :  { %3293 = vmatmul.mubr.bf16.gmra.mrb[36].mxu0 %v5600_v59  ;;  %2786 = vmatprep.mubr.bf16.mxu1 %v5864_v8  ;;  %v551_v59 = vmax.f32 %v487_v22, 0.0  ;;  %v1134_v22 = vrot.slane %v7319_v4, 1  ;;  %v502_v4 = vmul.f32 %v5705_v50, %v431_v54 }
  0xcb   :  { %3300 = vmatprep.mubr.bf16.mxu0 %v5922_v57 }
  0xcc   :  { %v615_v1 = vmin.f32 %v551_v59, 6.0  ;;  %v1135_v59 = vor.u32 %v1134_v22, %v7321_v13  ;;  %v362_v22 = vld [vmem:[%s7199_s0 + $0x180] sm:$0xff]  ;;  %v566_v41 = vmax.f32 %v502_v4, 0.0 }
  0xce   :  { %v4840_v10 = vround.rtne.f32 %v615_v1  ;;  %v4854_v1 = vround.rtne.f32 %v629_v56 }
  0xd1   :  { %2787 = vmatmul.mubr.bf16.gmra.mrb[72].mxu1 %v5947_v23 }
  0xd2   :  { %3301 = vmatmul.mubr.bf16.gmra.mrb[40].mxu0 %v5635_v18  ;;  %2794 = vmatprep.mubr.bf16.mxu1 %v5914_v53  ;;  %v550_v18 = vmax.f32 %v486_v45, 0.0  ;;  %v6002_v45 = vsel %vm5324_vm4, %v1133_v7, 0  ;;  %v7320_v7 = vshll.u32 %v5952_v61, 16 }
  0xd3   :  { %3308 = vmatprep.mubr.bf16.mxu0 %v5962_v51 }
  0xd4   :  { %v614_v32 = vmin.f32 %v550_v18, 6.0  ;;  %v876_v6 = vor.u32 %v7320_v7, %v873_v28  ;;  %v6017_v18 = vpack.c.bf16 %v4852_v34, %v4851_v43  ;;  %v880_v7 = vrot.slane %v7232_v30, 7 }
  0xd5   :  { %v433_v30 = vsub.f32 %v362_v22, %v5685_v16  ;;  %v630_v22 = vmin.f32 %v566_v41, 6.0 }
  0xd6   :  { %7322 = vst [vmem:[#allocation31_spill] sm:$0xff] %v6017_v18  ;;  %v4839_v12 = vround.rtne.f32 %v614_v32  ;;  %v6023_v28 = vsel %vm5215_vm2, %v876_v6, 0  ;;  %v7323_v6 = vshll.u32 %v5771_v9, 16  ;;  %v7234_v43 = vshrl.u32 %v6017_v18, 16 }
  0xd7   :  { %v4853_v32 = vround.rtne.f32 %v628_v58  ;;  %v7239_v58 = vshll.u32 %v6017_v18, 16 }
  0xd8   :  { %v1136_v54 = vrot.slane %v7323_v6, 1  ;;  %v6041_v34 = vpack.c.bf16 %v4840_v10, %v4839_v12  ;;  %v434_v6 = vsub.f32 %v363_v40, %v5685_v16  ;;  %v4941_v12 = vld [vmem:[%s7200_s1 + $0x1f0] sm:$0xff]   ;;  %v7324_v10 = vshrl.u32 %v5771_v9, 16 }
  0xd9   :  { %2795 = vmatmul.mubr.bf16.gmra.mrb[76].mxu1 %v5987_v52  ;;  %3506 = vmatpush1.bf16.msra.mxu0 %v4941_v12  ;;  %v887_v4 = vrot.slane %v7234_v43, 7  ;;  %v364_v12 = vld [vmem:[%s7199_s0 + $0x190] sm:$0xff] }
  0xda   :  { %3309 = vmatmul.mubr.bf16.gmra.mrb[44].mxu0 %v5668_v14  ;;  %2802 = vmatprep.mubr.bf16.mxu1 %v5952_v61  ;;  %v503_v14 = vmul.f32 %v5705_v50, %v432_v62  ;;  %v6036_v62 = vsel %vm5324_vm4, %v1135_v59, 0  ;;  %v883_v59 = vor.u32 %v7233_v37, %v880_v7  ;;  %v7237_v56 = vshll.u32 %v6041_v34, 16 }
  0xdb   :  { %3316 = vmatprep.mubr.bf16.mxu0 %v6002_v45  ;;  %v6060_v7 = vpack.c.bf16 %v4854_v1, %v4853_v32  ;;  %3507 = vmatprep.subr.bf16.mxu0 %v7317_v44  ;;  %v365_v32 = vld [vmem:[%s7199_s0 + $0x198] sm:$0xff]  ;;  %v435_v41 = vsub.f32 %v364_v12, %v5685_v16 }
  0xdc   :  { %v567_v13 = vmax.f32 %v503_v14, 0.0  ;;  %v1137_v14 = vor.u32 %v1136_v54, %v7324_v10  ;;  %v6065_v37 = vsel %vm5215_vm2, %v883_v59, 0  ;;  %v504_v54 = vmul.f32 %v5705_v50, %v433_v30 }
  0xdd   :  { %7325 = vst [vmem:[#allocation32_spill] sm:$0xff] %v6060_v7  ;;  %7326 = vst [vmem:[#allocation33_spill] sm:$0xff] %v6065_v37  ;;  %v505_v10 = vmul.f32 %v5705_v50, %v434_v6  ;;  %v890_v30 = vor.u32 %v7239_v58, %v887_v4  ;;  %v7240_v59 = vshrl.u32 %v6060_v7, 16  ;;  %v4855_v6 = vround.rtne.f32 %v630_v22 }
  0xde   :  { %v631_v40 = vmin.f32 %v567_v13, 6.0  ;;  %v6077_v1 = vsel %vm5324_vm4, %v1137_v14, 0  ;;  %v1434_v13 = vrot.slane %v7237_v56, 1  ;;  %v568_v14 = vmax.f32 %v504_v54, 0.0 }
  0xdf   :  { %v436_v55 = vsub.f32 %v365_v32, %v5685_v16  ;;  %v7327_v56 = vshrl.u32 %v6041_v34, 16  ;;  %v6095_v4 = vsel %vm5215_vm2, %v890_v30, 0  ;;  %v894_v22 = vrot.slane %v7240_v59, 7 }
  0xe0   :  { %v4856_v43 = vround.rtne.f32 %v631_v40  ;;  %7328 = vst [vmem:[#allocation34_spill] sm:$0xff] %v6095_v4  ;;  %v7243_v40 = vshll.u32 %v6060_v7, 16  ;;  %v506_v32 = vmul.f32 %v5705_v50, %v435_v41 }
  0xe1   :  { %2803 = vmatmul.mubr.bf16.gmra.mrb[80].mxu1 %v6023_v28  ;;  %v1435_v5 = vor.u32 %v1434_v13, %v7327_v56  ;;  %v507_v58 = vmul.f32 %v5705_v50, %v436_v55  ;;  %v366_v56 = vld [vmem:[%s7199_s0 + $0x1a0] sm:$0xff]  ;;  %v367_v13 = vld [vmem:[%s7199_s0 + $0x1a8] sm:$0xff] }
  0xe2   :  { %3317 = vmatmul.mubr.bf16.gmra.mrb[48].mxu0 %v5700_v49  ;;  %2810 = vmatprep.mubr.bf16.mxu1 %v5992_v38  ;;  %v569_v49 = vmax.f32 %v505_v10, 0.0  ;;  %v6100_v54 = vpack.c.bf16 %v4856_v43, %v4855_v6  ;;  %v632_v10 = vmin.f32 %v568_v14, 6.0  ;;  %v7331_v43 = vshll.u32 %v5831_v15, 16 }
  0xe3   :  { %3324 = vmatprep.mubr.bf16.mxu0 %v6036_v62  ;;  %v6112_v30 = vsel %vm5324_vm4, %v1435_v5, 0  ;;  %v897_v55 = vor.u32 %v7243_v40, %v894_v22  ;;  %v437_v41 = vsub.f32 %v366_v56, %v5685_v16  ;;  %v438_v14 = vsub.f32 %v367_v13, %v5685_v16 }
  0xe4   :  { %7329 = vst [vmem:[#allocation35_spill] sm:$0xff] %v6100_v54  ;;  %v633_v12 = vmin.f32 %v569_v49, 6.0  ;;  %7330 = vst [vmem:[#allocation36_spill] sm:$0xff] %v6112_v30  ;;  %v1138_v6 = vrot.slane %v7331_v43, 1  ;;  %v7246_v49 = vshrl.u32 %v6100_v54, 16  ;;  %v4857_v5 = vround.rtne.f32 %v632_v10  ;;  %v4942_v43 = vld [vmem:[%s7200_s1 + $0x1f8] sm:$0xff]  }
  0xe5   :  { %v571_v29 = vmax.f32 %v507_v58, 0.0  ;;  %v7332_v22 = vshrl.u32 %v5831_v15, 16  ;;  %3508 = vmatpush1.bf16.msra.mxu0 %v4942_v43  ;;  %v6132_v56 = vsel %vm5215_vm2, %v897_v55, 0  ;;  %v7254_v13 = vshll.u32 %v6100_v54, 16  ;;  %v369_v55 = vld [vmem:[%s7199_s0 + $0x1b8] sm:$0xff] }
  0xe6   :  { %v4858_v59 = vround.rtne.f32 %v633_v12  ;;  %7333 = vst [vmem:[#allocation37_spill] sm:$0xff] %v6132_v56  ;;  %v508_v10 = vmul.f32 %v5705_v50, %v437_v41  ;;  %v509_v58 = vmul.f32 %v5705_v50, %v438_v14  ;;  %v901_v12 = vrot.slane %v7246_v49, 7 }
  0xe7   :  { %v1139_v40 = vor.u32 %v1138_v6, %v7332_v22  ;;  %v368_v6 = vld [vmem:[%s7199_s0 + $0x1b0] sm:$0xff]  ;;  %v7335_v14 = vshll.u32 %v5864_v8, 16 }
  0xe8   :  { %v904_v22 = vor.u32 %v7254_v13, %v901_v12 }
  0xe9   :  { %2811 = vmatmul.mubr.bf16.gmra.mrb[84].mxu1 %v6065_v37  ;;  %v6149_v41 = vsel %vm5324_vm4, %v1139_v40, 0  ;;  %v1140_v43 = vrot.slane %v7335_v14, 1  ;;  %v370_v37 = vld [vmem:[%s7199_s0 + $0x1c0] sm:$0xff] }
  0xea   :  { %3325 = vmatmul.mubr.bf16.gmra.mrb[52].mxu0 %v5737_v33  ;;  %2818 = vmatprep.mubr.bf16.mxu1 %v6017_v18  ;;  %v570_v33 = vmax.f32 %v506_v32, 0.0  ;;  %v6139_v32 = vpack.c.bf16 %v4858_v59, %v4857_v5  ;;  %v572_v59 = vmax.f32 %v508_v10, 0.0  ;;  %v440_v5 = vsub.f32 %v369_v55, %v5685_v16 }
  0xeb   :  { %3332 = vmatprep.mubr.bf16.mxu0 %v6077_v1  ;;  %v7336_v10 = vshrl.u32 %v5864_v8, 16  ;;  %v6171_v12 = vsel %vm5215_vm2, %v904_v22, 0  ;;  %v441_v22 = vsub.f32 %v370_v37, %v5685_v16  ;;  %v7340_v37 = vshrl.u32 %v5914_v53, 16 }
  0xec   :  { %7334 = vst [vmem:[#allocation38_spill] sm:$0xff] %v6139_v32  ;;  %v7253_v40 = vshrl.u32 %v6139_v32, 16  ;;  %v636_v14 = vmin.f32 %v572_v59, 6.0  ;;  %7337 = vst [vmem:[#allocation39_spill] sm:$0xff] %v6171_v12  ;;  %v371_v59 = vld [vmem:[%s7199_s0 + $0x1c8] sm:$0xff] }
  0xed   :  { %v442_v48 = vsub.f32 %v371_v59, %v5685_v16 }
  0xf1   :  { %2819 = vmatmul.mubr.bf16.gmra.mrb[88].mxu1 %v6095_v4 }
  0xf2   :  { %3333 = vmatmul.mubr.bf16.gmra.mrb[56].mxu0 %v5771_v9  ;;  %2826 = vmatprep.mubr.bf16.mxu1 %v6060_v7  ;;  %v635_v9 = vmin.f32 %v571_v29, 6.0  ;;  %v439_v29 = vsub.f32 %v368_v6, %v5685_v16 }
  0xf3   :  { %3340 = vmatprep.mubr.bf16.mxu0 %v6112_v30  ;;  %v634_v30 = vmin.f32 %v570_v33, 6.0  ;;  %v573_v33 = vmax.f32 %v509_v58, 0.0  ;;  %v1141_v58 = vor.u32 %v1140_v43, %v7336_v10  ;;  %v4861_v10 = vround.rtne.f32 %v636_v14 }
  0xf4   :  { %v4860_v4 = vround.rtne.f32 %v635_v9  ;;  %v510_v55 = vmul.f32 %v5705_v50, %v439_v29  ;;  %v908_v9 = vrot.slane %v7253_v40, 7  ;;  %v7339_v29 = vshll.u32 %v5914_v53, 16 }
  0xf5   :  { %v4859_v49 = vround.rtne.f32 %v634_v30  ;;  %v637_v6 = vmin.f32 %v573_v33, 6.0  ;;  %v7256_v30 = vshll.u32 %v6139_v32, 16  ;;  %v6183_v33 = vsel %vm5324_vm4, %v1141_v58, 0 }
  0xf6   :  { %v574_v13 = vmax.f32 %v510_v55, 0.0  ;;  %v372_v55 = vld [vmem:[%s7199_s0 + $0x1d0] sm:$0xff] }
  0xf7   :  { %v6176_v43 = vpack.c.bf16 %v4860_v4, %v4859_v49  ;;  %v4862_v40 = vround.rtne.f32 %v637_v6  ;;  %v911_v49 = vor.u32 %v7256_v30, %v908_v9 }
  0xf8   :  { %v638_v6 = vmin.f32 %v574_v13, 6.0  ;;  %v373_v13 = vld [vmem:[%s7199_s0 + $0x1d8] sm:$0xff] }
  0xf9   :  { %2827 = vmatmul.mubr.bf16.gmra.mrb[92].mxu1 %v6132_v56  ;;  %v511_v56 = vmul.f32 %v5705_v50, %v440_v5  ;;  %7338 = vst [vmem:[#allocation40_spill] sm:$0xff] %v6176_v43  ;;  %v1142_v5 = vrot.slane %v7339_v29, 1  ;;  %v7257_v58 = vshrl.u32 %v6176_v43, 16  ;;  %v6198_v14 = vpack.c.bf16 %v4862_v40, %v4861_v10 }
  0xfa   :  { %3341 = vmatmul.mubr.bf16.gmra.mrb[60].mxu0 %v6041_v34  ;;  %2834 = vmatprep.mubr.bf16.mxu1 %v6100_v54  ;;  %v6206_v9 = vsel %vm5215_vm2, %v911_v49, 0  ;;  %v7264_v30 = vshll.u32 %v6176_v43, 16  ;;  %v513_v40 = vmul.f32 %v5705_v50, %v442_v48  ;;  %v444_v47 = vsub.f32 %v373_v13, %v5685_v16 }
  0xfb   :  { %3348 = vmatprep.mubr.bf16.mxu0 %v6149_v41  ;;  %v575_v4 = vmax.f32 %v511_v56, 0.0  ;;  %v1143_v29 = vor.u32 %v1142_v5, %v7340_v37  ;;  %7341 = vst [vmem:[#allocation41_spill] sm:$0xff] %v6198_v14  ;;  %7342 = vst [vmem:[#allocation42_spill] sm:$0xff] %v6206_v9  ;;  %v915_v59 = vrot.slane %v7257_v58, 7  ;;  %v4863_v37 = vround.rtne.f32 %v638_v6 }
  0xfc   :  { %v7267_v49 = vshll.u32 %v6198_v14, 16  ;;  %v7346_v6 = vshrl.u32 %v6198_v14, 16  ;;  %v515_v13 = vmul.f32 %v5705_v50, %v444_v47 }
  0xfd   :  { %v639_v56 = vmin.f32 %v575_v4, 6.0  ;;  %v6217_v5 = vsel %vm5324_vm4, %v1143_v29, 0  ;;  %v443_v4 = vsub.f32 %v372_v55, %v5685_v16  ;;  %v918_v29 = vor.u32 %v7264_v30, %v915_v59 }
  0xfe   :  { %7343 = vst [vmem:[#allocation43_spill] sm:$0xff] %v6217_v5  ;;  %v7345_v55 = vshrl.u32 %v5952_v61, 16  ;;  %v579_v30 = vmax.f32 %v515_v13, 0.0 }
  0xff   :  { %v4864_v58 = vround.rtne.f32 %v639_v56  ;;  %v922_v56 = vrot.slane %v7346_v6, 7  ;;  %v6240_v59 = vsel %vm5215_vm2, %v918_v29, 0 }
 0x101   :  { %2835 = vmatmul.mubr.bf16.gmra.mrb[96].mxu1 %v6171_v12  ;;  %v577_v12 = vmax.f32 %v513_v40, 0.0  ;;  %v925_v47 = vor.u32 %v7267_v49, %v922_v56  ;;  %v7349_v56 = vshrl.u32 %v5992_v38, 16 }
 0x102   :  { %3349 = vmatmul.mubr.bf16.gmra.mrb[64].mxu0 %v5831_v15  ;;  %2842 = vmatprep.mubr.bf16.mxu1 %v6139_v32  ;;  %v512_v15 = vmul.f32 %v5705_v50, %v441_v22  ;;  %v7344_v22 = vshll.u32 %v5952_v61, 16 }
 0x103   :  { %3356 = vmatprep.mubr.bf16.mxu0 %v6183_v33  ;;  %v641_v40 = vmin.f32 %v577_v12, 6.0 }
 0x104   :  { %v1144_v10 = vrot.slane %v7344_v22, 1  ;;  %v576_v48 = vmax.f32 %v512_v15, 0.0  ;;  %v6235_v15 = vpack.c.bf16 %v4864_v58, %v4863_v37 }
 0x105   :  { %v4866_v6 = vround.rtne.f32 %v641_v40 }
 0x106   :  { %v1145_v22 = vor.u32 %v1144_v10, %v7345_v55  ;;  %v374_v10 = vld [vmem:[%s7199_s0 + $0x1e0] sm:$0xff]  ;;  %v375_v55 = vld [vmem:[%s7199_s0 + $0x1e8] sm:$0xff]  ;;  %v7269_v13 = vshll.u32 %v6235_v15, 16 }
 0x108   :  { %v6251_v58 = vsel %vm5324_vm4, %v1145_v22, 0  ;;  %v445_v22 = vsub.f32 %v374_v10, %v5685_v16 }
 0x109   :  { %2843 = vmatmul.mubr.bf16.gmra.mrb[100].mxu1 %v6206_v9  ;;  %v514_v9 = vmul.f32 %v5705_v50, %v443_v4  ;;  %v7347_v4 = vshll.u32 %v5992_v38, 16 }
 0x10a   :  { %3357 = vmatmul.mubr.bf16.gmra.mrb[68].mxu0 %v5864_v8  ;;  %2850 = vmatprep.mubr.bf16.mxu1 %v6176_v43  ;;  %v640_v8 = vmin.f32 %v576_v48, 6.0 }
 0x10b   :  { %3364 = vmatprep.mubr.bf16.mxu0 %v6217_v5  ;;  %v1146_v37 = vrot.slane %v7347_v4, 1  ;;  %v578_v29 = vmax.f32 %v514_v9, 0.0  ;;  %v446_v5 = vsub.f32 %v375_v55, %v5685_v16  ;;  %v7350_v9 = vshrl.u32 %v6235_v15, 16 }
 0x10c   :  { %v4865_v48 = vround.rtne.f32 %v640_v8  ;;  %v6270_v8 = vsel %vm5215_vm2, %v925_v47, 0  ;;  %v643_v55 = vmin.f32 %v579_v30, 6.0 }
 0x10d   :  { %v1147_v49 = vor.u32 %v1146_v37, %v7349_v56  ;;  %v929_v40 = vrot.slane %v7350_v9, 7  ;;  %v642_v10 = vmin.f32 %v578_v29, 6.0  ;;  %v517_v37 = vmul.f32 %v5705_v50, %v446_v5 }
 0x10e   :  { %v6277_v16 = vpack.c.bf16 %v4866_v6, %v4865_v48  ;;  %v7352_v56 = vshll.u32 %v6017_v18, 16  ;;  %v4868_v30 = vround.rtne.f32 %v643_v55 }
 0x10f   :  { %v6283_v47 = vsel %vm5324_vm4, %v1147_v49, 0  ;;  %v932_v29 = vor.u32 %v7269_v13, %v929_v40  ;;  %v4867_v48 = vround.rtne.f32 %v642_v10  ;;  %v581_v6 = vmax.f32 %v517_v37, 0.0 }
 0x110   :  { %v1148_v9 = vrot.slane %v7352_v56, 1  ;;  %v7271_v10 = vshll.u32 %v6277_v16, 16 }
 0x111   :  { %2851 = vmatmul.mubr.bf16.gmra.mrb[104].mxu1 %v6240_v59  ;;  %v6300_v40 = vsel %vm5215_vm2, %v932_v29, 0  ;;  %v6307_v55 = vpack.c.bf16 %v4868_v30, %v4867_v48 }
 0x112   :  { %3365 = vmatmul.mubr.bf16.gmra.mrb[72].mxu0 %v5914_v53  ;;  %2858 = vmatprep.mubr.bf16.mxu1 %v6198_v14 }
 0x113   :  { %3372 = vmatprep.mubr.bf16.mxu0 %v6251_v58  ;;  %v7272_v30 = vshrl.u32 %v6307_v55, 16 }
 0x114   :  { %v6264_v4 = vpop.f32.mrb[0].mxu1 }
 0x115   :  { %7348 = vst [vmem:[#allocation44_spill] sm:$0xff] %v6264_v4  ;;  %v2646_v12 = vpop.f32.mrb[1].mxu1  ;;  %v516_v4 = vmul.f32 %v5705_v50, %v445_v22  ;;  %v7270_v50 = vshrl.u32 %v6277_v16, 16  ;;  %v7354_v22 = vshrl.u32 %v6017_v18, 16 }
 0x116   :  { %v6275_v53 = vpop.f32.mrb[2].mxu1 }
 0x117   :  { %7351 = vst [vmem:[#allocation45_spill] sm:$0xff] %v6275_v53  ;;  %v2649_v12 = vpop.f32.mrb[3].mxu1  ;;  %v580_v5 = vmax.f32 %v516_v4, 0.0  ;;  %v936_v4 = vrot.slane %v7270_v50, 7  ;;  %v645_v53 = vmin.f32 %v581_v6, 6.0 }
 0x118   :  { %v1149_v12 = vor.u32 %v1148_v9, %v7354_v22  ;;  %v7356_v22 = vshll.u32 %v6060_v7, 16 }
 0x119   :  { %2859 = vmatmul.mubr.bf16.gmra.mrb[108].mxu1 %v6270_v8  ;;  %v644_v37 = vmin.f32 %v580_v5, 6.0  ;;  %v939_v48 = vor.u32 %v7271_v10, %v936_v4  ;;  %v4870_v6 = vround.rtne.f32 %v645_v53  ;;  %v943_v4 = vrot.slane %v7272_v30, 7 }
 0x11a   :  { %3373 = vmatmul.mubr.bf16.gmra.mrb[76].mxu0 %v5952_v61  ;;  %2866 = vmatprep.mubr.bf16.mxu1 %v6235_v15  ;;  %v6311_v9 = vsel %vm5324_vm4, %v1149_v12, 0  ;;  %v1150_v29 = vrot.slane %v7356_v22, 1  ;;  %v7358_v12 = vshrl.u32 %v6060_v7, 16 }
 0x11b   :  { %3380 = vmatprep.mubr.bf16.mxu0 %v6283_v47  ;;  %v4869_v5 = vround.rtne.f32 %v644_v37  ;;  %v7273_v37 = vshll.u32 %v6307_v55, 16 }
 0x11c   :  { %v6294_v49 = vpop.f32.mrb[4].mxu1 }
 0x11d   :  { %7353 = vst [vmem:[#allocation46_spill] sm:$0xff] %v6294_v49  ;;  %v2654_v56 = vpop.f32.mrb[5].mxu1  ;;  %v6335_v53 = vpack.c.bf16 %v4870_v6, %v4869_v5  ;;  %v7362_v6 = vshrl.u32 %v6100_v54, 16 }
 0x11e   :  { %v6303_v13 = vpop.f32.mrb[6].mxu1  ;;  %v1151_v56 = vor.u32 %v1150_v29, %v7358_v12  ;;  %v7360_v29 = vshll.u32 %v6100_v54, 16 }
 0x11f   :  { %7355 = vst [vmem:[#allocation47_spill] sm:$0xff] %v6303_v13  ;;  %v2657_v49 = vpop.f32.mrb[7].mxu1  ;;  %v6330_v13 = vsel %vm5215_vm2, %v939_v48, 0  ;;  %v946_v48 = vor.u32 %v7273_v37, %v943_v4  ;;  %v7275_v5 = vshrl.u32 %v6335_v53, 16  ;;  %v7277_v4 = vshll.u32 %v6335_v53, 16 }
 0x120   :  { %v1152_v12 = vrot.slane %v7360_v29, 1 }
 0x121   :  { %2867 = vmatmul.mubr.bf16.gmra.mrb[112].mxu1 %v6300_v40  ;;  %v6358_v30 = vsel %vm5215_vm2, %v946_v48, 0 }
 0x122   :  { %3381 = vmatmul.mubr.bf16.gmra.mrb[80].mxu0 %v5992_v38  ;;  %2874 = vmatprep.mubr.bf16.mxu1 %v6277_v16 }
 0x123   :  { %3388 = vmatprep.mubr.bf16.mxu0 %v6311_v9 }
 0x124   :  { %v6322_v49 = vpop.f32.mrb[8].mxu1 }
 0x125   :  { %7357 = vst [vmem:[#allocation48_spill] sm:$0xff] %v6322_v49  ;;  %v2662_v22 = vpop.f32.mrb[9].mxu1  ;;  %v6339_v49 = vsel %vm5324_vm4, %v1151_v56, 0  ;;  %v1153_v56 = vor.u32 %v1152_v12, %v7362_v6 }
 0x126   :  { %v6326_v50 = vpop.f32.mrb[10].mxu1 }
 0x127   :  { %7359 = vst [vmem:[#allocation49_spill] sm:$0xff] %v6326_v50  ;;  %v2665_v10 = vpop.f32.mrb[11].mxu1  ;;  %v950_v50 = vrot.slane %v7275_v5, 7 }
 0x129   :  { %2875 = vmatmul.mubr.bf16.gmra.mrb[116].mxu1 %v6330_v13  ;;  %v953_v48 = vor.u32 %v7277_v4, %v950_v50  ;;  %v7368_v50 = vshll.u32 %v6176_v43, 16 }
 0x12a   :  { %3389 = vmatmul.mubr.bf16.gmra.mrb[84].mxu0 %v6017_v18  ;;  %2882 = vmatprep.mubr.bf16.mxu1 %v6307_v55  ;;  %v6365_v18 = vsel %vm5324_vm4, %v1153_v56, 0 }
 0x12b   :  { %3396 = vmatprep.mubr.bf16.mxu0 %v6339_v49  ;;  %v1156_v4 = vrot.slane %v7368_v50, 1 }
 0x12c   :  { %v6350_v10 = vpop.f32.mrb[12].mxu1 }
 0x12d   :  { %7361 = vst [vmem:[#allocation50_spill] sm:$0xff] %v6350_v10  ;;  %v2670_v22 = vpop.f32.mrb[13].mxu1  ;;  %v7364_v10 = vshll.u32 %v6139_v32, 16 }
 0x12e   :  { %v6354_v29 = vpop.f32.mrb[14].mxu1 }
 0x12f   :  { %7363 = vst [vmem:[#allocation51_spill] sm:$0xff] %v6354_v29  ;;  %v2673_v37 = vpop.f32.mrb[15].mxu1  ;;  %v1154_v12 = vrot.slane %v7364_v10, 1  ;;  %v6383_v10 = vsel %vm5215_vm2, %v953_v48, 0  ;;  %v7370_v48 = vshrl.u32 %v6176_v43, 16 }
 0x130   :  { %v7366_v37 = vshrl.u32 %v6139_v32, 16 }
 0x131   :  { %2883 = vmatmul.mubr.bf16.gmra.mrb[120].mxu1 %v6358_v30 }
 0x132   :  { %3397 = vmatmul.mubr.bf16.gmra.mrb[88].mxu0 %v6060_v7  ;;  %2890 = vmatprep.mubr.bf16.mxu1 %v6335_v53  ;;  %v1155_v56 = vor.u32 %v1154_v12, %v7366_v37 }
 0x133   :  { %3404 = vmatprep.mubr.bf16.mxu0 %v6365_v18 }
 0x134   :  { %v6375_v6 = vpop.f32.mrb[16].mxu1  ;;  %v6387_v7 = vsel %vm5324_vm4, %v1155_v56, 0 }
 0x135   :  { %7365 = vst [vmem:[#allocation52_spill] sm:$0xff] %v6375_v6  ;;  %v2678_v22 = vpop.f32.mrb[17].mxu1 }
 0x136   :  { %v6379_v5 = vpop.f32.mrb[18].mxu1 }
 0x137   :  { %7367 = vst [vmem:[#allocation53_spill] sm:$0xff] %v6379_v5  ;;  %v2681_v29 = vpop.f32.mrb[19].mxu1  ;;  %v7372_v5 = vshll.u32 %v6198_v14, 16 }
 0x138   :  { %v1157_v29 = vor.u32 %v1156_v4, %v7370_v48  ;;  %v4943_v4 = vld [vmem:[%s7200_s1 + $0x210] sm:$0xff]  }
 0x139   :  { %2891 = vmatmul.mubr.bf16.gmra.mrb[124].mxu1 %v6383_v10  ;;  %v1158_v6 = vrot.slane %v7372_v5, 1  ;;  %v7374_v5 = vshrl.u32 %v6198_v14, 16 }
 0x13a   :  { %3405 = vmatmul.mubr.bf16.gmra.mrb[92].mxu0 %v6100_v54  ;;  %2995 = vmatprep.mubr.bf16.mxu1 %v5631_v60  ;;  %v6403_v50 = vsel %vm5324_vm4, %v1157_v29, 0  ;;  %v4940_v54 = vld [vmem:[%s7200_s1 + $0x208] sm:$0xff]  }
 0x13b   :  { %3412 = vmatprep.mubr.bf16.mxu0 %v6387_v7  ;;  %v1159_v29 = vor.u32 %v1158_v6, %v7374_v5  ;;  %v376_v6 = vld [vmem:[%s7199_s0 + $0x1f0] sm:$0xff] }
 0x13c   :  { %v6395_v12 = vpop.f32.mrb[20].mxu1 }
 0x13d   :  { %7369 = vst [vmem:[#allocation54_spill] sm:$0xff] %v6395_v12  ;;  %v2686_v37 = vpop.f32.mrb[21].mxu1  ;;  %v7376_v12 = vshll.u32 %v6235_v15, 16 }
 0x13e   :  { %v6399_v22 = vpop.f32.mrb[22].mxu1 }
 0x13f   :  { %7371 = vst [vmem:[#allocation55_spill] sm:$0xff] %v6399_v22  ;;  %v2689_v56 = vpop.f32.mrb[23].mxu1 }
 0x141   :  { %2996 = vmatmul.mubr.bf16.vlgmr.msra.gmra.mrb[32].mxu1 %v5814_v26 }
 0x142   :  { %3413 = vmatmul.mubr.bf16.gmra.mrb[96].mxu0 %v6139_v32  ;;  %4378 = vmatpush3.bf16.msra.mxu1 %v5894_v11  ;;  %v6426_v11 = vsel %vm5324_vm4, %v1159_v29, 0  ;;  %v1160_v32 = vrot.slane %v7376_v12, 1  ;;  %v4951_v29 = vld [vmem:[%s7201_s2] ss:$0 sm:$0xff] }
 0x143   :  { %3003 = vmatprep.mubr.bf16.mxu1 %v5664_v36  ;;  %3420 = vmatprep.mubr.bf16.mxu0 %v6403_v50 }
 0x144   :  { %v6418_v48 = vpop.f32.mrb[24].mxu1  ;;  %4379 = vmatprep.subr.bf16.mxu1 %v4940_v54 }
 0x145   :  { %7373 = vst [vmem:[#allocation56_spill] sm:$0xff] %v6418_v48  ;;  %v2694_v37 = vpop.f32.mrb[25].mxu1  ;;  %v4944_v48 = vld [vmem:[%s7200_s1 + $0x218] sm:$0xff]  }
 0x146   :  { %v6422_v56 = vpop.f32.mrb[26].mxu1  ;;  %4380 = vmatpush3.bf16.msra.mxu1 %v4940_v54  ;;  %v377_v54 = vld [vmem:[%s7199_s0 + $0x1f8] sm:$0xff]  ;;  %v447_v37 = vsub.f32 %v376_v6, %v4951_v29  ;;  %v4952_v6 = vld [vmem:[%s7202_s3] ss:$0 sm:$0xff] }
 0x147   :  { %7375 = vst [vmem:[#allocation57_spill] sm:$0xff] %v6422_v56  ;;  %v2697_v22 = vpop.f32.mrb[27].mxu1  ;;  %4381 = vmatprep.subr.bf16.mxu1 %v4943_v4  ;;  %v448_v56 = vsub.f32 %v377_v54, %v4951_v29 }
 0x148   :  { %v7378_v22 = vshrl.u32 %v6235_v15, 16  ;;  %v518_v54 = vmul.f32 %v4952_v6, %v447_v37 }
 0x149   :  { %3004 = vmatmul.mubr.bf16.gmra.mrb[36].mxu1 %v5848_v21  ;;  %v519_v29 = vmul.f32 %v4952_v6, %v448_v56  ;;  %v4947_v56 = vld [vmem:[%s7200_s1 + $0x230] sm:$0xff]   ;;  %v7382_v6 = vshll.u32 %v6307_v55, 16 }
 0x14a   :  { %3421 = vmatmul.mubr.bf16.gmra.mrb[100].mxu0 %v6176_v43  ;;  %3011 = vmatprep.mubr.bf16.mxu1 %v5710_v31  ;;  %v1161_v5 = vor.u32 %v1160_v32, %v7378_v22  ;;  %v4945_v43 = vld [vmem:[%s7200_s1 + $0x220] sm:$0xff]   ;;  %v7380_v32 = vshll.u32 %v6277_v16, 16 }
 0x14b   :  { %3428 = vmatprep.mubr.bf16.mxu0 %v6426_v11  ;;  %4382 = vmatpush3.bf16.msra.mxu1 %v4943_v4  ;;  %v583_v37 = vmax.f32 %v519_v29, 0.0 }
 0x14c   :  { %v6443_v12 = vpop.f32.mrb[28].mxu1  ;;  %4383 = vmatprep.subr.bf16.mxu1 %v4944_v48  ;;  %v1162_v22 = vrot.slane %v7380_v32, 1 }
 0x14d   :  { %7377 = vst [vmem:[#allocation58_spill] sm:$0xff] %v6443_v12  ;;  %v2702_v21 = vpop.f32.mrb[29].mxu1  ;;  %v6457_v12 = vsel %vm5324_vm4, %v1161_v5, 0 }
 0x14e   :  { %v6453_v38 = vpop.f32.mrb[30].mxu1  ;;  %v4946_v21 = vld [vmem:[%s7200_s1 + $0x228] sm:$0xff]  }
 0x14f   :  { %7379 = vst [vmem:[#allocation59_spill] sm:$0xff] %v6453_v38  ;;  %v2705_v4 = vpop.f32.mrb[31].mxu1  ;;  %4384 = vmatpush3.bf16.msra.mxu1 %v4944_v48  ;;  %v7381_v48 = vshrl.u32 %v6277_v16, 16  ;;  %v1164_v38 = vrot.slane %v7382_v6, 1  ;;  %v7386_v6 = vshrl.u32 %v6041_v34, 16 }
 0x150   :  { %4385 = vmatprep.subr.bf16.mxu1 %v4945_v43  ;;  %v582_v4 = vmax.f32 %v518_v54, 0.0 }
 0x151   :  { %3012 = vmatmul.mubr.bf16.gmra.mrb[40].mxu1 %v5876_v39  ;;  %v1163_v5 = vor.u32 %v1162_v22, %v7381_v48  ;;  %v7383_v22 = vshrl.u32 %v6307_v55, 16 }
 0x152   :  { %3429 = vmatmul.mubr.bf16.gmra.mrb[104].mxu0 %v6198_v14  ;;  %3019 = vmatprep.mubr.bf16.mxu1 %v5735_v24  ;;  %v646_v14 = vmin.f32 %v582_v4, 6.0 }
 0x153   :  { %3436 = vmatprep.mubr.bf16.mxu0 %v6457_v12  ;;  %4386 = vmatpush3.bf16.msra.mxu1 %v4945_v43  ;;  %v6478_v32 = vsel %vm5324_vm4, %v1163_v5, 0  ;;  %v647_v43 = vmin.f32 %v583_v37, 6.0  ;;  %v1165_v54 = vor.u32 %v1164_v38, %v7383_v22  ;;  %v7384_v5 = vshll.u32 %v6335_v53, 16 }
 0x154   :  { %4387 = vmatprep.subr.bf16.mxu1 %v4946_v21  ;;  %v4871_v29 = vround.rtne.f32 %v646_v14  ;;  %v7385_v38 = vshrl.u32 %v6335_v53, 16 }
 0x155   :  { %v6490_v48 = vsel %vm5324_vm4, %v1165_v54, 0  ;;  %v1166_v4 = vrot.slane %v7384_v5, 1  ;;  %v7387_v5 = vshll.u32 %v6041_v34, 16 }
 0x157   :  { %4388 = vmatpush3.bf16.msra.mxu1 %v4946_v21  ;;  %v4872_v21 = vround.rtne.f32 %v647_v43  ;;  %v1167_v14 = vor.u32 %v1166_v4, %v7385_v38  ;;  %v1293_v43 = vrot.slane %v7386_v6, 7 }
 0x158   :  { %4389 = vmatprep.subr.bf16.mxu1 %v4947_v56 }
 0x159   :  { %3020 = vmatmul.mubr.bf16.gmra.mrb[44].mxu1 %v5922_v57  ;;  %v6494_v37 = vpack.c.bf16 %v4872_v21, %v4871_v29  ;;  %v6507_v22 = vsel %vm5324_vm4, %v1167_v14, 0  ;;  %v4948_v21 = vld [vmem:[%s7200_s1 + $0x238] sm:$0xff]   ;;  %v1296_v4 = vor.u32 %v7387_v5, %v1293_v43  ;;  %v7400_v5 = vld [vmem:[#allocation39_spill] sm:$0xff] }
 0x15a   :  { %3437 = vmatmul.mubr.bf16.gmra.mrb[108].mxu0 %v6235_v15  ;;  %3027 = vmatprep.mubr.bf16.mxu1 %v5766_v19  ;;  %v7397_v43 = vld [vmem:[#allocation37_spill] sm:$0xff] }
 0x15b   :  { %3444 = vmatprep.mubr.bf16.mxu0 %v6478_v32  ;;  %4390 = vmatpush3.bf16.msra.mxu1 %v4947_v56  ;;  %v1301_v56 = vshll.u32 %v6494_v37, 16  ;;  %v1298_v54 = vshrl.u32 %v6494_v37, 16  ;;  %v6525_v14 = vsel %vm5215_vm2, %v1296_v4, 0  ;;  %v7401_v4 = vld [vmem:[#allocation19_spill] sm:$0xff] }
 0x15c   :  { %4391 = vmatprep.subr.bf16.mxu1 %v4948_v21 }
 0x15d   :  { %v1436_v29 = vrot.slane %v1301_v56, 1 }
 0x15f   :  { %v1437_v38 = vor.u32 %v1436_v29, %v1298_v54  ;;  %4392 = vmatpush3.bf16.msra.mxu1 %v4948_v21  ;;  %v7398_v29 = vld [vmem:[#allocation14_spill] sm:$0xff] }
 0x160   :  { %v7399_v21 = vld [vmem:[#allocation18_spill] sm:$0xff] }
 0x161   :  { %3028 = vmatmul.mubr.bf16.gmra.mrb[48].mxu1 %v5962_v51  ;;  %v6529_v6 = vsel %vm5324_vm4, %v1437_v38, 0  ;;  %v7402_v38 = vld [vmem:[#allocation42_spill] sm:$0xff] }
 0x162   :  { %3445 = vmatmul.mubr.bf16.gmra.mrb[112].mxu0 %v6277_v16  ;;  %3035 = vmatprep.mubr.bf16.mxu1 %v5801_v63 }
 0x163   :  { %3452 = vmatprep.mubr.bf16.mxu0 %v6490_v48 }
 0x169   :  { %3036 = vmatmul.mubr.bf16.gmra.mrb[52].mxu1 %v6002_v45 }
 0x16a   :  { %3453 = vmatmul.mubr.bf16.gmra.mrb[116].mxu0 %v6307_v55  ;;  %3043 = vmatprep.mubr.bf16.mxu1 %v5836_v25 }
 0x16b   :  { %3460 = vmatprep.mubr.bf16.mxu0 %v6507_v22 }
 0x171   :  { %3044 = vmatmul.mubr.bf16.gmra.mrb[56].mxu1 %v6036_v62 }
 0x172   :  { %3461 = vmatmul.mubr.bf16.gmra.mrb[120].mxu0 %v6335_v53  ;;  %3051 = vmatprep.mubr.bf16.mxu1 %v6525_v14 }
 0x173   :  { %3468 = vmatprep.mubr.bf16.mxu0 %v6529_v6 }
 0x179   :  { %3052 = vmatmul.mubr.bf16.gmra.mrb[60].mxu1 %v6077_v1 }
 0x17a   :  { %3469 = vmatmul.mubr.bf16.gmra.mrb[124].mxu0 %v6494_v37  ;;  %3059 = vmatprep.mubr.bf16.mxu1 %v5902_v35  ;;  %v7392_v35 = vld [vmem:[#allocation8_spill] sm:$0xff] }
 0x17b   :  { %3509 = vmatprep.mubr.bf16.mxu0 %v5227_v27  ;;  %v7388_v27 = vld [vmem:[#allocation6_spill] sm:$0xff] }
 0x181   :  { %3060 = vmatmul.mubr.bf16.gmra.mrb[64].mxu1 %v7317_v44 }
 0x182   :  { %3510 = vmatmul.mubr.bf16.vlgmr.msra.gmra.mrb[0].mxu0 %v5301_v17  ;;  %3067 = vmatprep.mubr.bf16.mxu1 %v5947_v23  ;;  %v7389_v17 = vld [vmem:[#allocation43_spill] sm:$0xff] }
 0x183   :  { %3517 = vmatprep.mubr.bf16.mxu0 %v5255_v42  ;;  %v7391_v42 = vld [vmem:[#allocation33_spill] sm:$0xff] }
 0x189   :  { %3068 = vmatmul.mubr.bf16.gmra.mrb[68].mxu1 %v6149_v41  ;;  %v7395_v41 = vld [vmem:[#allocation11_spill] sm:$0xff] }
 0x18a   :  { %3518 = vmatmul.mubr.bf16.gmra.mrb[4].mxu0 %v5344_v46  ;;  %3075 = vmatprep.mubr.bf16.mxu1 %v5987_v52  ;;  %v7393_v46 = vld [vmem:[#allocation13_spill] sm:$0xff] }
 0x18b   :  { %3525 = vmatprep.mubr.bf16.mxu0 %v5288_v3  ;;  %v7394_v3 = vld [vmem:[#allocation34_spill] sm:$0xff] }
 0x191   :  { %3076 = vmatmul.mubr.bf16.gmra.mrb[72].mxu1 %v6183_v33 }
 0x192   :  { %3526 = vmatmul.mubr.bf16.gmra.mrb[8].mxu0 %v5384_v0  ;;  %3083 = vmatprep.mubr.bf16.mxu1 %v6023_v28  ;;  %v7396_v0 = vld [vmem:[#allocation16_spill] sm:$0xff] }
 0x193   :  { %3533 = vmatprep.mubr.bf16.mxu0 %v7388_v27  ;;  %v7403_v27 = vld [vmem:[#allocation21_spill] sm:$0xff] }
 0x199   :  { %3084 = vmatmul.mubr.bf16.gmra.mrb[76].mxu1 %v7389_v17 }
 0x19a   :  { %3534 = vmatmul.mubr.bf16.gmra.mrb[12].mxu0 %v7390_v2  ;;  %3091 = vmatprep.mubr.bf16.mxu1 %v7391_v42  ;;  %v7404_v2 = vld [vmem:[#allocation22_spill] sm:$0xff] }
 0x19b   :  { %3541 = vmatprep.mubr.bf16.mxu0 %v7392_v35  ;;  %v7405_v35 = vld [vmem:[#allocation23_spill] sm:$0xff] }
 0x1a1   :  { %3092 = vmatmul.mubr.bf16.gmra.mrb[80].mxu1 %v6251_v58 }
 0x1a2   :  { %3542 = vmatmul.mubr.bf16.gmra.mrb[16].mxu0 %v7393_v46  ;;  %3099 = vmatprep.mubr.bf16.mxu1 %v7394_v3  ;;  %v7415_v46 = vld [vmem:[#allocation17_spill] sm:$0xff] }
 0x1a3   :  { %3549 = vmatprep.mubr.bf16.mxu0 %v7395_v41  ;;  %v7416_v41 = vld [vmem:[#allocation20_spill] sm:$0xff] }
 0x1a9   :  { %3100 = vmatmul.mubr.bf16.gmra.mrb[84].mxu1 %v6283_v47 }
 0x1aa   :  { %3550 = vmatmul.mubr.bf16.gmra.mrb[20].mxu0 %v7396_v0  ;;  %3107 = vmatprep.mubr.bf16.mxu1 %v7397_v43  ;;  %v7417_v0 = vld [vmem:[#allocation30_spill] sm:$0xff] }
 0x1ab   :  { %3557 = vmatprep.mubr.bf16.mxu0 %v7398_v29 }
 0x1b1   :  { %3108 = vmatmul.mubr.bf16.gmra.mrb[88].mxu1 %v6311_v9 }
 0x1b2   :  { %3558 = vmatmul.mubr.bf16.gmra.mrb[24].mxu0 %v7399_v21  ;;  %3115 = vmatprep.mubr.bf16.mxu1 %v7400_v5 }
 0x1b3   :  { %3565 = vmatprep.mubr.bf16.mxu0 %v7401_v4 }
 0x1b9   :  { %3116 = vmatmul.mubr.bf16.gmra.mrb[92].mxu1 %v6339_v49 }
 0x1ba   :  { %3566 = vmatmul.mubr.bf16.gmra.mrb[28].mxu0 %v5631_v60  ;;  %3123 = vmatprep.mubr.bf16.mxu1 %v7402_v38  ;;  %v7406_v60 = vld [vmem:[#allocation24_spill] sm:$0xff] }
 0x1bb   :  { %3573 = vmatprep.mubr.bf16.mxu0 %v7403_v27  ;;  %v7418_v27 = vld [vmem:[#allocation27_spill] sm:$0xff] }
 0x1c1   :  { %3124 = vmatmul.mubr.bf16.gmra.mrb[96].mxu1 %v6365_v18 }
 0x1c2   :  { %3574 = vmatmul.mubr.bf16.gmra.mrb[32].mxu0 %v5664_v36  ;;  %3131 = vmatprep.mubr.bf16.mxu1 %v6240_v59  ;;  %v7407_v36 = vld [vmem:[#allocation25_spill] sm:$0xff] }
 0x1c3   :  { %3581 = vmatprep.mubr.bf16.mxu0 %v7404_v2 }
 0x1c9   :  { %3132 = vmatmul.mubr.bf16.gmra.mrb[100].mxu1 %v6387_v7 }
 0x1ca   :  { %3582 = vmatmul.mubr.bf16.gmra.mrb[36].mxu0 %v5710_v31  ;;  %3139 = vmatprep.mubr.bf16.mxu1 %v6270_v8  ;;  %v7408_v31 = vld [vmem:[#allocation26_spill] sm:$0xff] }
 0x1cb   :  { %3589 = vmatprep.mubr.bf16.mxu0 %v7405_v35  ;;  %v7420_v35 = vld [vmem:[#allocation32_spill] sm:$0xff] }
 0x1d1   :  { %3140 = vmatmul.mubr.bf16.gmra.mrb[104].mxu1 %v6403_v50 }
 0x1d2   :  { %3590 = vmatmul.mubr.bf16.gmra.mrb[40].mxu0 %v5735_v24  ;;  %3147 = vmatprep.mubr.bf16.mxu1 %v6300_v40  ;;  %v1300_v24 = vrot.slane %v1298_v54, 7  ;;  %v7413_v54 = vld [vmem:[#allocation29_spill] sm:$0xff] }
 0x1d3   :  { %3597 = vmatprep.mubr.bf16.mxu0 %v7406_v60 }
 0x1d9   :  { %3148 = vmatmul.mubr.bf16.gmra.mrb[108].mxu1 %v6426_v11 }
 0x1da   :  { %3598 = vmatmul.mubr.bf16.gmra.mrb[44].mxu0 %v5766_v19  ;;  %3155 = vmatprep.mubr.bf16.mxu1 %v6330_v13  ;;  %v1303_v19 = vor.u32 %v1301_v56, %v1300_v24  ;;  %v7411_v56 = vld [vmem:[#allocation9_spill] sm:$0xff] }
 0x1db   :  { %3605 = vmatprep.mubr.bf16.mxu0 %v7407_v36 }
 0x1e1   :  { %3156 = vmatmul.mubr.bf16.gmra.mrb[112].mxu1 %v6457_v12 }
 0x1e2   :  { %3606 = vmatmul.mubr.bf16.gmra.mrb[48].mxu0 %v5801_v63  ;;  %3163 = vmatprep.mubr.bf16.mxu1 %v6358_v30  ;;  %v6601_v63 = vsel %vm5215_vm2, %v1303_v19, 0  ;;  %v7422_v19 = vld [vmem:[#allocation36_spill] sm:$0xff] }
 0x1e3   :  { %3613 = vmatprep.mubr.bf16.mxu0 %v7408_v31  ;;  %v7421_v31 = vld [vmem:[#allocation35_spill] sm:$0xff] }
 0x1e9   :  { %3164 = vmatmul.mubr.bf16.gmra.mrb[116].mxu1 %v6478_v32 }
 0x1ea   :  { %3614 = vmatmul.mubr.bf16.gmra.mrb[52].mxu0 %v5836_v25  ;;  %3171 = vmatprep.mubr.bf16.mxu1 %v6383_v10  ;;  %v7409_v25 = vld [vmem:[#allocation7_spill] sm:$0xff] }
 0x1eb   :  { %3621 = vmatprep.mubr.bf16.mxu0 %v6041_v34  ;;  %v7410_v34 = vld [vmem:[#allocation28_spill] sm:$0xff] }
 0x1f1   :  { %3172 = vmatmul.mubr.bf16.gmra.mrb[120].mxu1 %v6490_v48 }
 0x1f2   :  { %3622 = vmatmul.mubr.bf16.gmra.mrb[56].mxu0 %v6525_v14  ;;  %3179 = vmatprep.mubr.bf16.mxu1 %v6601_v63  ;;  %v7414_v14 = vld [vmem:[#allocation15_spill] sm:$0xff] }
 0x1f3   :  { %3629 = vmatprep.mubr.bf16.mxu0 %v7317_v44 }
 0x1f9   :  { %3180 = vmatmul.mubr.bf16.gmra.mrb[124].mxu1 %v6507_v22 }
 0x1fa   :  { %3630 = vmatmul.mubr.bf16.gmra.mrb[60].mxu0 %v7317_v44  ;;  %4393 = vmatprep.mubr.bf16.mxu1 %v7409_v25  ;;  %v7423_v25 = vld [vmem:[#allocation38_spill] sm:$0xff] }
 0x1fb   :  { %3637 = vmatprep.mubr.bf16.mxu0 %v7410_v34 }
 0x201   :  { %4394 = vmatmul.mubr.bf16.vlgmr.msra.gmra.mrb[128].mxu1 %v7411_v56  ;;  %v7424_v56 = vld [vmem:[#allocation40_spill] sm:$0xff] }
 0x202   :  { %3638 = vmatmul.mubr.bf16.gmra.mrb[64].mxu0 %v5947_v23  ;;  %4397 = vmatprep.mubr.bf16.mxu1 %v7412_v20 }
 0x203   :  { %3645 = vmatprep.mubr.bf16.mxu0 %v7413_v54 }
 0x209   :  { %4398 = vmatmul.mubr.bf16.gmra.mrb[132].mxu1 %v7414_v14  ;;  %v7425_v14 = vld [vmem:[#allocation41_spill] sm:$0xff] }
 0x20a   :  { %3646 = vmatmul.mubr.bf16.gmra.mrb[68].mxu0 %v5987_v52  ;;  %4401 = vmatprep.mubr.bf16.mxu1 %v7415_v46 }
 0x20b   :  { %3653 = vmatprep.mubr.bf16.mxu0 %v5952_v61  ;;  %v7419_v61 = vld [vmem:[#allocation31_spill] sm:$0xff] }
 0x211   :  { %4402 = vmatmul.mubr.bf16.gmra.mrb[136].mxu1 %v7416_v41 }
 0x212   :  { %3654 = vmatmul.mubr.bf16.gmra.mrb[72].mxu0 %v6023_v28  ;;  %4405 = vmatprep.mubr.bf16.mxu1 %v5814_v26 }
 0x213   :  { %3661 = vmatprep.mubr.bf16.mxu0 %v7417_v0 }
 0x214   :  { %v6623_v23 = vpop.f32.mrb[32].mxu1 }
 0x215   :  { %v2999_v29 = vpop.f32.mrb[33].mxu1 }
 0x216   :  { %v6625_v21 = vpop.f32.mrb[34].mxu1  ;;  %v7426_v29 = vld [vmem:[#allocation44_spill] sm:$0xff] }
 0x217   :  { %v3002_v4 = vpop.f32.mrb[35].mxu1 }
 0x219   :  { %4406 = vmatmul.mubr.bf16.gmra.mrb[140].mxu1 %v7418_v27 }
 0x21a   :  { %3662 = vmatmul.mubr.bf16.gmra.mrb[76].mxu0 %v7391_v42  ;;  %4409 = vmatprep.mubr.bf16.mxu1 %v5876_v39 }
 0x21b   :  { %3669 = vmatprep.mubr.bf16.mxu0 %v7419_v61 }
 0x21c   :  { %v6631_v52 = vpop.f32.mrb[36].mxu1 }
 0x21d   :  { %v3007_v28 = vpop.f32.mrb[37].mxu1 }
 0x21e   :  { %v6633_v26 = vpop.f32.mrb[38].mxu1 }
 0x21f   :  { %v3010_v2 = vpop.f32.mrb[39].mxu1 }
 0x220   :  { %v7427_v2 = vld [vmem:[#allocation45_spill] sm:$0xff] }
 0x221   :  { %4410 = vmatmul.mubr.bf16.gmra.mrb[144].mxu1 %v5922_v57 }
 0x222   :  { %3670 = vmatmul.mubr.bf16.gmra.mrb[80].mxu0 %v7394_v3  ;;  %4413 = vmatprep.mubr.bf16.mxu1 %v5962_v51 }
 0x223   :  { %3677 = vmatprep.mubr.bf16.mxu0 %v7420_v35 }
 0x224   :  { %v6639_v60 = vpop.f32.mrb[40].mxu1 }
 0x225   :  { %v3015_v42 = vpop.f32.mrb[41].mxu1 }
 0x226   :  { %v6641_v39 = vpop.f32.mrb[42].mxu1  ;;  %v7428_v42 = vld [vmem:[#allocation46_spill] sm:$0xff] }
 0x227   :  { %v3018_v36 = vpop.f32.mrb[43].mxu1 }
 0x229   :  { %4414 = vmatmul.mubr.bf16.gmra.mrb[148].mxu1 %v6002_v45 }
 0x22a   :  { %3678 = vmatmul.mubr.bf16.gmra.mrb[84].mxu0 %v7397_v43  ;;  %4417 = vmatprep.mubr.bf16.mxu1 %v6036_v62 }
 0x22b   :  { %3685 = vmatprep.mubr.bf16.mxu0 %v7421_v31 }
 0x22c   :  { %v6647_v57 = vpop.f32.mrb[44].mxu1 }
 0x22d   :  { %v3023_v3 = vpop.f32.mrb[45].mxu1 }
 0x22e   :  { %v6649_v51 = vpop.f32.mrb[46].mxu1 }
 0x22f   :  { %v3026_v24 = vpop.f32.mrb[47].mxu1 }
 0x231   :  { %4418 = vmatmul.mubr.bf16.gmra.mrb[152].mxu1 %v6077_v1 }
 0x232   :  { %3686 = vmatmul.mubr.bf16.gmra.mrb[88].mxu0 %v7400_v5  ;;  %4421 = vmatprep.mubr.bf16.mxu1 %v7422_v19 }
 0x233   :  { %3693 = vmatprep.mubr.bf16.mxu0 %v7423_v25  ;;  %v7429_v25 = vld [vmem:[#allocation47_spill] sm:$0xff] }
 0x234   :  { %v6655_v45 = vpop.f32.mrb[48].mxu1 }
 0x235   :  { %v3031_v43 = vpop.f32.mrb[49].mxu1 }
 0x236   :  { %v6657_v62 = vpop.f32.mrb[50].mxu1 }
 0x237   :  { %v3034_v34 = vpop.f32.mrb[51].mxu1 }
 0x238   :  { %v7430_v34 = vld [vmem:[#allocation48_spill] sm:$0xff] }
 0x239   :  { %4422 = vmatmul.mubr.bf16.gmra.mrb[156].mxu1 %v7317_v44 }
 0x23a   :  { %3694 = vmatmul.mubr.bf16.gmra.mrb[92].mxu0 %v7402_v38  ;;  %4425 = vmatprep.mubr.bf16.mxu1 %v6183_v33 }
 0x23b   :  { %3701 = vmatprep.mubr.bf16.mxu0 %v7424_v56 }
 0x23c   :  { %v6663_v1 = vpop.f32.mrb[52].mxu1 }
 0x23d   :  { %v3039_v5 = vpop.f32.mrb[53].mxu1 }
 0x23e   :  { %v6665_v20 = vpop.f32.mrb[54].mxu1 }
 0x23f   :  { %v3042_v54 = vpop.f32.mrb[55].mxu1 }
 0x241   :  { %4426 = vmatmul.mubr.bf16.gmra.mrb[160].mxu1 %v7389_v17 }
 0x242   :  { %3702 = vmatmul.mubr.bf16.gmra.mrb[96].mxu0 %v6240_v59  ;;  %4429 = vmatprep.mubr.bf16.mxu1 %v6251_v58 }
 0x243   :  { %3709 = vmatprep.mubr.bf16.mxu0 %v7425_v14 }
 0x244   :  { %v6671_v46 = vpop.f32.mrb[56].mxu1 }
 0x245   :  { %v3047_v38 = vpop.f32.mrb[57].mxu1 }
 0x246   :  { %v6673_v33 = vpop.f32.mrb[58].mxu1 }
 0x247   :  { %v3050_v41 = vpop.f32.mrb[59].mxu1 }
 0x248   :  { %v7431_v41 = vld [vmem:[#allocation49_spill] sm:$0xff] }
 0x249   :  { %4430 = vmatmul.mubr.bf16.gmra.mrb[164].mxu1 %v6283_v47 }
 0x24a   :  { %3710 = vmatmul.mubr.bf16.gmra.mrb[100].mxu0 %v6270_v8  ;;  %4433 = vmatprep.mubr.bf16.mxu1 %v6311_v9 }
 0x24b   :  { %3717 = vmatprep.mubr.bf16.mxu0 %v6235_v15 }
 0x24c   :  { %v6679_v17 = vpop.f32.mrb[60].mxu1 }
 0x24d   :  { %v3055_v59 = vpop.f32.mrb[61].mxu1 }
 0x24e   :  { %v6681_v58 = vpop.f32.mrb[62].mxu1 }
 0x24f   :  { %v3058_v0 = vpop.f32.mrb[63].mxu1 }
 0x250   :  { %v7432_v0 = vld [vmem:[#allocation50_spill] sm:$0xff] }
 0x251   :  { %4434 = vmatmul.mubr.bf16.gmra.mrb[168].mxu1 %v6339_v49 }
 0x252   :  { %3718 = vmatmul.mubr.bf16.gmra.mrb[104].mxu0 %v6300_v40  ;;  %4437 = vmatprep.mubr.bf16.mxu1 %v6365_v18 }
 0x253   :  { %3725 = vmatprep.mubr.bf16.mxu0 %v6277_v16 }
 0x254   :  { %v6687_v47 = vpop.f32.mrb[64].mxu1 }
 0x255   :  { %v3511_v8 = vpop.f32.mrb[0].mxu0  ;;  %v3063_v9 = vpop.f32.mrb[65].mxu1 }
 0x256   :  { %v6690_v15 = vadd.f32 %v3511_v8, %v7426_v29  ;;  %v3513_v4 = vpop.f32.mrb[1].mxu0  ;;  %v6692_v27 = vpop.f32.mrb[66].mxu1 }
 0x257   :  { %v3514_v61 = vpop.f32.mrb[2].mxu0  ;;  %v3066_v28 = vpop.f32.mrb[67].mxu1 }
 0x258   :  { %v6695_v49 = vadd.f32 %v3514_v61, %v7427_v2  ;;  %v3516_v40 = vpop.f32.mrb[3].mxu0  ;;  %v7433_v28 = vld [vmem:[#allocation51_spill] sm:$0xff] }
 0x259   :  { %4438 = vmatmul.mubr.bf16.gmra.mrb[172].mxu1 %v6387_v7  ;;  %v7434_v40 = vld [vmem:[#allocation52_spill] sm:$0xff] }
 0x25a   :  { %3726 = vmatmul.mubr.bf16.gmra.mrb[108].mxu0 %v6330_v13  ;;  %4441 = vmatprep.mubr.bf16.mxu1 %v6403_v50 }
 0x25b   :  { %3733 = vmatprep.mubr.bf16.mxu0 %v6307_v55 }
 0x25c   :  { %v6701_v18 = vpop.f32.mrb[68].mxu1 }
 0x25d   :  { %v3519_v16 = vpop.f32.mrb[4].mxu0  ;;  %v3071_v35 = vpop.f32.mrb[69].mxu1 }
 0x25e   :  { %v6704_v36 = vadd.f32 %v3519_v16, %v7428_v42  ;;  %v3521_v31 = vpop.f32.mrb[5].mxu0  ;;  %v6706_v3 = vpop.f32.mrb[70].mxu1 }
 0x25f   :  { %v3522_v24 = vpop.f32.mrb[6].mxu0  ;;  %v3074_v19 = vpop.f32.mrb[71].mxu1 }
 0x260   :  { %v6709_v7 = vadd.f32 %v3522_v24, %v7429_v25  ;;  %v3524_v13 = vpop.f32.mrb[7].mxu0  ;;  %v7435_v19 = vld [vmem:[#allocation53_spill] sm:$0xff] }
 0x261   :  { %4442 = vmatmul.mubr.bf16.gmra.mrb[176].mxu1 %v6426_v11 }
 0x262   :  { %3734 = vmatmul.mubr.bf16.gmra.mrb[112].mxu0 %v6358_v30  ;;  %4445 = vmatprep.mubr.bf16.mxu1 %v6457_v12 }
 0x263   :  { %3741 = vmatprep.mubr.bf16.mxu0 %v6335_v53 }
 0x264   :  { %v6715_v55 = vpop.f32.mrb[72].mxu1 }
 0x265   :  { %v3527_v50 = vpop.f32.mrb[8].mxu0  ;;  %v3079_v43 = vpop.f32.mrb[73].mxu1 }
 0x266   :  { %v6718_v56 = vadd.f32 %v3527_v50, %v7430_v34  ;;  %v3529_v5 = vpop.f32.mrb[9].mxu0  ;;  %v6720_v54 = vpop.f32.mrb[74].mxu1  ;;  %v7436_v50 = vld [vmem:[#allocation54_spill] sm:$0xff] }
 0x267   :  { %v3530_v14 = vpop.f32.mrb[10].mxu0  ;;  %v3082_v38 = vpop.f32.mrb[75].mxu1 }
 0x268   :  { %v6723_v11 = vadd.f32 %v3530_v14, %v7431_v41  ;;  %v3532_v30 = vpop.f32.mrb[11].mxu0  ;;  %v7437_v41 = vld [vmem:[#allocation55_spill] sm:$0xff] }
 0x269   :  { %4446 = vmatmul.mubr.bf16.gmra.mrb[180].mxu1 %v6478_v32 }
 0x26a   :  { %3742 = vmatmul.mubr.bf16.gmra.mrb[116].mxu0 %v6383_v10  ;;  %4449 = vmatprep.mubr.bf16.mxu1 %v6490_v48 }
 0x26b   :  { %3749 = vmatprep.mubr.bf16.mxu0 %v6494_v37 }
 0x26c   :  { %v6729_v53 = vpop.f32.mrb[76].mxu1 }
 0x26d   :  { %v3535_v12 = vpop.f32.mrb[12].mxu0  ;;  %v3087_v59 = vpop.f32.mrb[77].mxu1 }
 0x26e   :  { %v6732_v8 = vadd.f32 %v3535_v12, %v7432_v0  ;;  %v3537_v9 = vpop.f32.mrb[13].mxu0  ;;  %v6734_v29 = vpop.f32.mrb[78].mxu1 }
 0x26f   :  { %v3538_v4 = vpop.f32.mrb[14].mxu0  ;;  %v3090_v61 = vpop.f32.mrb[79].mxu1  ;;  %v7438_v9 = vld [vmem:[#allocation56_spill] sm:$0xff] }
 0x270   :  { %v6737_v32 = vadd.f32 %v3538_v4, %v7433_v28  ;;  %v3540_v10 = vpop.f32.mrb[15].mxu0 }
 0x271   :  { %4450 = vmatmul.mubr.bf16.gmra.mrb[184].mxu1 %v6507_v22 }
 0x272   :  { %3750 = vmatmul.mubr.bf16.gmra.mrb[120].mxu0 %v6601_v63  ;;  %4453 = vmatprep.mubr.bf16.mxu1 %v6529_v6 }
 0x273   :  { %3757 = vmatprep.mubr.bf16.mxu0 %v7317_v44 }
 0x274   :  { %v6743_v48 = vpop.f32.mrb[80].mxu1 }
 0x275   :  { %v3543_v37 = vpop.f32.mrb[16].mxu0  ;;  %v3095_v2 = vpop.f32.mrb[81].mxu1 }
 0x276   :  { %v6746_v16 = vadd.f32 %v3543_v37, %v7434_v40  ;;  %v3545_v35 = vpop.f32.mrb[17].mxu0  ;;  %v6748_v42 = vpop.f32.mrb[82].mxu1  ;;  %v7439_v2 = vld [vmem:[#allocation57_spill] sm:$0xff] }
 0x277   :  { %v3546_v31 = vpop.f32.mrb[18].mxu0  ;;  %v3098_v24 = vpop.f32.mrb[83].mxu1 }
 0x278   :  { %v6751_v22 = vadd.f32 %v3546_v31, %v7435_v19  ;;  %v3548_v63 = vpop.f32.mrb[19].mxu0 }
 0x279   :  { %4454 = vmatmul.mubr.bf16.gmra.mrb[188].mxu1 %v7317_v44  ;;  %v7440_v63 = vld [vmem:[#allocation58_spill] sm:$0xff] }
 0x27a   :  { %3758 = vmatmul.mubr.bf16.gmra.mrb[124].mxu0 %v7317_v44 }
 0x27c   :  { %v6755_v6 = vpop.f32.mrb[84].mxu1 }
 0x27d   :  { %v3551_v25 = vpop.f32.mrb[20].mxu0  ;;  %v3103_v13 = vpop.f32.mrb[85].mxu1 }
 0x27e   :  { %v6758_v43 = vadd.f32 %v3551_v25, %v7436_v50  ;;  %v3553_v34 = vpop.f32.mrb[21].mxu0  ;;  %v6760_v5 = vpop.f32.mrb[86].mxu1 }
 0x27f   :  { %v3554_v14 = vpop.f32.mrb[22].mxu0  ;;  %v3106_v38 = vpop.f32.mrb[87].mxu1 }
 0x280   :  { %v6763_v30 = vadd.f32 %v3554_v14, %v7437_v41  ;;  %v3556_v12 = vpop.f32.mrb[23].mxu0  ;;  %v7441_v38 = vld [vmem:[#allocation59_spill] sm:$0xff] }
 0x284   :  { %v6765_v59 = vpop.f32.mrb[88].mxu1 }
 0x285   :  { %v3559_v0 = vpop.f32.mrb[24].mxu0  ;;  %v3111_v44 = vpop.f32.mrb[89].mxu1 }
 0x286   :  { %v6768_v4 = vadd.f32 %v3559_v0, %v7438_v9  ;;  %v3561_v61 = vpop.f32.mrb[25].mxu0  ;;  %v6770_v28 = vpop.f32.mrb[90].mxu1 }
 0x287   :  { %v3562_v10 = vpop.f32.mrb[26].mxu0  ;;  %v3114_v37 = vpop.f32.mrb[91].mxu1 }
 0x288   :  { %v6773_v40 = vadd.f32 %v3562_v10, %v7439_v2  ;;  %v3564_v35 = vpop.f32.mrb[27].mxu0 }
 0x28c   :  { %v6775_v31 = vpop.f32.mrb[92].mxu1 }
 0x28d   :  { %v3567_v24 = vpop.f32.mrb[28].mxu0  ;;  %v3119_v19 = vpop.f32.mrb[93].mxu1 }
 0x28e   :  { %v6778_v25 = vadd.f32 %v3567_v24, %v7440_v63  ;;  %v3569_v13 = vpop.f32.mrb[29].mxu0  ;;  %v6780_v50 = vpop.f32.mrb[94].mxu1 }
 0x28f   :  { %v3570_v34 = vpop.f32.mrb[30].mxu0  ;;  %v3122_v14 = vpop.f32.mrb[95].mxu1 }
 0x290   :  { %v6783_v41 = vadd.f32 %v3570_v34, %v7441_v38  ;;  %v3572_v12 = vpop.f32.mrb[31].mxu0 }
 0x294   :  { %v6785_v0 = vpop.f32.mrb[96].mxu1 }
 0x295   :  { %v3575_v44 = vpop.f32.mrb[32].mxu0  ;;  %v3127_v9 = vpop.f32.mrb[97].mxu1 }
 0x296   :  { %v6788_v61 = vadd.f32 %v3575_v44, %v6623_v23  ;;  %v3577_v10 = vpop.f32.mrb[33].mxu0  ;;  %v6790_v37 = vpop.f32.mrb[98].mxu1 }
 0x297   :  { %7442 = vst [vmem:[#allocation6_spill] sm:$0xff] %v6790_v37  ;;  %v3578_v2 = vpop.f32.mrb[34].mxu0  ;;  %v3130_v35 = vpop.f32.mrb[99].mxu1 }
 0x298   :  { %v6793_v24 = vadd.f32 %v3578_v2, %v6625_v21  ;;  %v3580_v19 = vpop.f32.mrb[35].mxu0 }
 0x29c   :  { %v6795_v63 = vpop.f32.mrb[100].mxu1 }
 0x29d   :  { %7443 = vst [vmem:[#allocation43_spill] sm:$0xff] %v6795_v63  ;;  %v3583_v13 = vpop.f32.mrb[36].mxu0  ;;  %v3135_v34 = vpop.f32.mrb[101].mxu1 }
 0x29e   :  { %v6798_v14 = vadd.f32 %v3583_v13, %v6631_v52  ;;  %v3585_v38 = vpop.f32.mrb[37].mxu0  ;;  %v6800_v12 = vpop.f32.mrb[102].mxu1 }
 0x29f   :  { %7444 = vst [vmem:[#allocation10_spill] sm:$0xff] %v6800_v12  ;;  %v3586_v23 = vpop.f32.mrb[38].mxu0  ;;  %v3138_v44 = vpop.f32.mrb[103].mxu1 }
 0x2a0   :  { %v6803_v9 = vadd.f32 %v3586_v23, %v6633_v26  ;;  %v3588_v10 = vpop.f32.mrb[39].mxu0 }
 0x2a4   :  { %v6805_v35 = vpop.f32.mrb[104].mxu1 }
 0x2a5   :  { %7445 = vst [vmem:[#allocation33_spill] sm:$0xff] %v6805_v35  ;;  %v3591_v21 = vpop.f32.mrb[40].mxu0  ;;  %v3143_v2 = vpop.f32.mrb[105].mxu1 }
 0x2a6   :  { %v6808_v19 = vadd.f32 %v3591_v21, %v6639_v60  ;;  %v3593_v34 = vpop.f32.mrb[41].mxu0  ;;  %v6810_v63 = vpop.f32.mrb[106].mxu1 }
 0x2a7   :  { %7446 = vst [vmem:[#allocation8_spill] sm:$0xff] %v6810_v63  ;;  %v3594_v52 = vpop.f32.mrb[42].mxu0  ;;  %v3146_v13 = vpop.f32.mrb[107].mxu1 }
 0x2a8   :  { %v6813_v38 = vadd.f32 %v3594_v52, %v6641_v39  ;;  %v3596_v44 = vpop.f32.mrb[43].mxu0 }
 0x2ac   :  { %v6815_v12 = vpop.f32.mrb[108].mxu1 }
 0x2ad   :  { %7447 = vst [vmem:[#allocation13_spill] sm:$0xff] %v6815_v12  ;;  %v3599_v26 = vpop.f32.mrb[44].mxu0  ;;  %v3151_v23 = vpop.f32.mrb[109].mxu1 }
 0x2ae   :  { %v6818_v10 = vadd.f32 %v3599_v26, %v6647_v57  ;;  %v3601_v2 = vpop.f32.mrb[45].mxu0  ;;  %v6820_v35 = vpop.f32.mrb[110].mxu1 }
 0x2af   :  { %7448 = vst [vmem:[#allocation34_spill] sm:$0xff] %v6820_v35  ;;  %v3602_v60 = vpop.f32.mrb[46].mxu0  ;;  %v3154_v21 = vpop.f32.mrb[111].mxu1 }
 0x2b0   :  { %v6823_v34 = vadd.f32 %v3602_v60, %v6649_v51  ;;  %v3604_v13 = vpop.f32.mrb[47].mxu0 }
 0x2b4   :  { %v6825_v63 = vpop.f32.mrb[112].mxu1 }
 0x2b5   :  { %7449 = vst [vmem:[#allocation11_spill] sm:$0xff] %v6825_v63  ;;  %v3607_v39 = vpop.f32.mrb[48].mxu0  ;;  %v3159_v52 = vpop.f32.mrb[113].mxu1 }
 0x2b6   :  { %v6828_v44 = vadd.f32 %v3607_v39, %v6655_v45  ;;  %v3609_v23 = vpop.f32.mrb[49].mxu0  ;;  %v6830_v12 = vpop.f32.mrb[114].mxu1 }
 0x2b7   :  { %7450 = vst [vmem:[#allocation16_spill] sm:$0xff] %v6830_v12  ;;  %v3610_v57 = vpop.f32.mrb[50].mxu0  ;;  %v3162_v26 = vpop.f32.mrb[115].mxu1 }
 0x2b8   :  { %v6833_v2 = vadd.f32 %v3610_v57, %v6657_v62  ;;  %v3612_v21 = vpop.f32.mrb[51].mxu0 }
 0x2bc   :  { %v6835_v35 = vpop.f32.mrb[116].mxu1 }
 0x2bd   :  { %7451 = vst [vmem:[#allocation37_spill] sm:$0xff] %v6835_v35  ;;  %v3615_v51 = vpop.f32.mrb[52].mxu0  ;;  %v3167_v60 = vpop.f32.mrb[117].mxu1 }
 0x2be   :  { %v6838_v13 = vadd.f32 %v3615_v51, %v6663_v1  ;;  %v3617_v52 = vpop.f32.mrb[53].mxu0  ;;  %v6840_v63 = vpop.f32.mrb[118].mxu1 }
 0x2bf   :  { %7452 = vst [vmem:[#allocation14_spill] sm:$0xff] %v6840_v63  ;;  %v3618_v45 = vpop.f32.mrb[54].mxu0  ;;  %v3170_v39 = vpop.f32.mrb[119].mxu1 }
 0x2c0   :  { %v6843_v23 = vadd.f32 %v3618_v45, %v6665_v20  ;;  %v3620_v26 = vpop.f32.mrb[55].mxu0 }
 0x2c4   :  { %v6845_v12 = vpop.f32.mrb[120].mxu1 }
 0x2c5   :  { %7453 = vst [vmem:[#allocation18_spill] sm:$0xff] %v6845_v12  ;;  %v3623_v62 = vpop.f32.mrb[56].mxu0  ;;  %v3175_v57 = vpop.f32.mrb[121].mxu1 }
 0x2c6   :  { %v6848_v21 = vadd.f32 %v3623_v62, %v6671_v46  ;;  %v3625_v60 = vpop.f32.mrb[57].mxu0  ;;  %v6850_v35 = vpop.f32.mrb[122].mxu1 }
 0x2c7   :  { %7454 = vst [vmem:[#allocation39_spill] sm:$0xff] %v6850_v35  ;;  %v3626_v1 = vpop.f32.mrb[58].mxu0  ;;  %v3178_v51 = vpop.f32.mrb[123].mxu1 }
 0x2c8   :  { %v6853_v52 = vadd.f32 %v3626_v1, %v6673_v33  ;;  %v3628_v39 = vpop.f32.mrb[59].mxu0  ;;  %v4057_v33 = vld [vmem:[%s7203_s4 + $0x10] sm:$0xff] }
 0x2cc   :  { %v6855_v63 = vpop.f32.mrb[124].mxu1 }
 0x2cd   :  { %7455 = vst [vmem:[#allocation19_spill] sm:$0xff] %v6855_v63  ;;  %v3631_v20 = vpop.f32.mrb[60].mxu0  ;;  %v3183_v45 = vpop.f32.mrb[125].mxu1  ;;  %v4056_v63 = vld [vmem:[%s7203_s4 + $0x8] sm:$0xff] }
 0x2ce   :  { %v6858_v26 = vadd.f32 %v3631_v20, %v6679_v17  ;;  %v3633_v57 = vpop.f32.mrb[61].mxu0  ;;  %v6860_v12 = vpop.f32.mrb[126].mxu1  ;;  %v4055_v17 = vld [vmem:[%s7203_s4] sm:$0xff] }
 0x2cf   :  { %7456 = vst [vmem:[#allocation42_spill] sm:$0xff] %v6860_v12  ;;  %v3634_v46 = vpop.f32.mrb[62].mxu0  ;;  %v3186_v62 = vpop.f32.mrb[127].mxu1 }
 0x2d0   :  { %v6863_v60 = vadd.f32 %v3634_v46, %v6681_v58  ;;  %v3636_v51 = vpop.f32.mrb[63].mxu0  ;;  %v4058_v62 = vld [vmem:[%s7203_s4 + $0x18] sm:$0xff] }
 0x2d4   :  { %v4395_v35 = vpop.f32.mrb[128].mxu1 }
 0x2d5   :  { %v3639_v1 = vpop.f32.mrb[64].mxu0  ;;  %v3809_v39 = vadd.f32 %v6704_v36, %v4395_v35  ;;  %v3800_v45 = vpop.f32.mrb[129].mxu1 }
 0x2d6   :  { %v6873_v20 = vadd.f32 %v3639_v1, %v6687_v47  ;;  %v3641_v57 = vpop.f32.mrb[65].mxu0  ;;  %v3801_v58 = vadd.f32 %v6690_v15, %v3800_v45  ;;  %v4396_v46 = vpop.f32.mrb[130].mxu1 }
 0x2d7   :  { %v4121_v51 = vadd.f32 %v4057_v33, %v3809_v39  ;;  %v3642_v12 = vpop.f32.mrb[66].mxu0  ;;  %v3812_v36 = vadd.f32 %v6709_v7, %v4396_v46  ;;  %v3803_v35 = vpop.f32.mrb[131].mxu1  ;;  %v4061_v7 = vld [vmem:[%s7203_s4 + $0x30] sm:$0xff]  ;;  %v4062_v46 = vld [vmem:[%s7203_s4 + $0x38] sm:$0xff] }
 0x2d8   :  { %v4119_v37 = vadd.f32 %v4055_v17, %v3801_v58  ;;  %v6884_v47 = vadd.f32 %v3642_v12, %v6692_v27  ;;  %v3644_v1 = vpop.f32.mrb[67].mxu0  ;;  %v3804_v15 = vadd.f32 %v6695_v49, %v3803_v35  ;;  %v4059_v27 = vld [vmem:[%s7203_s4 + $0x20] sm:$0xff]  ;;  %v4060_v35 = vld [vmem:[%s7203_s4 + $0x28] sm:$0xff] }
 0x2d9   :  { %4185 = vst [vmem:[#allocation3 + $0x10] sm:$0xff] %v4121_v51  ;;  %v4122_v45 = vadd.f32 %v4058_v62, %v3812_v36 }
 0x2da   :  { %4183 = vst [vmem:[#allocation3] sm:$0xff] %v4119_v37  ;;  %v4120_v57 = vadd.f32 %v4056_v63, %v3804_v15 }
 0x2db   :  { %4186 = vst [vmem:[#allocation3 + $0x18] sm:$0xff] %v4122_v45 }
 0x2dc   :  { %4184 = vst [vmem:[#allocation3 + $0x8] sm:$0xff] %v4120_v57  ;;  %v4399_v33 = vpop.f32.mrb[132].mxu1 }
 0x2dd   :  { %v3647_v39 = vpop.f32.mrb[68].mxu0  ;;  %v3825_v17 = vadd.f32 %v6732_v8, %v4399_v33  ;;  %v3816_v58 = vpop.f32.mrb[133].mxu1 }
 0x2de   :  { %v6895_v49 = vadd.f32 %v3647_v39, %v6701_v18  ;;  %v3649_v37 = vpop.f32.mrb[69].mxu0  ;;  %v3817_v63 = vadd.f32 %v6718_v56, %v3816_v58  ;;  %v4400_v12 = vpop.f32.mrb[134].mxu1 }
 0x2df   :  { %v4125_v62 = vadd.f32 %v4061_v7, %v3825_v17  ;;  %v3650_v51 = vpop.f32.mrb[70].mxu0  ;;  %v3828_v8 = vadd.f32 %v6737_v32, %v4400_v12  ;;  %v3819_v36 = vpop.f32.mrb[135].mxu1  ;;  %v4065_v32 = vld [vmem:[%s7203_s4 + $0x50] sm:$0xff] }
 0x2e0   :  { %v4123_v1 = vadd.f32 %v4059_v27, %v3817_v63  ;;  %v6906_v18 = vadd.f32 %v3650_v51, %v6706_v3  ;;  %v3652_v15 = vpop.f32.mrb[71].mxu0  ;;  %v3820_v56 = vadd.f32 %v6723_v11, %v3819_v36  ;;  %v4063_v3 = vld [vmem:[%s7203_s4 + $0x40] sm:$0xff]  ;;  %v4066_v63 = vld [vmem:[%s7203_s4 + $0x58] sm:$0xff]  ;;  %v4064_v51 = vld [vmem:[%s7203_s4 + $0x48] sm:$0xff] }
 0x2e1   :  { %4189 = vst [vmem:[#allocation3 + $0x30] sm:$0xff] %v4125_v62  ;;  %v4126_v45 = vadd.f32 %v4062_v46, %v3828_v8 }
 0x2e2   :  { %4187 = vst [vmem:[#allocation3 + $0x20] sm:$0xff] %v4123_v1  ;;  %v4124_v57 = vadd.f32 %v4060_v35, %v3820_v56 }
 0x2e3   :  { %4190 = vst [vmem:[#allocation3 + $0x38] sm:$0xff] %v4126_v45 }
 0x2e4   :  { %4188 = vst [vmem:[#allocation3 + $0x28] sm:$0xff] %v4124_v57  ;;  %v4403_v33 = vpop.f32.mrb[136].mxu1 }
 0x2e5   :  { %v3655_v7 = vpop.f32.mrb[72].mxu0  ;;  %v3841_v39 = vadd.f32 %v6758_v43, %v4403_v33  ;;  %v3832_v17 = vpop.f32.mrb[137].mxu1 }
 0x2e6   :  { %v6917_v11 = vadd.f32 %v3655_v7, %v6715_v55  ;;  %v3657_v58 = vpop.f32.mrb[73].mxu0  ;;  %v3833_v27 = vadd.f32 %v6746_v16, %v3832_v17  ;;  %v4404_v37 = vpop.f32.mrb[138].mxu1 }
 0x2e7   :  { %v4129_v12 = vadd.f32 %v4065_v32, %v3841_v39  ;;  %v3658_v46 = vpop.f32.mrb[74].mxu0  ;;  %v3844_v43 = vadd.f32 %v6763_v30, %v4404_v37  ;;  %v3835_v62 = vpop.f32.mrb[139].mxu1  ;;  %v4069_v30 = vld [vmem:[%s7203_s4 + $0x70] sm:$0xff]  ;;  %v4070_v39 = vld [vmem:[%s7203_s4 + $0x78] sm:$0xff] }
 0x2e8   :  { %v4127_v8 = vadd.f32 %v4063_v3, %v3833_v27  ;;  %v6928_v55 = vadd.f32 %v3658_v46, %v6720_v54  ;;  %v3660_v36 = vpop.f32.mrb[75].mxu0  ;;  %v3836_v16 = vadd.f32 %v6751_v22, %v3835_v62  ;;  %v4067_v54 = vld [vmem:[%s7203_s4 + $0x60] sm:$0xff]  ;;  %v4068_v27 = vld [vmem:[%s7203_s4 + $0x68] sm:$0xff] }
 0x2e9   :  { %4193 = vst [vmem:[#allocation3 + $0x50] sm:$0xff] %v4129_v12  ;;  %v4130_v35 = vadd.f32 %v4066_v63, %v3844_v43 }
 0x2ea   :  { %4191 = vst [vmem:[#allocation3 + $0x40] sm:$0xff] %v4127_v8  ;;  %v4128_v1 = vadd.f32 %v4064_v51, %v3836_v16 }
 0x2eb   :  { %4194 = vst [vmem:[#allocation3 + $0x58] sm:$0xff] %v4130_v35 }
 0x2ec   :  { %4192 = vst [vmem:[#allocation3 + $0x48] sm:$0xff] %v4128_v1  ;;  %v4407_v15 = vpop.f32.mrb[140].mxu1  ;;  %v4074_v1 = vld [vmem:[%s7203_s4 + $0x98] sm:$0xff] }
 0x2ed   :  { %v3663_v56 = vpop.f32.mrb[76].mxu0  ;;  %v3857_v45 = vadd.f32 %v6778_v25, %v4407_v15  ;;  %v3848_v57 = vpop.f32.mrb[141].mxu1 }
 0x2ee   :  { %v6939_v22 = vadd.f32 %v3663_v56, %v6729_v53  ;;  %v3665_v33 = vpop.f32.mrb[77].mxu0  ;;  %v3849_v32 = vadd.f32 %v6768_v4, %v3848_v57  ;;  %v4408_v7 = vpop.f32.mrb[142].mxu1 }
 0x2ef   :  { %v4133_v17 = vadd.f32 %v4069_v30, %v3857_v45  ;;  %v3666_v3 = vpop.f32.mrb[78].mxu0  ;;  %v3860_v25 = vadd.f32 %v6783_v41, %v4408_v7  ;;  %v3851_v58 = vpop.f32.mrb[143].mxu1  ;;  %v4073_v41 = vld [vmem:[%s7203_s4 + $0x90] sm:$0xff]  ;;  %v4072_v45 = vld [vmem:[%s7203_s4 + $0x88] sm:$0xff] }
 0x2f0   :  { %v4131_v37 = vadd.f32 %v4067_v54, %v3849_v32  ;;  %v6950_v53 = vadd.f32 %v3666_v3, %v6734_v29  ;;  %v3668_v63 = vpop.f32.mrb[79].mxu0  ;;  %v3852_v4 = vadd.f32 %v6773_v40, %v3851_v58  ;;  %v4071_v29 = vld [vmem:[%s7203_s4 + $0x80] sm:$0xff] }
 0x2f1   :  { %4197 = vst [vmem:[#allocation3 + $0x70] sm:$0xff] %v4133_v17  ;;  %v4134_v12 = vadd.f32 %v4070_v39, %v3860_v25 }
 0x2f2   :  { %4195 = vst [vmem:[#allocation3 + $0x60] sm:$0xff] %v4131_v37  ;;  %v4132_v46 = vadd.f32 %v4068_v27, %v3852_v4  ;;  %v4078_v37 = vld [vmem:[%s7203_s4 + $0xb8] sm:$0xff] }
 0x2f3   :  { %4198 = vst [vmem:[#allocation3 + $0x78] sm:$0xff] %v4134_v12 }
 0x2f4   :  { %4196 = vst [vmem:[#allocation3 + $0x68] sm:$0xff] %v4132_v46  ;;  %v4411_v43 = vpop.f32.mrb[144].mxu1  ;;  %v4076_v46 = vld [vmem:[%s7203_s4 + $0xa8] sm:$0xff] }
 0x2f5   :  { %v3671_v62 = vpop.f32.mrb[80].mxu0  ;;  %v3873_v51 = vadd.f32 %v6798_v14, %v4411_v43  ;;  %v3864_v8 = vpop.f32.mrb[145].mxu1 }
 0x2f6   :  { %v6961_v40 = vadd.f32 %v3671_v62, %v6743_v48  ;;  %v3673_v36 = vpop.f32.mrb[81].mxu0  ;;  %v3865_v16 = vadd.f32 %v6788_v61, %v3864_v8  ;;  %v4412_v35 = vpop.f32.mrb[146].mxu1 }
 0x2f7   :  { %v4137_v15 = vadd.f32 %v4073_v41, %v3873_v51  ;;  %v3674_v30 = vpop.f32.mrb[82].mxu0  ;;  %v3876_v14 = vadd.f32 %v6803_v9, %v4412_v35  ;;  %v3867_v56 = vpop.f32.mrb[147].mxu1  ;;  %v4077_v9 = vld [vmem:[%s7203_s4 + $0xb0] sm:$0xff] }
 0x2f8   :  { %v4135_v57 = vadd.f32 %v4071_v29, %v3865_v16  ;;  %v6972_v48 = vadd.f32 %v3674_v30, %v6748_v42  ;;  %v3676_v54 = vpop.f32.mrb[83].mxu0  ;;  %v3868_v61 = vadd.f32 %v6793_v24, %v3867_v56  ;;  %v4075_v42 = vld [vmem:[%s7203_s4 + $0xa0] sm:$0xff]  ;;  %v4082_v30 = vld [vmem:[%s7203_s4 + $0xd8] sm:$0xff] }
 0x2f9   :  { %4201 = vst [vmem:[#allocation3 + $0x90] sm:$0xff] %v4137_v15  ;;  %v4138_v33 = vadd.f32 %v4074_v1, %v3876_v14 }
 0x2fa   :  { %4199 = vst [vmem:[#allocation3 + $0x80] sm:$0xff] %v4135_v57  ;;  %v4136_v32 = vadd.f32 %v4072_v45, %v3868_v61  ;;  %v4080_v57 = vld [vmem:[%s7203_s4 + $0xc8] sm:$0xff] }
 0x2fb   :  { %4202 = vst [vmem:[#allocation3 + $0x98] sm:$0xff] %v4138_v33 }
 0x2fc   :  { %4200 = vst [vmem:[#allocation3 + $0x88] sm:$0xff] %v4136_v32  ;;  %v4415_v7 = vpop.f32.mrb[148].mxu1 }
 0x2fd   :  { %v3679_v39 = vpop.f32.mrb[84].mxu0  ;;  %v3889_v17 = vadd.f32 %v6818_v10, %v4415_v7  ;;  %v3880_v3 = vpop.f32.mrb[149].mxu1 }
 0x2fe   :  { %v6983_v24 = vadd.f32 %v3679_v39, %v6755_v6  ;;  %v3681_v25 = vpop.f32.mrb[85].mxu0  ;;  %v3881_v58 = vadd.f32 %v6808_v19, %v3880_v3  ;;  %v4416_v27 = vpop.f32.mrb[150].mxu1 }
 0x2ff   :  { %v4141_v63 = vadd.f32 %v4077_v9, %v3889_v17  ;;  %v3682_v4 = vpop.f32.mrb[86].mxu0  ;;  %v3892_v10 = vadd.f32 %v6823_v34, %v4416_v27  ;;  %v3883_v12 = vpop.f32.mrb[151].mxu1  ;;  %v4081_v34 = vld [vmem:[%s7203_s4 + $0xd0] sm:$0xff] }
 0x300   :  { %v4139_v43 = vadd.f32 %v4075_v42, %v3881_v58  ;;  %v6994_v6 = vadd.f32 %v3682_v4, %v6760_v5  ;;  %v3684_v41 = vpop.f32.mrb[87].mxu0  ;;  %v3884_v19 = vadd.f32 %v6813_v38, %v3883_v12  ;;  %v4079_v5 = vld [vmem:[%s7203_s4 + $0xc0] sm:$0xff]  ;;  %v4086_v58 = vld [vmem:[%s7203_s4 + $0xf8] sm:$0xff]  ;;  %v4084_v4 = vld [vmem:[%s7203_s4 + $0xe8] sm:$0xff] }
 0x301   :  { %4205 = vst [vmem:[#allocation3 + $0xb0] sm:$0xff] %v4141_v63  ;;  %v4142_v62 = vadd.f32 %v4078_v37, %v3892_v10 }
 0x302   :  { %4203 = vst [vmem:[#allocation3 + $0xa0] sm:$0xff] %v4139_v43  ;;  %v4140_v51 = vadd.f32 %v4076_v46, %v3884_v19 }
 0x303   :  { %4206 = vst [vmem:[#allocation3 + $0xb8] sm:$0xff] %v4142_v62 }
 0x304   :  { %4204 = vst [vmem:[#allocation3 + $0xa8] sm:$0xff] %v4140_v51  ;;  %v4419_v8 = vpop.f32.mrb[152].mxu1 }
 0x305   :  { %v3687_v29 = vpop.f32.mrb[88].mxu0  ;;  %v3905_v36 = vadd.f32 %v6838_v13, %v4419_v8  ;;  %v3896_v16 = vpop.f32.mrb[153].mxu1 }
 0x306   :  { %v7005_v38 = vadd.f32 %v3687_v29, %v6765_v59  ;;  %v3689_v35 = vpop.f32.mrb[89].mxu0  ;;  %v3897_v1 = vadd.f32 %v6828_v44, %v3896_v16  ;;  %v4420_v15 = vpop.f32.mrb[154].mxu1 }
 0x307   :  { %v4145_v14 = vadd.f32 %v4081_v34, %v3905_v36  ;;  %v3690_v56 = vpop.f32.mrb[90].mxu0  ;;  %v3908_v13 = vadd.f32 %v6843_v23, %v4420_v15  ;;  %v3899_v45 = vpop.f32.mrb[155].mxu1  ;;  %v4085_v23 = vld [vmem:[%s7203_s4 + $0xf0] sm:$0xff]  ;;  %v4090_v36 = vld [vmem:[%s7203_s4 + $0x118] sm:$0xff] }
 0x308   :  { %v4143_v54 = vadd.f32 %v4079_v5, %v3897_v1  ;;  %v7016_v59 = vadd.f32 %v3690_v56, %v6770_v28  ;;  %v3692_v61 = vpop.f32.mrb[91].mxu0  ;;  %v3900_v44 = vadd.f32 %v6833_v2, %v3899_v45  ;;  %v4083_v28 = vld [vmem:[%s7203_s4 + $0xe0] sm:$0xff]  ;;  %v4088_v1 = vld [vmem:[%s7203_s4 + $0x108] sm:$0xff] }
 0x309   :  { %4209 = vst [vmem:[#allocation3 + $0xd0] sm:$0xff] %v4145_v14  ;;  %v4146_v33 = vadd.f32 %v4082_v30, %v3908_v13 }
 0x30a   :  { %4207 = vst [vmem:[#allocation3 + $0xc0] sm:$0xff] %v4143_v54  ;;  %v4144_v32 = vadd.f32 %v4080_v57, %v3900_v44  ;;  %v4091_v44 = vld [vmem:[%s7203_s4 + $0x120] sm:$0xff] }
 0x30b   :  { %4210 = vst [vmem:[#allocation3 + $0xd8] sm:$0xff] %v4146_v33 }
 0x30c   :  { %4208 = vst [vmem:[#allocation3 + $0xc8] sm:$0xff] %v4144_v32  ;;  %v4423_v7 = vpop.f32.mrb[156].mxu1 }
 0x30d   :  { %v3695_v9 = vpop.f32.mrb[92].mxu0  ;;  %v3921_v39 = vadd.f32 %v6858_v26, %v4423_v7  ;;  %v3912_v17 = vpop.f32.mrb[157].mxu1 }
 0x30e   :  { %v7027_v2 = vadd.f32 %v3695_v9, %v6775_v31  ;;  %v3697_v3 = vpop.f32.mrb[93].mxu0  ;;  %v3913_v42 = vadd.f32 %v6848_v21, %v3912_v17  ;;  %v4424_v25 = vpop.f32.mrb[158].mxu1  ;;  %v4094_v9 = vld [vmem:[%s7203_s4 + $0x138] sm:$0xff] }
 0x30f   :  { %v4149_v27 = vadd.f32 %v4085_v23, %v3921_v39  ;;  %v3698_v37 = vpop.f32.mrb[94].mxu0  ;;  %v3924_v26 = vadd.f32 %v6863_v60, %v4424_v25  ;;  %v3915_v63 = vpop.f32.mrb[159].mxu1  ;;  %v4089_v60 = vld [vmem:[%s7203_s4 + $0x110] sm:$0xff]  ;;  %v4092_v3 = vld [vmem:[%s7203_s4 + $0x128] sm:$0xff]  ;;  %v7459_v25 = vld [vmem:[#allocation10_spill] sm:$0xff] }
 0x310   :  { %v4147_v10 = vadd.f32 %v4083_v28, %v3913_v42  ;;  %v7038_v31 = vadd.f32 %v3698_v37, %v6780_v50  ;;  %v3700_v12 = vpop.f32.mrb[95].mxu0  ;;  %v3916_v21 = vadd.f32 %v6853_v52, %v3915_v63  ;;  %v4087_v50 = vld [vmem:[%s7203_s4 + $0x100] sm:$0xff] }
 0x311   :  { %4213 = vst [vmem:[#allocation3 + $0xf0] sm:$0xff] %v4149_v27  ;;  %v4150_v46 = vadd.f32 %v4086_v58, %v3924_v26 }
 0x312   :  { %4211 = vst [vmem:[#allocation3 + $0xe0] sm:$0xff] %v4147_v10  ;;  %v4148_v43 = vadd.f32 %v4084_v4, %v3916_v21  ;;  %v4095_v21 = vld [vmem:[%s7203_s4 + $0x140] sm:$0xff] }
 0x313   :  { %4214 = vst [vmem:[#allocation3 + $0xf8] sm:$0xff] %v4150_v46 }
 0x314   :  { %4212 = vst [vmem:[#allocation3 + $0xe8] sm:$0xff] %v4148_v43  ;;  %v4427_v41 = vpop.f32.mrb[160].mxu1 }
 0x315   :  { %v3703_v19 = vpop.f32.mrb[96].mxu0  ;;  %v3937_v62 = vadd.f32 %v6895_v49, %v4427_v41  ;;  %v3928_v51 = vpop.f32.mrb[161].mxu1 }
 0x316   :  { %v7049_v52 = vadd.f32 %v3703_v19, %v6785_v0  ;;  %v3705_v8 = vpop.f32.mrb[97].mxu0  ;;  %v3929_v34 = vadd.f32 %v6873_v20, %v3928_v51  ;;  %v4428_v29 = vpop.f32.mrb[162].mxu1  ;;  %v7457_v0 = vld [vmem:[#allocation6_spill] sm:$0xff]  ;;  %v4098_v19 = vld [vmem:[%s7203_s4 + $0x158] sm:$0xff] }
 0x317   :  { %v4153_v16 = vadd.f32 %v4089_v60, %v3937_v62  ;;  %v3706_v5 = vpop.f32.mrb[98].mxu0  ;;  %v3940_v49 = vadd.f32 %v6906_v18, %v4428_v29  ;;  %v3931_v35 = vpop.f32.mrb[163].mxu1  ;;  %v4093_v18 = vld [vmem:[%s7203_s4 + $0x130] sm:$0xff]  ;;  %v4096_v8 = vld [vmem:[%s7203_s4 + $0x148] sm:$0xff] }
 0x318   :  { %v4151_v15 = vadd.f32 %v4087_v50, %v3929_v34  ;;  %v7060_v30 = vadd.f32 %v3706_v5, %v7457_v0  ;;  %v3708_v14 = vpop.f32.mrb[99].mxu0  ;;  %v3932_v20 = vadd.f32 %v6884_v47, %v3931_v35  ;;  %v7458_v47 = vld [vmem:[#allocation43_spill] sm:$0xff]  ;;  %v7461_v29 = vld [vmem:[#allocation8_spill] sm:$0xff] }
 0x319   :  { %4217 = vst [vmem:[#allocation3 + $0x110] sm:$0xff] %v4153_v16  ;;  %v4154_v56 = vadd.f32 %v4090_v36, %v3940_v49  ;;  %v4099_v14 = vld [vmem:[%s7203_s4 + $0x160] sm:$0xff] }
 0x31a   :  { %4215 = vst [vmem:[#allocation3 + $0x100] sm:$0xff] %v4151_v15  ;;  %v4152_v13 = vadd.f32 %v4088_v1, %v3932_v20 }
 0x31b   :  { %4218 = vst [vmem:[#allocation3 + $0x118] sm:$0xff] %v4154_v56 }
 0x31c   :  { %4216 = vst [vmem:[#allocation3 + $0x108] sm:$0xff] %v4152_v13  ;;  %v4431_v45 = vpop.f32.mrb[164].mxu1 }
 0x31d   :  { %v3711_v57 = vpop.f32.mrb[100].mxu0  ;;  %v3953_v54 = vadd.f32 %v6939_v22, %v4431_v45  ;;  %v3944_v61 = vpop.f32.mrb[165].mxu1 }
 0x31e   :  { %v7071_v33 = vadd.f32 %v3711_v57, %v7458_v47  ;;  %v3713_v32 = vpop.f32.mrb[101].mxu0  ;;  %v3945_v7 = vadd.f32 %v6917_v11, %v3944_v61  ;;  %v4432_v23 = vpop.f32.mrb[166].mxu1 }
 0x31f   :  { %v4157_v39 = vadd.f32 %v4093_v18, %v3953_v54  ;;  %v3714_v17 = vpop.f32.mrb[102].mxu0  ;;  %v3956_v22 = vadd.f32 %v6950_v53, %v4432_v23  ;;  %v3947_v28 = vpop.f32.mrb[167].mxu1  ;;  %v4097_v53 = vld [vmem:[%s7203_s4 + $0x150] sm:$0xff]  ;;  %v4102_v18 = vld [vmem:[%s7203_s4 + $0x178] sm:$0xff]  ;;  %v7463_v32 = vld [vmem:[#allocation34_spill] sm:$0xff] }
 0x320   :  { %v4155_v42 = vadd.f32 %v4091_v44, %v3945_v7  ;;  %v7082_v58 = vadd.f32 %v3714_v17, %v7459_v25  ;;  %v3716_v27 = vpop.f32.mrb[103].mxu0  ;;  %v3948_v11 = vadd.f32 %v6928_v55, %v3947_v28  ;;  %v7460_v55 = vld [vmem:[#allocation33_spill] sm:$0xff]  ;;  %v4100_v44 = vld [vmem:[%s7203_s4 + $0x168] sm:$0xff] }
 0x321   :  { %4221 = vst [vmem:[#allocation3 + $0x130] sm:$0xff] %v4157_v39  ;;  %v4158_v37 = vadd.f32 %v4094_v9, %v3956_v22 }
 0x322   :  { %4219 = vst [vmem:[#allocation3 + $0x120] sm:$0xff] %v4155_v42  ;;  %v4156_v26 = vadd.f32 %v4092_v3, %v3948_v11  ;;  %v4103_v42 = vld [vmem:[%s7203_s4 + $0x180] sm:$0xff] }
 0x323   :  { %4222 = vst [vmem:[#allocation3 + $0x138] sm:$0xff] %v4158_v37 }
 0x324   :  { %4220 = vst [vmem:[#allocation3 + $0x128] sm:$0xff] %v4156_v26  ;;  %v4435_v63 = vpop.f32.mrb[168].mxu1  ;;  %v4106_v26 = vld [vmem:[%s7203_s4 + $0x198] sm:$0xff] }
 0x325   :  { %v3719_v4 = vpop.f32.mrb[104].mxu0  ;;  %v3969_v10 = vadd.f32 %v6983_v24, %v4435_v63  ;;  %v3960_v12 = vpop.f32.mrb[169].mxu1 }
 0x326   :  { %v7093_v46 = vadd.f32 %v3719_v4, %v7460_v55  ;;  %v3721_v43 = vpop.f32.mrb[105].mxu0  ;;  %v3961_v41 = vadd.f32 %v6961_v40, %v3960_v12  ;;  %v4436_v60 = vpop.f32.mrb[170].mxu1 }
 0x327   :  { %v4161_v62 = vadd.f32 %v4097_v53, %v3969_v10  ;;  %v3722_v51 = vpop.f32.mrb[106].mxu0  ;;  %v3972_v24 = vadd.f32 %v6994_v6, %v4436_v60  ;;  %v3963_v50 = vpop.f32.mrb[171].mxu1  ;;  %v4101_v6 = vld [vmem:[%s7203_s4 + $0x170] sm:$0xff]  ;;  %v4104_v10 = vld [vmem:[%s7203_s4 + $0x188] sm:$0xff] }
 0x328   :  { %v4159_v34 = vadd.f32 %v4095_v21, %v3961_v41  ;;  %v7104_v36 = vadd.f32 %v3722_v51, %v7461_v29  ;;  %v3724_v16 = vpop.f32.mrb[107].mxu0  ;;  %v3964_v40 = vadd.f32 %v6972_v48, %v3963_v50  ;;  %v7462_v48 = vld [vmem:[#allocation13_spill] sm:$0xff]  ;;  %v7465_v21 = vld [vmem:[#allocation16_spill] sm:$0xff]  ;;  %v4107_v50 = vld [vmem:[%s7203_s4 + $0x1a0] sm:$0xff] }
 0x329   :  { %4225 = vst [vmem:[#allocation3 + $0x150] sm:$0xff] %v4161_v62  ;;  %v4162_v5 = vadd.f32 %v4098_v19, %v3972_v24 }
 0x32a   :  { %4223 = vst [vmem:[#allocation3 + $0x140] sm:$0xff] %v4159_v34  ;;  %v4160_v49 = vadd.f32 %v4096_v8, %v3964_v40  ;;  %v7466_v8 = vld [vmem:[#allocation37_spill] sm:$0xff] }
 0x32b   :  { %4226 = vst [vmem:[#allocation3 + $0x158] sm:$0xff] %v4162_v5  ;;  %v4110_v40 = vld [vmem:[%s7203_s4 + $0x1b8] sm:$0xff] }
 0x32c   :  { %4224 = vst [vmem:[#allocation3 + $0x148] sm:$0xff] %v4160_v49  ;;  %v4439_v35 = vpop.f32.mrb[172].mxu1 }
 0x32d   :  { %v3727_v1 = vpop.f32.mrb[108].mxu0  ;;  %v3985_v15 = vadd.f32 %v7027_v2, %v4439_v35  ;;  %v3976_v0 = vpop.f32.mrb[173].mxu1 }
 0x32e   :  { %v4543_v20 = vadd.f32 %v3727_v1, %v7462_v48  ;;  %v3729_v56 = vpop.f32.mrb[109].mxu0  ;;  %v3977_v13 = vadd.f32 %v7005_v38, %v3976_v0  ;;  %v4440_v45 = vpop.f32.mrb[174].mxu1  ;;  %v4108_v1 = vld [vmem:[%s7203_s4 + $0x1a8] sm:$0xff]  ;;  %v7467_v0 = vld [vmem:[#allocation14_spill] sm:$0xff] }
 0x32f   :  { %v4165_v57 = vadd.f32 %v4101_v6, %v3985_v15  ;;  %v3730_v54 = vpop.f32.mrb[110].mxu0  ;;  %v3988_v61 = vadd.f32 %v7038_v31, %v4440_v45  ;;  %v3979_v2 = vpop.f32.mrb[175].mxu1  ;;  %v4105_v31 = vld [vmem:[%s7203_s4 + $0x190] sm:$0xff] }
 0x330   :  { %v4163_v47 = vadd.f32 %v4099_v14, %v3977_v13  ;;  %v4544_v7 = vadd.f32 %v3730_v54, %v7463_v32  ;;  %v3732_v23 = vpop.f32.mrb[111].mxu0  ;;  %v3980_v38 = vadd.f32 %v7016_v59, %v3979_v2  ;;  %v7464_v59 = vld [vmem:[#allocation11_spill] sm:$0xff]  ;;  %v4113_v45 = vld [vmem:[%s7203_s4 + $0x1d0] sm:$0xff]  ;;  %v7468_v2 = vld [vmem:[#allocation18_spill] sm:$0xff] }
 0x331   :  { %4229 = vst [vmem:[#allocation3 + $0x170] sm:$0xff] %v4165_v57  ;;  %v4166_v9 = vadd.f32 %v4102_v18, %v3988_v61  ;;  %v4111_v61 = vld [vmem:[%s7203_s4 + $0x1c0] sm:$0xff] }
 0x332   :  { %4227 = vst [vmem:[#allocation3 + $0x160] sm:$0xff] %v4163_v47  ;;  %v4164_v39 = vadd.f32 %v4100_v44, %v3980_v38 }
 0x333   :  { %4230 = vst [vmem:[#allocation3 + $0x178] sm:$0xff] %v4166_v9 }
 0x334   :  { %4228 = vst [vmem:[#allocation3 + $0x168] sm:$0xff] %v4164_v39  ;;  %v4443_v17 = vpop.f32.mrb[176].mxu1 }
 0x335   :  { %v3735_v22 = vpop.f32.mrb[112].mxu0  ;;  %v4001_v28 = vadd.f32 %v7071_v33, %v4443_v17  ;;  %v3992_v3 = vpop.f32.mrb[177].mxu1  ;;  %v4112_v17 = vld [vmem:[%s7203_s4 + $0x1c8] sm:$0xff] }
 0x336   :  { %v4545_v25 = vadd.f32 %v3735_v22, %v7464_v59  ;;  %v3737_v27 = vpop.f32.mrb[113].mxu0  ;;  %v3993_v11 = vadd.f32 %v7049_v52, %v3992_v3  ;;  %v4444_v37 = vpop.f32.mrb[178].mxu1  ;;  %v7469_v22 = vld [vmem:[#allocation39_spill] sm:$0xff] }
 0x337   :  { %v4169_v63 = vadd.f32 %v4105_v31, %v4001_v28  ;;  %v3738_v53 = vpop.f32.mrb[114].mxu0  ;;  %v4004_v4 = vadd.f32 %v7082_v58, %v4444_v37  ;;  %v3995_v33 = vpop.f32.mrb[179].mxu1  ;;  %v4109_v58 = vld [vmem:[%s7203_s4 + $0x1b0] sm:$0xff] }
 0x338   :  { %v4167_v12 = vadd.f32 %v4103_v42, %v3993_v11  ;;  %v4546_v55 = vadd.f32 %v3738_v53, %v7465_v21  ;;  %v3740_v43 = vpop.f32.mrb[115].mxu0  ;;  %v3996_v52 = vadd.f32 %v7060_v30, %v3995_v33 }
 0x339   :  { %4233 = vst [vmem:[#allocation3 + $0x190] sm:$0xff] %v4169_v63  ;;  %v4170_v41 = vadd.f32 %v4106_v26, %v4004_v4  ;;  %v4115_v26 = vld [vmem:[%s7203_s4 + $0x1e0] sm:$0xff]  ;;  %v7470_v63 = vld [vmem:[#allocation19_spill] sm:$0xff] }
 0x33a   :  { %4231 = vst [vmem:[#allocation3 + $0x180] sm:$0xff] %v4167_v12  ;;  %v4168_v60 = vadd.f32 %v4104_v10, %v3996_v52  ;;  %v4117_v12 = vld [vmem:[%s7203_s4 + $0x1f0] sm:$0xff]  ;;  %v4116_v43 = vld [vmem:[%s7203_s4 + $0x1e8] sm:$0xff] }
 0x33b   :  { %4234 = vst [vmem:[#allocation3 + $0x198] sm:$0xff] %v4170_v41 }
 0x33c   :  { %4232 = vst [vmem:[#allocation3 + $0x188] sm:$0xff] %v4168_v60  ;;  %v4447_v19 = vpop.f32.mrb[180].mxu1  ;;  %v7471_v60 = vld [vmem:[#allocation42_spill] sm:$0xff] }
 0x33d   :  { %v3743_v62 = vpop.f32.mrb[116].mxu0  ;;  %v4017_v51 = vadd.f32 %v4543_v20, %v4447_v19  ;;  %v4008_v24 = vpop.f32.mrb[181].mxu1 }
 0x33e   :  { %v4547_v30 = vadd.f32 %v3743_v62, %v7466_v8  ;;  %v3745_v34 = vpop.f32.mrb[117].mxu0  ;;  %v4009_v29 = vadd.f32 %v7093_v46, %v4008_v24  ;;  %v4448_v16 = vpop.f32.mrb[182].mxu1 }
 0x33f   :  { %v4173_v5 = vadd.f32 %v4109_v58, %v4017_v51  ;;  %v3746_v49 = vpop.f32.mrb[118].mxu0  ;;  %v4020_v35 = vadd.f32 %v4544_v7, %v4448_v16  ;;  %v4011_v6 = vpop.f32.mrb[183].mxu1  ;;  %v4114_v7 = vld [vmem:[%s7203_s4 + $0x1d8] sm:$0xff] }
 0x340   :  { %v4171_v15 = vadd.f32 %v4107_v50, %v4009_v29  ;;  %v4548_v14 = vadd.f32 %v3746_v49, %v7467_v0  ;;  %v3748_v48 = vpop.f32.mrb[119].mxu0  ;;  %v4012_v20 = vadd.f32 %v7104_v36, %v4011_v6  ;;  %v4118_v51 = vld [vmem:[%s7203_s4 + $0x1f8] sm:$0xff] }
 0x341   :  { %4237 = vst [vmem:[#allocation3 + $0x1b0] sm:$0xff] %v4173_v5  ;;  %v4174_v46 = vadd.f32 %v4110_v40, %v4020_v35 }
 0x342   :  { %4235 = vst [vmem:[#allocation3 + $0x1a0] sm:$0xff] %v4171_v15  ;;  %v4172_v56 = vadd.f32 %v4108_v1, %v4012_v20 }
 0x343   :  { %4238 = vst [vmem:[#allocation3 + $0x1b8] sm:$0xff] %v4174_v46 }
 0x344   :  { %4236 = vst [vmem:[#allocation3 + $0x1a8] sm:$0xff] %v4172_v56  ;;  %v4451_v13 = vpop.f32.mrb[184].mxu1 }
 0x345   :  { %v3751_v18 = vpop.f32.mrb[120].mxu0  ;;  %v4033_v57 = vadd.f32 %v4547_v30, %v4451_v13  ;;  %v4024_v54 = vpop.f32.mrb[185].mxu1 }
 0x346   :  { %v4549_v36 = vadd.f32 %v3751_v18, %v7468_v2  ;;  %v3753_v44 = vpop.f32.mrb[121].mxu0  ;;  %v4025_v47 = vadd.f32 %v4545_v25, %v4024_v54  ;;  %v4452_v32 = vpop.f32.mrb[186].mxu1 }
 0x347   :  { %v4177_v23 = vadd.f32 %v4113_v45, %v4033_v57  ;;  %v3754_v38 = vpop.f32.mrb[122].mxu0  ;;  %v4036_v9 = vadd.f32 %v4548_v14, %v4452_v32  ;;  %v4027_v39 = vpop.f32.mrb[187].mxu1 }
 0x348   :  { %v4175_v31 = vadd.f32 %v4111_v61, %v4025_v47  ;;  %v4550_v28 = vadd.f32 %v3754_v38, %v7469_v22  ;;  %v3756_v3 = vpop.f32.mrb[123].mxu0  ;;  %v4028_v42 = vadd.f32 %v4546_v55, %v4027_v39 }
 0x349   :  { %4241 = vst [vmem:[#allocation3 + $0x1d0] sm:$0xff] %v4177_v23  ;;  %v4178_v59 = vadd.f32 %v4114_v7, %v4036_v9 }
 0x34a   :  { %4239 = vst [vmem:[#allocation3 + $0x1c0] sm:$0xff] %v4175_v31  ;;  %v4176_v25 = vadd.f32 %v4112_v17, %v4028_v42 }
 0x34b   :  { %4242 = vst [vmem:[#allocation3 + $0x1d8] sm:$0xff] %v4178_v59 }
 0x34c   :  { %4240 = vst [vmem:[#allocation3 + $0x1c8] sm:$0xff] %v4176_v25  ;;  %v4455_v27 = vpop.f32.mrb[188].mxu1 }
 0x34d   :  { %v3759_v11 = vpop.f32.mrb[124].mxu0  ;;  %v4040_v37 = vpop.f32.mrb[189].mxu1 }
 0x34e   :  { %v4551_v53 = vadd.f32 %v3759_v11, %v7470_v63  ;;  %v3761_v4 = vpop.f32.mrb[125].mxu0  ;;  %v4041_v33 = vadd.f32 %v4549_v36, %v4040_v37  ;;  %v4456_v10 = vpop.f32.mrb[190].mxu1 }
 0x34f   :  { %v3762_v21 = vpop.f32.mrb[126].mxu0  ;;  %v4043_v55 = vpop.f32.mrb[191].mxu1 }
 0x350   :  { %v4049_v52 = vadd.f32 %v4551_v53, %v4455_v27  ;;  %v4179_v41 = vadd.f32 %v4115_v26, %v4041_v33  ;;  %v4552_v19 = vadd.f32 %v3762_v21, %v7471_v60  ;;  %v3764_v58 = vpop.f32.mrb[127].mxu0  ;;  %v4044_v62 = vadd.f32 %v4550_v28, %v4043_v55 }
 0x352   :  { %v4181_v24 = vadd.f32 %v4117_v12, %v4049_v52  ;;  %4243 = vst [vmem:[#allocation3 + $0x1e0] sm:$0xff] %v4179_v41  ;;  %v4052_v50 = vadd.f32 %v4552_v19, %v4456_v10  ;;  %v4180_v8 = vadd.f32 %v4116_v43, %v4044_v62 }
 0x354   :  { %4245 = vst [vmem:[#allocation3 + $0x1f0] sm:$0xff] %v4181_v24  ;;  %v4182_v30 = vadd.f32 %v4118_v51, %v4052_v50  ;;  %4244 = vst [vmem:[#allocation3 + $0x1e8] sm:$0xff] %v4180_v8 }
 0x356   :  { %4246 = vst [vmem:[#allocation3 + $0x1f8] sm:$0xff] %v4182_v30 }
 0x357   :  { %4964 = shalt.err (!%p4961_p4)
}
 0x358   :  { %s4965_s4 = scalar_lea.hbm %s7204_s5, 8192 }
 0x359   :  { %p4966_p5 = scmp.ne.s32.totalorder %s7204_s5, %s4965_s4  ;;  %p4969_p6 = scmp.lt.u32.totalorder %s4965_s4, %s7204_s5 }
 0x35b   :  { %p4971_p7 = pnand %p4969_p6, %p4966_p5 }
 0x35d   :  { %4974 = shalt.err (!%p4971_p7)
}
 0x35e   :  { %s4979_s2 = smov 128   ;;  %s4980_s18 = smov 8  }
 0x35f   :  { %4258 = dma.vmem_to_hbm [thread:$0]  %s4253_s9, 8192, %s7204_s5, [#allocation4], %s4979_s2, %s4979_s2, %s4980_s18  }
 0x360   :  { %4975 = dma.done.wait [#allocation4], 8192  }
 0x361   :  { %4976 = vsyncadd [#allocation4], 4294959104 }
 0x362   :  { %4262 = vsyncpa [#allocation4], 1 }

</bundles_post_ra>
